<compile_context>
chip_gen: v6e
topology: v6e:2x2x1
jax: 0.10.0
libtpu: 0.0.40
codegen_flags: <defaults>
</compile_context>

<pallas_src>
import functools

import jax
import jax.numpy as jnp
from jax.experimental import pallas as pl
from jax.experimental.pallas import tpu as pltpu

EPS = 1e-5  # nn.BatchNorm2d default eps


# ------------------------------ Pallas kernel -------------------------------

def _residual_block_kernel(x_ref, ml_ref, mr_ref,
                           w1_ref, b1_ref, g1_ref, be1_ref, a_ref,
                           w2_ref, b2_ref, g2_ref, be2_ref,
                           out_ref, ypad_ref, *, C, B, H, W, G):
    """Fused conv3x3+BN+PReLU+conv3x3+BN+residual.

    x_ref   : (C, B, HW + 2G) VMEM, real pixels in [:, :, G:G+HW], zero flanks
    ml/mr   : (1, HW) VMEM column masks (0. at w==0 / w==W-1)
    w*_ref  : (C*C*9,) SMEM flattened conv weights (PyTorch OIHW order)
    b*/g*/be*: (C,) SMEM, a_ref: (1,) SMEM PReLU slope
    out_ref : (C, B, HW) VMEM
    ypad_ref: (C, B, HW + 2G) VMEM scratch for the padded intermediate
    """
    HW = H * W
    mask_l = ml_ref[...]   # (1, HW): 0 where w == 0     (left image edge)
    mask_r = mr_ref[...]   # (1, HW): 0 where w == W - 1 (right image edge)

    def conv3x3(src_ref, w_ref, b_ref):
        # src_ref holds zero halos in its G-wide flanks, so shifted reads along
        # the flattened H*W axis give exact zero padding for the H boundary;
        # the W-boundary wrap within a row is killed by mask_l / mask_r.
        taps = []  # taps[ci][k], k = kh*3 + kw
        for ci in range(C):
            t_ci = []
            for kh in range(3):
                for kw in range(3):
                    off = (kh - 1) * W + (kw - 1)
                    t = src_ref[ci, :, G + off:G + off + HW]    # (B, HW)
                    if kw == 0:       # source col w-1 invalid on left edge
                        t = t * mask_l
                    elif kw == 2:     # source col w+1 invalid on right edge
                        t = t * mask_r
                    t_ci.append(t)
            taps.append(t_ci)
        outs = []
        for co in range(C):
            acc = jnp.zeros((B, HW), jnp.float32)
            for ci in range(C):
                base = (co * C + ci) * 9
                for k in range(9):
                    acc = acc + w_ref[base + k] * taps[ci][k]   # scalar MAC (VPU)
            outs.append(acc + b_ref[co])
        return outs  # list of C arrays, each (B, HW)

    def batchnorm(chans, g_ref, be_ref):
        # Training-mode BN: per-channel mean / biased var over all B*H*W.
        inv_n = 1.0 / float(B * HW)
        outs = []
        for c in range(C):
            y = chans[c]
            mean = jnp.sum(y, keepdims=True) * inv_n                 # (1, 1)
            var = jnp.sum((y - mean) ** 2, keepdims=True) * inv_n    # (1, 1)
            outs.append((y - mean) * jax.lax.rsqrt(var + EPS) * g_ref[c]
                        + be_ref[c])
        return outs

    # ---- conv1 -> BN1 -> PReLU ---------------------------------------------
    y = conv3x3(x_ref, w1_ref, b1_ref)
    y = batchnorm(y, g1_ref, be1_ref)
    slope = a_ref[0]
    y = [jnp.where(t >= 0.0, t, slope * t) for t in y]

    # ---- stage intermediate into zero-padded VMEM scratch (no HBM round trip)
    ypad_ref[...] = jnp.zeros(ypad_ref.shape, jnp.float32)
    for c in range(C):
        ypad_ref[c, :, G:G + HW] = y[c]

    # ---- conv2 -> BN2 -> residual add --------------------------------------
    z = conv3x3(ypad_ref, w2_ref, b2_ref)
    z = batchnorm(z, g2_ref, be2_ref)
    for c in range(C):
        out_ref[c, :, :] = x_ref[c, :, G:G + HW] + z[c]


# ------------------------------- JAX wrapper ---------------------------------

def residual_block(x_nchw, params):
    B, C, H, W = x_nchw.shape
    HW = H * W
    G = -(-(W + 1) // 128) * 128          # halo width, rounded to a lane tile
    padw = HW + 2 * G

    # NCHW -> lane-dense (C, B, H*W), zero-padded along the flattened axis.
    x_flat = jnp.transpose(x_nchw, (1, 0, 2, 3)).reshape(C, B, HW)
    x_pad = jnp.pad(x_flat.astype(jnp.float32), ((0, 0), (0, 0), (G, G)))

    # Left / right image-edge column masks (constants).
    w_col = jnp.arange(HW, dtype=jnp.int32) % W
    mask_l = (w_col != 0).astype(jnp.float32).reshape(1, HW)
    mask_r = (w_col != (W - 1)).astype(jnp.float32).reshape(1, HW)

    vmem = pl.BlockSpec(memory_space=pltpu.MemorySpace.VMEM)
    smem = pl.BlockSpec(memory_space=pltpu.MemorySpace.SMEM)

    kernel = functools.partial(_residual_block_kernel, C=C, B=B, H=H, W=W, G=G)

    out = pl.pallas_call(
        kernel,
        out_shape=jax.ShapeDtypeStruct((C, B, HW), jnp.float32),
        in_specs=[vmem, vmem, vmem] + [smem] * 9,
        out_specs=vmem,
        scratch_shapes=[pltpu.VMEM((C, B, padw), jnp.float32)],
    )(x_pad, mask_l, mask_r,
      params["w1"].reshape(-1).astype(jnp.float32), params["b1"],
      params["g1"], params["be1"], params["a"],
      params["w2"].reshape(-1).astype(jnp.float32), params["b2"],
      params["g2"], params["be2"])

    return jnp.transpose(out.reshape(C, B, H, W), (1, 0, 2, 3))  # back to NCHW


# ---------------------------- pure-JAX reference -----------------------------

def residual_block_ref(x, p):
    def conv(z, w, b):
        y = jax.lax.conv_general_dilated(
            z, w, (1, 1), "SAME", dimension_numbers=("NCHW", "OIHW", "NCHW"))
        return y + b[None, :, None, None]

    def bn(z, g, be):
        mean = jnp.mean(z, axis=(0, 2, 3), keepdims=True)
        var = jnp.mean((z - mean) ** 2, axis=(0, 2, 3), keepdims=True)
        return (z - mean) / jnp.sqrt(var + EPS) * g[None, :, None, None] \
            + be[None, :, None, None]

    y = conv(x, p["w1"], p["b1"])
    y = bn(y, p["g1"], p["be1"])
    y = jnp.where(y >= 0.0, y, p["a"][0] * y)
    y = conv(y, p["w2"], p["b2"])
    y = bn(y, p["g2"], p["be2"])
    return x + y


# ----------------------------------- main -------------------------------------

if __name__ == "__main__":
    B, C, H, W = 2, 4, 16, 16

    key = jax.random.PRNGKey(0)
    ks = jax.random.split(key, 10)
    x = jax.random.normal(ks[0], (B, C, H, W), jnp.float32)

    params = {
        "w1": jax.random.normal(ks[1], (C, C, 3, 3), jnp.float32) * 0.1,
        "b1": jax.random.normal(ks[2], (C,), jnp.float32) * 0.1,
        "g1": 1.0 + 0.1 * jax.random.normal(ks[3], (C,), jnp.float32),
        "be1": 0.1 * jax.random.normal(ks[4], (C,), jnp.float32),
        "a": jnp.array([0.25], jnp.float32),          # nn.PReLU() default slope
        "w2": jax.random.normal(ks[5], (C, C, 3, 3), jnp.float32) * 0.1,
        "b2": jax.random.normal(ks[6], (C,), jnp.float32) * 0.1,
        "g2": 1.0 + 0.1 * jax.random.normal(ks[7], (C,), jnp.float32),
        "be2": 0.1 * jax.random.normal(ks[8], (C,), jnp.float32),
    }

    out = jax.jit(residual_block)(x, params)
    out = jax.block_until_ready(out)

    assert out.shape == x.shape and out.dtype == jnp.float32
    assert bool(jnp.all(jnp.isfinite(out)))

    ref = residual_block_ref(x, params)
    err = float(jnp.max(jnp.abs(out - ref)))
    if not bool(jnp.allclose(out, ref, rtol=1e-2, atol=1e-2)):
        raise AssertionError(f"mismatch vs reference, max abs err = {err}")

    print("KERNEL_OK")
</pallas_src>

<mosaic_0001>
module attributes {stable_mosaic.version = 11 : i64} {
  func.func @_residual_block_kernel(%arg0: memref<4x2x512xf32, #tpu.memory_space<vmem>>, %arg1: memref<1x256xf32, #tpu.memory_space<vmem>>, %arg2: memref<1x256xf32, #tpu.memory_space<vmem>>, %arg3: memref<144xf32, #tpu.memory_space<smem>>, %arg4: memref<4xf32, #tpu.memory_space<smem>>, %arg5: memref<4xf32, #tpu.memory_space<smem>>, %arg6: memref<4xf32, #tpu.memory_space<smem>>, %arg7: memref<1xf32, #tpu.memory_space<smem>>, %arg8: memref<144xf32, #tpu.memory_space<smem>>, %arg9: memref<4xf32, #tpu.memory_space<smem>>, %arg10: memref<4xf32, #tpu.memory_space<smem>>, %arg11: memref<4xf32, #tpu.memory_space<smem>>, %arg12: memref<4x2x256xf32, #tpu.memory_space<vmem>>, %arg13: memref<4x2x512xf32, #tpu.memory_space<vmem>>) attributes {dimension_semantics = [], scalar_prefetch = 0 : i64, scratch_operands = 1 : i64, tpu.core_type = #tpu.core_type<tc>} {
    %c0 = arith.constant 0 : index
    %c0_0 = arith.constant 0 : index
    %0 = vector.load %arg1[%c0, %c0_0] : memref<1x256xf32, #tpu.memory_space<vmem>>, vector<1x256xf32>
    %c0_1 = arith.constant 0 : index
    %c0_2 = arith.constant 0 : index
    %1 = vector.load %arg2[%c0_1, %c0_2] : memref<1x256xf32, #tpu.memory_space<vmem>>, vector<1x256xf32>
    %c0_3 = arith.constant 0 : index
    %c0_4 = arith.constant 0 : index
    %c111 = arith.constant 111 : index
    %2 = vector.load %arg0[%c0_3, %c0_4, %c111] : memref<4x2x512xf32, #tpu.memory_space<vmem>>, vector<1x2x256xf32>
    %3 = vector.shape_cast %2 : vector<1x2x256xf32> to vector<2x256xf32>
    %4 = vector.broadcast %0 : vector<1x256xf32> to vector<2x256xf32>
    %5 = arith.mulf %3, %4 : vector<2x256xf32>
    %c0_5 = arith.constant 0 : index
    %c0_6 = arith.constant 0 : index
    %c112 = arith.constant 112 : index
    %6 = vector.load %arg0[%c0_5, %c0_6, %c112] : memref<4x2x512xf32, #tpu.memory_space<vmem>>, vector<1x2x256xf32>
    %7 = vector.shape_cast %6 : vector<1x2x256xf32> to vector<2x256xf32>
    %c0_7 = arith.constant 0 : index
    %c0_8 = arith.constant 0 : index
    %c113 = arith.constant 113 : index
    %8 = vector.load %arg0[%c0_7, %c0_8, %c113] : memref<4x2x512xf32, #tpu.memory_space<vmem>>, vector<1x2x256xf32>
    %9 = vector.shape_cast %8 : vector<1x2x256xf32> to vector<2x256xf32>
    %10 = vector.broadcast %1 : vector<1x256xf32> to vector<2x256xf32>
    %11 = arith.mulf %9, %10 : vector<2x256xf32>
    %c0_9 = arith.constant 0 : index
    %c0_10 = arith.constant 0 : index
    %c127 = arith.constant 127 : index
    %12 = vector.load %arg0[%c0_9, %c0_10, %c127] : memref<4x2x512xf32, #tpu.memory_space<vmem>>, vector<1x2x256xf32>
    %13 = vector.shape_cast %12 : vector<1x2x256xf32> to vector<2x256xf32>
    %14 = vector.broadcast %0 : vector<1x256xf32> to vector<2x256xf32>
    %15 = arith.mulf %13, %14 : vector<2x256xf32>
    %c0_11 = arith.constant 0 : index
    %c0_12 = arith.constant 0 : index
    %c128 = arith.constant 128 : index
    %16 = vector.load %arg0[%c0_11, %c0_12, %c128] : memref<4x2x512xf32, #tpu.memory_space<vmem>>, vector<1x2x256xf32>
    %17 = vector.shape_cast %16 : vector<1x2x256xf32> to vector<2x256xf32>
    %c0_13 = arith.constant 0 : index
    %c0_14 = arith.constant 0 : index
    %c129 = arith.constant 129 : index
    %18 = vector.load %arg0[%c0_13, %c0_14, %c129] : memref<4x2x512xf32, #tpu.memory_space<vmem>>, vector<1x2x256xf32>
    %19 = vector.shape_cast %18 : vector<1x2x256xf32> to vector<2x256xf32>
    %20 = vector.broadcast %1 : vector<1x256xf32> to vector<2x256xf32>
    %21 = arith.mulf %19, %20 : vector<2x256xf32>
    %c0_15 = arith.constant 0 : index
    %c0_16 = arith.constant 0 : index
    %c143 = arith.constant 143 : index
    %22 = vector.load %arg0[%c0_15, %c0_16, %c143] : memref<4x2x512xf32, #tpu.memory_space<vmem>>, vector<1x2x256xf32>
    %23 = vector.shape_cast %22 : vector<1x2x256xf32> to vector<2x256xf32>
    %24 = vector.broadcast %0 : vector<1x256xf32> to vector<2x256xf32>
    %25 = arith.mulf %23, %24 : vector<2x256xf32>
    %c0_17 = arith.constant 0 : index
    %c0_18 = arith.constant 0 : index
    %c144 = arith.constant 144 : index
    %26 = vector.load %arg0[%c0_17, %c0_18, %c144] : memref<4x2x512xf32, #tpu.memory_space<vmem>>, vector<1x2x256xf32>
    %27 = vector.shape_cast %26 : vector<1x2x256xf32> to vector<2x256xf32>
    %c0_19 = arith.constant 0 : index
    %c0_20 = arith.constant 0 : index
    %c145 = arith.constant 145 : index
    %28 = vector.load %arg0[%c0_19, %c0_20, %c145] : memref<4x2x512xf32, #tpu.memory_space<vmem>>, vector<1x2x256xf32>
    %29 = vector.shape_cast %28 : vector<1x2x256xf32> to vector<2x256xf32>
    %30 = vector.broadcast %1 : vector<1x256xf32> to vector<2x256xf32>
    %31 = arith.mulf %29, %30 : vector<2x256xf32>
    %c1 = arith.constant 1 : index
    %c0_21 = arith.constant 0 : index
    %c111_22 = arith.constant 111 : index
    %32 = vector.load %arg0[%c1, %c0_21, %c111_22] : memref<4x2x512xf32, #tpu.memory_space<vmem>>, vector<1x2x256xf32>
    %33 = vector.shape_cast %32 : vector<1x2x256xf32> to vector<2x256xf32>
    %34 = vector.broadcast %0 : vector<1x256xf32> to vector<2x256xf32>
    %35 = arith.mulf %33, %34 : vector<2x256xf32>
    %c1_23 = arith.constant 1 : index
    %c0_24 = arith.constant 0 : index
    %c112_25 = arith.constant 112 : index
    %36 = vector.load %arg0[%c1_23, %c0_24, %c112_25] : memref<4x2x512xf32, #tpu.memory_space<vmem>>, vector<1x2x256xf32>
    %37 = vector.shape_cast %36 : vector<1x2x256xf32> to vector<2x256xf32>
    %c1_26 = arith.constant 1 : index
    %c0_27 = arith.constant 0 : index
    %c113_28 = arith.constant 113 : index
    %38 = vector.load %arg0[%c1_26, %c0_27, %c113_28] : memref<4x2x512xf32, #tpu.memory_space<vmem>>, vector<1x2x256xf32>
    %39 = vector.shape_cast %38 : vector<1x2x256xf32> to vector<2x256xf32>
    %40 = vector.broadcast %1 : vector<1x256xf32> to vector<2x256xf32>
    %41 = arith.mulf %39, %40 : vector<2x256xf32>
    %c1_29 = arith.constant 1 : index
    %c0_30 = arith.constant 0 : index
    %c127_31 = arith.constant 127 : index
    %42 = vector.load %arg0[%c1_29, %c0_30, %c127_31] : memref<4x2x512xf32, #tpu.memory_space<vmem>>, vector<1x2x256xf32>
    %43 = vector.shape_cast %42 : vector<1x2x256xf32> to vector<2x256xf32>
    %44 = vector.broadcast %0 : vector<1x256xf32> to vector<2x256xf32>
    %45 = arith.mulf %43, %44 : vector<2x256xf32>
    %c1_32 = arith.constant 1 : index
    %c0_33 = arith.constant 0 : index
    %c128_34 = arith.constant 128 : index
    %46 = vector.load %arg0[%c1_32, %c0_33, %c128_34] : memref<4x2x512xf32, #tpu.memory_space<vmem>>, vector<1x2x256xf32>
    %47 = vector.shape_cast %46 : vector<1x2x256xf32> to vector<2x256xf32>
    %c1_35 = arith.constant 1 : index
    %c0_36 = arith.constant 0 : index
    %c129_37 = arith.constant 129 : index
    %48 = vector.load %arg0[%c1_35, %c0_36, %c129_37] : memref<4x2x512xf32, #tpu.memory_space<vmem>>, vector<1x2x256xf32>
    %49 = vector.shape_cast %48 : vector<1x2x256xf32> to vector<2x256xf32>
    %50 = vector.broadcast %1 : vector<1x256xf32> to vector<2x256xf32>
    %51 = arith.mulf %49, %50 : vector<2x256xf32>
    %c1_38 = arith.constant 1 : index
    %c0_39 = arith.constant 0 : index
    %c143_40 = arith.constant 143 : index
    %52 = vector.load %arg0[%c1_38, %c0_39, %c143_40] : memref<4x2x512xf32, #tpu.memory_space<vmem>>, vector<1x2x256xf32>
    %53 = vector.shape_cast %52 : vector<1x2x256xf32> to vector<2x256xf32>
    %54 = vector.broadcast %0 : vector<1x256xf32> to vector<2x256xf32>
    %55 = arith.mulf %53, %54 : vector<2x256xf32>
    %c1_41 = arith.constant 1 : index
    %c0_42 = arith.constant 0 : index
    %c144_43 = arith.constant 144 : index
    %56 = vector.load %arg0[%c1_41, %c0_42, %c144_43] : memref<4x2x512xf32, #tpu.memory_space<vmem>>, vector<1x2x256xf32>
    %57 = vector.shape_cast %56 : vector<1x2x256xf32> to vector<2x256xf32>
    %c1_44 = arith.constant 1 : index
    %c0_45 = arith.constant 0 : index
    %c145_46 = arith.constant 145 : index
    %58 = vector.load %arg0[%c1_44, %c0_45, %c145_46] : memref<4x2x512xf32, #tpu.memory_space<vmem>>, vector<1x2x256xf32>
    %59 = vector.shape_cast %58 : vector<1x2x256xf32> to vector<2x256xf32>
    %60 = vector.broadcast %1 : vector<1x256xf32> to vector<2x256xf32>
    %61 = arith.mulf %59, %60 : vector<2x256xf32>
    %c2 = arith.constant 2 : index
    %c0_47 = arith.constant 0 : index
    %c111_48 = arith.constant 111 : index
    %62 = vector.load %arg0[%c2, %c0_47, %c111_48] : memref<4x2x512xf32, #tpu.memory_space<vmem>>, vector<1x2x256xf32>
    %63 = vector.shape_cast %62 : vector<1x2x256xf32> to vector<2x256xf32>
    %64 = vector.broadcast %0 : vector<1x256xf32> to vector<2x256xf32>
    %65 = arith.mulf %63, %64 : vector<2x256xf32>
    %c2_49 = arith.constant 2 : index
    %c0_50 = arith.constant 0 : index
    %c112_51 = arith.constant 112 : index
    %66 = vector.load %arg0[%c2_49, %c0_50, %c112_51] : memref<4x2x512xf32, #tpu.memory_space<vmem>>, vector<1x2x256xf32>
    %67 = vector.shape_cast %66 : vector<1x2x256xf32> to vector<2x256xf32>
    %c2_52 = arith.constant 2 : index
    %c0_53 = arith.constant 0 : index
    %c113_54 = arith.constant 113 : index
    %68 = vector.load %arg0[%c2_52, %c0_53, %c113_54] : memref<4x2x512xf32, #tpu.memory_space<vmem>>, vector<1x2x256xf32>
    %69 = vector.shape_cast %68 : vector<1x2x256xf32> to vector<2x256xf32>
    %70 = vector.broadcast %1 : vector<1x256xf32> to vector<2x256xf32>
    %71 = arith.mulf %69, %70 : vector<2x256xf32>
    %c2_55 = arith.constant 2 : index
    %c0_56 = arith.constant 0 : index
    %c127_57 = arith.constant 127 : index
    %72 = vector.load %arg0[%c2_55, %c0_56, %c127_57] : memref<4x2x512xf32, #tpu.memory_space<vmem>>, vector<1x2x256xf32>
    %73 = vector.shape_cast %72 : vector<1x2x256xf32> to vector<2x256xf32>
    %74 = vector.broadcast %0 : vector<1x256xf32> to vector<2x256xf32>
    %75 = arith.mulf %73, %74 : vector<2x256xf32>
    %c2_58 = arith.constant 2 : index
    %c0_59 = arith.constant 0 : index
    %c128_60 = arith.constant 128 : index
    %76 = vector.load %arg0[%c2_58, %c0_59, %c128_60] : memref<4x2x512xf32, #tpu.memory_space<vmem>>, vector<1x2x256xf32>
    %77 = vector.shape_cast %76 : vector<1x2x256xf32> to vector<2x256xf32>
    %c2_61 = arith.constant 2 : index
    %c0_62 = arith.constant 0 : index
    %c129_63 = arith.constant 129 : index
    %78 = vector.load %arg0[%c2_61, %c0_62, %c129_63] : memref<4x2x512xf32, #tpu.memory_space<vmem>>, vector<1x2x256xf32>
    %79 = vector.shape_cast %78 : vector<1x2x256xf32> to vector<2x256xf32>
    %80 = vector.broadcast %1 : vector<1x256xf32> to vector<2x256xf32>
    %81 = arith.mulf %79, %80 : vector<2x256xf32>
    %c2_64 = arith.constant 2 : index
    %c0_65 = arith.constant 0 : index
    %c143_66 = arith.constant 143 : index
    %82 = vector.load %arg0[%c2_64, %c0_65, %c143_66] : memref<4x2x512xf32, #tpu.memory_space<vmem>>, vector<1x2x256xf32>
    %83 = vector.shape_cast %82 : vector<1x2x256xf32> to vector<2x256xf32>
    %84 = vector.broadcast %0 : vector<1x256xf32> to vector<2x256xf32>
    %85 = arith.mulf %83, %84 : vector<2x256xf32>
    %c2_67 = arith.constant 2 : index
    %c0_68 = arith.constant 0 : index
    %c144_69 = arith.constant 144 : index
    %86 = vector.load %arg0[%c2_67, %c0_68, %c144_69] : memref<4x2x512xf32, #tpu.memory_space<vmem>>, vector<1x2x256xf32>
    %87 = vector.shape_cast %86 : vector<1x2x256xf32> to vector<2x256xf32>
    %c2_70 = arith.constant 2 : index
    %c0_71 = arith.constant 0 : index
    %c145_72 = arith.constant 145 : index
    %88 = vector.load %arg0[%c2_70, %c0_71, %c145_72] : memref<4x2x512xf32, #tpu.memory_space<vmem>>, vector<1x2x256xf32>
    %89 = vector.shape_cast %88 : vector<1x2x256xf32> to vector<2x256xf32>
    %90 = vector.broadcast %1 : vector<1x256xf32> to vector<2x256xf32>
    %91 = arith.mulf %89, %90 : vector<2x256xf32>
    %c3 = arith.constant 3 : index
    %c0_73 = arith.constant 0 : index
    %c111_74 = arith.constant 111 : index
    %92 = vector.load %arg0[%c3, %c0_73, %c111_74] : memref<4x2x512xf32, #tpu.memory_space<vmem>>, vector<1x2x256xf32>
    %93 = vector.shape_cast %92 : vector<1x2x256xf32> to vector<2x256xf32>
    %94 = vector.broadcast %0 : vector<1x256xf32> to vector<2x256xf32>
    %95 = arith.mulf %93, %94 : vector<2x256xf32>
    %c3_75 = arith.constant 3 : index
    %c0_76 = arith.constant 0 : index
    %c112_77 = arith.constant 112 : index
    %96 = vector.load %arg0[%c3_75, %c0_76, %c112_77] : memref<4x2x512xf32, #tpu.memory_space<vmem>>, vector<1x2x256xf32>
    %97 = vector.shape_cast %96 : vector<1x2x256xf32> to vector<2x256xf32>
    %c3_78 = arith.constant 3 : index
    %c0_79 = arith.constant 0 : index
    %c113_80 = arith.constant 113 : index
    %98 = vector.load %arg0[%c3_78, %c0_79, %c113_80] : memref<4x2x512xf32, #tpu.memory_space<vmem>>, vector<1x2x256xf32>
    %99 = vector.shape_cast %98 : vector<1x2x256xf32> to vector<2x256xf32>
    %100 = vector.broadcast %1 : vector<1x256xf32> to vector<2x256xf32>
    %101 = arith.mulf %99, %100 : vector<2x256xf32>
    %c3_81 = arith.constant 3 : index
    %c0_82 = arith.constant 0 : index
    %c127_83 = arith.constant 127 : index
    %102 = vector.load %arg0[%c3_81, %c0_82, %c127_83] : memref<4x2x512xf32, #tpu.memory_space<vmem>>, vector<1x2x256xf32>
    %103 = vector.shape_cast %102 : vector<1x2x256xf32> to vector<2x256xf32>
    %104 = vector.broadcast %0 : vector<1x256xf32> to vector<2x256xf32>
    %105 = arith.mulf %103, %104 : vector<2x256xf32>
    %c3_84 = arith.constant 3 : index
    %c0_85 = arith.constant 0 : index
    %c128_86 = arith.constant 128 : index
    %106 = vector.load %arg0[%c3_84, %c0_85, %c128_86] : memref<4x2x512xf32, #tpu.memory_space<vmem>>, vector<1x2x256xf32>
    %107 = vector.shape_cast %106 : vector<1x2x256xf32> to vector<2x256xf32>
    %c3_87 = arith.constant 3 : index
    %c0_88 = arith.constant 0 : index
    %c129_89 = arith.constant 129 : index
    %108 = vector.load %arg0[%c3_87, %c0_88, %c129_89] : memref<4x2x512xf32, #tpu.memory_space<vmem>>, vector<1x2x256xf32>
    %109 = vector.shape_cast %108 : vector<1x2x256xf32> to vector<2x256xf32>
    %110 = vector.broadcast %1 : vector<1x256xf32> to vector<2x256xf32>
    %111 = arith.mulf %109, %110 : vector<2x256xf32>
    %c3_90 = arith.constant 3 : index
    %c0_91 = arith.constant 0 : index
    %c143_92 = arith.constant 143 : index
    %112 = vector.load %arg0[%c3_90, %c0_91, %c143_92] : memref<4x2x512xf32, #tpu.memory_space<vmem>>, vector<1x2x256xf32>
    %113 = vector.shape_cast %112 : vector<1x2x256xf32> to vector<2x256xf32>
    %114 = vector.broadcast %0 : vector<1x256xf32> to vector<2x256xf32>
    %115 = arith.mulf %113, %114 : vector<2x256xf32>
    %c3_93 = arith.constant 3 : index
    %c0_94 = arith.constant 0 : index
    %c144_95 = arith.constant 144 : index
    %116 = vector.load %arg0[%c3_93, %c0_94, %c144_95] : memref<4x2x512xf32, #tpu.memory_space<vmem>>, vector<1x2x256xf32>
    %117 = vector.shape_cast %116 : vector<1x2x256xf32> to vector<2x256xf32>
    %c3_96 = arith.constant 3 : index
    %c0_97 = arith.constant 0 : index
    %c145_98 = arith.constant 145 : index
    %118 = vector.load %arg0[%c3_96, %c0_97, %c145_98] : memref<4x2x512xf32, #tpu.memory_space<vmem>>, vector<1x2x256xf32>
    %119 = vector.shape_cast %118 : vector<1x2x256xf32> to vector<2x256xf32>
    %120 = vector.broadcast %1 : vector<1x256xf32> to vector<2x256xf32>
    %121 = arith.mulf %119, %120 : vector<2x256xf32>
    %cst = arith.constant 0.000000e+00 : f32
    %122 = vector.broadcast %cst : f32 to vector<2x256xf32>
    %c0_99 = arith.constant 0 : index
    %123 = memref.load %arg3[%c0_99] : memref<144xf32, #tpu.memory_space<smem>>
    %124 = vector.broadcast %123 : f32 to vector<2x256xf32>
    %125 = arith.mulf %124, %5 : vector<2x256xf32>
    %126 = arith.addf %122, %125 : vector<2x256xf32>
    %c1_100 = arith.constant 1 : index
    %127 = memref.load %arg3[%c1_100] : memref<144xf32, #tpu.memory_space<smem>>
    %128 = vector.broadcast %127 : f32 to vector<2x256xf32>
    %129 = arith.mulf %128, %7 : vector<2x256xf32>
    %130 = arith.addf %126, %129 : vector<2x256xf32>
    %c2_101 = arith.constant 2 : index
    %131 = memref.load %arg3[%c2_101] : memref<144xf32, #tpu.memory_space<smem>>
    %132 = vector.broadcast %131 : f32 to vector<2x256xf32>
    %133 = arith.mulf %132, %11 : vector<2x256xf32>
    %134 = arith.addf %130, %133 : vector<2x256xf32>
    %c3_102 = arith.constant 3 : index
    %135 = memref.load %arg3[%c3_102] : memref<144xf32, #tpu.memory_space<smem>>
    %136 = vector.broadcast %135 : f32 to vector<2x256xf32>
    %137 = arith.mulf %136, %15 : vector<2x256xf32>
    %138 = arith.addf %134, %137 : vector<2x256xf32>
    %c4 = arith.constant 4 : index
    %139 = memref.load %arg3[%c4] : memref<144xf32, #tpu.memory_space<smem>>
    %140 = vector.broadcast %139 : f32 to vector<2x256xf32>
    %141 = arith.mulf %140, %17 : vector<2x256xf32>
    %142 = arith.addf %138, %141 : vector<2x256xf32>
    %c5 = arith.constant 5 : index
    %143 = memref.load %arg3[%c5] : memref<144xf32, #tpu.memory_space<smem>>
    %144 = vector.broadcast %143 : f32 to vector<2x256xf32>
    %145 = arith.mulf %144, %21 : vector<2x256xf32>
    %146 = arith.addf %142, %145 : vector<2x256xf32>
    %c6 = arith.constant 6 : index
    %147 = memref.load %arg3[%c6] : memref<144xf32, #tpu.memory_space<smem>>
    %148 = vector.broadcast %147 : f32 to vector<2x256xf32>
    %149 = arith.mulf %148, %25 : vector<2x256xf32>
    %150 = arith.addf %146, %149 : vector<2x256xf32>
    %c7 = arith.constant 7 : index
    %151 = memref.load %arg3[%c7] : memref<144xf32, #tpu.memory_space<smem>>
    %152 = vector.broadcast %151 : f32 to vector<2x256xf32>
    %153 = arith.mulf %152, %27 : vector<2x256xf32>
    %154 = arith.addf %150, %153 : vector<2x256xf32>
    %c8 = arith.constant 8 : index
    %155 = memref.load %arg3[%c8] : memref<144xf32, #tpu.memory_space<smem>>
    %156 = vector.broadcast %155 : f32 to vector<2x256xf32>
    %157 = arith.mulf %156, %31 : vector<2x256xf32>
    %158 = arith.addf %154, %157 : vector<2x256xf32>
    %c9 = arith.constant 9 : index
    %159 = memref.load %arg3[%c9] : memref<144xf32, #tpu.memory_space<smem>>
    %160 = vector.broadcast %159 : f32 to vector<2x256xf32>
    %161 = arith.mulf %160, %35 : vector<2x256xf32>
    %162 = arith.addf %158, %161 : vector<2x256xf32>
    %c10 = arith.constant 10 : index
    %163 = memref.load %arg3[%c10] : memref<144xf32, #tpu.memory_space<smem>>
    %164 = vector.broadcast %163 : f32 to vector<2x256xf32>
    %165 = arith.mulf %164, %37 : vector<2x256xf32>
    %166 = arith.addf %162, %165 : vector<2x256xf32>
    %c11 = arith.constant 11 : index
    %167 = memref.load %arg3[%c11] : memref<144xf32, #tpu.memory_space<smem>>
    %168 = vector.broadcast %167 : f32 to vector<2x256xf32>
    %169 = arith.mulf %168, %41 : vector<2x256xf32>
    %170 = arith.addf %166, %169 : vector<2x256xf32>
    %c12 = arith.constant 12 : index
    %171 = memref.load %arg3[%c12] : memref<144xf32, #tpu.memory_space<smem>>
    %172 = vector.broadcast %171 : f32 to vector<2x256xf32>
    %173 = arith.mulf %172, %45 : vector<2x256xf32>
    %174 = arith.addf %170, %173 : vector<2x256xf32>
    %c13 = arith.constant 13 : index
    %175 = memref.load %arg3[%c13] : memref<144xf32, #tpu.memory_space<smem>>
    %176 = vector.broadcast %175 : f32 to vector<2x256xf32>
    %177 = arith.mulf %176, %47 : vector<2x256xf32>
    %178 = arith.addf %174, %177 : vector<2x256xf32>
    %c14 = arith.constant 14 : index
    %179 = memref.load %arg3[%c14] : memref<144xf32, #tpu.memory_space<smem>>
    %180 = vector.broadcast %179 : f32 to vector<2x256xf32>
    %181 = arith.mulf %180, %51 : vector<2x256xf32>
    %182 = arith.addf %178, %181 : vector<2x256xf32>
    %c15 = arith.constant 15 : index
    %183 = memref.load %arg3[%c15] : memref<144xf32, #tpu.memory_space<smem>>
    %184 = vector.broadcast %183 : f32 to vector<2x256xf32>
    %185 = arith.mulf %184, %55 : vector<2x256xf32>
    %186 = arith.addf %182, %185 : vector<2x256xf32>
    %c16 = arith.constant 16 : index
    %187 = memref.load %arg3[%c16] : memref<144xf32, #tpu.memory_space<smem>>
    %188 = vector.broadcast %187 : f32 to vector<2x256xf32>
    %189 = arith.mulf %188, %57 : vector<2x256xf32>
    %190 = arith.addf %186, %189 : vector<2x256xf32>
    %c17 = arith.constant 17 : index
    %191 = memref.load %arg3[%c17] : memref<144xf32, #tpu.memory_space<smem>>
    %192 = vector.broadcast %191 : f32 to vector<2x256xf32>
    %193 = arith.mulf %192, %61 : vector<2x256xf32>
    %194 = arith.addf %190, %193 : vector<2x256xf32>
    %c18 = arith.constant 18 : index
    %195 = memref.load %arg3[%c18] : memref<144xf32, #tpu.memory_space<smem>>
    %196 = vector.broadcast %195 : f32 to vector<2x256xf32>
    %197 = arith.mulf %196, %65 : vector<2x256xf32>
    %198 = arith.addf %194, %197 : vector<2x256xf32>
    %c19 = arith.constant 19 : index
    %199 = memref.load %arg3[%c19] : memref<144xf32, #tpu.memory_space<smem>>
    %200 = vector.broadcast %199 : f32 to vector<2x256xf32>
    %201 = arith.mulf %200, %67 : vector<2x256xf32>
    %202 = arith.addf %198, %201 : vector<2x256xf32>
    %c20 = arith.constant 20 : index
    %203 = memref.load %arg3[%c20] : memref<144xf32, #tpu.memory_space<smem>>
    %204 = vector.broadcast %203 : f32 to vector<2x256xf32>
    %205 = arith.mulf %204, %71 : vector<2x256xf32>
    %206 = arith.addf %202, %205 : vector<2x256xf32>
    %c21 = arith.constant 21 : index
    %207 = memref.load %arg3[%c21] : memref<144xf32, #tpu.memory_space<smem>>
    %208 = vector.broadcast %207 : f32 to vector<2x256xf32>
    %209 = arith.mulf %208, %75 : vector<2x256xf32>
    %210 = arith.addf %206, %209 : vector<2x256xf32>
    %c22 = arith.constant 22 : index
    %211 = memref.load %arg3[%c22] : memref<144xf32, #tpu.memory_space<smem>>
    %212 = vector.broadcast %211 : f32 to vector<2x256xf32>
    %213 = arith.mulf %212, %77 : vector<2x256xf32>
    %214 = arith.addf %210, %213 : vector<2x256xf32>
    %c23 = arith.constant 23 : index
    %215 = memref.load %arg3[%c23] : memref<144xf32, #tpu.memory_space<smem>>
    %216 = vector.broadcast %215 : f32 to vector<2x256xf32>
    %217 = arith.mulf %216, %81 : vector<2x256xf32>
    %218 = arith.addf %214, %217 : vector<2x256xf32>
    %c24 = arith.constant 24 : index
    %219 = memref.load %arg3[%c24] : memref<144xf32, #tpu.memory_space<smem>>
    %220 = vector.broadcast %219 : f32 to vector<2x256xf32>
    %221 = arith.mulf %220, %85 : vector<2x256xf32>
    %222 = arith.addf %218, %221 : vector<2x256xf32>
    %c25 = arith.constant 25 : index
    %223 = memref.load %arg3[%c25] : memref<144xf32, #tpu.memory_space<smem>>
    %224 = vector.broadcast %223 : f32 to vector<2x256xf32>
    %225 = arith.mulf %224, %87 : vector<2x256xf32>
    %226 = arith.addf %222, %225 : vector<2x256xf32>
    %c26 = arith.constant 26 : index
    %227 = memref.load %arg3[%c26] : memref<144xf32, #tpu.memory_space<smem>>
    %228 = vector.broadcast %227 : f32 to vector<2x256xf32>
    %229 = arith.mulf %228, %91 : vector<2x256xf32>
    %230 = arith.addf %226, %229 : vector<2x256xf32>
    %c27 = arith.constant 27 : index
    %231 = memref.load %arg3[%c27] : memref<144xf32, #tpu.memory_space<smem>>
    %232 = vector.broadcast %231 : f32 to vector<2x256xf32>
    %233 = arith.mulf %232, %95 : vector<2x256xf32>
    %234 = arith.addf %230, %233 : vector<2x256xf32>
    %c28 = arith.constant 28 : index
    %235 = memref.load %arg3[%c28] : memref<144xf32, #tpu.memory_space<smem>>
    %236 = vector.broadcast %235 : f32 to vector<2x256xf32>
    %237 = arith.mulf %236, %97 : vector<2x256xf32>
    %238 = arith.addf %234, %237 : vector<2x256xf32>
    %c29 = arith.constant 29 : index
    %239 = memref.load %arg3[%c29] : memref<144xf32, #tpu.memory_space<smem>>
    %240 = vector.broadcast %239 : f32 to vector<2x256xf32>
    %241 = arith.mulf %240, %101 : vector<2x256xf32>
    %242 = arith.addf %238, %241 : vector<2x256xf32>
    %c30 = arith.constant 30 : index
    %243 = memref.load %arg3[%c30] : memref<144xf32, #tpu.memory_space<smem>>
    %244 = vector.broadcast %243 : f32 to vector<2x256xf32>
    %245 = arith.mulf %244, %105 : vector<2x256xf32>
    %246 = arith.addf %242, %245 : vector<2x256xf32>
    %c31 = arith.constant 31 : index
    %247 = memref.load %arg3[%c31] : memref<144xf32, #tpu.memory_space<smem>>
    %248 = vector.broadcast %247 : f32 to vector<2x256xf32>
    %249 = arith.mulf %248, %107 : vector<2x256xf32>
    %250 = arith.addf %246, %249 : vector<2x256xf32>
    %c32 = arith.constant 32 : index
    %251 = memref.load %arg3[%c32] : memref<144xf32, #tpu.memory_space<smem>>
    %252 = vector.broadcast %251 : f32 to vector<2x256xf32>
    %253 = arith.mulf %252, %111 : vector<2x256xf32>
    %254 = arith.addf %250, %253 : vector<2x256xf32>
    %c33 = arith.constant 33 : index
    %255 = memref.load %arg3[%c33] : memref<144xf32, #tpu.memory_space<smem>>
    %256 = vector.broadcast %255 : f32 to vector<2x256xf32>
    %257 = arith.mulf %256, %115 : vector<2x256xf32>
    %258 = arith.addf %254, %257 : vector<2x256xf32>
    %c34 = arith.constant 34 : index
    %259 = memref.load %arg3[%c34] : memref<144xf32, #tpu.memory_space<smem>>
    %260 = vector.broadcast %259 : f32 to vector<2x256xf32>
    %261 = arith.mulf %260, %117 : vector<2x256xf32>
    %262 = arith.addf %258, %261 : vector<2x256xf32>
    %c35 = arith.constant 35 : index
    %263 = memref.load %arg3[%c35] : memref<144xf32, #tpu.memory_space<smem>>
    %264 = vector.broadcast %263 : f32 to vector<2x256xf32>
    %265 = arith.mulf %264, %121 : vector<2x256xf32>
    %266 = arith.addf %262, %265 : vector<2x256xf32>
    %c0_103 = arith.constant 0 : index
    %267 = memref.load %arg4[%c0_103] : memref<4xf32, #tpu.memory_space<smem>>
    %268 = vector.broadcast %267 : f32 to vector<2x256xf32>
    %269 = arith.addf %266, %268 : vector<2x256xf32>
    %cst_104 = arith.constant 0.000000e+00 : f32
    %270 = vector.broadcast %cst_104 : f32 to vector<2x256xf32>
    %c36 = arith.constant 36 : index
    %271 = memref.load %arg3[%c36] : memref<144xf32, #tpu.memory_space<smem>>
    %272 = vector.broadcast %271 : f32 to vector<2x256xf32>
    %273 = arith.mulf %272, %5 : vector<2x256xf32>
    %274 = arith.addf %270, %273 : vector<2x256xf32>
    %c37 = arith.constant 37 : index
    %275 = memref.load %arg3[%c37] : memref<144xf32, #tpu.memory_space<smem>>
    %276 = vector.broadcast %275 : f32 to vector<2x256xf32>
    %277 = arith.mulf %276, %7 : vector<2x256xf32>
    %278 = arith.addf %274, %277 : vector<2x256xf32>
    %c38 = arith.constant 38 : index
    %279 = memref.load %arg3[%c38] : memref<144xf32, #tpu.memory_space<smem>>
    %280 = vector.broadcast %279 : f32 to vector<2x256xf32>
    %281 = arith.mulf %280, %11 : vector<2x256xf32>
    %282 = arith.addf %278, %281 : vector<2x256xf32>
    %c39 = arith.constant 39 : index
    %283 = memref.load %arg3[%c39] : memref<144xf32, #tpu.memory_space<smem>>
    %284 = vector.broadcast %283 : f32 to vector<2x256xf32>
    %285 = arith.mulf %284, %15 : vector<2x256xf32>
    %286 = arith.addf %282, %285 : vector<2x256xf32>
    %c40 = arith.constant 40 : index
    %287 = memref.load %arg3[%c40] : memref<144xf32, #tpu.memory_space<smem>>
    %288 = vector.broadcast %287 : f32 to vector<2x256xf32>
    %289 = arith.mulf %288, %17 : vector<2x256xf32>
    %290 = arith.addf %286, %289 : vector<2x256xf32>
    %c41 = arith.constant 41 : index
    %291 = memref.load %arg3[%c41] : memref<144xf32, #tpu.memory_space<smem>>
    %292 = vector.broadcast %291 : f32 to vector<2x256xf32>
    %293 = arith.mulf %292, %21 : vector<2x256xf32>
    %294 = arith.addf %290, %293 : vector<2x256xf32>
    %c42 = arith.constant 42 : index
    %295 = memref.load %arg3[%c42] : memref<144xf32, #tpu.memory_space<smem>>
    %296 = vector.broadcast %295 : f32 to vector<2x256xf32>
    %297 = arith.mulf %296, %25 : vector<2x256xf32>
    %298 = arith.addf %294, %297 : vector<2x256xf32>
    %c43 = arith.constant 43 : index
    %299 = memref.load %arg3[%c43] : memref<144xf32, #tpu.memory_space<smem>>
    %300 = vector.broadcast %299 : f32 to vector<2x256xf32>
    %301 = arith.mulf %300, %27 : vector<2x256xf32>
    %302 = arith.addf %298, %301 : vector<2x256xf32>
    %c44 = arith.constant 44 : index
    %303 = memref.load %arg3[%c44] : memref<144xf32, #tpu.memory_space<smem>>
    %304 = vector.broadcast %303 : f32 to vector<2x256xf32>
    %305 = arith.mulf %304, %31 : vector<2x256xf32>
    %306 = arith.addf %302, %305 : vector<2x256xf32>
    %c45 = arith.constant 45 : index
    %307 = memref.load %arg3[%c45] : memref<144xf32, #tpu.memory_space<smem>>
    %308 = vector.broadcast %307 : f32 to vector<2x256xf32>
    %309 = arith.mulf %308, %35 : vector<2x256xf32>
    %310 = arith.addf %306, %309 : vector<2x256xf32>
    %c46 = arith.constant 46 : index
    %311 = memref.load %arg3[%c46] : memref<144xf32, #tpu.memory_space<smem>>
    %312 = vector.broadcast %311 : f32 to vector<2x256xf32>
    %313 = arith.mulf %312, %37 : vector<2x256xf32>
    %314 = arith.addf %310, %313 : vector<2x256xf32>
    %c47 = arith.constant 47 : index
    %315 = memref.load %arg3[%c47] : memref<144xf32, #tpu.memory_space<smem>>
    %316 = vector.broadcast %315 : f32 to vector<2x256xf32>
    %317 = arith.mulf %316, %41 : vector<2x256xf32>
    %318 = arith.addf %314, %317 : vector<2x256xf32>
    %c48 = arith.constant 48 : index
    %319 = memref.load %arg3[%c48] : memref<144xf32, #tpu.memory_space<smem>>
    %320 = vector.broadcast %319 : f32 to vector<2x256xf32>
    %321 = arith.mulf %320, %45 : vector<2x256xf32>
    %322 = arith.addf %318, %321 : vector<2x256xf32>
    %c49 = arith.constant 49 : index
    %323 = memref.load %arg3[%c49] : memref<144xf32, #tpu.memory_space<smem>>
    %324 = vector.broadcast %323 : f32 to vector<2x256xf32>
    %325 = arith.mulf %324, %47 : vector<2x256xf32>
    %326 = arith.addf %322, %325 : vector<2x256xf32>
    %c50 = arith.constant 50 : index
    %327 = memref.load %arg3[%c50] : memref<144xf32, #tpu.memory_space<smem>>
    %328 = vector.broadcast %327 : f32 to vector<2x256xf32>
    %329 = arith.mulf %328, %51 : vector<2x256xf32>
    %330 = arith.addf %326, %329 : vector<2x256xf32>
    %c51 = arith.constant 51 : index
    %331 = memref.load %arg3[%c51] : memref<144xf32, #tpu.memory_space<smem>>
    %332 = vector.broadcast %331 : f32 to vector<2x256xf32>
    %333 = arith.mulf %332, %55 : vector<2x256xf32>
    %334 = arith.addf %330, %333 : vector<2x256xf32>
    %c52 = arith.constant 52 : index
    %335 = memref.load %arg3[%c52] : memref<144xf32, #tpu.memory_space<smem>>
    %336 = vector.broadcast %335 : f32 to vector<2x256xf32>
    %337 = arith.mulf %336, %57 : vector<2x256xf32>
    %338 = arith.addf %334, %337 : vector<2x256xf32>
    %c53 = arith.constant 53 : index
    %339 = memref.load %arg3[%c53] : memref<144xf32, #tpu.memory_space<smem>>
    %340 = vector.broadcast %339 : f32 to vector<2x256xf32>
    %341 = arith.mulf %340, %61 : vector<2x256xf32>
    %342 = arith.addf %338, %341 : vector<2x256xf32>
    %c54 = arith.constant 54 : index
    %343 = memref.load %arg3[%c54] : memref<144xf32, #tpu.memory_space<smem>>
    %344 = vector.broadcast %343 : f32 to vector<2x256xf32>
    %345 = arith.mulf %344, %65 : vector<2x256xf32>
    %346 = arith.addf %342, %345 : vector<2x256xf32>
    %c55 = arith.constant 55 : index
    %347 = memref.load %arg3[%c55] : memref<144xf32, #tpu.memory_space<smem>>
    %348 = vector.broadcast %347 : f32 to vector<2x256xf32>
    %349 = arith.mulf %348, %67 : vector<2x256xf32>
    %350 = arith.addf %346, %349 : vector<2x256xf32>
    %c56 = arith.constant 56 : index
    %351 = memref.load %arg3[%c56] : memref<144xf32, #tpu.memory_space<smem>>
    %352 = vector.broadcast %351 : f32 to vector<2x256xf32>
    %353 = arith.mulf %352, %71 : vector<2x256xf32>
    %354 = arith.addf %350, %353 : vector<2x256xf32>
    %c57 = arith.constant 57 : index
    %355 = memref.load %arg3[%c57] : memref<144xf32, #tpu.memory_space<smem>>
    %356 = vector.broadcast %355 : f32 to vector<2x256xf32>
    %357 = arith.mulf %356, %75 : vector<2x256xf32>
    %358 = arith.addf %354, %357 : vector<2x256xf32>
    %c58 = arith.constant 58 : index
    %359 = memref.load %arg3[%c58] : memref<144xf32, #tpu.memory_space<smem>>
    %360 = vector.broadcast %359 : f32 to vector<2x256xf32>
    %361 = arith.mulf %360, %77 : vector<2x256xf32>
    %362 = arith.addf %358, %361 : vector<2x256xf32>
    %c59 = arith.constant 59 : index
    %363 = memref.load %arg3[%c59] : memref<144xf32, #tpu.memory_space<smem>>
    %364 = vector.broadcast %363 : f32 to vector<2x256xf32>
    %365 = arith.mulf %364, %81 : vector<2x256xf32>
    %366 = arith.addf %362, %365 : vector<2x256xf32>
    %c60 = arith.constant 60 : index
    %367 = memref.load %arg3[%c60] : memref<144xf32, #tpu.memory_space<smem>>
    %368 = vector.broadcast %367 : f32 to vector<2x256xf32>
    %369 = arith.mulf %368, %85 : vector<2x256xf32>
    %370 = arith.addf %366, %369 : vector<2x256xf32>
    %c61 = arith.constant 61 : index
    %371 = memref.load %arg3[%c61] : memref<144xf32, #tpu.memory_space<smem>>
    %372 = vector.broadcast %371 : f32 to vector<2x256xf32>
    %373 = arith.mulf %372, %87 : vector<2x256xf32>
    %374 = arith.addf %370, %373 : vector<2x256xf32>
    %c62 = arith.constant 62 : index
    %375 = memref.load %arg3[%c62] : memref<144xf32, #tpu.memory_space<smem>>
    %376 = vector.broadcast %375 : f32 to vector<2x256xf32>
    %377 = arith.mulf %376, %91 : vector<2x256xf32>
    %378 = arith.addf %374, %377 : vector<2x256xf32>
    %c63 = arith.constant 63 : index
    %379 = memref.load %arg3[%c63] : memref<144xf32, #tpu.memory_space<smem>>
    %380 = vector.broadcast %379 : f32 to vector<2x256xf32>
    %381 = arith.mulf %380, %95 : vector<2x256xf32>
    %382 = arith.addf %378, %381 : vector<2x256xf32>
    %c64 = arith.constant 64 : index
    %383 = memref.load %arg3[%c64] : memref<144xf32, #tpu.memory_space<smem>>
    %384 = vector.broadcast %383 : f32 to vector<2x256xf32>
    %385 = arith.mulf %384, %97 : vector<2x256xf32>
    %386 = arith.addf %382, %385 : vector<2x256xf32>
    %c65 = arith.constant 65 : index
    %387 = memref.load %arg3[%c65] : memref<144xf32, #tpu.memory_space<smem>>
    %388 = vector.broadcast %387 : f32 to vector<2x256xf32>
    %389 = arith.mulf %388, %101 : vector<2x256xf32>
    %390 = arith.addf %386, %389 : vector<2x256xf32>
    %c66 = arith.constant 66 : index
    %391 = memref.load %arg3[%c66] : memref<144xf32, #tpu.memory_space<smem>>
    %392 = vector.broadcast %391 : f32 to vector<2x256xf32>
    %393 = arith.mulf %392, %105 : vector<2x256xf32>
    %394 = arith.addf %390, %393 : vector<2x256xf32>
    %c67 = arith.constant 67 : index
    %395 = memref.load %arg3[%c67] : memref<144xf32, #tpu.memory_space<smem>>
    %396 = vector.broadcast %395 : f32 to vector<2x256xf32>
    %397 = arith.mulf %396, %107 : vector<2x256xf32>
    %398 = arith.addf %394, %397 : vector<2x256xf32>
    %c68 = arith.constant 68 : index
    %399 = memref.load %arg3[%c68] : memref<144xf32, #tpu.memory_space<smem>>
    %400 = vector.broadcast %399 : f32 to vector<2x256xf32>
    %401 = arith.mulf %400, %111 : vector<2x256xf32>
    %402 = arith.addf %398, %401 : vector<2x256xf32>
    %c69 = arith.constant 69 : index
    %403 = memref.load %arg3[%c69] : memref<144xf32, #tpu.memory_space<smem>>
    %404 = vector.broadcast %403 : f32 to vector<2x256xf32>
    %405 = arith.mulf %404, %115 : vector<2x256xf32>
    %406 = arith.addf %402, %405 : vector<2x256xf32>
    %c70 = arith.constant 70 : index
    %407 = memref.load %arg3[%c70] : memref<144xf32, #tpu.memory_space<smem>>
    %408 = vector.broadcast %407 : f32 to vector<2x256xf32>
    %409 = arith.mulf %408, %117 : vector<2x256xf32>
    %410 = arith.addf %406, %409 : vector<2x256xf32>
    %c71 = arith.constant 71 : index
    %411 = memref.load %arg3[%c71] : memref<144xf32, #tpu.memory_space<smem>>
    %412 = vector.broadcast %411 : f32 to vector<2x256xf32>
    %413 = arith.mulf %412, %121 : vector<2x256xf32>
    %414 = arith.addf %410, %413 : vector<2x256xf32>
    %c1_105 = arith.constant 1 : index
    %415 = memref.load %arg4[%c1_105] : memref<4xf32, #tpu.memory_space<smem>>
    %416 = vector.broadcast %415 : f32 to vector<2x256xf32>
    %417 = arith.addf %414, %416 : vector<2x256xf32>
    %cst_106 = arith.constant 0.000000e+00 : f32
    %418 = vector.broadcast %cst_106 : f32 to vector<2x256xf32>
    %c72 = arith.constant 72 : index
    %419 = memref.load %arg3[%c72] : memref<144xf32, #tpu.memory_space<smem>>
    %420 = vector.broadcast %419 : f32 to vector<2x256xf32>
    %421 = arith.mulf %420, %5 : vector<2x256xf32>
    %422 = arith.addf %418, %421 : vector<2x256xf32>
    %c73 = arith.constant 73 : index
    %423 = memref.load %arg3[%c73] : memref<144xf32, #tpu.memory_space<smem>>
    %424 = vector.broadcast %423 : f32 to vector<2x256xf32>
    %425 = arith.mulf %424, %7 : vector<2x256xf32>
    %426 = arith.addf %422, %425 : vector<2x256xf32>
    %c74 = arith.constant 74 : index
    %427 = memref.load %arg3[%c74] : memref<144xf32, #tpu.memory_space<smem>>
    %428 = vector.broadcast %427 : f32 to vector<2x256xf32>
    %429 = arith.mulf %428, %11 : vector<2x256xf32>
    %430 = arith.addf %426, %429 : vector<2x256xf32>
    %c75 = arith.constant 75 : index
    %431 = memref.load %arg3[%c75] : memref<144xf32, #tpu.memory_space<smem>>
    %432 = vector.broadcast %431 : f32 to vector<2x256xf32>
    %433 = arith.mulf %432, %15 : vector<2x256xf32>
    %434 = arith.addf %430, %433 : vector<2x256xf32>
    %c76 = arith.constant 76 : index
    %435 = memref.load %arg3[%c76] : memref<144xf32, #tpu.memory_space<smem>>
    %436 = vector.broadcast %435 : f32 to vector<2x256xf32>
    %437 = arith.mulf %436, %17 : vector<2x256xf32>
    %438 = arith.addf %434, %437 : vector<2x256xf32>
    %c77 = arith.constant 77 : index
    %439 = memref.load %arg3[%c77] : memref<144xf32, #tpu.memory_space<smem>>
    %440 = vector.broadcast %439 : f32 to vector<2x256xf32>
    %441 = arith.mulf %440, %21 : vector<2x256xf32>
    %442 = arith.addf %438, %441 : vector<2x256xf32>
    %c78 = arith.constant 78 : index
    %443 = memref.load %arg3[%c78] : memref<144xf32, #tpu.memory_space<smem>>
    %444 = vector.broadcast %443 : f32 to vector<2x256xf32>
    %445 = arith.mulf %444, %25 : vector<2x256xf32>
    %446 = arith.addf %442, %445 : vector<2x256xf32>
    %c79 = arith.constant 79 : index
    %447 = memref.load %arg3[%c79] : memref<144xf32, #tpu.memory_space<smem>>
    %448 = vector.broadcast %447 : f32 to vector<2x256xf32>
    %449 = arith.mulf %448, %27 : vector<2x256xf32>
    %450 = arith.addf %446, %449 : vector<2x256xf32>
    %c80 = arith.constant 80 : index
    %451 = memref.load %arg3[%c80] : memref<144xf32, #tpu.memory_space<smem>>
    %452 = vector.broadcast %451 : f32 to vector<2x256xf32>
    %453 = arith.mulf %452, %31 : vector<2x256xf32>
    %454 = arith.addf %450, %453 : vector<2x256xf32>
    %c81 = arith.constant 81 : index
    %455 = memref.load %arg3[%c81] : memref<144xf32, #tpu.memory_space<smem>>
    %456 = vector.broadcast %455 : f32 to vector<2x256xf32>
    %457 = arith.mulf %456, %35 : vector<2x256xf32>
    %458 = arith.addf %454, %457 : vector<2x256xf32>
    %c82 = arith.constant 82 : index
    %459 = memref.load %arg3[%c82] : memref<144xf32, #tpu.memory_space<smem>>
    %460 = vector.broadcast %459 : f32 to vector<2x256xf32>
    %461 = arith.mulf %460, %37 : vector<2x256xf32>
    %462 = arith.addf %458, %461 : vector<2x256xf32>
    %c83 = arith.constant 83 : index
    %463 = memref.load %arg3[%c83] : memref<144xf32, #tpu.memory_space<smem>>
    %464 = vector.broadcast %463 : f32 to vector<2x256xf32>
    %465 = arith.mulf %464, %41 : vector<2x256xf32>
    %466 = arith.addf %462, %465 : vector<2x256xf32>
    %c84 = arith.constant 84 : index
    %467 = memref.load %arg3[%c84] : memref<144xf32, #tpu.memory_space<smem>>
    %468 = vector.broadcast %467 : f32 to vector<2x256xf32>
    %469 = arith.mulf %468, %45 : vector<2x256xf32>
    %470 = arith.addf %466, %469 : vector<2x256xf32>
    %c85 = arith.constant 85 : index
    %471 = memref.load %arg3[%c85] : memref<144xf32, #tpu.memory_space<smem>>
    %472 = vector.broadcast %471 : f32 to vector<2x256xf32>
    %473 = arith.mulf %472, %47 : vector<2x256xf32>
    %474 = arith.addf %470, %473 : vector<2x256xf32>
    %c86 = arith.constant 86 : index
    %475 = memref.load %arg3[%c86] : memref<144xf32, #tpu.memory_space<smem>>
    %476 = vector.broadcast %475 : f32 to vector<2x256xf32>
    %477 = arith.mulf %476, %51 : vector<2x256xf32>
    %478 = arith.addf %474, %477 : vector<2x256xf32>
    %c87 = arith.constant 87 : index
    %479 = memref.load %arg3[%c87] : memref<144xf32, #tpu.memory_space<smem>>
    %480 = vector.broadcast %479 : f32 to vector<2x256xf32>
    %481 = arith.mulf %480, %55 : vector<2x256xf32>
    %482 = arith.addf %478, %481 : vector<2x256xf32>
    %c88 = arith.constant 88 : index
    %483 = memref.load %arg3[%c88] : memref<144xf32, #tpu.memory_space<smem>>
    %484 = vector.broadcast %483 : f32 to vector<2x256xf32>
    %485 = arith.mulf %484, %57 : vector<2x256xf32>
    %486 = arith.addf %482, %485 : vector<2x256xf32>
    %c89 = arith.constant 89 : index
    %487 = memref.load %arg3[%c89] : memref<144xf32, #tpu.memory_space<smem>>
    %488 = vector.broadcast %487 : f32 to vector<2x256xf32>
    %489 = arith.mulf %488, %61 : vector<2x256xf32>
    %490 = arith.addf %486, %489 : vector<2x256xf32>
    %c90 = arith.constant 90 : index
    %491 = memref.load %arg3[%c90] : memref<144xf32, #tpu.memory_space<smem>>
    %492 = vector.broadcast %491 : f32 to vector<2x256xf32>
    %493 = arith.mulf %492, %65 : vector<2x256xf32>
    %494 = arith.addf %490, %493 : vector<2x256xf32>
    %c91 = arith.constant 91 : index
    %495 = memref.load %arg3[%c91] : memref<144xf32, #tpu.memory_space<smem>>
    %496 = vector.broadcast %495 : f32 to vector<2x256xf32>
    %497 = arith.mulf %496, %67 : vector<2x256xf32>
    %498 = arith.addf %494, %497 : vector<2x256xf32>
    %c92 = arith.constant 92 : index
    %499 = memref.load %arg3[%c92] : memref<144xf32, #tpu.memory_space<smem>>
    %500 = vector.broadcast %499 : f32 to vector<2x256xf32>
    %501 = arith.mulf %500, %71 : vector<2x256xf32>
    %502 = arith.addf %498, %501 : vector<2x256xf32>
    %c93 = arith.constant 93 : index
    %503 = memref.load %arg3[%c93] : memref<144xf32, #tpu.memory_space<smem>>
    %504 = vector.broadcast %503 : f32 to vector<2x256xf32>
    %505 = arith.mulf %504, %75 : vector<2x256xf32>
    %506 = arith.addf %502, %505 : vector<2x256xf32>
    %c94 = arith.constant 94 : index
    %507 = memref.load %arg3[%c94] : memref<144xf32, #tpu.memory_space<smem>>
    %508 = vector.broadcast %507 : f32 to vector<2x256xf32>
    %509 = arith.mulf %508, %77 : vector<2x256xf32>
    %510 = arith.addf %506, %509 : vector<2x256xf32>
    %c95 = arith.constant 95 : index
    %511 = memref.load %arg3[%c95] : memref<144xf32, #tpu.memory_space<smem>>
    %512 = vector.broadcast %511 : f32 to vector<2x256xf32>
    %513 = arith.mulf %512, %81 : vector<2x256xf32>
    %514 = arith.addf %510, %513 : vector<2x256xf32>
    %c96 = arith.constant 96 : index
    %515 = memref.load %arg3[%c96] : memref<144xf32, #tpu.memory_space<smem>>
    %516 = vector.broadcast %515 : f32 to vector<2x256xf32>
    %517 = arith.mulf %516, %85 : vector<2x256xf32>
    %518 = arith.addf %514, %517 : vector<2x256xf32>
    %c97 = arith.constant 97 : index
    %519 = memref.load %arg3[%c97] : memref<144xf32, #tpu.memory_space<smem>>
    %520 = vector.broadcast %519 : f32 to vector<2x256xf32>
    %521 = arith.mulf %520, %87 : vector<2x256xf32>
    %522 = arith.addf %518, %521 : vector<2x256xf32>
    %c98 = arith.constant 98 : index
    %523 = memref.load %arg3[%c98] : memref<144xf32, #tpu.memory_space<smem>>
    %524 = vector.broadcast %523 : f32 to vector<2x256xf32>
    %525 = arith.mulf %524, %91 : vector<2x256xf32>
    %526 = arith.addf %522, %525 : vector<2x256xf32>
    %c99 = arith.constant 99 : index
    %527 = memref.load %arg3[%c99] : memref<144xf32, #tpu.memory_space<smem>>
    %528 = vector.broadcast %527 : f32 to vector<2x256xf32>
    %529 = arith.mulf %528, %95 : vector<2x256xf32>
    %530 = arith.addf %526, %529 : vector<2x256xf32>
    %c100 = arith.constant 100 : index
    %531 = memref.load %arg3[%c100] : memref<144xf32, #tpu.memory_space<smem>>
    %532 = vector.broadcast %531 : f32 to vector<2x256xf32>
    %533 = arith.mulf %532, %97 : vector<2x256xf32>
    %534 = arith.addf %530, %533 : vector<2x256xf32>
    %c101 = arith.constant 101 : index
    %535 = memref.load %arg3[%c101] : memref<144xf32, #tpu.memory_space<smem>>
    %536 = vector.broadcast %535 : f32 to vector<2x256xf32>
    %537 = arith.mulf %536, %101 : vector<2x256xf32>
    %538 = arith.addf %534, %537 : vector<2x256xf32>
    %c102 = arith.constant 102 : index
    %539 = memref.load %arg3[%c102] : memref<144xf32, #tpu.memory_space<smem>>
    %540 = vector.broadcast %539 : f32 to vector<2x256xf32>
    %541 = arith.mulf %540, %105 : vector<2x256xf32>
    %542 = arith.addf %538, %541 : vector<2x256xf32>
    %c103 = arith.constant 103 : index
    %543 = memref.load %arg3[%c103] : memref<144xf32, #tpu.memory_space<smem>>
    %544 = vector.broadcast %543 : f32 to vector<2x256xf32>
    %545 = arith.mulf %544, %107 : vector<2x256xf32>
    %546 = arith.addf %542, %545 : vector<2x256xf32>
    %c104 = arith.constant 104 : index
    %547 = memref.load %arg3[%c104] : memref<144xf32, #tpu.memory_space<smem>>
    %548 = vector.broadcast %547 : f32 to vector<2x256xf32>
    %549 = arith.mulf %548, %111 : vector<2x256xf32>
    %550 = arith.addf %546, %549 : vector<2x256xf32>
    %c105 = arith.constant 105 : index
    %551 = memref.load %arg3[%c105] : memref<144xf32, #tpu.memory_space<smem>>
    %552 = vector.broadcast %551 : f32 to vector<2x256xf32>
    %553 = arith.mulf %552, %115 : vector<2x256xf32>
    %554 = arith.addf %550, %553 : vector<2x256xf32>
    %c106 = arith.constant 106 : index
    %555 = memref.load %arg3[%c106] : memref<144xf32, #tpu.memory_space<smem>>
    %556 = vector.broadcast %555 : f32 to vector<2x256xf32>
    %557 = arith.mulf %556, %117 : vector<2x256xf32>
    %558 = arith.addf %554, %557 : vector<2x256xf32>
    %c107 = arith.constant 107 : index
    %559 = memref.load %arg3[%c107] : memref<144xf32, #tpu.memory_space<smem>>
    %560 = vector.broadcast %559 : f32 to vector<2x256xf32>
    %561 = arith.mulf %560, %121 : vector<2x256xf32>
    %562 = arith.addf %558, %561 : vector<2x256xf32>
    %c2_107 = arith.constant 2 : index
    %563 = memref.load %arg4[%c2_107] : memref<4xf32, #tpu.memory_space<smem>>
    %564 = vector.broadcast %563 : f32 to vector<2x256xf32>
    %565 = arith.addf %562, %564 : vector<2x256xf32>
    %cst_108 = arith.constant 0.000000e+00 : f32
    %566 = vector.broadcast %cst_108 : f32 to vector<2x256xf32>
    %c108 = arith.constant 108 : index
    %567 = memref.load %arg3[%c108] : memref<144xf32, #tpu.memory_space<smem>>
    %568 = vector.broadcast %567 : f32 to vector<2x256xf32>
    %569 = arith.mulf %568, %5 : vector<2x256xf32>
    %570 = arith.addf %566, %569 : vector<2x256xf32>
    %c109 = arith.constant 109 : index
    %571 = memref.load %arg3[%c109] : memref<144xf32, #tpu.memory_space<smem>>
    %572 = vector.broadcast %571 : f32 to vector<2x256xf32>
    %573 = arith.mulf %572, %7 : vector<2x256xf32>
    %574 = arith.addf %570, %573 : vector<2x256xf32>
    %c110 = arith.constant 110 : index
    %575 = memref.load %arg3[%c110] : memref<144xf32, #tpu.memory_space<smem>>
    %576 = vector.broadcast %575 : f32 to vector<2x256xf32>
    %577 = arith.mulf %576, %11 : vector<2x256xf32>
    %578 = arith.addf %574, %577 : vector<2x256xf32>
    %c111_109 = arith.constant 111 : index
    %579 = memref.load %arg3[%c111_109] : memref<144xf32, #tpu.memory_space<smem>>
    %580 = vector.broadcast %579 : f32 to vector<2x256xf32>
    %581 = arith.mulf %580, %15 : vector<2x256xf32>
    %582 = arith.addf %578, %581 : vector<2x256xf32>
    %c112_110 = arith.constant 112 : index
    %583 = memref.load %arg3[%c112_110] : memref<144xf32, #tpu.memory_space<smem>>
    %584 = vector.broadcast %583 : f32 to vector<2x256xf32>
    %585 = arith.mulf %584, %17 : vector<2x256xf32>
    %586 = arith.addf %582, %585 : vector<2x256xf32>
    %c113_111 = arith.constant 113 : index
    %587 = memref.load %arg3[%c113_111] : memref<144xf32, #tpu.memory_space<smem>>
    %588 = vector.broadcast %587 : f32 to vector<2x256xf32>
    %589 = arith.mulf %588, %21 : vector<2x256xf32>
    %590 = arith.addf %586, %589 : vector<2x256xf32>
    %c114 = arith.constant 114 : index
    %591 = memref.load %arg3[%c114] : memref<144xf32, #tpu.memory_space<smem>>
    %592 = vector.broadcast %591 : f32 to vector<2x256xf32>
    %593 = arith.mulf %592, %25 : vector<2x256xf32>
    %594 = arith.addf %590, %593 : vector<2x256xf32>
    %c115 = arith.constant 115 : index
    %595 = memref.load %arg3[%c115] : memref<144xf32, #tpu.memory_space<smem>>
    %596 = vector.broadcast %595 : f32 to vector<2x256xf32>
    %597 = arith.mulf %596, %27 : vector<2x256xf32>
    %598 = arith.addf %594, %597 : vector<2x256xf32>
    %c116 = arith.constant 116 : index
    %599 = memref.load %arg3[%c116] : memref<144xf32, #tpu.memory_space<smem>>
    %600 = vector.broadcast %599 : f32 to vector<2x256xf32>
    %601 = arith.mulf %600, %31 : vector<2x256xf32>
    %602 = arith.addf %598, %601 : vector<2x256xf32>
    %c117 = arith.constant 117 : index
    %603 = memref.load %arg3[%c117] : memref<144xf32, #tpu.memory_space<smem>>
    %604 = vector.broadcast %603 : f32 to vector<2x256xf32>
    %605 = arith.mulf %604, %35 : vector<2x256xf32>
    %606 = arith.addf %602, %605 : vector<2x256xf32>
    %c118 = arith.constant 118 : index
    %607 = memref.load %arg3[%c118] : memref<144xf32, #tpu.memory_space<smem>>
    %608 = vector.broadcast %607 : f32 to vector<2x256xf32>
    %609 = arith.mulf %608, %37 : vector<2x256xf32>
    %610 = arith.addf %606, %609 : vector<2x256xf32>
    %c119 = arith.constant 119 : index
    %611 = memref.load %arg3[%c119] : memref<144xf32, #tpu.memory_space<smem>>
    %612 = vector.broadcast %611 : f32 to vector<2x256xf32>
    %613 = arith.mulf %612, %41 : vector<2x256xf32>
    %614 = arith.addf %610, %613 : vector<2x256xf32>
    %c120 = arith.constant 120 : index
    %615 = memref.load %arg3[%c120] : memref<144xf32, #tpu.memory_space<smem>>
    %616 = vector.broadcast %615 : f32 to vector<2x256xf32>
    %617 = arith.mulf %616, %45 : vector<2x256xf32>
    %618 = arith.addf %614, %617 : vector<2x256xf32>
    %c121 = arith.constant 121 : index
    %619 = memref.load %arg3[%c121] : memref<144xf32, #tpu.memory_space<smem>>
    %620 = vector.broadcast %619 : f32 to vector<2x256xf32>
    %621 = arith.mulf %620, %47 : vector<2x256xf32>
    %622 = arith.addf %618, %621 : vector<2x256xf32>
    %c122 = arith.constant 122 : index
    %623 = memref.load %arg3[%c122] : memref<144xf32, #tpu.memory_space<smem>>
    %624 = vector.broadcast %623 : f32 to vector<2x256xf32>
    %625 = arith.mulf %624, %51 : vector<2x256xf32>
    %626 = arith.addf %622, %625 : vector<2x256xf32>
    %c123 = arith.constant 123 : index
    %627 = memref.load %arg3[%c123] : memref<144xf32, #tpu.memory_space<smem>>
    %628 = vector.broadcast %627 : f32 to vector<2x256xf32>
    %629 = arith.mulf %628, %55 : vector<2x256xf32>
    %630 = arith.addf %626, %629 : vector<2x256xf32>
    %c124 = arith.constant 124 : index
    %631 = memref.load %arg3[%c124] : memref<144xf32, #tpu.memory_space<smem>>
    %632 = vector.broadcast %631 : f32 to vector<2x256xf32>
    %633 = arith.mulf %632, %57 : vector<2x256xf32>
    %634 = arith.addf %630, %633 : vector<2x256xf32>
    %c125 = arith.constant 125 : index
    %635 = memref.load %arg3[%c125] : memref<144xf32, #tpu.memory_space<smem>>
    %636 = vector.broadcast %635 : f32 to vector<2x256xf32>
    %637 = arith.mulf %636, %61 : vector<2x256xf32>
    %638 = arith.addf %634, %637 : vector<2x256xf32>
    %c126 = arith.constant 126 : index
    %639 = memref.load %arg3[%c126] : memref<144xf32, #tpu.memory_space<smem>>
    %640 = vector.broadcast %639 : f32 to vector<2x256xf32>
    %641 = arith.mulf %640, %65 : vector<2x256xf32>
    %642 = arith.addf %638, %641 : vector<2x256xf32>
    %c127_112 = arith.constant 127 : index
    %643 = memref.load %arg3[%c127_112] : memref<144xf32, #tpu.memory_space<smem>>
    %644 = vector.broadcast %643 : f32 to vector<2x256xf32>
    %645 = arith.mulf %644, %67 : vector<2x256xf32>
    %646 = arith.addf %642, %645 : vector<2x256xf32>
    %c128_113 = arith.constant 128 : index
    %647 = memref.load %arg3[%c128_113] : memref<144xf32, #tpu.memory_space<smem>>
    %648 = vector.broadcast %647 : f32 to vector<2x256xf32>
    %649 = arith.mulf %648, %71 : vector<2x256xf32>
    %650 = arith.addf %646, %649 : vector<2x256xf32>
    %c129_114 = arith.constant 129 : index
    %651 = memref.load %arg3[%c129_114] : memref<144xf32, #tpu.memory_space<smem>>
    %652 = vector.broadcast %651 : f32 to vector<2x256xf32>
    %653 = arith.mulf %652, %75 : vector<2x256xf32>
    %654 = arith.addf %650, %653 : vector<2x256xf32>
    %c130 = arith.constant 130 : index
    %655 = memref.load %arg3[%c130] : memref<144xf32, #tpu.memory_space<smem>>
    %656 = vector.broadcast %655 : f32 to vector<2x256xf32>
    %657 = arith.mulf %656, %77 : vector<2x256xf32>
    %658 = arith.addf %654, %657 : vector<2x256xf32>
    %c131 = arith.constant 131 : index
    %659 = memref.load %arg3[%c131] : memref<144xf32, #tpu.memory_space<smem>>
    %660 = vector.broadcast %659 : f32 to vector<2x256xf32>
    %661 = arith.mulf %660, %81 : vector<2x256xf32>
    %662 = arith.addf %658, %661 : vector<2x256xf32>
    %c132 = arith.constant 132 : index
    %663 = memref.load %arg3[%c132] : memref<144xf32, #tpu.memory_space<smem>>
    %664 = vector.broadcast %663 : f32 to vector<2x256xf32>
    %665 = arith.mulf %664, %85 : vector<2x256xf32>
    %666 = arith.addf %662, %665 : vector<2x256xf32>
    %c133 = arith.constant 133 : index
    %667 = memref.load %arg3[%c133] : memref<144xf32, #tpu.memory_space<smem>>
    %668 = vector.broadcast %667 : f32 to vector<2x256xf32>
    %669 = arith.mulf %668, %87 : vector<2x256xf32>
    %670 = arith.addf %666, %669 : vector<2x256xf32>
    %c134 = arith.constant 134 : index
    %671 = memref.load %arg3[%c134] : memref<144xf32, #tpu.memory_space<smem>>
    %672 = vector.broadcast %671 : f32 to vector<2x256xf32>
    %673 = arith.mulf %672, %91 : vector<2x256xf32>
    %674 = arith.addf %670, %673 : vector<2x256xf32>
    %c135 = arith.constant 135 : index
    %675 = memref.load %arg3[%c135] : memref<144xf32, #tpu.memory_space<smem>>
    %676 = vector.broadcast %675 : f32 to vector<2x256xf32>
    %677 = arith.mulf %676, %95 : vector<2x256xf32>
    %678 = arith.addf %674, %677 : vector<2x256xf32>
    %c136 = arith.constant 136 : index
    %679 = memref.load %arg3[%c136] : memref<144xf32, #tpu.memory_space<smem>>
    %680 = vector.broadcast %679 : f32 to vector<2x256xf32>
    %681 = arith.mulf %680, %97 : vector<2x256xf32>
    %682 = arith.addf %678, %681 : vector<2x256xf32>
    %c137 = arith.constant 137 : index
    %683 = memref.load %arg3[%c137] : memref<144xf32, #tpu.memory_space<smem>>
    %684 = vector.broadcast %683 : f32 to vector<2x256xf32>
    %685 = arith.mulf %684, %101 : vector<2x256xf32>
    %686 = arith.addf %682, %685 : vector<2x256xf32>
    %c138 = arith.constant 138 : index
    %687 = memref.load %arg3[%c138] : memref<144xf32, #tpu.memory_space<smem>>
    %688 = vector.broadcast %687 : f32 to vector<2x256xf32>
    %689 = arith.mulf %688, %105 : vector<2x256xf32>
    %690 = arith.addf %686, %689 : vector<2x256xf32>
    %c139 = arith.constant 139 : index
    %691 = memref.load %arg3[%c139] : memref<144xf32, #tpu.memory_space<smem>>
    %692 = vector.broadcast %691 : f32 to vector<2x256xf32>
    %693 = arith.mulf %692, %107 : vector<2x256xf32>
    %694 = arith.addf %690, %693 : vector<2x256xf32>
    %c140 = arith.constant 140 : index
    %695 = memref.load %arg3[%c140] : memref<144xf32, #tpu.memory_space<smem>>
    %696 = vector.broadcast %695 : f32 to vector<2x256xf32>
    %697 = arith.mulf %696, %111 : vector<2x256xf32>
    %698 = arith.addf %694, %697 : vector<2x256xf32>
    %c141 = arith.constant 141 : index
    %699 = memref.load %arg3[%c141] : memref<144xf32, #tpu.memory_space<smem>>
    %700 = vector.broadcast %699 : f32 to vector<2x256xf32>
    %701 = arith.mulf %700, %115 : vector<2x256xf32>
    %702 = arith.addf %698, %701 : vector<2x256xf32>
    %c142 = arith.constant 142 : index
    %703 = memref.load %arg3[%c142] : memref<144xf32, #tpu.memory_space<smem>>
    %704 = vector.broadcast %703 : f32 to vector<2x256xf32>
    %705 = arith.mulf %704, %117 : vector<2x256xf32>
    %706 = arith.addf %702, %705 : vector<2x256xf32>
    %c143_115 = arith.constant 143 : index
    %707 = memref.load %arg3[%c143_115] : memref<144xf32, #tpu.memory_space<smem>>
    %708 = vector.broadcast %707 : f32 to vector<2x256xf32>
    %709 = arith.mulf %708, %121 : vector<2x256xf32>
    %710 = arith.addf %706, %709 : vector<2x256xf32>
    %c3_116 = arith.constant 3 : index
    %711 = memref.load %arg4[%c3_116] : memref<4xf32, #tpu.memory_space<smem>>
    %712 = vector.broadcast %711 : f32 to vector<2x256xf32>
    %713 = arith.addf %710, %712 : vector<2x256xf32>
    %714 = vector.shape_cast %269 : vector<2x256xf32> to vector<1x2x256xf32>
    %cst_117 = arith.constant dense<0.000000e+00> : vector<1xf32>
    %715 = vector.multi_reduction <add>, %714, %cst_117 [1, 2] : vector<1x2x256xf32> to vector<1xf32>
    %716 = vector.shape_cast %715 : vector<1xf32> to vector<1x1x1xf32>
    %717 = vector.extract %716[0, 0, 0] : f32 from vector<1x1x1xf32>
    %718 = vector.broadcast %717 : f32 to vector<1x1xf32>
    %cst_118 = arith.constant 0.001953125 : f32
    %719 = vector.broadcast %cst_118 : f32 to vector<1x1xf32>
    %720 = arith.mulf %718, %719 : vector<1x1xf32>
    %721 = vector.broadcast %720 : vector<1x1xf32> to vector<2x256xf32>
    %722 = arith.subf %269, %721 : vector<2x256xf32>
    %723 = arith.mulf %722, %722 : vector<2x256xf32>
    %724 = vector.shape_cast %723 : vector<2x256xf32> to vector<1x2x256xf32>
    %cst_119 = arith.constant dense<0.000000e+00> : vector<1xf32>
    %725 = vector.multi_reduction <add>, %724, %cst_119 [1, 2] : vector<1x2x256xf32> to vector<1xf32>
    %726 = vector.shape_cast %725 : vector<1xf32> to vector<1x1x1xf32>
    %727 = vector.extract %726[0, 0, 0] : f32 from vector<1x1x1xf32>
    %728 = vector.broadcast %727 : f32 to vector<1x1xf32>
    %cst_120 = arith.constant 0.001953125 : f32
    %729 = vector.broadcast %cst_120 : f32 to vector<1x1xf32>
    %730 = arith.mulf %728, %729 : vector<1x1xf32>
    %731 = vector.broadcast %720 : vector<1x1xf32> to vector<2x256xf32>
    %732 = arith.subf %269, %731 : vector<2x256xf32>
    %cst_121 = arith.constant 9.99999974E-6 : f32
    %733 = vector.broadcast %cst_121 : f32 to vector<1x1xf32>
    %734 = arith.addf %730, %733 : vector<1x1xf32>
    %735 = math.rsqrt %734 : vector<1x1xf32>
    %736 = vector.broadcast %735 : vector<1x1xf32> to vector<2x256xf32>
    %737 = arith.mulf %732, %736 : vector<2x256xf32>
    %c0_122 = arith.constant 0 : index
    %738 = memref.load %arg5[%c0_122] : memref<4xf32, #tpu.memory_space<smem>>
    %739 = vector.broadcast %738 : f32 to vector<2x256xf32>
    %740 = arith.mulf %737, %739 : vector<2x256xf32>
    %c0_123 = arith.constant 0 : index
    %741 = memref.load %arg6[%c0_123] : memref<4xf32, #tpu.memory_space<smem>>
    %742 = vector.broadcast %741 : f32 to vector<2x256xf32>
    %743 = arith.addf %740, %742 : vector<2x256xf32>
    %744 = vector.shape_cast %417 : vector<2x256xf32> to vector<1x2x256xf32>
    %cst_124 = arith.constant dense<0.000000e+00> : vector<1xf32>
    %745 = vector.multi_reduction <add>, %744, %cst_124 [1, 2] : vector<1x2x256xf32> to vector<1xf32>
    %746 = vector.shape_cast %745 : vector<1xf32> to vector<1x1x1xf32>
    %747 = vector.extract %746[0, 0, 0] : f32 from vector<1x1x1xf32>
    %748 = vector.broadcast %747 : f32 to vector<1x1xf32>
    %cst_125 = arith.constant 0.001953125 : f32
    %749 = vector.broadcast %cst_125 : f32 to vector<1x1xf32>
    %750 = arith.mulf %748, %749 : vector<1x1xf32>
    %751 = vector.broadcast %750 : vector<1x1xf32> to vector<2x256xf32>
    %752 = arith.subf %417, %751 : vector<2x256xf32>
    %753 = arith.mulf %752, %752 : vector<2x256xf32>
    %754 = vector.shape_cast %753 : vector<2x256xf32> to vector<1x2x256xf32>
    %cst_126 = arith.constant dense<0.000000e+00> : vector<1xf32>
    %755 = vector.multi_reduction <add>, %754, %cst_126 [1, 2] : vector<1x2x256xf32> to vector<1xf32>
    %756 = vector.shape_cast %755 : vector<1xf32> to vector<1x1x1xf32>
    %757 = vector.extract %756[0, 0, 0] : f32 from vector<1x1x1xf32>
    %758 = vector.broadcast %757 : f32 to vector<1x1xf32>
    %cst_127 = arith.constant 0.001953125 : f32
    %759 = vector.broadcast %cst_127 : f32 to vector<1x1xf32>
    %760 = arith.mulf %758, %759 : vector<1x1xf32>
    %761 = vector.broadcast %750 : vector<1x1xf32> to vector<2x256xf32>
    %762 = arith.subf %417, %761 : vector<2x256xf32>
    %cst_128 = arith.constant 9.99999974E-6 : f32
    %763 = vector.broadcast %cst_128 : f32 to vector<1x1xf32>
    %764 = arith.addf %760, %763 : vector<1x1xf32>
    %765 = math.rsqrt %764 : vector<1x1xf32>
    %766 = vector.broadcast %765 : vector<1x1xf32> to vector<2x256xf32>
    %767 = arith.mulf %762, %766 : vector<2x256xf32>
    %c1_129 = arith.constant 1 : index
    %768 = memref.load %arg5[%c1_129] : memref<4xf32, #tpu.memory_space<smem>>
    %769 = vector.broadcast %768 : f32 to vector<2x256xf32>
    %770 = arith.mulf %767, %769 : vector<2x256xf32>
    %c1_130 = arith.constant 1 : index
    %771 = memref.load %arg6[%c1_130] : memref<4xf32, #tpu.memory_space<smem>>
    %772 = vector.broadcast %771 : f32 to vector<2x256xf32>
    %773 = arith.addf %770, %772 : vector<2x256xf32>
    %774 = vector.shape_cast %565 : vector<2x256xf32> to vector<1x2x256xf32>
    %cst_131 = arith.constant dense<0.000000e+00> : vector<1xf32>
    %775 = vector.multi_reduction <add>, %774, %cst_131 [1, 2] : vector<1x2x256xf32> to vector<1xf32>
    %776 = vector.shape_cast %775 : vector<1xf32> to vector<1x1x1xf32>
    %777 = vector.extract %776[0, 0, 0] : f32 from vector<1x1x1xf32>
    %778 = vector.broadcast %777 : f32 to vector<1x1xf32>
    %cst_132 = arith.constant 0.001953125 : f32
    %779 = vector.broadcast %cst_132 : f32 to vector<1x1xf32>
    %780 = arith.mulf %778, %779 : vector<1x1xf32>
    %781 = vector.broadcast %780 : vector<1x1xf32> to vector<2x256xf32>
    %782 = arith.subf %565, %781 : vector<2x256xf32>
    %783 = arith.mulf %782, %782 : vector<2x256xf32>
    %784 = vector.shape_cast %783 : vector<2x256xf32> to vector<1x2x256xf32>
    %cst_133 = arith.constant dense<0.000000e+00> : vector<1xf32>
    %785 = vector.multi_reduction <add>, %784, %cst_133 [1, 2] : vector<1x2x256xf32> to vector<1xf32>
    %786 = vector.shape_cast %785 : vector<1xf32> to vector<1x1x1xf32>
    %787 = vector.extract %786[0, 0, 0] : f32 from vector<1x1x1xf32>
    %788 = vector.broadcast %787 : f32 to vector<1x1xf32>
    %cst_134 = arith.constant 0.001953125 : f32
    %789 = vector.broadcast %cst_134 : f32 to vector<1x1xf32>
    %790 = arith.mulf %788, %789 : vector<1x1xf32>
    %791 = vector.broadcast %780 : vector<1x1xf32> to vector<2x256xf32>
    %792 = arith.subf %565, %791 : vector<2x256xf32>
    %cst_135 = arith.constant 9.99999974E-6 : f32
    %793 = vector.broadcast %cst_135 : f32 to vector<1x1xf32>
    %794 = arith.addf %790, %793 : vector<1x1xf32>
    %795 = math.rsqrt %794 : vector<1x1xf32>
    %796 = vector.broadcast %795 : vector<1x1xf32> to vector<2x256xf32>
    %797 = arith.mulf %792, %796 : vector<2x256xf32>
    %c2_136 = arith.constant 2 : index
    %798 = memref.load %arg5[%c2_136] : memref<4xf32, #tpu.memory_space<smem>>
    %799 = vector.broadcast %798 : f32 to vector<2x256xf32>
    %800 = arith.mulf %797, %799 : vector<2x256xf32>
    %c2_137 = arith.constant 2 : index
    %801 = memref.load %arg6[%c2_137] : memref<4xf32, #tpu.memory_space<smem>>
    %802 = vector.broadcast %801 : f32 to vector<2x256xf32>
    %803 = arith.addf %800, %802 : vector<2x256xf32>
    %804 = vector.shape_cast %713 : vector<2x256xf32> to vector<1x2x256xf32>
    %cst_138 = arith.constant dense<0.000000e+00> : vector<1xf32>
    %805 = vector.multi_reduction <add>, %804, %cst_138 [1, 2] : vector<1x2x256xf32> to vector<1xf32>
    %806 = vector.shape_cast %805 : vector<1xf32> to vector<1x1x1xf32>
    %807 = vector.extract %806[0, 0, 0] : f32 from vector<1x1x1xf32>
    %808 = vector.broadcast %807 : f32 to vector<1x1xf32>
    %cst_139 = arith.constant 0.001953125 : f32
    %809 = vector.broadcast %cst_139 : f32 to vector<1x1xf32>
    %810 = arith.mulf %808, %809 : vector<1x1xf32>
    %811 = vector.broadcast %810 : vector<1x1xf32> to vector<2x256xf32>
    %812 = arith.subf %713, %811 : vector<2x256xf32>
    %813 = arith.mulf %812, %812 : vector<2x256xf32>
    %814 = vector.shape_cast %813 : vector<2x256xf32> to vector<1x2x256xf32>
    %cst_140 = arith.constant dense<0.000000e+00> : vector<1xf32>
    %815 = vector.multi_reduction <add>, %814, %cst_140 [1, 2] : vector<1x2x256xf32> to vector<1xf32>
    %816 = vector.shape_cast %815 : vector<1xf32> to vector<1x1x1xf32>
    %817 = vector.extract %816[0, 0, 0] : f32 from vector<1x1x1xf32>
    %818 = vector.broadcast %817 : f32 to vector<1x1xf32>
    %cst_141 = arith.constant 0.001953125 : f32
    %819 = vector.broadcast %cst_141 : f32 to vector<1x1xf32>
    %820 = arith.mulf %818, %819 : vector<1x1xf32>
    %821 = vector.broadcast %810 : vector<1x1xf32> to vector<2x256xf32>
    %822 = arith.subf %713, %821 : vector<2x256xf32>
    %cst_142 = arith.constant 9.99999974E-6 : f32
    %823 = vector.broadcast %cst_142 : f32 to vector<1x1xf32>
    %824 = arith.addf %820, %823 : vector<1x1xf32>
    %825 = math.rsqrt %824 : vector<1x1xf32>
    %826 = vector.broadcast %825 : vector<1x1xf32> to vector<2x256xf32>
    %827 = arith.mulf %822, %826 : vector<2x256xf32>
    %c3_143 = arith.constant 3 : index
    %828 = memref.load %arg5[%c3_143] : memref<4xf32, #tpu.memory_space<smem>>
    %829 = vector.broadcast %828 : f32 to vector<2x256xf32>
    %830 = arith.mulf %827, %829 : vector<2x256xf32>
    %c3_144 = arith.constant 3 : index
    %831 = memref.load %arg6[%c3_144] : memref<4xf32, #tpu.memory_space<smem>>
    %832 = vector.broadcast %831 : f32 to vector<2x256xf32>
    %833 = arith.addf %830, %832 : vector<2x256xf32>
    %c0_145 = arith.constant 0 : index
    %834 = memref.load %arg7[%c0_145] : memref<1xf32, #tpu.memory_space<smem>>
    %cst_146 = arith.constant 0.000000e+00 : f32
    %835 = vector.broadcast %cst_146 : f32 to vector<2x256xf32>
    %836 = arith.cmpf oge, %743, %835 : vector<2x256xf32>
    %837 = vector.broadcast %834 : f32 to vector<2x256xf32>
    %838 = arith.mulf %837, %743 : vector<2x256xf32>
    %839 = arith.select %836, %743, %838 : vector<2x256xi1>, vector<2x256xf32>
    %cst_147 = arith.constant 0.000000e+00 : f32
    %840 = vector.broadcast %cst_147 : f32 to vector<2x256xf32>
    %841 = arith.cmpf oge, %773, %840 : vector<2x256xf32>
    %842 = vector.broadcast %834 : f32 to vector<2x256xf32>
    %843 = arith.mulf %842, %773 : vector<2x256xf32>
    %844 = arith.select %841, %773, %843 : vector<2x256xi1>, vector<2x256xf32>
    %cst_148 = arith.constant 0.000000e+00 : f32
    %845 = vector.broadcast %cst_148 : f32 to vector<2x256xf32>
    %846 = arith.cmpf oge, %803, %845 : vector<2x256xf32>
    %847 = vector.broadcast %834 : f32 to vector<2x256xf32>
    %848 = arith.mulf %847, %803 : vector<2x256xf32>
    %849 = arith.select %846, %803, %848 : vector<2x256xi1>, vector<2x256xf32>
    %cst_149 = arith.constant 0.000000e+00 : f32
    %850 = vector.broadcast %cst_149 : f32 to vector<2x256xf32>
    %851 = arith.cmpf oge, %833, %850 : vector<2x256xf32>
    %852 = vector.broadcast %834 : f32 to vector<2x256xf32>
    %853 = arith.mulf %852, %833 : vector<2x256xf32>
    %854 = arith.select %851, %833, %853 : vector<2x256xi1>, vector<2x256xf32>
    %cst_150 = arith.constant 0.000000e+00 : f32
    %855 = vector.broadcast %cst_150 : f32 to vector<4x2x512xf32>
    %c0_151 = arith.constant 0 : index
    %c0_152 = arith.constant 0 : index
    %c0_153 = arith.constant 0 : index
    %856 = vector.load %arg13[%c0_151, %c0_152, %c0_153] : memref<4x2x512xf32, #tpu.memory_space<vmem>>, vector<4x2x512xf32>
    tpu.vector_store %arg13[%c0_151, %c0_152, %c0_153], %855 {strides = array<i32>} : memref<4x2x512xf32, #tpu.memory_space<vmem>>, vector<4x2x512xf32>,
    %c0_154 = arith.constant 0 : index
    %c0_155 = arith.constant 0 : index
    %c128_156 = arith.constant 128 : index
    %857 = vector.load %arg13[%c0_154, %c0_155, %c128_156] : memref<4x2x512xf32, #tpu.memory_space<vmem>>, vector<1x2x256xf32>
    %858 = vector.shape_cast %857 : vector<1x2x256xf32> to vector<2x256xf32>
    %859 = vector.shape_cast %839 : vector<2x256xf32> to vector<1x2x256xf32>
    tpu.vector_store %arg13[%c0_154, %c0_155, %c128_156], %859 {strides = array<i32>} : memref<4x2x512xf32, #tpu.memory_space<vmem>>, vector<1x2x256xf32>,
    %c1_157 = arith.constant 1 : index
    %c0_158 = arith.constant 0 : index
    %c128_159 = arith.constant 128 : index
    %860 = vector.load %arg13[%c1_157, %c0_158, %c128_159] : memref<4x2x512xf32, #tpu.memory_space<vmem>>, vector<1x2x256xf32>
    %861 = vector.shape_cast %860 : vector<1x2x256xf32> to vector<2x256xf32>
    %862 = vector.shape_cast %844 : vector<2x256xf32> to vector<1x2x256xf32>
    tpu.vector_store %arg13[%c1_157, %c0_158, %c128_159], %862 {strides = array<i32>} : memref<4x2x512xf32, #tpu.memory_space<vmem>>, vector<1x2x256xf32>,
    %c2_160 = arith.constant 2 : index
    %c0_161 = arith.constant 0 : index
    %c128_162 = arith.constant 128 : index
    %863 = vector.load %arg13[%c2_160, %c0_161, %c128_162] : memref<4x2x512xf32, #tpu.memory_space<vmem>>, vector<1x2x256xf32>
    %864 = vector.shape_cast %863 : vector<1x2x256xf32> to vector<2x256xf32>
    %865 = vector.shape_cast %849 : vector<2x256xf32> to vector<1x2x256xf32>
    tpu.vector_store %arg13[%c2_160, %c0_161, %c128_162], %865 {strides = array<i32>} : memref<4x2x512xf32, #tpu.memory_space<vmem>>, vector<1x2x256xf32>,
    %c3_163 = arith.constant 3 : index
    %c0_164 = arith.constant 0 : index
    %c128_165 = arith.constant 128 : index
    %866 = vector.load %arg13[%c3_163, %c0_164, %c128_165] : memref<4x2x512xf32, #tpu.memory_space<vmem>>, vector<1x2x256xf32>
    %867 = vector.shape_cast %866 : vector<1x2x256xf32> to vector<2x256xf32>
    %868 = vector.shape_cast %854 : vector<2x256xf32> to vector<1x2x256xf32>
    tpu.vector_store %arg13[%c3_163, %c0_164, %c128_165], %868 {strides = array<i32>} : memref<4x2x512xf32, #tpu.memory_space<vmem>>, vector<1x2x256xf32>,
    %c0_166 = arith.constant 0 : index
    %c0_167 = arith.constant 0 : index
    %c111_168 = arith.constant 111 : index
    %869 = vector.load %arg13[%c0_166, %c0_167, %c111_168] : memref<4x2x512xf32, #tpu.memory_space<vmem>>, vector<1x2x256xf32>
    %870 = vector.shape_cast %869 : vector<1x2x256xf32> to vector<2x256xf32>
    %871 = vector.broadcast %0 : vector<1x256xf32> to vector<2x256xf32>
    %872 = arith.mulf %870, %871 : vector<2x256xf32>
    %c0_169 = arith.constant 0 : index
    %c0_170 = arith.constant 0 : index
    %c112_171 = arith.constant 112 : index
    %873 = vector.load %arg13[%c0_169, %c0_170, %c112_171] : memref<4x2x512xf32, #tpu.memory_space<vmem>>, vector<1x2x256xf32>
    %874 = vector.shape_cast %873 : vector<1x2x256xf32> to vector<2x256xf32>
    %c0_172 = arith.constant 0 : index
    %c0_173 = arith.constant 0 : index
    %c113_174 = arith.constant 113 : index
    %875 = vector.load %arg13[%c0_172, %c0_173, %c113_174] : memref<4x2x512xf32, #tpu.memory_space<vmem>>, vector<1x2x256xf32>
    %876 = vector.shape_cast %875 : vector<1x2x256xf32> to vector<2x256xf32>
    %877 = vector.broadcast %1 : vector<1x256xf32> to vector<2x256xf32>
    %878 = arith.mulf %876, %877 : vector<2x256xf32>
    %c0_175 = arith.constant 0 : index
    %c0_176 = arith.constant 0 : index
    %c127_177 = arith.constant 127 : index
    %879 = vector.load %arg13[%c0_175, %c0_176, %c127_177] : memref<4x2x512xf32, #tpu.memory_space<vmem>>, vector<1x2x256xf32>
    %880 = vector.shape_cast %879 : vector<1x2x256xf32> to vector<2x256xf32>
    %881 = vector.broadcast %0 : vector<1x256xf32> to vector<2x256xf32>
    %882 = arith.mulf %880, %881 : vector<2x256xf32>
    %c0_178 = arith.constant 0 : index
    %c0_179 = arith.constant 0 : index
    %c128_180 = arith.constant 128 : index
    %883 = vector.load %arg13[%c0_178, %c0_179, %c128_180] : memref<4x2x512xf32, #tpu.memory_space<vmem>>, vector<1x2x256xf32>
    %884 = vector.shape_cast %883 : vector<1x2x256xf32> to vector<2x256xf32>
    %c0_181 = arith.constant 0 : index
    %c0_182 = arith.constant 0 : index
    %c129_183 = arith.constant 129 : index
    %885 = vector.load %arg13[%c0_181, %c0_182, %c129_183] : memref<4x2x512xf32, #tpu.memory_space<vmem>>, vector<1x2x256xf32>
    %886 = vector.shape_cast %885 : vector<1x2x256xf32> to vector<2x256xf32>
    %887 = vector.broadcast %1 : vector<1x256xf32> to vector<2x256xf32>
    %888 = arith.mulf %886, %887 : vector<2x256xf32>
    %c0_184 = arith.constant 0 : index
    %c0_185 = arith.constant 0 : index
    %c143_186 = arith.constant 143 : index
    %889 = vector.load %arg13[%c0_184, %c0_185, %c143_186] : memref<4x2x512xf32, #tpu.memory_space<vmem>>, vector<1x2x256xf32>
    %890 = vector.shape_cast %889 : vector<1x2x256xf32> to vector<2x256xf32>
    %891 = vector.broadcast %0 : vector<1x256xf32> to vector<2x256xf32>
    %892 = arith.mulf %890, %891 : vector<2x256xf32>
    %c0_187 = arith.constant 0 : index
    %c0_188 = arith.constant 0 : index
    %c144_189 = arith.constant 144 : index
    %893 = vector.load %arg13[%c0_187, %c0_188, %c144_189] : memref<4x2x512xf32, #tpu.memory_space<vmem>>, vector<1x2x256xf32>
    %894 = vector.shape_cast %893 : vector<1x2x256xf32> to vector<2x256xf32>
    %c0_190 = arith.constant 0 : index
    %c0_191 = arith.constant 0 : index
    %c145_192 = arith.constant 145 : index
    %895 = vector.load %arg13[%c0_190, %c0_191, %c145_192] : memref<4x2x512xf32, #tpu.memory_space<vmem>>, vector<1x2x256xf32>
    %896 = vector.shape_cast %895 : vector<1x2x256xf32> to vector<2x256xf32>
    %897 = vector.broadcast %1 : vector<1x256xf32> to vector<2x256xf32>
    %898 = arith.mulf %896, %897 : vector<2x256xf32>
    %c1_193 = arith.constant 1 : index
    %c0_194 = arith.constant 0 : index
    %c111_195 = arith.constant 111 : index
    %899 = vector.load %arg13[%c1_193, %c0_194, %c111_195] : memref<4x2x512xf32, #tpu.memory_space<vmem>>, vector<1x2x256xf32>
    %900 = vector.shape_cast %899 : vector<1x2x256xf32> to vector<2x256xf32>
    %901 = vector.broadcast %0 : vector<1x256xf32> to vector<2x256xf32>
    %902 = arith.mulf %900, %901 : vector<2x256xf32>
    %c1_196 = arith.constant 1 : index
    %c0_197 = arith.constant 0 : index
    %c112_198 = arith.constant 112 : index
    %903 = vector.load %arg13[%c1_196, %c0_197, %c112_198] : memref<4x2x512xf32, #tpu.memory_space<vmem>>, vector<1x2x256xf32>
    %904 = vector.shape_cast %903 : vector<1x2x256xf32> to vector<2x256xf32>
    %c1_199 = arith.constant 1 : index
    %c0_200 = arith.constant 0 : index
    %c113_201 = arith.constant 113 : index
    %905 = vector.load %arg13[%c1_199, %c0_200, %c113_201] : memref<4x2x512xf32, #tpu.memory_space<vmem>>, vector<1x2x256xf32>
    %906 = vector.shape_cast %905 : vector<1x2x256xf32> to vector<2x256xf32>
    %907 = vector.broadcast %1 : vector<1x256xf32> to vector<2x256xf32>
    %908 = arith.mulf %906, %907 : vector<2x256xf32>
    %c1_202 = arith.constant 1 : index
    %c0_203 = arith.constant 0 : index
    %c127_204 = arith.constant 127 : index
    %909 = vector.load %arg13[%c1_202, %c0_203, %c127_204] : memref<4x2x512xf32, #tpu.memory_space<vmem>>, vector<1x2x256xf32>
    %910 = vector.shape_cast %909 : vector<1x2x256xf32> to vector<2x256xf32>
    %911 = vector.broadcast %0 : vector<1x256xf32> to vector<2x256xf32>
    %912 = arith.mulf %910, %911 : vector<2x256xf32>
    %c1_205 = arith.constant 1 : index
    %c0_206 = arith.constant 0 : index
    %c128_207 = arith.constant 128 : index
    %913 = vector.load %arg13[%c1_205, %c0_206, %c128_207] : memref<4x2x512xf32, #tpu.memory_space<vmem>>, vector<1x2x256xf32>
    %914 = vector.shape_cast %913 : vector<1x2x256xf32> to vector<2x256xf32>
    %c1_208 = arith.constant 1 : index
    %c0_209 = arith.constant 0 : index
    %c129_210 = arith.constant 129 : index
    %915 = vector.load %arg13[%c1_208, %c0_209, %c129_210] : memref<4x2x512xf32, #tpu.memory_space<vmem>>, vector<1x2x256xf32>
    %916 = vector.shape_cast %915 : vector<1x2x256xf32> to vector<2x256xf32>
    %917 = vector.broadcast %1 : vector<1x256xf32> to vector<2x256xf32>
    %918 = arith.mulf %916, %917 : vector<2x256xf32>
    %c1_211 = arith.constant 1 : index
    %c0_212 = arith.constant 0 : index
    %c143_213 = arith.constant 143 : index
    %919 = vector.load %arg13[%c1_211, %c0_212, %c143_213] : memref<4x2x512xf32, #tpu.memory_space<vmem>>, vector<1x2x256xf32>
    %920 = vector.shape_cast %919 : vector<1x2x256xf32> to vector<2x256xf32>
    %921 = vector.broadcast %0 : vector<1x256xf32> to vector<2x256xf32>
    %922 = arith.mulf %920, %921 : vector<2x256xf32>
    %c1_214 = arith.constant 1 : index
    %c0_215 = arith.constant 0 : index
    %c144_216 = arith.constant 144 : index
    %923 = vector.load %arg13[%c1_214, %c0_215, %c144_216] : memref<4x2x512xf32, #tpu.memory_space<vmem>>, vector<1x2x256xf32>
    %924 = vector.shape_cast %923 : vector<1x2x256xf32> to vector<2x256xf32>
    %c1_217 = arith.constant 1 : index
    %c0_218 = arith.constant 0 : index
    %c145_219 = arith.constant 145 : index
    %925 = vector.load %arg13[%c1_217, %c0_218, %c145_219] : memref<4x2x512xf32, #tpu.memory_space<vmem>>, vector<1x2x256xf32>
    %926 = vector.shape_cast %925 : vector<1x2x256xf32> to vector<2x256xf32>
    %927 = vector.broadcast %1 : vector<1x256xf32> to vector<2x256xf32>
    %928 = arith.mulf %926, %927 : vector<2x256xf32>
    %c2_220 = arith.constant 2 : index
    %c0_221 = arith.constant 0 : index
    %c111_222 = arith.constant 111 : index
    %929 = vector.load %arg13[%c2_220, %c0_221, %c111_222] : memref<4x2x512xf32, #tpu.memory_space<vmem>>, vector<1x2x256xf32>
    %930 = vector.shape_cast %929 : vector<1x2x256xf32> to vector<2x256xf32>
    %931 = vector.broadcast %0 : vector<1x256xf32> to vector<2x256xf32>
    %932 = arith.mulf %930, %931 : vector<2x256xf32>
    %c2_223 = arith.constant 2 : index
    %c0_224 = arith.constant 0 : index
    %c112_225 = arith.constant 112 : index
    %933 = vector.load %arg13[%c2_223, %c0_224, %c112_225] : memref<4x2x512xf32, #tpu.memory_space<vmem>>, vector<1x2x256xf32>
    %934 = vector.shape_cast %933 : vector<1x2x256xf32> to vector<2x256xf32>
    %c2_226 = arith.constant 2 : index
    %c0_227 = arith.constant 0 : index
    %c113_228 = arith.constant 113 : index
    %935 = vector.load %arg13[%c2_226, %c0_227, %c113_228] : memref<4x2x512xf32, #tpu.memory_space<vmem>>, vector<1x2x256xf32>
    %936 = vector.shape_cast %935 : vector<1x2x256xf32> to vector<2x256xf32>
    %937 = vector.broadcast %1 : vector<1x256xf32> to vector<2x256xf32>
    %938 = arith.mulf %936, %937 : vector<2x256xf32>
    %c2_229 = arith.constant 2 : index
    %c0_230 = arith.constant 0 : index
    %c127_231 = arith.constant 127 : index
    %939 = vector.load %arg13[%c2_229, %c0_230, %c127_231] : memref<4x2x512xf32, #tpu.memory_space<vmem>>, vector<1x2x256xf32>
    %940 = vector.shape_cast %939 : vector<1x2x256xf32> to vector<2x256xf32>
    %941 = vector.broadcast %0 : vector<1x256xf32> to vector<2x256xf32>
    %942 = arith.mulf %940, %941 : vector<2x256xf32>
    %c2_232 = arith.constant 2 : index
    %c0_233 = arith.constant 0 : index
    %c128_234 = arith.constant 128 : index
    %943 = vector.load %arg13[%c2_232, %c0_233, %c128_234] : memref<4x2x512xf32, #tpu.memory_space<vmem>>, vector<1x2x256xf32>
    %944 = vector.shape_cast %943 : vector<1x2x256xf32> to vector<2x256xf32>
    %c2_235 = arith.constant 2 : index
    %c0_236 = arith.constant 0 : index
    %c129_237 = arith.constant 129 : index
    %945 = vector.load %arg13[%c2_235, %c0_236, %c129_237] : memref<4x2x512xf32, #tpu.memory_space<vmem>>, vector<1x2x256xf32>
    %946 = vector.shape_cast %945 : vector<1x2x256xf32> to vector<2x256xf32>
    %947 = vector.broadcast %1 : vector<1x256xf32> to vector<2x256xf32>
    %948 = arith.mulf %946, %947 : vector<2x256xf32>
    %c2_238 = arith.constant 2 : index
    %c0_239 = arith.constant 0 : index
    %c143_240 = arith.constant 143 : index
    %949 = vector.load %arg13[%c2_238, %c0_239, %c143_240] : memref<4x2x512xf32, #tpu.memory_space<vmem>>, vector<1x2x256xf32>
    %950 = vector.shape_cast %949 : vector<1x2x256xf32> to vector<2x256xf32>
    %951 = vector.broadcast %0 : vector<1x256xf32> to vector<2x256xf32>
    %952 = arith.mulf %950, %951 : vector<2x256xf32>
    %c2_241 = arith.constant 2 : index
    %c0_242 = arith.constant 0 : index
    %c144_243 = arith.constant 144 : index
    %953 = vector.load %arg13[%c2_241, %c0_242, %c144_243] : memref<4x2x512xf32, #tpu.memory_space<vmem>>, vector<1x2x256xf32>
    %954 = vector.shape_cast %953 : vector<1x2x256xf32> to vector<2x256xf32>
    %c2_244 = arith.constant 2 : index
    %c0_245 = arith.constant 0 : index
    %c145_246 = arith.constant 145 : index
    %955 = vector.load %arg13[%c2_244, %c0_245, %c145_246] : memref<4x2x512xf32, #tpu.memory_space<vmem>>, vector<1x2x256xf32>
    %956 = vector.shape_cast %955 : vector<1x2x256xf32> to vector<2x256xf32>
    %957 = vector.broadcast %1 : vector<1x256xf32> to vector<2x256xf32>
    %958 = arith.mulf %956, %957 : vector<2x256xf32>
    %c3_247 = arith.constant 3 : index
    %c0_248 = arith.constant 0 : index
    %c111_249 = arith.constant 111 : index
    %959 = vector.load %arg13[%c3_247, %c0_248, %c111_249] : memref<4x2x512xf32, #tpu.memory_space<vmem>>, vector<1x2x256xf32>
    %960 = vector.shape_cast %959 : vector<1x2x256xf32> to vector<2x256xf32>
    %961 = vector.broadcast %0 : vector<1x256xf32> to vector<2x256xf32>
    %962 = arith.mulf %960, %961 : vector<2x256xf32>
    %c3_250 = arith.constant 3 : index
    %c0_251 = arith.constant 0 : index
    %c112_252 = arith.constant 112 : index
    %963 = vector.load %arg13[%c3_250, %c0_251, %c112_252] : memref<4x2x512xf32, #tpu.memory_space<vmem>>, vector<1x2x256xf32>
    %964 = vector.shape_cast %963 : vector<1x2x256xf32> to vector<2x256xf32>
    %c3_253 = arith.constant 3 : index
    %c0_254 = arith.constant 0 : index
    %c113_255 = arith.constant 113 : index
    %965 = vector.load %arg13[%c3_253, %c0_254, %c113_255] : memref<4x2x512xf32, #tpu.memory_space<vmem>>, vector<1x2x256xf32>
    %966 = vector.shape_cast %965 : vector<1x2x256xf32> to vector<2x256xf32>
    %967 = vector.broadcast %1 : vector<1x256xf32> to vector<2x256xf32>
    %968 = arith.mulf %966, %967 : vector<2x256xf32>
    %c3_256 = arith.constant 3 : index
    %c0_257 = arith.constant 0 : index
    %c127_258 = arith.constant 127 : index
    %969 = vector.load %arg13[%c3_256, %c0_257, %c127_258] : memref<4x2x512xf32, #tpu.memory_space<vmem>>, vector<1x2x256xf32>
    %970 = vector.shape_cast %969 : vector<1x2x256xf32> to vector<2x256xf32>
    %971 = vector.broadcast %0 : vector<1x256xf32> to vector<2x256xf32>
    %972 = arith.mulf %970, %971 : vector<2x256xf32>
    %c3_259 = arith.constant 3 : index
    %c0_260 = arith.constant 0 : index
    %c128_261 = arith.constant 128 : index
    %973 = vector.load %arg13[%c3_259, %c0_260, %c128_261] : memref<4x2x512xf32, #tpu.memory_space<vmem>>, vector<1x2x256xf32>
    %974 = vector.shape_cast %973 : vector<1x2x256xf32> to vector<2x256xf32>
    %c3_262 = arith.constant 3 : index
    %c0_263 = arith.constant 0 : index
    %c129_264 = arith.constant 129 : index
    %975 = vector.load %arg13[%c3_262, %c0_263, %c129_264] : memref<4x2x512xf32, #tpu.memory_space<vmem>>, vector<1x2x256xf32>
    %976 = vector.shape_cast %975 : vector<1x2x256xf32> to vector<2x256xf32>
    %977 = vector.broadcast %1 : vector<1x256xf32> to vector<2x256xf32>
    %978 = arith.mulf %976, %977 : vector<2x256xf32>
    %c3_265 = arith.constant 3 : index
    %c0_266 = arith.constant 0 : index
    %c143_267 = arith.constant 143 : index
    %979 = vector.load %arg13[%c3_265, %c0_266, %c143_267] : memref<4x2x512xf32, #tpu.memory_space<vmem>>, vector<1x2x256xf32>
    %980 = vector.shape_cast %979 : vector<1x2x256xf32> to vector<2x256xf32>
    %981 = vector.broadcast %0 : vector<1x256xf32> to vector<2x256xf32>
    %982 = arith.mulf %980, %981 : vector<2x256xf32>
    %c3_268 = arith.constant 3 : index
    %c0_269 = arith.constant 0 : index
    %c144_270 = arith.constant 144 : index
    %983 = vector.load %arg13[%c3_268, %c0_269, %c144_270] : memref<4x2x512xf32, #tpu.memory_space<vmem>>, vector<1x2x256xf32>
    %984 = vector.shape_cast %983 : vector<1x2x256xf32> to vector<2x256xf32>
    %c3_271 = arith.constant 3 : index
    %c0_272 = arith.constant 0 : index
    %c145_273 = arith.constant 145 : index
    %985 = vector.load %arg13[%c3_271, %c0_272, %c145_273] : memref<4x2x512xf32, #tpu.memory_space<vmem>>, vector<1x2x256xf32>
    %986 = vector.shape_cast %985 : vector<1x2x256xf32> to vector<2x256xf32>
    %987 = vector.broadcast %1 : vector<1x256xf32> to vector<2x256xf32>
    %988 = arith.mulf %986, %987 : vector<2x256xf32>
    %cst_274 = arith.constant 0.000000e+00 : f32
    %989 = vector.broadcast %cst_274 : f32 to vector<2x256xf32>
    %c0_275 = arith.constant 0 : index
    %990 = memref.load %arg8[%c0_275] : memref<144xf32, #tpu.memory_space<smem>>
    %991 = vector.broadcast %990 : f32 to vector<2x256xf32>
    %992 = arith.mulf %991, %872 : vector<2x256xf32>
    %993 = arith.addf %989, %992 : vector<2x256xf32>
    %c1_276 = arith.constant 1 : index
    %994 = memref.load %arg8[%c1_276] : memref<144xf32, #tpu.memory_space<smem>>
    %995 = vector.broadcast %994 : f32 to vector<2x256xf32>
    %996 = arith.mulf %995, %874 : vector<2x256xf32>
    %997 = arith.addf %993, %996 : vector<2x256xf32>
    %c2_277 = arith.constant 2 : index
    %998 = memref.load %arg8[%c2_277] : memref<144xf32, #tpu.memory_space<smem>>
    %999 = vector.broadcast %998 : f32 to vector<2x256xf32>
    %1000 = arith.mulf %999, %878 : vector<2x256xf32>
    %1001 = arith.addf %997, %1000 : vector<2x256xf32>
    %c3_278 = arith.constant 3 : index
    %1002 = memref.load %arg8[%c3_278] : memref<144xf32, #tpu.memory_space<smem>>
    %1003 = vector.broadcast %1002 : f32 to vector<2x256xf32>
    %1004 = arith.mulf %1003, %882 : vector<2x256xf32>
    %1005 = arith.addf %1001, %1004 : vector<2x256xf32>
    %c4_279 = arith.constant 4 : index
    %1006 = memref.load %arg8[%c4_279] : memref<144xf32, #tpu.memory_space<smem>>
    %1007 = vector.broadcast %1006 : f32 to vector<2x256xf32>
    %1008 = arith.mulf %1007, %884 : vector<2x256xf32>
    %1009 = arith.addf %1005, %1008 : vector<2x256xf32>
    %c5_280 = arith.constant 5 : index
    %1010 = memref.load %arg8[%c5_280] : memref<144xf32, #tpu.memory_space<smem>>
    %1011 = vector.broadcast %1010 : f32 to vector<2x256xf32>
    %1012 = arith.mulf %1011, %888 : vector<2x256xf32>
    %1013 = arith.addf %1009, %1012 : vector<2x256xf32>
    %c6_281 = arith.constant 6 : index
    %1014 = memref.load %arg8[%c6_281] : memref<144xf32, #tpu.memory_space<smem>>
    %1015 = vector.broadcast %1014 : f32 to vector<2x256xf32>
    %1016 = arith.mulf %1015, %892 : vector<2x256xf32>
    %1017 = arith.addf %1013, %1016 : vector<2x256xf32>
    %c7_282 = arith.constant 7 : index
    %1018 = memref.load %arg8[%c7_282] : memref<144xf32, #tpu.memory_space<smem>>
    %1019 = vector.broadcast %1018 : f32 to vector<2x256xf32>
    %1020 = arith.mulf %1019, %894 : vector<2x256xf32>
    %1021 = arith.addf %1017, %1020 : vector<2x256xf32>
    %c8_283 = arith.constant 8 : index
    %1022 = memref.load %arg8[%c8_283] : memref<144xf32, #tpu.memory_space<smem>>
    %1023 = vector.broadcast %1022 : f32 to vector<2x256xf32>
    %1024 = arith.mulf %1023, %898 : vector<2x256xf32>
    %1025 = arith.addf %1021, %1024 : vector<2x256xf32>
    %c9_284 = arith.constant 9 : index
    %1026 = memref.load %arg8[%c9_284] : memref<144xf32, #tpu.memory_space<smem>>
    %1027 = vector.broadcast %1026 : f32 to vector<2x256xf32>
    %1028 = arith.mulf %1027, %902 : vector<2x256xf32>
    %1029 = arith.addf %1025, %1028 : vector<2x256xf32>
    %c10_285 = arith.constant 10 : index
    %1030 = memref.load %arg8[%c10_285] : memref<144xf32, #tpu.memory_space<smem>>
    %1031 = vector.broadcast %1030 : f32 to vector<2x256xf32>
    %1032 = arith.mulf %1031, %904 : vector<2x256xf32>
    %1033 = arith.addf %1029, %1032 : vector<2x256xf32>
    %c11_286 = arith.constant 11 : index
    %1034 = memref.load %arg8[%c11_286] : memref<144xf32, #tpu.memory_space<smem>>
    %1035 = vector.broadcast %1034 : f32 to vector<2x256xf32>
    %1036 = arith.mulf %1035, %908 : vector<2x256xf32>
    %1037 = arith.addf %1033, %1036 : vector<2x256xf32>
    %c12_287 = arith.constant 12 : index
    %1038 = memref.load %arg8[%c12_287] : memref<144xf32, #tpu.memory_space<smem>>
    %1039 = vector.broadcast %1038 : f32 to vector<2x256xf32>
    %1040 = arith.mulf %1039, %912 : vector<2x256xf32>
    %1041 = arith.addf %1037, %1040 : vector<2x256xf32>
    %c13_288 = arith.constant 13 : index
    %1042 = memref.load %arg8[%c13_288] : memref<144xf32, #tpu.memory_space<smem>>
    %1043 = vector.broadcast %1042 : f32 to vector<2x256xf32>
    %1044 = arith.mulf %1043, %914 : vector<2x256xf32>
    %1045 = arith.addf %1041, %1044 : vector<2x256xf32>
    %c14_289 = arith.constant 14 : index
    %1046 = memref.load %arg8[%c14_289] : memref<144xf32, #tpu.memory_space<smem>>
    %1047 = vector.broadcast %1046 : f32 to vector<2x256xf32>
    %1048 = arith.mulf %1047, %918 : vector<2x256xf32>
    %1049 = arith.addf %1045, %1048 : vector<2x256xf32>
    %c15_290 = arith.constant 15 : index
    %1050 = memref.load %arg8[%c15_290] : memref<144xf32, #tpu.memory_space<smem>>
    %1051 = vector.broadcast %1050 : f32 to vector<2x256xf32>
    %1052 = arith.mulf %1051, %922 : vector<2x256xf32>
    %1053 = arith.addf %1049, %1052 : vector<2x256xf32>
    %c16_291 = arith.constant 16 : index
    %1054 = memref.load %arg8[%c16_291] : memref<144xf32, #tpu.memory_space<smem>>
    %1055 = vector.broadcast %1054 : f32 to vector<2x256xf32>
    %1056 = arith.mulf %1055, %924 : vector<2x256xf32>
    %1057 = arith.addf %1053, %1056 : vector<2x256xf32>
    %c17_292 = arith.constant 17 : index
    %1058 = memref.load %arg8[%c17_292] : memref<144xf32, #tpu.memory_space<smem>>
    %1059 = vector.broadcast %1058 : f32 to vector<2x256xf32>
    %1060 = arith.mulf %1059, %928 : vector<2x256xf32>
    %1061 = arith.addf %1057, %1060 : vector<2x256xf32>
    %c18_293 = arith.constant 18 : index
    %1062 = memref.load %arg8[%c18_293] : memref<144xf32, #tpu.memory_space<smem>>
    %1063 = vector.broadcast %1062 : f32 to vector<2x256xf32>
    %1064 = arith.mulf %1063, %932 : vector<2x256xf32>
    %1065 = arith.addf %1061, %1064 : vector<2x256xf32>
    %c19_294 = arith.constant 19 : index
    %1066 = memref.load %arg8[%c19_294] : memref<144xf32, #tpu.memory_space<smem>>
    %1067 = vector.broadcast %1066 : f32 to vector<2x256xf32>
    %1068 = arith.mulf %1067, %934 : vector<2x256xf32>
    %1069 = arith.addf %1065, %1068 : vector<2x256xf32>
    %c20_295 = arith.constant 20 : index
    %1070 = memref.load %arg8[%c20_295] : memref<144xf32, #tpu.memory_space<smem>>
    %1071 = vector.broadcast %1070 : f32 to vector<2x256xf32>
    %1072 = arith.mulf %1071, %938 : vector<2x256xf32>
    %1073 = arith.addf %1069, %1072 : vector<2x256xf32>
    %c21_296 = arith.constant 21 : index
    %1074 = memref.load %arg8[%c21_296] : memref<144xf32, #tpu.memory_space<smem>>
    %1075 = vector.broadcast %1074 : f32 to vector<2x256xf32>
    %1076 = arith.mulf %1075, %942 : vector<2x256xf32>
    %1077 = arith.addf %1073, %1076 : vector<2x256xf32>
    %c22_297 = arith.constant 22 : index
    %1078 = memref.load %arg8[%c22_297] : memref<144xf32, #tpu.memory_space<smem>>
    %1079 = vector.broadcast %1078 : f32 to vector<2x256xf32>
    %1080 = arith.mulf %1079, %944 : vector<2x256xf32>
    %1081 = arith.addf %1077, %1080 : vector<2x256xf32>
    %c23_298 = arith.constant 23 : index
    %1082 = memref.load %arg8[%c23_298] : memref<144xf32, #tpu.memory_space<smem>>
    %1083 = vector.broadcast %1082 : f32 to vector<2x256xf32>
    %1084 = arith.mulf %1083, %948 : vector<2x256xf32>
    %1085 = arith.addf %1081, %1084 : vector<2x256xf32>
    %c24_299 = arith.constant 24 : index
    %1086 = memref.load %arg8[%c24_299] : memref<144xf32, #tpu.memory_space<smem>>
    %1087 = vector.broadcast %1086 : f32 to vector<2x256xf32>
    %1088 = arith.mulf %1087, %952 : vector<2x256xf32>
    %1089 = arith.addf %1085, %1088 : vector<2x256xf32>
    %c25_300 = arith.constant 25 : index
    %1090 = memref.load %arg8[%c25_300] : memref<144xf32, #tpu.memory_space<smem>>
    %1091 = vector.broadcast %1090 : f32 to vector<2x256xf32>
    %1092 = arith.mulf %1091, %954 : vector<2x256xf32>
    %1093 = arith.addf %1089, %1092 : vector<2x256xf32>
    %c26_301 = arith.constant 26 : index
    %1094 = memref.load %arg8[%c26_301] : memref<144xf32, #tpu.memory_space<smem>>
    %1095 = vector.broadcast %1094 : f32 to vector<2x256xf32>
    %1096 = arith.mulf %1095, %958 : vector<2x256xf32>
    %1097 = arith.addf %1093, %1096 : vector<2x256xf32>
    %c27_302 = arith.constant 27 : index
    %1098 = memref.load %arg8[%c27_302] : memref<144xf32, #tpu.memory_space<smem>>
    %1099 = vector.broadcast %1098 : f32 to vector<2x256xf32>
    %1100 = arith.mulf %1099, %962 : vector<2x256xf32>
    %1101 = arith.addf %1097, %1100 : vector<2x256xf32>
    %c28_303 = arith.constant 28 : index
    %1102 = memref.load %arg8[%c28_303] : memref<144xf32, #tpu.memory_space<smem>>
    %1103 = vector.broadcast %1102 : f32 to vector<2x256xf32>
    %1104 = arith.mulf %1103, %964 : vector<2x256xf32>
    %1105 = arith.addf %1101, %1104 : vector<2x256xf32>
    %c29_304 = arith.constant 29 : index
    %1106 = memref.load %arg8[%c29_304] : memref<144xf32, #tpu.memory_space<smem>>
    %1107 = vector.broadcast %1106 : f32 to vector<2x256xf32>
    %1108 = arith.mulf %1107, %968 : vector<2x256xf32>
    %1109 = arith.addf %1105, %1108 : vector<2x256xf32>
    %c30_305 = arith.constant 30 : index
    %1110 = memref.load %arg8[%c30_305] : memref<144xf32, #tpu.memory_space<smem>>
    %1111 = vector.broadcast %1110 : f32 to vector<2x256xf32>
    %1112 = arith.mulf %1111, %972 : vector<2x256xf32>
    %1113 = arith.addf %1109, %1112 : vector<2x256xf32>
    %c31_306 = arith.constant 31 : index
    %1114 = memref.load %arg8[%c31_306] : memref<144xf32, #tpu.memory_space<smem>>
    %1115 = vector.broadcast %1114 : f32 to vector<2x256xf32>
    %1116 = arith.mulf %1115, %974 : vector<2x256xf32>
    %1117 = arith.addf %1113, %1116 : vector<2x256xf32>
    %c32_307 = arith.constant 32 : index
    %1118 = memref.load %arg8[%c32_307] : memref<144xf32, #tpu.memory_space<smem>>
    %1119 = vector.broadcast %1118 : f32 to vector<2x256xf32>
    %1120 = arith.mulf %1119, %978 : vector<2x256xf32>
    %1121 = arith.addf %1117, %1120 : vector<2x256xf32>
    %c33_308 = arith.constant 33 : index
    %1122 = memref.load %arg8[%c33_308] : memref<144xf32, #tpu.memory_space<smem>>
    %1123 = vector.broadcast %1122 : f32 to vector<2x256xf32>
    %1124 = arith.mulf %1123, %982 : vector<2x256xf32>
    %1125 = arith.addf %1121, %1124 : vector<2x256xf32>
    %c34_309 = arith.constant 34 : index
    %1126 = memref.load %arg8[%c34_309] : memref<144xf32, #tpu.memory_space<smem>>
    %1127 = vector.broadcast %1126 : f32 to vector<2x256xf32>
    %1128 = arith.mulf %1127, %984 : vector<2x256xf32>
    %1129 = arith.addf %1125, %1128 : vector<2x256xf32>
    %c35_310 = arith.constant 35 : index
    %1130 = memref.load %arg8[%c35_310] : memref<144xf32, #tpu.memory_space<smem>>
    %1131 = vector.broadcast %1130 : f32 to vector<2x256xf32>
    %1132 = arith.mulf %1131, %988 : vector<2x256xf32>
    %1133 = arith.addf %1129, %1132 : vector<2x256xf32>
    %c0_311 = arith.constant 0 : index
    %1134 = memref.load %arg9[%c0_311] : memref<4xf32, #tpu.memory_space<smem>>
    %1135 = vector.broadcast %1134 : f32 to vector<2x256xf32>
    %1136 = arith.addf %1133, %1135 : vector<2x256xf32>
    %cst_312 = arith.constant 0.000000e+00 : f32
    %1137 = vector.broadcast %cst_312 : f32 to vector<2x256xf32>
    %c36_313 = arith.constant 36 : index
    %1138 = memref.load %arg8[%c36_313] : memref<144xf32, #tpu.memory_space<smem>>
    %1139 = vector.broadcast %1138 : f32 to vector<2x256xf32>
    %1140 = arith.mulf %1139, %872 : vector<2x256xf32>
    %1141 = arith.addf %1137, %1140 : vector<2x256xf32>
    %c37_314 = arith.constant 37 : index
    %1142 = memref.load %arg8[%c37_314] : memref<144xf32, #tpu.memory_space<smem>>
    %1143 = vector.broadcast %1142 : f32 to vector<2x256xf32>
    %1144 = arith.mulf %1143, %874 : vector<2x256xf32>
    %1145 = arith.addf %1141, %1144 : vector<2x256xf32>
    %c38_315 = arith.constant 38 : index
    %1146 = memref.load %arg8[%c38_315] : memref<144xf32, #tpu.memory_space<smem>>
    %1147 = vector.broadcast %1146 : f32 to vector<2x256xf32>
    %1148 = arith.mulf %1147, %878 : vector<2x256xf32>
    %1149 = arith.addf %1145, %1148 : vector<2x256xf32>
    %c39_316 = arith.constant 39 : index
    %1150 = memref.load %arg8[%c39_316] : memref<144xf32, #tpu.memory_space<smem>>
    %1151 = vector.broadcast %1150 : f32 to vector<2x256xf32>
    %1152 = arith.mulf %1151, %882 : vector<2x256xf32>
    %1153 = arith.addf %1149, %1152 : vector<2x256xf32>
    %c40_317 = arith.constant 40 : index
    %1154 = memref.load %arg8[%c40_317] : memref<144xf32, #tpu.memory_space<smem>>
    %1155 = vector.broadcast %1154 : f32 to vector<2x256xf32>
    %1156 = arith.mulf %1155, %884 : vector<2x256xf32>
    %1157 = arith.addf %1153, %1156 : vector<2x256xf32>
    %c41_318 = arith.constant 41 : index
    %1158 = memref.load %arg8[%c41_318] : memref<144xf32, #tpu.memory_space<smem>>
    %1159 = vector.broadcast %1158 : f32 to vector<2x256xf32>
    %1160 = arith.mulf %1159, %888 : vector<2x256xf32>
    %1161 = arith.addf %1157, %1160 : vector<2x256xf32>
    %c42_319 = arith.constant 42 : index
    %1162 = memref.load %arg8[%c42_319] : memref<144xf32, #tpu.memory_space<smem>>
    %1163 = vector.broadcast %1162 : f32 to vector<2x256xf32>
    %1164 = arith.mulf %1163, %892 : vector<2x256xf32>
    %1165 = arith.addf %1161, %1164 : vector<2x256xf32>
    %c43_320 = arith.constant 43 : index
    %1166 = memref.load %arg8[%c43_320] : memref<144xf32, #tpu.memory_space<smem>>
    %1167 = vector.broadcast %1166 : f32 to vector<2x256xf32>
    %1168 = arith.mulf %1167, %894 : vector<2x256xf32>
    %1169 = arith.addf %1165, %1168 : vector<2x256xf32>
    %c44_321 = arith.constant 44 : index
    %1170 = memref.load %arg8[%c44_321] : memref<144xf32, #tpu.memory_space<smem>>
    %1171 = vector.broadcast %1170 : f32 to vector<2x256xf32>
    %1172 = arith.mulf %1171, %898 : vector<2x256xf32>
    %1173 = arith.addf %1169, %1172 : vector<2x256xf32>
    %c45_322 = arith.constant 45 : index
    %1174 = memref.load %arg8[%c45_322] : memref<144xf32, #tpu.memory_space<smem>>
    %1175 = vector.broadcast %1174 : f32 to vector<2x256xf32>
    %1176 = arith.mulf %1175, %902 : vector<2x256xf32>
    %1177 = arith.addf %1173, %1176 : vector<2x256xf32>
    %c46_323 = arith.constant 46 : index
    %1178 = memref.load %arg8[%c46_323] : memref<144xf32, #tpu.memory_space<smem>>
    %1179 = vector.broadcast %1178 : f32 to vector<2x256xf32>
    %1180 = arith.mulf %1179, %904 : vector<2x256xf32>
    %1181 = arith.addf %1177, %1180 : vector<2x256xf32>
    %c47_324 = arith.constant 47 : index
    %1182 = memref.load %arg8[%c47_324] : memref<144xf32, #tpu.memory_space<smem>>
    %1183 = vector.broadcast %1182 : f32 to vector<2x256xf32>
    %1184 = arith.mulf %1183, %908 : vector<2x256xf32>
    %1185 = arith.addf %1181, %1184 : vector<2x256xf32>
    %c48_325 = arith.constant 48 : index
    %1186 = memref.load %arg8[%c48_325] : memref<144xf32, #tpu.memory_space<smem>>
    %1187 = vector.broadcast %1186 : f32 to vector<2x256xf32>
    %1188 = arith.mulf %1187, %912 : vector<2x256xf32>
    %1189 = arith.addf %1185, %1188 : vector<2x256xf32>
    %c49_326 = arith.constant 49 : index
    %1190 = memref.load %arg8[%c49_326] : memref<144xf32, #tpu.memory_space<smem>>
    %1191 = vector.broadcast %1190 : f32 to vector<2x256xf32>
    %1192 = arith.mulf %1191, %914 : vector<2x256xf32>
    %1193 = arith.addf %1189, %1192 : vector<2x256xf32>
    %c50_327 = arith.constant 50 : index
    %1194 = memref.load %arg8[%c50_327] : memref<144xf32, #tpu.memory_space<smem>>
    %1195 = vector.broadcast %1194 : f32 to vector<2x256xf32>
    %1196 = arith.mulf %1195, %918 : vector<2x256xf32>
    %1197 = arith.addf %1193, %1196 : vector<2x256xf32>
    %c51_328 = arith.constant 51 : index
    %1198 = memref.load %arg8[%c51_328] : memref<144xf32, #tpu.memory_space<smem>>
    %1199 = vector.broadcast %1198 : f32 to vector<2x256xf32>
    %1200 = arith.mulf %1199, %922 : vector<2x256xf32>
    %1201 = arith.addf %1197, %1200 : vector<2x256xf32>
    %c52_329 = arith.constant 52 : index
    %1202 = memref.load %arg8[%c52_329] : memref<144xf32, #tpu.memory_space<smem>>
    %1203 = vector.broadcast %1202 : f32 to vector<2x256xf32>
    %1204 = arith.mulf %1203, %924 : vector<2x256xf32>
    %1205 = arith.addf %1201, %1204 : vector<2x256xf32>
    %c53_330 = arith.constant 53 : index
    %1206 = memref.load %arg8[%c53_330] : memref<144xf32, #tpu.memory_space<smem>>
    %1207 = vector.broadcast %1206 : f32 to vector<2x256xf32>
    %1208 = arith.mulf %1207, %928 : vector<2x256xf32>
    %1209 = arith.addf %1205, %1208 : vector<2x256xf32>
    %c54_331 = arith.constant 54 : index
    %1210 = memref.load %arg8[%c54_331] : memref<144xf32, #tpu.memory_space<smem>>
    %1211 = vector.broadcast %1210 : f32 to vector<2x256xf32>
    %1212 = arith.mulf %1211, %932 : vector<2x256xf32>
    %1213 = arith.addf %1209, %1212 : vector<2x256xf32>
    %c55_332 = arith.constant 55 : index
    %1214 = memref.load %arg8[%c55_332] : memref<144xf32, #tpu.memory_space<smem>>
    %1215 = vector.broadcast %1214 : f32 to vector<2x256xf32>
    %1216 = arith.mulf %1215, %934 : vector<2x256xf32>
    %1217 = arith.addf %1213, %1216 : vector<2x256xf32>
    %c56_333 = arith.constant 56 : index
    %1218 = memref.load %arg8[%c56_333] : memref<144xf32, #tpu.memory_space<smem>>
    %1219 = vector.broadcast %1218 : f32 to vector<2x256xf32>
    %1220 = arith.mulf %1219, %938 : vector<2x256xf32>
    %1221 = arith.addf %1217, %1220 : vector<2x256xf32>
    %c57_334 = arith.constant 57 : index
    %1222 = memref.load %arg8[%c57_334] : memref<144xf32, #tpu.memory_space<smem>>
    %1223 = vector.broadcast %1222 : f32 to vector<2x256xf32>
    %1224 = arith.mulf %1223, %942 : vector<2x256xf32>
    %1225 = arith.addf %1221, %1224 : vector<2x256xf32>
    %c58_335 = arith.constant 58 : index
    %1226 = memref.load %arg8[%c58_335] : memref<144xf32, #tpu.memory_space<smem>>
    %1227 = vector.broadcast %1226 : f32 to vector<2x256xf32>
    %1228 = arith.mulf %1227, %944 : vector<2x256xf32>
    %1229 = arith.addf %1225, %1228 : vector<2x256xf32>
    %c59_336 = arith.constant 59 : index
    %1230 = memref.load %arg8[%c59_336] : memref<144xf32, #tpu.memory_space<smem>>
    %1231 = vector.broadcast %1230 : f32 to vector<2x256xf32>
    %1232 = arith.mulf %1231, %948 : vector<2x256xf32>
    %1233 = arith.addf %1229, %1232 : vector<2x256xf32>
    %c60_337 = arith.constant 60 : index
    %1234 = memref.load %arg8[%c60_337] : memref<144xf32, #tpu.memory_space<smem>>
    %1235 = vector.broadcast %1234 : f32 to vector<2x256xf32>
    %1236 = arith.mulf %1235, %952 : vector<2x256xf32>
    %1237 = arith.addf %1233, %1236 : vector<2x256xf32>
    %c61_338 = arith.constant 61 : index
    %1238 = memref.load %arg8[%c61_338] : memref<144xf32, #tpu.memory_space<smem>>
    %1239 = vector.broadcast %1238 : f32 to vector<2x256xf32>
    %1240 = arith.mulf %1239, %954 : vector<2x256xf32>
    %1241 = arith.addf %1237, %1240 : vector<2x256xf32>
    %c62_339 = arith.constant 62 : index
    %1242 = memref.load %arg8[%c62_339] : memref<144xf32, #tpu.memory_space<smem>>
    %1243 = vector.broadcast %1242 : f32 to vector<2x256xf32>
    %1244 = arith.mulf %1243, %958 : vector<2x256xf32>
    %1245 = arith.addf %1241, %1244 : vector<2x256xf32>
    %c63_340 = arith.constant 63 : index
    %1246 = memref.load %arg8[%c63_340] : memref<144xf32, #tpu.memory_space<smem>>
    %1247 = vector.broadcast %1246 : f32 to vector<2x256xf32>
    %1248 = arith.mulf %1247, %962 : vector<2x256xf32>
    %1249 = arith.addf %1245, %1248 : vector<2x256xf32>
    %c64_341 = arith.constant 64 : index
    %1250 = memref.load %arg8[%c64_341] : memref<144xf32, #tpu.memory_space<smem>>
    %1251 = vector.broadcast %1250 : f32 to vector<2x256xf32>
    %1252 = arith.mulf %1251, %964 : vector<2x256xf32>
    %1253 = arith.addf %1249, %1252 : vector<2x256xf32>
    %c65_342 = arith.constant 65 : index
    %1254 = memref.load %arg8[%c65_342] : memref<144xf32, #tpu.memory_space<smem>>
    %1255 = vector.broadcast %1254 : f32 to vector<2x256xf32>
    %1256 = arith.mulf %1255, %968 : vector<2x256xf32>
    %1257 = arith.addf %1253, %1256 : vector<2x256xf32>
    %c66_343 = arith.constant 66 : index
    %1258 = memref.load %arg8[%c66_343] : memref<144xf32, #tpu.memory_space<smem>>
    %1259 = vector.broadcast %1258 : f32 to vector<2x256xf32>
    %1260 = arith.mulf %1259, %972 : vector<2x256xf32>
    %1261 = arith.addf %1257, %1260 : vector<2x256xf32>
    %c67_344 = arith.constant 67 : index
    %1262 = memref.load %arg8[%c67_344] : memref<144xf32, #tpu.memory_space<smem>>
    %1263 = vector.broadcast %1262 : f32 to vector<2x256xf32>
    %1264 = arith.mulf %1263, %974 : vector<2x256xf32>
    %1265 = arith.addf %1261, %1264 : vector<2x256xf32>
    %c68_345 = arith.constant 68 : index
    %1266 = memref.load %arg8[%c68_345] : memref<144xf32, #tpu.memory_space<smem>>
    %1267 = vector.broadcast %1266 : f32 to vector<2x256xf32>
    %1268 = arith.mulf %1267, %978 : vector<2x256xf32>
    %1269 = arith.addf %1265, %1268 : vector<2x256xf32>
    %c69_346 = arith.constant 69 : index
    %1270 = memref.load %arg8[%c69_346] : memref<144xf32, #tpu.memory_space<smem>>
    %1271 = vector.broadcast %1270 : f32 to vector<2x256xf32>
    %1272 = arith.mulf %1271, %982 : vector<2x256xf32>
    %1273 = arith.addf %1269, %1272 : vector<2x256xf32>
    %c70_347 = arith.constant 70 : index
    %1274 = memref.load %arg8[%c70_347] : memref<144xf32, #tpu.memory_space<smem>>
    %1275 = vector.broadcast %1274 : f32 to vector<2x256xf32>
    %1276 = arith.mulf %1275, %984 : vector<2x256xf32>
    %1277 = arith.addf %1273, %1276 : vector<2x256xf32>
    %c71_348 = arith.constant 71 : index
    %1278 = memref.load %arg8[%c71_348] : memref<144xf32, #tpu.memory_space<smem>>
    %1279 = vector.broadcast %1278 : f32 to vector<2x256xf32>
    %1280 = arith.mulf %1279, %988 : vector<2x256xf32>
    %1281 = arith.addf %1277, %1280 : vector<2x256xf32>
    %c1_349 = arith.constant 1 : index
    %1282 = memref.load %arg9[%c1_349] : memref<4xf32, #tpu.memory_space<smem>>
    %1283 = vector.broadcast %1282 : f32 to vector<2x256xf32>
    %1284 = arith.addf %1281, %1283 : vector<2x256xf32>
    %cst_350 = arith.constant 0.000000e+00 : f32
    %1285 = vector.broadcast %cst_350 : f32 to vector<2x256xf32>
    %c72_351 = arith.constant 72 : index
    %1286 = memref.load %arg8[%c72_351] : memref<144xf32, #tpu.memory_space<smem>>
    %1287 = vector.broadcast %1286 : f32 to vector<2x256xf32>
    %1288 = arith.mulf %1287, %872 : vector<2x256xf32>
    %1289 = arith.addf %1285, %1288 : vector<2x256xf32>
    %c73_352 = arith.constant 73 : index
    %1290 = memref.load %arg8[%c73_352] : memref<144xf32, #tpu.memory_space<smem>>
    %1291 = vector.broadcast %1290 : f32 to vector<2x256xf32>
    %1292 = arith.mulf %1291, %874 : vector<2x256xf32>
    %1293 = arith.addf %1289, %1292 : vector<2x256xf32>
    %c74_353 = arith.constant 74 : index
    %1294 = memref.load %arg8[%c74_353] : memref<144xf32, #tpu.memory_space<smem>>
    %1295 = vector.broadcast %1294 : f32 to vector<2x256xf32>
    %1296 = arith.mulf %1295, %878 : vector<2x256xf32>
    %1297 = arith.addf %1293, %1296 : vector<2x256xf32>
    %c75_354 = arith.constant 75 : index
    %1298 = memref.load %arg8[%c75_354] : memref<144xf32, #tpu.memory_space<smem>>
    %1299 = vector.broadcast %1298 : f32 to vector<2x256xf32>
    %1300 = arith.mulf %1299, %882 : vector<2x256xf32>
    %1301 = arith.addf %1297, %1300 : vector<2x256xf32>
    %c76_355 = arith.constant 76 : index
    %1302 = memref.load %arg8[%c76_355] : memref<144xf32, #tpu.memory_space<smem>>
    %1303 = vector.broadcast %1302 : f32 to vector<2x256xf32>
    %1304 = arith.mulf %1303, %884 : vector<2x256xf32>
    %1305 = arith.addf %1301, %1304 : vector<2x256xf32>
    %c77_356 = arith.constant 77 : index
    %1306 = memref.load %arg8[%c77_356] : memref<144xf32, #tpu.memory_space<smem>>
    %1307 = vector.broadcast %1306 : f32 to vector<2x256xf32>
    %1308 = arith.mulf %1307, %888 : vector<2x256xf32>
    %1309 = arith.addf %1305, %1308 : vector<2x256xf32>
    %c78_357 = arith.constant 78 : index
    %1310 = memref.load %arg8[%c78_357] : memref<144xf32, #tpu.memory_space<smem>>
    %1311 = vector.broadcast %1310 : f32 to vector<2x256xf32>
    %1312 = arith.mulf %1311, %892 : vector<2x256xf32>
    %1313 = arith.addf %1309, %1312 : vector<2x256xf32>
    %c79_358 = arith.constant 79 : index
    %1314 = memref.load %arg8[%c79_358] : memref<144xf32, #tpu.memory_space<smem>>
    %1315 = vector.broadcast %1314 : f32 to vector<2x256xf32>
    %1316 = arith.mulf %1315, %894 : vector<2x256xf32>
    %1317 = arith.addf %1313, %1316 : vector<2x256xf32>
    %c80_359 = arith.constant 80 : index
    %1318 = memref.load %arg8[%c80_359] : memref<144xf32, #tpu.memory_space<smem>>
    %1319 = vector.broadcast %1318 : f32 to vector<2x256xf32>
    %1320 = arith.mulf %1319, %898 : vector<2x256xf32>
    %1321 = arith.addf %1317, %1320 : vector<2x256xf32>
    %c81_360 = arith.constant 81 : index
    %1322 = memref.load %arg8[%c81_360] : memref<144xf32, #tpu.memory_space<smem>>
    %1323 = vector.broadcast %1322 : f32 to vector<2x256xf32>
    %1324 = arith.mulf %1323, %902 : vector<2x256xf32>
    %1325 = arith.addf %1321, %1324 : vector<2x256xf32>
    %c82_361 = arith.constant 82 : index
    %1326 = memref.load %arg8[%c82_361] : memref<144xf32, #tpu.memory_space<smem>>
    %1327 = vector.broadcast %1326 : f32 to vector<2x256xf32>
    %1328 = arith.mulf %1327, %904 : vector<2x256xf32>
    %1329 = arith.addf %1325, %1328 : vector<2x256xf32>
    %c83_362 = arith.constant 83 : index
    %1330 = memref.load %arg8[%c83_362] : memref<144xf32, #tpu.memory_space<smem>>
    %1331 = vector.broadcast %1330 : f32 to vector<2x256xf32>
    %1332 = arith.mulf %1331, %908 : vector<2x256xf32>
    %1333 = arith.addf %1329, %1332 : vector<2x256xf32>
    %c84_363 = arith.constant 84 : index
    %1334 = memref.load %arg8[%c84_363] : memref<144xf32, #tpu.memory_space<smem>>
    %1335 = vector.broadcast %1334 : f32 to vector<2x256xf32>
    %1336 = arith.mulf %1335, %912 : vector<2x256xf32>
    %1337 = arith.addf %1333, %1336 : vector<2x256xf32>
    %c85_364 = arith.constant 85 : index
    %1338 = memref.load %arg8[%c85_364] : memref<144xf32, #tpu.memory_space<smem>>
    %1339 = vector.broadcast %1338 : f32 to vector<2x256xf32>
    %1340 = arith.mulf %1339, %914 : vector<2x256xf32>
    %1341 = arith.addf %1337, %1340 : vector<2x256xf32>
    %c86_365 = arith.constant 86 : index
    %1342 = memref.load %arg8[%c86_365] : memref<144xf32, #tpu.memory_space<smem>>
    %1343 = vector.broadcast %1342 : f32 to vector<2x256xf32>
    %1344 = arith.mulf %1343, %918 : vector<2x256xf32>
    %1345 = arith.addf %1341, %1344 : vector<2x256xf32>
    %c87_366 = arith.constant 87 : index
    %1346 = memref.load %arg8[%c87_366] : memref<144xf32, #tpu.memory_space<smem>>
    %1347 = vector.broadcast %1346 : f32 to vector<2x256xf32>
    %1348 = arith.mulf %1347, %922 : vector<2x256xf32>
    %1349 = arith.addf %1345, %1348 : vector<2x256xf32>
    %c88_367 = arith.constant 88 : index
    %1350 = memref.load %arg8[%c88_367] : memref<144xf32, #tpu.memory_space<smem>>
    %1351 = vector.broadcast %1350 : f32 to vector<2x256xf32>
    %1352 = arith.mulf %1351, %924 : vector<2x256xf32>
    %1353 = arith.addf %1349, %1352 : vector<2x256xf32>
    %c89_368 = arith.constant 89 : index
    %1354 = memref.load %arg8[%c89_368] : memref<144xf32, #tpu.memory_space<smem>>
    %1355 = vector.broadcast %1354 : f32 to vector<2x256xf32>
    %1356 = arith.mulf %1355, %928 : vector<2x256xf32>
    %1357 = arith.addf %1353, %1356 : vector<2x256xf32>
    %c90_369 = arith.constant 90 : index
    %1358 = memref.load %arg8[%c90_369] : memref<144xf32, #tpu.memory_space<smem>>
    %1359 = vector.broadcast %1358 : f32 to vector<2x256xf32>
    %1360 = arith.mulf %1359, %932 : vector<2x256xf32>
    %1361 = arith.addf %1357, %1360 : vector<2x256xf32>
    %c91_370 = arith.constant 91 : index
    %1362 = memref.load %arg8[%c91_370] : memref<144xf32, #tpu.memory_space<smem>>
    %1363 = vector.broadcast %1362 : f32 to vector<2x256xf32>
    %1364 = arith.mulf %1363, %934 : vector<2x256xf32>
    %1365 = arith.addf %1361, %1364 : vector<2x256xf32>
    %c92_371 = arith.constant 92 : index
    %1366 = memref.load %arg8[%c92_371] : memref<144xf32, #tpu.memory_space<smem>>
    %1367 = vector.broadcast %1366 : f32 to vector<2x256xf32>
    %1368 = arith.mulf %1367, %938 : vector<2x256xf32>
    %1369 = arith.addf %1365, %1368 : vector<2x256xf32>
    %c93_372 = arith.constant 93 : index
    %1370 = memref.load %arg8[%c93_372] : memref<144xf32, #tpu.memory_space<smem>>
    %1371 = vector.broadcast %1370 : f32 to vector<2x256xf32>
    %1372 = arith.mulf %1371, %942 : vector<2x256xf32>
    %1373 = arith.addf %1369, %1372 : vector<2x256xf32>
    %c94_373 = arith.constant 94 : index
    %1374 = memref.load %arg8[%c94_373] : memref<144xf32, #tpu.memory_space<smem>>
    %1375 = vector.broadcast %1374 : f32 to vector<2x256xf32>
    %1376 = arith.mulf %1375, %944 : vector<2x256xf32>
    %1377 = arith.addf %1373, %1376 : vector<2x256xf32>
    %c95_374 = arith.constant 95 : index
    %1378 = memref.load %arg8[%c95_374] : memref<144xf32, #tpu.memory_space<smem>>
    %1379 = vector.broadcast %1378 : f32 to vector<2x256xf32>
    %1380 = arith.mulf %1379, %948 : vector<2x256xf32>
    %1381 = arith.addf %1377, %1380 : vector<2x256xf32>
    %c96_375 = arith.constant 96 : index
    %1382 = memref.load %arg8[%c96_375] : memref<144xf32, #tpu.memory_space<smem>>
    %1383 = vector.broadcast %1382 : f32 to vector<2x256xf32>
    %1384 = arith.mulf %1383, %952 : vector<2x256xf32>
    %1385 = arith.addf %1381, %1384 : vector<2x256xf32>
    %c97_376 = arith.constant 97 : index
    %1386 = memref.load %arg8[%c97_376] : memref<144xf32, #tpu.memory_space<smem>>
    %1387 = vector.broadcast %1386 : f32 to vector<2x256xf32>
    %1388 = arith.mulf %1387, %954 : vector<2x256xf32>
    %1389 = arith.addf %1385, %1388 : vector<2x256xf32>
    %c98_377 = arith.constant 98 : index
    %1390 = memref.load %arg8[%c98_377] : memref<144xf32, #tpu.memory_space<smem>>
    %1391 = vector.broadcast %1390 : f32 to vector<2x256xf32>
    %1392 = arith.mulf %1391, %958 : vector<2x256xf32>
    %1393 = arith.addf %1389, %1392 : vector<2x256xf32>
    %c99_378 = arith.constant 99 : index
    %1394 = memref.load %arg8[%c99_378] : memref<144xf32, #tpu.memory_space<smem>>
    %1395 = vector.broadcast %1394 : f32 to vector<2x256xf32>
    %1396 = arith.mulf %1395, %962 : vector<2x256xf32>
    %1397 = arith.addf %1393, %1396 : vector<2x256xf32>
    %c100_379 = arith.constant 100 : index
    %1398 = memref.load %arg8[%c100_379] : memref<144xf32, #tpu.memory_space<smem>>
    %1399 = vector.broadcast %1398 : f32 to vector<2x256xf32>
    %1400 = arith.mulf %1399, %964 : vector<2x256xf32>
    %1401 = arith.addf %1397, %1400 : vector<2x256xf32>
    %c101_380 = arith.constant 101 : index
    %1402 = memref.load %arg8[%c101_380] : memref<144xf32, #tpu.memory_space<smem>>
    %1403 = vector.broadcast %1402 : f32 to vector<2x256xf32>
    %1404 = arith.mulf %1403, %968 : vector<2x256xf32>
    %1405 = arith.addf %1401, %1404 : vector<2x256xf32>
    %c102_381 = arith.constant 102 : index
    %1406 = memref.load %arg8[%c102_381] : memref<144xf32, #tpu.memory_space<smem>>
    %1407 = vector.broadcast %1406 : f32 to vector<2x256xf32>
    %1408 = arith.mulf %1407, %972 : vector<2x256xf32>
    %1409 = arith.addf %1405, %1408 : vector<2x256xf32>
    %c103_382 = arith.constant 103 : index
    %1410 = memref.load %arg8[%c103_382] : memref<144xf32, #tpu.memory_space<smem>>
    %1411 = vector.broadcast %1410 : f32 to vector<2x256xf32>
    %1412 = arith.mulf %1411, %974 : vector<2x256xf32>
    %1413 = arith.addf %1409, %1412 : vector<2x256xf32>
    %c104_383 = arith.constant 104 : index
    %1414 = memref.load %arg8[%c104_383] : memref<144xf32, #tpu.memory_space<smem>>
    %1415 = vector.broadcast %1414 : f32 to vector<2x256xf32>
    %1416 = arith.mulf %1415, %978 : vector<2x256xf32>
    %1417 = arith.addf %1413, %1416 : vector<2x256xf32>
    %c105_384 = arith.constant 105 : index
    %1418 = memref.load %arg8[%c105_384] : memref<144xf32, #tpu.memory_space<smem>>
    %1419 = vector.broadcast %1418 : f32 to vector<2x256xf32>
    %1420 = arith.mulf %1419, %982 : vector<2x256xf32>
    %1421 = arith.addf %1417, %1420 : vector<2x256xf32>
    %c106_385 = arith.constant 106 : index
    %1422 = memref.load %arg8[%c106_385] : memref<144xf32, #tpu.memory_space<smem>>
    %1423 = vector.broadcast %1422 : f32 to vector<2x256xf32>
    %1424 = arith.mulf %1423, %984 : vector<2x256xf32>
    %1425 = arith.addf %1421, %1424 : vector<2x256xf32>
    %c107_386 = arith.constant 107 : index
    %1426 = memref.load %arg8[%c107_386] : memref<144xf32, #tpu.memory_space<smem>>
    %1427 = vector.broadcast %1426 : f32 to vector<2x256xf32>
    %1428 = arith.mulf %1427, %988 : vector<2x256xf32>
    %1429 = arith.addf %1425, %1428 : vector<2x256xf32>
    %c2_387 = arith.constant 2 : index
    %1430 = memref.load %arg9[%c2_387] : memref<4xf32, #tpu.memory_space<smem>>
    %1431 = vector.broadcast %1430 : f32 to vector<2x256xf32>
    %1432 = arith.addf %1429, %1431 : vector<2x256xf32>
    %cst_388 = arith.constant 0.000000e+00 : f32
    %1433 = vector.broadcast %cst_388 : f32 to vector<2x256xf32>
    %c108_389 = arith.constant 108 : index
    %1434 = memref.load %arg8[%c108_389] : memref<144xf32, #tpu.memory_space<smem>>
    %1435 = vector.broadcast %1434 : f32 to vector<2x256xf32>
    %1436 = arith.mulf %1435, %872 : vector<2x256xf32>
    %1437 = arith.addf %1433, %1436 : vector<2x256xf32>
    %c109_390 = arith.constant 109 : index
    %1438 = memref.load %arg8[%c109_390] : memref<144xf32, #tpu.memory_space<smem>>
    %1439 = vector.broadcast %1438 : f32 to vector<2x256xf32>
    %1440 = arith.mulf %1439, %874 : vector<2x256xf32>
    %1441 = arith.addf %1437, %1440 : vector<2x256xf32>
    %c110_391 = arith.constant 110 : index
    %1442 = memref.load %arg8[%c110_391] : memref<144xf32, #tpu.memory_space<smem>>
    %1443 = vector.broadcast %1442 : f32 to vector<2x256xf32>
    %1444 = arith.mulf %1443, %878 : vector<2x256xf32>
    %1445 = arith.addf %1441, %1444 : vector<2x256xf32>
    %c111_392 = arith.constant 111 : index
    %1446 = memref.load %arg8[%c111_392] : memref<144xf32, #tpu.memory_space<smem>>
    %1447 = vector.broadcast %1446 : f32 to vector<2x256xf32>
    %1448 = arith.mulf %1447, %882 : vector<2x256xf32>
    %1449 = arith.addf %1445, %1448 : vector<2x256xf32>
    %c112_393 = arith.constant 112 : index
    %1450 = memref.load %arg8[%c112_393] : memref<144xf32, #tpu.memory_space<smem>>
    %1451 = vector.broadcast %1450 : f32 to vector<2x256xf32>
    %1452 = arith.mulf %1451, %884 : vector<2x256xf32>
    %1453 = arith.addf %1449, %1452 : vector<2x256xf32>
    %c113_394 = arith.constant 113 : index
    %1454 = memref.load %arg8[%c113_394] : memref<144xf32, #tpu.memory_space<smem>>
    %1455 = vector.broadcast %1454 : f32 to vector<2x256xf32>
    %1456 = arith.mulf %1455, %888 : vector<2x256xf32>
    %1457 = arith.addf %1453, %1456 : vector<2x256xf32>
    %c114_395 = arith.constant 114 : index
    %1458 = memref.load %arg8[%c114_395] : memref<144xf32, #tpu.memory_space<smem>>
    %1459 = vector.broadcast %1458 : f32 to vector<2x256xf32>
    %1460 = arith.mulf %1459, %892 : vector<2x256xf32>
    %1461 = arith.addf %1457, %1460 : vector<2x256xf32>
    %c115_396 = arith.constant 115 : index
    %1462 = memref.load %arg8[%c115_396] : memref<144xf32, #tpu.memory_space<smem>>
    %1463 = vector.broadcast %1462 : f32 to vector<2x256xf32>
    %1464 = arith.mulf %1463, %894 : vector<2x256xf32>
    %1465 = arith.addf %1461, %1464 : vector<2x256xf32>
    %c116_397 = arith.constant 116 : index
    %1466 = memref.load %arg8[%c116_397] : memref<144xf32, #tpu.memory_space<smem>>
    %1467 = vector.broadcast %1466 : f32 to vector<2x256xf32>
    %1468 = arith.mulf %1467, %898 : vector<2x256xf32>
    %1469 = arith.addf %1465, %1468 : vector<2x256xf32>
    %c117_398 = arith.constant 117 : index
    %1470 = memref.load %arg8[%c117_398] : memref<144xf32, #tpu.memory_space<smem>>
    %1471 = vector.broadcast %1470 : f32 to vector<2x256xf32>
    %1472 = arith.mulf %1471, %902 : vector<2x256xf32>
    %1473 = arith.addf %1469, %1472 : vector<2x256xf32>
    %c118_399 = arith.constant 118 : index
    %1474 = memref.load %arg8[%c118_399] : memref<144xf32, #tpu.memory_space<smem>>
    %1475 = vector.broadcast %1474 : f32 to vector<2x256xf32>
    %1476 = arith.mulf %1475, %904 : vector<2x256xf32>
    %1477 = arith.addf %1473, %1476 : vector<2x256xf32>
    %c119_400 = arith.constant 119 : index
    %1478 = memref.load %arg8[%c119_400] : memref<144xf32, #tpu.memory_space<smem>>
    %1479 = vector.broadcast %1478 : f32 to vector<2x256xf32>
    %1480 = arith.mulf %1479, %908 : vector<2x256xf32>
    %1481 = arith.addf %1477, %1480 : vector<2x256xf32>
    %c120_401 = arith.constant 120 : index
    %1482 = memref.load %arg8[%c120_401] : memref<144xf32, #tpu.memory_space<smem>>
    %1483 = vector.broadcast %1482 : f32 to vector<2x256xf32>
    %1484 = arith.mulf %1483, %912 : vector<2x256xf32>
    %1485 = arith.addf %1481, %1484 : vector<2x256xf32>
    %c121_402 = arith.constant 121 : index
    %1486 = memref.load %arg8[%c121_402] : memref<144xf32, #tpu.memory_space<smem>>
    %1487 = vector.broadcast %1486 : f32 to vector<2x256xf32>
    %1488 = arith.mulf %1487, %914 : vector<2x256xf32>
    %1489 = arith.addf %1485, %1488 : vector<2x256xf32>
    %c122_403 = arith.constant 122 : index
    %1490 = memref.load %arg8[%c122_403] : memref<144xf32, #tpu.memory_space<smem>>
    %1491 = vector.broadcast %1490 : f32 to vector<2x256xf32>
    %1492 = arith.mulf %1491, %918 : vector<2x256xf32>
    %1493 = arith.addf %1489, %1492 : vector<2x256xf32>
    %c123_404 = arith.constant 123 : index
    %1494 = memref.load %arg8[%c123_404] : memref<144xf32, #tpu.memory_space<smem>>
    %1495 = vector.broadcast %1494 : f32 to vector<2x256xf32>
    %1496 = arith.mulf %1495, %922 : vector<2x256xf32>
    %1497 = arith.addf %1493, %1496 : vector<2x256xf32>
    %c124_405 = arith.constant 124 : index
    %1498 = memref.load %arg8[%c124_405] : memref<144xf32, #tpu.memory_space<smem>>
    %1499 = vector.broadcast %1498 : f32 to vector<2x256xf32>
    %1500 = arith.mulf %1499, %924 : vector<2x256xf32>
    %1501 = arith.addf %1497, %1500 : vector<2x256xf32>
    %c125_406 = arith.constant 125 : index
    %1502 = memref.load %arg8[%c125_406] : memref<144xf32, #tpu.memory_space<smem>>
    %1503 = vector.broadcast %1502 : f32 to vector<2x256xf32>
    %1504 = arith.mulf %1503, %928 : vector<2x256xf32>
    %1505 = arith.addf %1501, %1504 : vector<2x256xf32>
    %c126_407 = arith.constant 126 : index
    %1506 = memref.load %arg8[%c126_407] : memref<144xf32, #tpu.memory_space<smem>>
    %1507 = vector.broadcast %1506 : f32 to vector<2x256xf32>
    %1508 = arith.mulf %1507, %932 : vector<2x256xf32>
    %1509 = arith.addf %1505, %1508 : vector<2x256xf32>
    %c127_408 = arith.constant 127 : index
    %1510 = memref.load %arg8[%c127_408] : memref<144xf32, #tpu.memory_space<smem>>
    %1511 = vector.broadcast %1510 : f32 to vector<2x256xf32>
    %1512 = arith.mulf %1511, %934 : vector<2x256xf32>
    %1513 = arith.addf %1509, %1512 : vector<2x256xf32>
    %c128_409 = arith.constant 128 : index
    %1514 = memref.load %arg8[%c128_409] : memref<144xf32, #tpu.memory_space<smem>>
    %1515 = vector.broadcast %1514 : f32 to vector<2x256xf32>
    %1516 = arith.mulf %1515, %938 : vector<2x256xf32>
    %1517 = arith.addf %1513, %1516 : vector<2x256xf32>
    %c129_410 = arith.constant 129 : index
    %1518 = memref.load %arg8[%c129_410] : memref<144xf32, #tpu.memory_space<smem>>
    %1519 = vector.broadcast %1518 : f32 to vector<2x256xf32>
    %1520 = arith.mulf %1519, %942 : vector<2x256xf32>
    %1521 = arith.addf %1517, %1520 : vector<2x256xf32>
    %c130_411 = arith.constant 130 : index
    %1522 = memref.load %arg8[%c130_411] : memref<144xf32, #tpu.memory_space<smem>>
    %1523 = vector.broadcast %1522 : f32 to vector<2x256xf32>
    %1524 = arith.mulf %1523, %944 : vector<2x256xf32>
    %1525 = arith.addf %1521, %1524 : vector<2x256xf32>
    %c131_412 = arith.constant 131 : index
    %1526 = memref.load %arg8[%c131_412] : memref<144xf32, #tpu.memory_space<smem>>
    %1527 = vector.broadcast %1526 : f32 to vector<2x256xf32>
    %1528 = arith.mulf %1527, %948 : vector<2x256xf32>
    %1529 = arith.addf %1525, %1528 : vector<2x256xf32>
    %c132_413 = arith.constant 132 : index
    %1530 = memref.load %arg8[%c132_413] : memref<144xf32, #tpu.memory_space<smem>>
    %1531 = vector.broadcast %1530 : f32 to vector<2x256xf32>
    %1532 = arith.mulf %1531, %952 : vector<2x256xf32>
    %1533 = arith.addf %1529, %1532 : vector<2x256xf32>
    %c133_414 = arith.constant 133 : index
    %1534 = memref.load %arg8[%c133_414] : memref<144xf32, #tpu.memory_space<smem>>
    %1535 = vector.broadcast %1534 : f32 to vector<2x256xf32>
    %1536 = arith.mulf %1535, %954 : vector<2x256xf32>
    %1537 = arith.addf %1533, %1536 : vector<2x256xf32>
    %c134_415 = arith.constant 134 : index
    %1538 = memref.load %arg8[%c134_415] : memref<144xf32, #tpu.memory_space<smem>>
    %1539 = vector.broadcast %1538 : f32 to vector<2x256xf32>
    %1540 = arith.mulf %1539, %958 : vector<2x256xf32>
    %1541 = arith.addf %1537, %1540 : vector<2x256xf32>
    %c135_416 = arith.constant 135 : index
    %1542 = memref.load %arg8[%c135_416] : memref<144xf32, #tpu.memory_space<smem>>
    %1543 = vector.broadcast %1542 : f32 to vector<2x256xf32>
    %1544 = arith.mulf %1543, %962 : vector<2x256xf32>
    %1545 = arith.addf %1541, %1544 : vector<2x256xf32>
    %c136_417 = arith.constant 136 : index
    %1546 = memref.load %arg8[%c136_417] : memref<144xf32, #tpu.memory_space<smem>>
    %1547 = vector.broadcast %1546 : f32 to vector<2x256xf32>
    %1548 = arith.mulf %1547, %964 : vector<2x256xf32>
    %1549 = arith.addf %1545, %1548 : vector<2x256xf32>
    %c137_418 = arith.constant 137 : index
    %1550 = memref.load %arg8[%c137_418] : memref<144xf32, #tpu.memory_space<smem>>
    %1551 = vector.broadcast %1550 : f32 to vector<2x256xf32>
    %1552 = arith.mulf %1551, %968 : vector<2x256xf32>
    %1553 = arith.addf %1549, %1552 : vector<2x256xf32>
    %c138_419 = arith.constant 138 : index
    %1554 = memref.load %arg8[%c138_419] : memref<144xf32, #tpu.memory_space<smem>>
    %1555 = vector.broadcast %1554 : f32 to vector<2x256xf32>
    %1556 = arith.mulf %1555, %972 : vector<2x256xf32>
    %1557 = arith.addf %1553, %1556 : vector<2x256xf32>
    %c139_420 = arith.constant 139 : index
    %1558 = memref.load %arg8[%c139_420] : memref<144xf32, #tpu.memory_space<smem>>
    %1559 = vector.broadcast %1558 : f32 to vector<2x256xf32>
    %1560 = arith.mulf %1559, %974 : vector<2x256xf32>
    %1561 = arith.addf %1557, %1560 : vector<2x256xf32>
    %c140_421 = arith.constant 140 : index
    %1562 = memref.load %arg8[%c140_421] : memref<144xf32, #tpu.memory_space<smem>>
    %1563 = vector.broadcast %1562 : f32 to vector<2x256xf32>
    %1564 = arith.mulf %1563, %978 : vector<2x256xf32>
    %1565 = arith.addf %1561, %1564 : vector<2x256xf32>
    %c141_422 = arith.constant 141 : index
    %1566 = memref.load %arg8[%c141_422] : memref<144xf32, #tpu.memory_space<smem>>
    %1567 = vector.broadcast %1566 : f32 to vector<2x256xf32>
    %1568 = arith.mulf %1567, %982 : vector<2x256xf32>
    %1569 = arith.addf %1565, %1568 : vector<2x256xf32>
    %c142_423 = arith.constant 142 : index
    %1570 = memref.load %arg8[%c142_423] : memref<144xf32, #tpu.memory_space<smem>>
    %1571 = vector.broadcast %1570 : f32 to vector<2x256xf32>
    %1572 = arith.mulf %1571, %984 : vector<2x256xf32>
    %1573 = arith.addf %1569, %1572 : vector<2x256xf32>
    %c143_424 = arith.constant 143 : index
    %1574 = memref.load %arg8[%c143_424] : memref<144xf32, #tpu.memory_space<smem>>
    %1575 = vector.broadcast %1574 : f32 to vector<2x256xf32>
    %1576 = arith.mulf %1575, %988 : vector<2x256xf32>
    %1577 = arith.addf %1573, %1576 : vector<2x256xf32>
    %c3_425 = arith.constant 3 : index
    %1578 = memref.load %arg9[%c3_425] : memref<4xf32, #tpu.memory_space<smem>>
    %1579 = vector.broadcast %1578 : f32 to vector<2x256xf32>
    %1580 = arith.addf %1577, %1579 : vector<2x256xf32>
    %1581 = vector.shape_cast %1136 : vector<2x256xf32> to vector<1x2x256xf32>
    %cst_426 = arith.constant dense<0.000000e+00> : vector<1xf32>
    %1582 = vector.multi_reduction <add>, %1581, %cst_426 [1, 2] : vector<1x2x256xf32> to vector<1xf32>
    %1583 = vector.shape_cast %1582 : vector<1xf32> to vector<1x1x1xf32>
    %1584 = vector.extract %1583[0, 0, 0] : f32 from vector<1x1x1xf32>
    %1585 = vector.broadcast %1584 : f32 to vector<1x1xf32>
    %cst_427 = arith.constant 0.001953125 : f32
    %1586 = vector.broadcast %cst_427 : f32 to vector<1x1xf32>
    %1587 = arith.mulf %1585, %1586 : vector<1x1xf32>
    %1588 = vector.broadcast %1587 : vector<1x1xf32> to vector<2x256xf32>
    %1589 = arith.subf %1136, %1588 : vector<2x256xf32>
    %1590 = arith.mulf %1589, %1589 : vector<2x256xf32>
    %1591 = vector.shape_cast %1590 : vector<2x256xf32> to vector<1x2x256xf32>
    %cst_428 = arith.constant dense<0.000000e+00> : vector<1xf32>
    %1592 = vector.multi_reduction <add>, %1591, %cst_428 [1, 2] : vector<1x2x256xf32> to vector<1xf32>
    %1593 = vector.shape_cast %1592 : vector<1xf32> to vector<1x1x1xf32>
    %1594 = vector.extract %1593[0, 0, 0] : f32 from vector<1x1x1xf32>
    %1595 = vector.broadcast %1594 : f32 to vector<1x1xf32>
    %cst_429 = arith.constant 0.001953125 : f32
    %1596 = vector.broadcast %cst_429 : f32 to vector<1x1xf32>
    %1597 = arith.mulf %1595, %1596 : vector<1x1xf32>
    %1598 = vector.broadcast %1587 : vector<1x1xf32> to vector<2x256xf32>
    %1599 = arith.subf %1136, %1598 : vector<2x256xf32>
    %cst_430 = arith.constant 9.99999974E-6 : f32
    %1600 = vector.broadcast %cst_430 : f32 to vector<1x1xf32>
    %1601 = arith.addf %1597, %1600 : vector<1x1xf32>
    %1602 = math.rsqrt %1601 : vector<1x1xf32>
    %1603 = vector.broadcast %1602 : vector<1x1xf32> to vector<2x256xf32>
    %1604 = arith.mulf %1599, %1603 : vector<2x256xf32>
    %c0_431 = arith.constant 0 : index
    %1605 = memref.load %arg10[%c0_431] : memref<4xf32, #tpu.memory_space<smem>>
    %1606 = vector.broadcast %1605 : f32 to vector<2x256xf32>
    %1607 = arith.mulf %1604, %1606 : vector<2x256xf32>
    %c0_432 = arith.constant 0 : index
    %1608 = memref.load %arg11[%c0_432] : memref<4xf32, #tpu.memory_space<smem>>
    %1609 = vector.broadcast %1608 : f32 to vector<2x256xf32>
    %1610 = arith.addf %1607, %1609 : vector<2x256xf32>
    %1611 = vector.shape_cast %1284 : vector<2x256xf32> to vector<1x2x256xf32>
    %cst_433 = arith.constant dense<0.000000e+00> : vector<1xf32>
    %1612 = vector.multi_reduction <add>, %1611, %cst_433 [1, 2] : vector<1x2x256xf32> to vector<1xf32>
    %1613 = vector.shape_cast %1612 : vector<1xf32> to vector<1x1x1xf32>
    %1614 = vector.extract %1613[0, 0, 0] : f32 from vector<1x1x1xf32>
    %1615 = vector.broadcast %1614 : f32 to vector<1x1xf32>
    %cst_434 = arith.constant 0.001953125 : f32
    %1616 = vector.broadcast %cst_434 : f32 to vector<1x1xf32>
    %1617 = arith.mulf %1615, %1616 : vector<1x1xf32>
    %1618 = vector.broadcast %1617 : vector<1x1xf32> to vector<2x256xf32>
    %1619 = arith.subf %1284, %1618 : vector<2x256xf32>
    %1620 = arith.mulf %1619, %1619 : vector<2x256xf32>
    %1621 = vector.shape_cast %1620 : vector<2x256xf32> to vector<1x2x256xf32>
    %cst_435 = arith.constant dense<0.000000e+00> : vector<1xf32>
    %1622 = vector.multi_reduction <add>, %1621, %cst_435 [1, 2] : vector<1x2x256xf32> to vector<1xf32>
    %1623 = vector.shape_cast %1622 : vector<1xf32> to vector<1x1x1xf32>
    %1624 = vector.extract %1623[0, 0, 0] : f32 from vector<1x1x1xf32>
    %1625 = vector.broadcast %1624 : f32 to vector<1x1xf32>
    %cst_436 = arith.constant 0.001953125 : f32
    %1626 = vector.broadcast %cst_436 : f32 to vector<1x1xf32>
    %1627 = arith.mulf %1625, %1626 : vector<1x1xf32>
    %1628 = vector.broadcast %1617 : vector<1x1xf32> to vector<2x256xf32>
    %1629 = arith.subf %1284, %1628 : vector<2x256xf32>
    %cst_437 = arith.constant 9.99999974E-6 : f32
    %1630 = vector.broadcast %cst_437 : f32 to vector<1x1xf32>
    %1631 = arith.addf %1627, %1630 : vector<1x1xf32>
    %1632 = math.rsqrt %1631 : vector<1x1xf32>
    %1633 = vector.broadcast %1632 : vector<1x1xf32> to vector<2x256xf32>
    %1634 = arith.mulf %1629, %1633 : vector<2x256xf32>
    %c1_438 = arith.constant 1 : index
    %1635 = memref.load %arg10[%c1_438] : memref<4xf32, #tpu.memory_space<smem>>
    %1636 = vector.broadcast %1635 : f32 to vector<2x256xf32>
    %1637 = arith.mulf %1634, %1636 : vector<2x256xf32>
    %c1_439 = arith.constant 1 : index
    %1638 = memref.load %arg11[%c1_439] : memref<4xf32, #tpu.memory_space<smem>>
    %1639 = vector.broadcast %1638 : f32 to vector<2x256xf32>
    %1640 = arith.addf %1637, %1639 : vector<2x256xf32>
    %1641 = vector.shape_cast %1432 : vector<2x256xf32> to vector<1x2x256xf32>
    %cst_440 = arith.constant dense<0.000000e+00> : vector<1xf32>
    %1642 = vector.multi_reduction <add>, %1641, %cst_440 [1, 2] : vector<1x2x256xf32> to vector<1xf32>
    %1643 = vector.shape_cast %1642 : vector<1xf32> to vector<1x1x1xf32>
    %1644 = vector.extract %1643[0, 0, 0] : f32 from vector<1x1x1xf32>
    %1645 = vector.broadcast %1644 : f32 to vector<1x1xf32>
    %cst_441 = arith.constant 0.001953125 : f32
    %1646 = vector.broadcast %cst_441 : f32 to vector<1x1xf32>
    %1647 = arith.mulf %1645, %1646 : vector<1x1xf32>
    %1648 = vector.broadcast %1647 : vector<1x1xf32> to vector<2x256xf32>
    %1649 = arith.subf %1432, %1648 : vector<2x256xf32>
    %1650 = arith.mulf %1649, %1649 : vector<2x256xf32>
    %1651 = vector.shape_cast %1650 : vector<2x256xf32> to vector<1x2x256xf32>
    %cst_442 = arith.constant dense<0.000000e+00> : vector<1xf32>
    %1652 = vector.multi_reduction <add>, %1651, %cst_442 [1, 2] : vector<1x2x256xf32> to vector<1xf32>
    %1653 = vector.shape_cast %1652 : vector<1xf32> to vector<1x1x1xf32>
    %1654 = vector.extract %1653[0, 0, 0] : f32 from vector<1x1x1xf32>
    %1655 = vector.broadcast %1654 : f32 to vector<1x1xf32>
    %cst_443 = arith.constant 0.001953125 : f32
    %1656 = vector.broadcast %cst_443 : f32 to vector<1x1xf32>
    %1657 = arith.mulf %1655, %1656 : vector<1x1xf32>
    %1658 = vector.broadcast %1647 : vector<1x1xf32> to vector<2x256xf32>
    %1659 = arith.subf %1432, %1658 : vector<2x256xf32>
    %cst_444 = arith.constant 9.99999974E-6 : f32
    %1660 = vector.broadcast %cst_444 : f32 to vector<1x1xf32>
    %1661 = arith.addf %1657, %1660 : vector<1x1xf32>
    %1662 = math.rsqrt %1661 : vector<1x1xf32>
    %1663 = vector.broadcast %1662 : vector<1x1xf32> to vector<2x256xf32>
    %1664 = arith.mulf %1659, %1663 : vector<2x256xf32>
    %c2_445 = arith.constant 2 : index
    %1665 = memref.load %arg10[%c2_445] : memref<4xf32, #tpu.memory_space<smem>>
    %1666 = vector.broadcast %1665 : f32 to vector<2x256xf32>
    %1667 = arith.mulf %1664, %1666 : vector<2x256xf32>
    %c2_446 = arith.constant 2 : index
    %1668 = memref.load %arg11[%c2_446] : memref<4xf32, #tpu.memory_space<smem>>
    %1669 = vector.broadcast %1668 : f32 to vector<2x256xf32>
    %1670 = arith.addf %1667, %1669 : vector<2x256xf32>
    %1671 = vector.shape_cast %1580 : vector<2x256xf32> to vector<1x2x256xf32>
    %cst_447 = arith.constant dense<0.000000e+00> : vector<1xf32>
    %1672 = vector.multi_reduction <add>, %1671, %cst_447 [1, 2] : vector<1x2x256xf32> to vector<1xf32>
    %1673 = vector.shape_cast %1672 : vector<1xf32> to vector<1x1x1xf32>
    %1674 = vector.extract %1673[0, 0, 0] : f32 from vector<1x1x1xf32>
    %1675 = vector.broadcast %1674 : f32 to vector<1x1xf32>
    %cst_448 = arith.constant 0.001953125 : f32
    %1676 = vector.broadcast %cst_448 : f32 to vector<1x1xf32>
    %1677 = arith.mulf %1675, %1676 : vector<1x1xf32>
    %1678 = vector.broadcast %1677 : vector<1x1xf32> to vector<2x256xf32>
    %1679 = arith.subf %1580, %1678 : vector<2x256xf32>
    %1680 = arith.mulf %1679, %1679 : vector<2x256xf32>
    %1681 = vector.shape_cast %1680 : vector<2x256xf32> to vector<1x2x256xf32>
    %cst_449 = arith.constant dense<0.000000e+00> : vector<1xf32>
    %1682 = vector.multi_reduction <add>, %1681, %cst_449 [1, 2] : vector<1x2x256xf32> to vector<1xf32>
    %1683 = vector.shape_cast %1682 : vector<1xf32> to vector<1x1x1xf32>
    %1684 = vector.extract %1683[0, 0, 0] : f32 from vector<1x1x1xf32>
    %1685 = vector.broadcast %1684 : f32 to vector<1x1xf32>
    %cst_450 = arith.constant 0.001953125 : f32
    %1686 = vector.broadcast %cst_450 : f32 to vector<1x1xf32>
    %1687 = arith.mulf %1685, %1686 : vector<1x1xf32>
    %1688 = vector.broadcast %1677 : vector<1x1xf32> to vector<2x256xf32>
    %1689 = arith.subf %1580, %1688 : vector<2x256xf32>
    %cst_451 = arith.constant 9.99999974E-6 : f32
    %1690 = vector.broadcast %cst_451 : f32 to vector<1x1xf32>
    %1691 = arith.addf %1687, %1690 : vector<1x1xf32>
    %1692 = math.rsqrt %1691 : vector<1x1xf32>
    %1693 = vector.broadcast %1692 : vector<1x1xf32> to vector<2x256xf32>
    %1694 = arith.mulf %1689, %1693 : vector<2x256xf32>
    %c3_452 = arith.constant 3 : index
    %1695 = memref.load %arg10[%c3_452] : memref<4xf32, #tpu.memory_space<smem>>
    %1696 = vector.broadcast %1695 : f32 to vector<2x256xf32>
    %1697 = arith.mulf %1694, %1696 : vector<2x256xf32>
    %c3_453 = arith.constant 3 : index
    %1698 = memref.load %arg11[%c3_453] : memref<4xf32, #tpu.memory_space<smem>>
    %1699 = vector.broadcast %1698 : f32 to vector<2x256xf32>
    %1700 = arith.addf %1697, %1699 : vector<2x256xf32>
    %c0_454 = arith.constant 0 : index
    %c0_455 = arith.constant 0 : index
    %c128_456 = arith.constant 128 : index
    %1701 = vector.load %arg0[%c0_454, %c0_455, %c128_456] : memref<4x2x512xf32, #tpu.memory_space<vmem>>, vector<1x2x256xf32>
    %1702 = vector.shape_cast %1701 : vector<1x2x256xf32> to vector<2x256xf32>
    %1703 = arith.addf %1702, %1610 : vector<2x256xf32>
    %c0_457 = arith.constant 0 : index
    %c0_458 = arith.constant 0 : index
    %c0_459 = arith.constant 0 : index
    %1704 = vector.load %arg12[%c0_457, %c0_458, %c0_459] : memref<4x2x256xf32, #tpu.memory_space<vmem>>, vector<1x2x256xf32>
    %1705 = vector.shape_cast %1704 : vector<1x2x256xf32> to vector<2x256xf32>
    %1706 = vector.shape_cast %1703 : vector<2x256xf32> to vector<1x2x256xf32>
    tpu.vector_store %arg12[%c0_457, %c0_458, %c0_459], %1706 {strides = array<i32>} : memref<4x2x256xf32, #tpu.memory_space<vmem>>, vector<1x2x256xf32>,
    %c1_460 = arith.constant 1 : index
    %c0_461 = arith.constant 0 : index
    %c128_462 = arith.constant 128 : index
    %1707 = vector.load %arg0[%c1_460, %c0_461, %c128_462] : memref<4x2x512xf32, #tpu.memory_space<vmem>>, vector<1x2x256xf32>
    %1708 = vector.shape_cast %1707 : vector<1x2x256xf32> to vector<2x256xf32>
    %1709 = arith.addf %1708, %1640 : vector<2x256xf32>
    %c1_463 = arith.constant 1 : index
    %c0_464 = arith.constant 0 : index
    %c0_465 = arith.constant 0 : index
    %1710 = vector.load %arg12[%c1_463, %c0_464, %c0_465] : memref<4x2x256xf32, #tpu.memory_space<vmem>>, vector<1x2x256xf32>
    %1711 = vector.shape_cast %1710 : vector<1x2x256xf32> to vector<2x256xf32>
    %1712 = vector.shape_cast %1709 : vector<2x256xf32> to vector<1x2x256xf32>
    tpu.vector_store %arg12[%c1_463, %c0_464, %c0_465], %1712 {strides = array<i32>} : memref<4x2x256xf32, #tpu.memory_space<vmem>>, vector<1x2x256xf32>,
    %c2_466 = arith.constant 2 : index
    %c0_467 = arith.constant 0 : index
    %c128_468 = arith.constant 128 : index
    %1713 = vector.load %arg0[%c2_466, %c0_467, %c128_468] : memref<4x2x512xf32, #tpu.memory_space<vmem>>, vector<1x2x256xf32>
    %1714 = vector.shape_cast %1713 : vector<1x2x256xf32> to vector<2x256xf32>
    %1715 = arith.addf %1714, %1670 : vector<2x256xf32>
    %c2_469 = arith.constant 2 : index
    %c0_470 = arith.constant 0 : index
    %c0_471 = arith.constant 0 : index
    %1716 = vector.load %arg12[%c2_469, %c0_470, %c0_471] : memref<4x2x256xf32, #tpu.memory_space<vmem>>, vector<1x2x256xf32>
    %1717 = vector.shape_cast %1716 : vector<1x2x256xf32> to vector<2x256xf32>
    %1718 = vector.shape_cast %1715 : vector<2x256xf32> to vector<1x2x256xf32>
    tpu.vector_store %arg12[%c2_469, %c0_470, %c0_471], %1718 {strides = array<i32>} : memref<4x2x256xf32, #tpu.memory_space<vmem>>, vector<1x2x256xf32>,
    %c3_472 = arith.constant 3 : index
    %c0_473 = arith.constant 0 : index
    %c128_474 = arith.constant 128 : index
    %1719 = vector.load %arg0[%c3_472, %c0_473, %c128_474] : memref<4x2x512xf32, #tpu.memory_space<vmem>>, vector<1x2x256xf32>
    %1720 = vector.shape_cast %1719 : vector<1x2x256xf32> to vector<2x256xf32>
    %1721 = arith.addf %1720, %1700 : vector<2x256xf32>
    %c3_475 = arith.constant 3 : index
    %c0_476 = arith.constant 0 : index
    %c0_477 = arith.constant 0 : index
    %1722 = vector.load %arg12[%c3_475, %c0_476, %c0_477] : memref<4x2x256xf32, #tpu.memory_space<vmem>>, vector<1x2x256xf32>
    %1723 = vector.shape_cast %1722 : vector<1x2x256xf32> to vector<2x256xf32>
    %1724 = vector.shape_cast %1721 : vector<2x256xf32> to vector<1x2x256xf32>
    tpu.vector_store %arg12[%c3_475, %c0_476, %c0_477], %1724 {strides = array<i32>} : memref<4x2x256xf32, #tpu.memory_space<vmem>>, vector<1x2x256xf32>,
    return
  }
}

</mosaic_0001>

<bundles_post_ra>
// kernel: residual_block.1
= control target key start
LH: loop header
LB: loop body
LE: loop exit
PB: predicated region body
PF: predicated region fallthrough
CT: control target
= control target key end

     0   :  { %18 = vsyncpa [#allocation5], 0  ;;  %s6025_s0 = inlined_call_operand.vmem [shape: f32[4,2,512], index: 0, kind: input, shape index: {}]   ;;  %s6026_s1 = inlined_call_operand.vmem [shape: f32[1,256], index: 1, kind: input, shape index: {}]   ;;  %s6027_s2 = inlined_call_operand.vmem [shape: f32[1,256], index: 2, kind: input, shape index: {}]   ;;  %s6028_s3 = inlined_call_operand.vmem [shape: f32[144], index: 3, kind: input, shape index: {}]   ;;  %s6029_s4 = inlined_call_operand.vmem [shape: f32[4], index: 4, kind: input, shape index: {}]   ;;  %s6030_s5 = inlined_call_operand.vmem [shape: f32[4], index: 5, kind: input, shape index: {}]   ;;  %s6031_s6 = inlined_call_operand.vmem [shape: f32[4], index: 6, kind: input, shape index: {}]   ;;  %s6032_s7 = inlined_call_operand.<no memory space> [shape: f32[1], index: 7, kind: input, shape index: {}]   ;;  %s6033_s8 = inlined_call_operand.vmem [shape: f32[144], index: 8, kind: input, shape index: {}]   ;;  %s6034_s9 = inlined_call_operand.vmem [shape: f32[4], index: 9, kind: input, shape index: {}]   ;;  %s6035_s10 = inlined_call_operand.vmem [shape: f32[4], index: 10, kind: input, shape index: {}]   ;;  %s6036_s11 = inlined_call_operand.vmem [shape: f32[4], index: 11, kind: input, shape index: {}]   ;;  %s6037_s12 = inlined_call_operand.vmem [shape: f32[4,2,256], index: 12, kind: output, shape index: {}]  }
   0x1   :  { %19 = vsyncpa [#allocation7], 0 }
   0x2   :  { %20 = vsyncpa [#allocation10], 0 }
   0x3   :  { %21 = vsyncpa [#allocation13], 0  ;;  %s45_s23 = sshll.u32 %s6029_s4, 4  ;;  %s46_s23 = int_to_ptr.vmem [resolvable:$true] %s45_s23 }
   0x4   :  { %22 = vsyncpa [#allocation16], 0  ;;  %s65_s26 = sshll.u32 %s6031_s6, 4  ;;  %s4256_s27 = scalar_lea.vmem %s46_s23, 16  ;;  %s66_s26 = int_to_ptr.vmem [resolvable:$true] %s65_s26 }
   0x5   :  { %p4257_p0 = scmp.ne.s32.totalorder %s46_s23, %s4256_s27  ;;  %p4261_p1 = scmp.lt.s32.totalorder %s46_s23, %s46_s23 }
   0x6   :  { %p4262_p2 = scmp.lt.s32.totalorder %s4256_s27, %s4256_s27 }
   0x8   :  { %p4263_p3 = por %p4262_p2, %p4261_p1 }
   0xa   :  { %p4264_p4 = pnand %p4263_p3, %p4257_p0 }
   0xc   :  { %4267 = shalt.err (!%p4264_p4)
}
   0xd   :  { %s4362_s28 = smov [#allocation6]   ;;  %s4268_s29 = scalar_lea.vmem %s66_s26, 16 }
   0xe   :  { %48 = dma.vmem_to_smem %s46_s23, 16, %s4362_s28, [#allocation7]  }
   0xf   :  { %p4269_p5 = scmp.ne.s32.totalorder %s66_s26, %s4268_s29  ;;  %p4273_p6 = scmp.lt.s32.totalorder %s66_s26, %s66_s26 }
  0x10   :  { %p4274_p7 = scmp.lt.s32.totalorder %s4268_s29, %s4268_s29 }
  0x12   :  { %p4275_p8 = por %p4274_p7, %p4273_p6 }
  0x14   :  { %p4276_p9 = pnand %p4275_p8, %p4269_p5 }
  0x16   :  { %4279 = shalt.err (!%p4276_p9)
}
  0x17   :  { %s4363_s4 = smov [#allocation9]   ;;  %s87_s13 = sshll.u32 %s6034_s9, 4  ;;  %s88_s13 = int_to_ptr.vmem [resolvable:$true] %s87_s13 }
  0x18   :  { %68 = dma.vmem_to_smem %s66_s26, 16, %s4363_s4, [#allocation10]  }
  0x19   :  { %s35_s16 = sshll.u32 %s6028_s3, 4  ;;  %s4280_s17 = scalar_lea.vmem %s88_s13, 16  ;;  %s36_s16 = int_to_ptr.vmem [resolvable:$true] %s35_s16 }
  0x1a   :  { %p4281_p10 = scmp.ne.s32.totalorder %s88_s13, %s4280_s17  ;;  %p4285_p11 = scmp.lt.s32.totalorder %s88_s13, %s88_s13 }
  0x1b   :  { %p4286_p12 = scmp.lt.s32.totalorder %s4280_s17, %s4280_s17 }
  0x1d   :  { %p4287_p13 = por %p4286_p12, %p4285_p11 }
  0x1f   :  { %p4288_p0 = pnand %p4287_p13, %p4281_p10 }
  0x21   :  { %4291 = shalt.err (!%p4288_p0)
}
  0x22   :  { %s4364_s18 = smov [#allocation12]   ;;  %s4292_s19 = scalar_lea.vmem %s36_s16, 32 }
  0x23   :  { %90 = dma.vmem_to_smem %s88_s13, 16, %s4364_s18, [#allocation13]  }
  0x24   :  { %p4293_p1 = scmp.ne.s32.totalorder %s36_s16, %s4292_s19  ;;  %p4297_p2 = scmp.lt.s32.totalorder %s36_s16, %s36_s16 }
  0x25   :  { %p4298_p3 = scmp.lt.s32.totalorder %s4292_s19, %s4292_s19 }
  0x27   :  { %p4299_p4 = por %p4298_p3, %p4297_p2 }
  0x29   :  { %p4300_p5 = pnand %p4299_p4, %p4293_p1 }
  0x2b   :  { %4303 = shalt.err (!%p4300_p5)
}
  0x2c   :  { %s4365_s9 = smov [#allocation4]   ;;  %s55_s21 = sshll.u32 %s6030_s5, 4  ;;  %s56_s21 = int_to_ptr.vmem [resolvable:$true] %s55_s21 }
  0x2d   :  { %38 = dma.vmem_to_smem %s36_s16, 32, %s4365_s9, [#allocation5]  }
  0x2e   :  { %s77_s24 = sshll.u32 %s6033_s8, 4  ;;  %s4304_s25 = scalar_lea.vmem %s56_s21, 16  ;;  %s78_s24 = int_to_ptr.vmem [resolvable:$true] %s77_s24 }
  0x2f   :  { %p4305_p6 = scmp.ne.s32.totalorder %s56_s21, %s4304_s25  ;;  %p4309_p7 = scmp.lt.s32.totalorder %s56_s21, %s56_s21 }
  0x30   :  { %p4310_p8 = scmp.lt.s32.totalorder %s4304_s25, %s4304_s25 }
  0x32   :  { %p4311_p9 = por %p4310_p8, %p4309_p7 }
  0x34   :  { %p4312_p10 = pnand %p4311_p9, %p4305_p6 }
  0x36   :  { %4315 = shalt.err (!%p4312_p10)
}
  0x37   :  { %s4366_s26 = smov [#allocation8]   ;;  %s4316_s27 = scalar_lea.vmem %s78_s24, 32 }
  0x38   :  { %58 = dma.vmem_to_smem %s56_s21, 16, %s4366_s26, [#allocation7]  }
  0x39   :  { %p4317_p11 = scmp.ne.s32.totalorder %s78_s24, %s4316_s27  ;;  %p4321_p12 = scmp.lt.s32.totalorder %s78_s24, %s78_s24 }
  0x3a   :  { %p4322_p13 = scmp.lt.s32.totalorder %s4316_s27, %s4316_s27 }
  0x3c   :  { %p4323_p0 = por %p4322_p13, %p4321_p12 }
  0x3e   :  { %p4324_p1 = pnand %p4323_p0, %p4317_p11 }
  0x40   :  { %4327 = shalt.err (!%p4324_p1)
}
  0x41   :  { %s4367_s5 = smov [#allocation11]   ;;  %s97_s29 = sshll.u32 %s6035_s10, 4  ;;  %s98_s29 = int_to_ptr.vmem [resolvable:$true] %s97_s29 }
  0x42   :  { %80 = dma.vmem_to_smem %s78_s24, 32, %s4367_s5, [#allocation10]  }
  0x43   :  { %s107_s30 = sshll.u32 %s6036_s11, 4  ;;  %s4328_s13 = scalar_lea.vmem %s98_s29, 16  ;;  %s108_s30 = int_to_ptr.vmem [resolvable:$true] %s107_s30 }
  0x44   :  { %p4329_p2 = scmp.ne.s32.totalorder %s98_s29, %s4328_s13  ;;  %p4333_p3 = scmp.lt.s32.totalorder %s98_s29, %s98_s29 }
  0x45   :  { %p4334_p4 = scmp.lt.s32.totalorder %s4328_s13, %s4328_s13 }
  0x47   :  { %p4335_p5 = por %p4334_p4, %p4333_p3 }
  0x49   :  { %p4336_p6 = pnand %p4335_p5, %p4329_p2 }
  0x4b   :  { %4339 = shalt.err (!%p4336_p6)
}
  0x4c   :  { %s4368_s14 = smov [#allocation14]   ;;  %s4340_s15 = scalar_lea.vmem %s108_s30, 16 }
  0x4d   :  { %100 = dma.vmem_to_smem %s98_s29, 16, %s4368_s14, [#allocation13]  }
  0x4e   :  { %p4341_p7 = scmp.ne.s32.totalorder %s108_s30, %s4340_s15  ;;  %p4345_p8 = scmp.lt.s32.totalorder %s108_s30, %s108_s30 }
  0x4f   :  { %p4346_p9 = scmp.lt.s32.totalorder %s4340_s15, %s4340_s15 }
  0x51   :  { %p4347_p10 = por %p4346_p9, %p4345_p8 }
  0x53   :  { %p4348_p11 = pnand %p4347_p10, %p4341_p7 }
  0x55   :  { %4351 = shalt.err (!%p4348_p11)
}
  0x56   :  { %s4369_s10 = smov [#allocation15]  }
  0x57   :  { %110 = dma.vmem_to_smem %s108_s30, 16, %s4369_s10, [#allocation16]  }
  0x58   :  { %4352 = dma.done.wait [#allocation5], 32  }
  0x59   :  { %4353 = vsyncadd [#allocation5], 4294967264 }
  0x5a   :  { %4354 = dma.done.wait [#allocation7], 32  }
  0x5b   :  { %4355 = vsyncadd [#allocation7], 4294967264 }
  0x5c   :  { %4356 = dma.done.wait [#allocation10], 48  }
  0x5d   :  { %4357 = vsyncadd [#allocation10], 4294967248 }
  0x5e   :  { %4358 = dma.done.wait [#allocation13], 32  }
  0x5f   :  { %4359 = vsyncadd [#allocation13], 4294967264 }
  0x60   :  { %4360 = dma.done.wait [#allocation16], 16  }
  0x61   :  { %4361 = vsyncadd [#allocation16], 4294967280 }
  0x62   :  { %135 = sfence }
  0x63   :  { %v140_v0 = vlaneseq  ;;  %v4370_v1 = vmov 1983009808   ;;  %v137_v4 = vld [vmem:[%s6027_s2] sm:$0x3]  ;;  %s3852_s19 = sld [smem:[#allocation4 + $0x1]]  ;;  %s4371_s9 = smov 113  }
  0x64   :  { %v150_v2 = vunpack.c.l.s4 %v4370_v1  ;;  %v136_v6 = vld [vmem:[%s6026_s1] sm:$0x3]  ;;  %s4372_s2 = smov 1   ;;  %s4373_s1 = smov 127   ;;  %vm183_vm0 = vcmask 924672   ;;  %vm199_vm1 = vcmask 7168  }
  0x65   :  { %v141_v3 = vshrl.u32 %v140_v0, 7  ;;  %s4374_s3 = smov 15   ;;  %v4487_v18 = vld [vmem:[%s6025_s0] sm:$0x3f]  ;;  %s4375_s22 = smov 17   ;;  %vm190_vm2 = vcmask 1039360  }
  0x66   :  { %v151_v5 = vunpack.c.0.s8 %v150_v2  ;;  %s4376_s23 = smov 111   ;;  %s3853_s24 = sld [smem:[#allocation4 + $0x2]]  ;;  %vm206_vm3 = vcmask 121856   ;;  %v4512_v32 = vld [vmem:[%s6025_s0 + $0x2] sm:$0xf]  ;;  %vm213_vm4 = vcmask 138240  }
  0x67   :  { %v142_v7 = vsub.s32 0, %v141_v3  ;;  %v146_v8 = vsub.s32 1, %v141_v3  ;;  %s4493_s25 = sld [smem:[#allocation4 + $0x4]]  ;;  %v4529_v39 = vld [vmem:[%s6025_s0 + $0x2] sm:$0x3f]  ;;  %s4377_s13 = smov 126  }
  0x68   :  { %v4479_v9 = vsub.s32 %v151_v5, %v141_v3  ;;  %s4495_s26 = sld [smem:[#allocation4 + $0x3]]  ;;  %s4378_s10 = smov 112   ;;  %v4570_v55 = vld [vmem:[%s6025_s0 + $0x8] sm:$0x3f]  ;;  %vm159_vm5 = vcmask 908288   ;;  %vm268_vm6 = vcmask 1031168  }
  0x69   :  { %v167_v10 = vrot.slane %v137_v4, %v142_v7  ;;  %v171_v11 = vrot.slane %v137_v4, %v146_v8  ;;  %v143_v12 = vrot.slane %v136_v6, %v142_v7  ;;  %v147_v13 = vrot.slane %v136_v6, %v146_v8  ;;  %s4497_s27 = sld [smem:[#allocation4 + $0x6]]  ;;  %s4381_s20 = smov 95   ;;  %v4588_v62 = vld [vmem:[%s6025_s0 + $0xa] sm:$0xf] }
  0x6a   :  { %v252_v19 = vstv %s3852_s19  ;;  %s4501_s5 = sld [smem:[#allocation4 + $0x5]]  ;;  %s4379_s19 = smov 96   ;;  %v4599_v3 = vld [vmem:[%s6025_s0 + $0xa] sm:$0x3f]  ;;  %vm279_vm7 = vcmask 916480   ;;  %vm300_vm8 = vcmask 900096  }
  0x6b   :  { %v172_v14 = vcombine.low %v167_v10, %v171_v11  ;;  %v148_v15 = vcombine.low %v143_v12, %v147_v13  ;;  %v253_v20 = vmul.f32 %v252_v19, %v4487_v18  ;;  %s4507_s8 = sld [smem:[#allocation4 + $0x7]]  ;;  %s4382_s21 = smov 94   ;;  %vm311_vm9 = vcmask 785408  }
  0x6c   :  { %v262_v26 = vstv %s3853_s24  ;;  %s4515_s4 = sld [smem:[#allocation4 + $0x8]]  ;;  %vm322_vm10 = vcmask 777216   ;;  %vm333_vm11 = vcmask 769024   ;;  %vm1636_vm12 = vcmask 1041408  }
  0x6d   :  { %v179_v16 = vrot.slane %v172_v14, %v4479_v9  ;;  %v155_v17 = vrot.slane %v148_v15, %v4479_v9  ;;  %v284_v33 = vstv %s4493_s25  ;;  %s4542_s14 = sld [smem:[#allocation4 + $0xa]] }
  0x6e   :  { %v273_v38 = vstv %s4495_s26  ;;  %v285_v40 = vmul.f32 %v284_v33, %v4512_v32  ;;  %s4553_s15 = sld [smem:[#allocation4 + $0xb]] }
  0x6f   :  { %180 = vrot.lane.b32.xlu0 %v179_v16, %s4371_s9  ;;  %196 = vrot.lane.b32.xlu1 %v179_v16, %s4372_s2  ;;  %v305_v45 = vstv %s4497_s27  ;;  %s4564_s11 = sld [smem:[#allocation4 + $0xd]]  ;;  %s4380_s9 = smov 110  }
  0x70   :  { %v294_v49 = vstv %s4501_s5  ;;  %s3863_s18 = sld [smem:[#allocation4 + $0xc]] }
  0x71   :  { %v316_v52 = vstv %s4507_s8  ;;  %s3865_s2 = sld [smem:[#allocation4 + $0xe]] }
  0x72   :  { %v327_v53 = vstv %s4515_s4  ;;  %v317_v56 = vmul.f32 %v316_v52, %v4529_v39  ;;  %s3867_s26 = sld [smem:[#allocation4 + $0x10]] }
  0x73   :  { %187 = vrot.lane.b32.xlu0 %v155_v17, %s4373_s1  ;;  %203 = vrot.lane.b32.xlu1 %v155_v17, %s4374_s3  ;;  %v342_v58 = vstv %s4542_s14  ;;  %s3866_s3 = sld [smem:[#allocation4 + $0xf]] }
  0x74   :  { %v352_v60 = vstv %s4553_s15  ;;  %v343_v61 = vmul.f32 %v4570_v55, %v342_v58  ;;  %s3868_s8 = sld [smem:[#allocation4 + $0x11]] }
  0x75   :  { %v372_v63 = vstv %s4564_s11  ;;  %s3870_s28 = sld [smem:[#allocation4 + $0x13]] }
  0x76   :  { %v362_v2 = vstv %s3863_s18  ;;  %v373_v4 = vmul.f32 %v4588_v62, %v372_v63  ;;  %s3871_s29 = sld [smem:[#allocation4 + $0x14]]  ;;  %v4691_v63 = vld [vmem:[%s6025_s0 + $0x1a] sm:$0xf] }
  0x77   :  { %210 = vrot.lane.b32.xlu0 %v179_v16, %s4375_s22  ;;  %156 = vrot.lane.b32.xlu1 %v155_v17, %s4376_s23  ;;  %v382_v8 = vstv %s3865_s2  ;;  %s3873_s4 = sld [smem:[#allocation4 + $0x16]]  ;;  %v4624_v16 = vld [vmem:[%s6025_s0 + $0x10] sm:$0x3f] }
  0x78   :  { %v402_v11 = vstv %s3867_s26  ;;  %s3872_s14 = sld [smem:[#allocation4 + $0x15]] }
  0x79   :  { %v392_v10 = vstv %s3866_s3  ;;  %v403_v17 = vmul.f32 %v4599_v3, %v402_v11  ;;  %s3874_s15 = sld [smem:[#allocation4 + $0x17]] }
  0x7a   :  { %v412_v15 = vstv %s3868_s8  ;;  %s3875_s11 = sld [smem:[#allocation4 + $0x18]] }
  0x7b   :  { %255 = vrot.lane.b32.xlu0 %v253_v20, %s4373_s1  ;;  %v426_v19 = vstv %s3870_s28  ;;  %s3876_s18 = sld [smem:[#allocation4 + $0x19]] }
  0x7c   :  { %s3877_s24 = sld [smem:[#allocation4 + $0x1a]] }
  0x7d   :  { %s3879_s25 = sld [smem:[#allocation4 + $0x1c]] }
  0x7e   :  { %s3880_s26 = sld [smem:[#allocation4 + $0x1d]] }
  0x7f   :  { %s3882_s27 = sld [smem:[#allocation4 + $0x1f]] }
  0x80   :  { %s3881_s28 = sld [smem:[#allocation4 + $0x1e]] }
  0x81   :  { %s3886_s16 = sld [smem:[#allocation4 + $0x23]] }
  0x82   :  { %v496_v52 = vstv %s3877_s24  ;;  %s247_s17 = sld [smem:[#allocation4]] }
  0x83   :  { %s3869_s2 = sld [smem:[#allocation4 + $0x12]] }
  0x84   :  { %s3878_s3 = sld [smem:[#allocation4 + $0x1b]] }
  0x85   :  { %s589_s24 = sld [smem:[#allocation6]] }
  0x86   :  { %s3890_s5 = sld [smem:[#allocation4 + $0x27]] }
  0x87   :  { %s3891_s8 = sld [smem:[#allocation4 + $0x28]] }
  0x88   :  { %s3895_s6 = sld [smem:[#allocation4 + $0x2c]] }
  0x89   :  { %s3897_s30 = sld [smem:[#allocation4 + $0x2e]] }
  0xe1   :  { %v181_v21 = vpop.permute.xlu0 %180  ;;  %v197_v22 = vpop.permute.xlu1 %196 }
  0xe2   :  { %v182_v23 = vrot.slane %v181_v21, 6  ;;  %v198_v25 = vrot.slane %v197_v22, 6 }
  0xe4   :  { %v4499_v24 = vsel %vm183_vm0, %v182_v23, %v181_v21  ;;  %v4518_v35 = vsel %vm199_vm1, %v198_v25, %v197_v22  ;;  %v436_v22 = vstv %s3871_s29  ;;  %v427_v23 = vmul.f32 %v4624_v16, %v426_v19  ;;  %v4640_v25 = vld [vmem:[%s6025_s0 + $0x12] sm:$0xf]  ;;  %s3883_s29 = sld [smem:[#allocation4 + $0x20]] }
  0xe5   :  { %6062 = vst [vmem:[#allocation22_spill] sm:$0xff] %v4499_v24  ;;  %v188_v27 = vpop.permute.xlu0 %187  ;;  %v4505_v28 = vmul.f32 %v4499_v24, %v4487_v18  ;;  %v204_v29 = vpop.permute.xlu1 %203  ;;  %6063 = vst [vmem:[#allocation23_spill] sm:$0xff] %v4518_v35  ;;  %v4547_v47 = vmul.f32 %v4518_v35, %v4529_v39  ;;  %v4579_v59 = vmul.f32 %v4570_v55, %v4499_v24 }
  0xe6   :  { %v189_v30 = vrot.slane %v188_v27, 6  ;;  %v205_v31 = vrot.slane %v204_v29, 6  ;;  %v4607_v6 = vmul.f32 %v4599_v3, %v4518_v35  ;;  %v4632_v21 = vmul.f32 %v4624_v16, %v4499_v24 }
  0xe7   :  { %v263_v34 = vmul.f32 %v262_v26, %v4505_v28  ;;  %v295_v54 = vmul.f32 %v294_v49, %v4547_v47  ;;  %v353_v0 = vmul.f32 %v352_v60, %v4579_v59  ;;  %v456_v26 = vstv %s3873_s4  ;;  %s3884_s4 = sld [smem:[#allocation4 + $0x21]] }
  0xe8   :  { %v4521_v36 = vsel %vm190_vm2, %v189_v30, %v188_v27  ;;  %v4523_v37 = vsel %vm206_vm3, %v205_v31, %v204_v29  ;;  %v383_v12 = vmul.f32 %v382_v8, %v4607_v6  ;;  %v437_v27 = vmul.f32 %v436_v22, %v4632_v21  ;;  %v4650_v31 = vld [vmem:[%s6025_s0 + $0x12] sm:$0x3f]  ;;  %v4701_v8 = vld [vmem:[%s6025_s0 + $0x1a] sm:$0x3f] }
  0xe9   :  { %6064 = vst [vmem:[#allocation24_spill] sm:$0xff] %v4521_v36  ;;  %6065 = vst [vmem:[#allocation25_spill] sm:$0xff] %v4523_v37  ;;  %265 = vrot.lane.b32.xlu1 %v263_v34, %s4377_s13  ;;  %v4535_v41 = vmul.f32 %v4521_v36, %v4487_v18  ;;  %v211_v42 = vpop.permute.xlu0 %210  ;;  %v4539_v43 = vmul.f32 %v4523_v37, %v4529_v39  ;;  %v4594_v1 = vmul.f32 %v4570_v55, %v4521_v36 }
  0xea   :  { %v212_v44 = vrot.slane %v211_v42, 6  ;;  %v4611_v7 = vmul.f32 %v4599_v3, %v4523_v37  ;;  %v4645_v29 = vmul.f32 %v4624_v16, %v4521_v36  ;;  %v446_v30 = vstv %s3872_s14  ;;  %s3885_s14 = sld [smem:[#allocation4 + $0x22]] }
  0xeb   :  { %v274_v46 = vmul.f32 %v273_v38, %v4535_v41  ;;  %v306_v50 = vmul.f32 %v305_v45, %v4539_v43  ;;  %v363_v5 = vmul.f32 %v362_v2, %v4594_v1  ;;  %v457_v33 = vmul.f32 %v4640_v25, %v456_v26 }
  0xec   :  { %v4550_v48 = vsel %vm213_vm4, %v212_v44, %v211_v42  ;;  %v393_v13 = vmul.f32 %v392_v10, %v4611_v7  ;;  %v447_v34 = vmul.f32 %v446_v30, %v4645_v29  ;;  %v4658_v38 = vmul.f32 %v4650_v31, %v4518_v35 }
  0xed   :  { %6066 = vst [vmem:[#allocation26_spill] sm:$0xff] %v4550_v48  ;;  %287 = vrot.lane.b32.xlu1 %v285_v40, %s4376_s23  ;;  %276 = vrot.lane.b32.xlu0 %v274_v46, %s4378_s10  ;;  %v4560_v51 = vmul.f32 %v4550_v48, %v4529_v39  ;;  %v4619_v14 = vmul.f32 %v4599_v3, %v4550_v48  ;;  %v466_v42 = vstv %s3874_s15  ;;  %v476_v44 = vstv %s3875_s11  ;;  %s3900_s15 = sld [smem:[#allocation4 + $0x31]] }
  0xee   :  { %v4662_v40 = vmul.f32 %v4650_v31, %v4523_v37  ;;  %v486_v45 = vstv %s3876_s18  ;;  %v467_v46 = vmul.f32 %v466_v42, %v4658_v38  ;;  %v520_v60 = vstv %s3880_s26  ;;  %s3860_s18 = sld [smem:[#allocation4 + $0x9]] }
  0xef   :  { %v328_v57 = vmul.f32 %v327_v53, %v4560_v51  ;;  %v413_v20 = vmul.f32 %v412_v15, %v4619_v14  ;;  %v4675_v53 = vld [vmem:[%s6025_s0 + $0x18] sm:$0x3f]  ;;  %v550_v15 = vstv %s3883_s29  ;;  %v580_v26 = vstv %s3886_s16  ;;  %s3888_s26 = sld [smem:[#allocation4 + $0x25]] }
  0xf0   :  { %v477_v49 = vmul.f32 %v476_v44, %v4662_v40  ;;  %v4683_v58 = vmul.f32 %v4675_v53, %v4499_v24  ;;  %v570_v19 = vstv %s3885_s14  ;;  %v256_v44 = vpop.permute.xlu0 %255  ;;  %s3893_s29 = sld [smem:[#allocation4 + $0x2a]] }
  0xf1   :  { %308 = vrot.lane.b32.xlu1 %v306_v50, %s4379_s19  ;;  %297 = vrot.lane.b32.xlu0 %v295_v54, %s4380_s9  ;;  %v4670_v50 = vmul.f32 %v4650_v31, %v4550_v48  ;;  %v487_v54 = vmul.f32 %v4650_v31, %v486_v45  ;;  %s3899_s14 = sld [smem:[#allocation4 + $0x30]] }
  0xf2   :  { %6067 = vst [vmem:[#allocation27_spill] sm:$0xff] %v4683_v58  ;;  %v521_v2 = vmul.f32 %v520_v60, %v4683_v58  ;;  %s3901_s11 = sld [smem:[#allocation4 + $0x32]] }
  0xf3   :  { %s3902_s16 = sld [smem:[#allocation4 + $0x33]] }
  0xf5   :  { %319 = vrot.lane.b32.xlu0 %v317_v56, %s4381_s20  ;;  %330 = vrot.lane.b32.xlu1 %v328_v57, %s4382_s21  ;;  %v510_v56 = vstv %s3879_s25  ;;  %v497_v57 = vmul.f32 %v496_v52, %v4670_v50  ;;  %s3898_s25 = sld [smem:[#allocation4 + $0x2f]] }
  0xf9   :  { %345 = vrot.lane.b32.xlu0 %v343_v61, %s4373_s1  ;;  %355 = vrot.lane.b32.xlu1 %v353_v0, %s4377_s13  ;;  %v511_v61 = vmul.f32 %v4675_v53, %v510_v56  ;;  %v540_v0 = vstv %s3882_s27  ;;  %s3889_s27 = sld [smem:[#allocation4 + $0x26]] }
  0xfa   :  { %v541_v10 = vmul.f32 %v4691_v63, %v540_v0 }
  0xfd   :  { %365 = vrot.lane.b32.xlu0 %v363_v5, %s4378_s10  ;;  %375 = vrot.lane.b32.xlu1 %v373_v4, %s4376_s23  ;;  %v4696_v4 = vmul.f32 %v4675_v53, %v4521_v36  ;;  %v530_v5 = vstv %s3881_s28  ;;  %s3892_s28 = sld [smem:[#allocation4 + $0x29]] }
  0xff   :  { %v531_v11 = vmul.f32 %v530_v5, %v4696_v4 }
 0x101   :  { %385 = vrot.lane.b32.xlu0 %v383_v12, %s4380_s9  ;;  %395 = vrot.lane.b32.xlu1 %v393_v13, %s4379_s19  ;;  %v4709_v12 = vmul.f32 %v4701_v8, %v4518_v35  ;;  %v4713_v13 = vmul.f32 %v4701_v8, %v4523_v37 }
 0x103   :  { %6068 = vst [vmem:[#allocation28_spill] sm:$0xff] %v4713_v13 }
 0x105   :  { %405 = vrot.lane.b32.xlu0 %v403_v17, %s4381_s20  ;;  %415 = vrot.lane.b32.xlu1 %v413_v20, %s4382_s21  ;;  %v560_v17 = vstv %s3884_s4  ;;  %v551_v20 = vmul.f32 %v550_v15, %v4709_v12  ;;  %s3894_s4 = sld [smem:[#allocation4 + $0x2b]] }
 0x106   :  { %v561_v22 = vmul.f32 %v560_v17, %v4713_v13 }
 0x109   :  { %429 = vrot.lane.b32.xlu0 %v427_v23, %s4373_s1  ;;  %439 = vrot.lane.b32.xlu1 %v437_v27, %s4377_s13  ;;  %v4721_v23 = vmul.f32 %v4701_v8, %v4550_v48  ;;  %v571_v27 = vmul.f32 %v4701_v8, %v570_v19 }
 0x10b   :  { %6069 = vst [vmem:[#allocation29_spill] sm:$0xff] %v4721_v23  ;;  %v581_v30 = vmul.f32 %v580_v26, %v4721_v23 }
 0x10d   :  { %449 = vrot.lane.b32.xlu0 %v447_v34, %s4378_s10  ;;  %459 = vrot.lane.b32.xlu1 %v457_v33, %s4376_s23  ;;  %v157_v33 = vpop.permute.xlu1 %156 }
 0x10e   :  { %v158_v34 = vrot.slane %v157_v33, 6 }
 0x110   :  { %v4730_v42 = vsel %vm159_vm5, %v158_v34, %v157_v33 }
 0x111   :  { %469 = vrot.lane.b32.xlu0 %v467_v46, %s4380_s9  ;;  %479 = vrot.lane.b32.xlu1 %v477_v49, %s4379_s19  ;;  %6070 = vst [vmem:[#allocation30_spill] sm:$0xff] %v4730_v42  ;;  %v4734_v45 = vmul.f32 %v4730_v42, %v4487_v18  ;;  %v248_v46 = vstv %s247_s17  ;;  %v257_v49 = vrot.slane %v256_v44, 2  ;;  %s3904_s17 = sld [smem:[#allocation4 + $0x35]] }
 0x113   :  { %6071 = vst [vmem:[#allocation31_spill] sm:$0xff] %v4734_v45  ;;  %v249_v52 = vmul.f32 %v248_v46, %v4734_v45 }
 0x115   :  { %489 = vrot.lane.b32.xlu0 %v487_v54, %s4381_s20  ;;  %499 = vrot.lane.b32.xlu1 %v497_v57, %s4382_s21  ;;  %v258_v54 = vsel %vm190_vm2, %v256_v44, %v257_v49 }
 0x116   :  { %v260_v60 = vadd.f32 %v258_v54, %v249_v52 }
 0x119   :  { %513 = vrot.lane.b32.xlu0 %v511_v61, %s4373_s1  ;;  %523 = vrot.lane.b32.xlu1 %v521_v2, %s4377_s13 }
 0x11d   :  { %533 = vrot.lane.b32.xlu0 %v531_v11, %s4378_s10  ;;  %543 = vrot.lane.b32.xlu1 %v541_v10, %s4376_s23 }
 0x121   :  { %553 = vrot.lane.b32.xlu0 %v551_v20, %s4380_s9  ;;  %563 = vrot.lane.b32.xlu1 %v561_v22, %s4379_s19 }
 0x125   :  { %583 = vrot.lane.b32.xlu1 %v581_v30, %s4382_s21  ;;  %573 = vrot.lane.b32.xlu0 %v571_v27, %s4381_s20 }
 0x15b   :  { %v266_v56 = vpop.permute.xlu1 %265 }
 0x15c   :  { %v267_v57 = vrot.slane %v266_v56, 2 }
 0x15e   :  { %v269_v61 = vsel %vm268_vm6, %v266_v56, %v267_v57  ;;  %v4745_v57 = vmul.f32 %v4570_v55, %v4730_v42 }
 0x15f   :  { %v288_v0 = vpop.permute.xlu1 %287  ;;  %v277_v2 = vpop.permute.xlu0 %276  ;;  %v271_v11 = vadd.f32 %v269_v61, %v260_v60  ;;  %v338_v61 = vstv %s3860_s18  ;;  %s3907_s18 = sld [smem:[#allocation4 + $0x38]] }
 0x160   :  { %v289_v5 = vrot.slane %v288_v0, 6  ;;  %v278_v10 = vrot.slane %v277_v2, 2 }
 0x162   :  { %v280_v15 = vsel %vm279_vm7, %v277_v2, %v278_v10  ;;  %v290_v22 = vsel %vm159_vm5, %v289_v5, %v288_v0 }
 0x163   :  { %v282_v17 = vadd.f32 %v280_v15, %v271_v11  ;;  %v309_v19 = vpop.permute.xlu1 %308  ;;  %v298_v20 = vpop.permute.xlu0 %297 }
 0x164   :  { %v310_v26 = vrot.slane %v309_v19, 6  ;;  %v299_v27 = vrot.slane %v298_v20, 6 }
 0x165   :  { %v292_v30 = vadd.f32 %v290_v22, %v282_v17  ;;  %v339_v17 = vmul.f32 %v338_v61, %v4745_v57 }
 0x166   :  { %v301_v33 = vsel %vm300_vm8, %v299_v27, %v298_v20  ;;  %v312_v49 = vsel %vm311_vm9, %v310_v26, %v309_v19 }
 0x167   :  { %v303_v34 = vadd.f32 %v301_v33, %v292_v30  ;;  %v331_v44 = vpop.permute.xlu1 %330  ;;  %v320_v46 = vpop.permute.xlu0 %319 }
 0x168   :  { %v332_v52 = vrot.slane %v331_v44, 6  ;;  %v321_v54 = vrot.slane %v320_v46, 6 }
 0x169   :  { %v314_v56 = vadd.f32 %v312_v49, %v303_v34 }
 0x16a   :  { %v323_v60 = vsel %vm322_vm10, %v321_v54, %v320_v46  ;;  %v334_v10 = vsel %vm333_vm11, %v332_v52, %v331_v44 }
 0x16b   :  { %v325_v0 = vadd.f32 %v323_v60, %v314_v56  ;;  %v356_v2 = vpop.permute.xlu1 %355  ;;  %v346_v5 = vpop.permute.xlu0 %345 }
 0x16c   :  { %v347_v11 = vrot.slane %v346_v5, 2  ;;  %v357_v19 = vrot.slane %v356_v2, 2 }
 0x16d   :  { %v336_v15 = vadd.f32 %v334_v10, %v325_v0 }
 0x16e   :  { %v348_v27 = vsel %vm190_vm2, %v346_v5, %v347_v11  ;;  %v358_v34 = vsel %vm268_vm6, %v356_v2, %v357_v19 }
 0x16f   :  { %v340_v20 = vadd.f32 %v339_v17, %v336_v15  ;;  %v376_v22 = vpop.permute.xlu1 %375  ;;  %v366_v26 = vpop.permute.xlu0 %365 }
 0x170   :  { %v367_v30 = vrot.slane %v366_v26, 2  ;;  %v377_v46 = vrot.slane %v376_v22, 6 }
 0x171   :  { %v350_v33 = vadd.f32 %v348_v27, %v340_v20 }
 0x172   :  { %v368_v44 = vsel %vm279_vm7, %v366_v26, %v367_v30  ;;  %v378_v61 = vsel %vm159_vm5, %v377_v46, %v376_v22  ;;  %v4758_v26 = vmul.f32 %v4624_v16, %v4730_v42 }
 0x173   :  { %v360_v49 = vadd.f32 %v358_v34, %v350_v33  ;;  %v396_v54 = vpop.permute.xlu1 %395  ;;  %v386_v56 = vpop.permute.xlu0 %385  ;;  %v422_v34 = vstv %s3869_s2  ;;  %s3909_s2 = sld [smem:[#allocation4 + $0x3a]] }
 0x174   :  { %v387_v52 = vrot.slane %v386_v56, 6  ;;  %v397_v0 = vrot.slane %v396_v54, 6 }
 0x175   :  { %v370_v60 = vadd.f32 %v368_v44, %v360_v49 }
 0x176   :  { %v388_v5 = vsel %vm300_vm8, %v387_v52, %v386_v56  ;;  %v398_v2 = vsel %vm311_vm9, %v397_v0, %v396_v54  ;;  %v423_v52 = vmul.f32 %v422_v34, %v4758_v26 }
 0x177   :  { %v380_v10 = vadd.f32 %v378_v61, %v370_v60  ;;  %v416_v15 = vpop.permute.xlu1 %415  ;;  %v406_v17 = vpop.permute.xlu0 %405 }
 0x178   :  { %v407_v11 = vrot.slane %v406_v17, 6  ;;  %v417_v19 = vrot.slane %v416_v15, 6 }
 0x179   :  { %v390_v20 = vadd.f32 %v388_v5, %v380_v10 }
 0x17a   :  { %v408_v22 = vsel %vm322_vm10, %v407_v11, %v406_v17  ;;  %v418_v49 = vsel %vm333_vm11, %v417_v19, %v416_v15 }
 0x17b   :  { %v400_v27 = vadd.f32 %v398_v2, %v390_v20  ;;  %v440_v33 = vpop.permute.xlu1 %439  ;;  %v430_v30 = vpop.permute.xlu0 %429 }
 0x17c   :  { %v431_v44 = vrot.slane %v430_v30, 2  ;;  %v441_v61 = vrot.slane %v440_v33, 2 }
 0x17d   :  { %v410_v46 = vadd.f32 %v408_v22, %v400_v27 }
 0x17e   :  { %v432_v10 = vsel %vm190_vm2, %v430_v30, %v431_v44  ;;  %v442_v17 = vsel %vm268_vm6, %v440_v33, %v441_v61 }
 0x17f   :  { %v420_v56 = vadd.f32 %v418_v49, %v410_v46  ;;  %v460_v60 = vpop.permute.xlu1 %459  ;;  %v450_v54 = vpop.permute.xlu0 %449 }
 0x180   :  { %v451_v5 = vrot.slane %v450_v54, 2  ;;  %v461_v11 = vrot.slane %v460_v60, 6 }
 0x181   :  { %v424_v0 = vadd.f32 %v423_v52, %v420_v56 }
 0x182   :  { %v452_v15 = vsel %vm279_vm7, %v450_v54, %v451_v5  ;;  %v462_v49 = vsel %vm159_vm5, %v461_v11, %v460_v60  ;;  %v4771_v54 = vmul.f32 %v4675_v53, %v4730_v42 }
 0x183   :  { %v434_v20 = vadd.f32 %v432_v10, %v424_v0  ;;  %v480_v2 = vpop.permute.xlu1 %479  ;;  %v470_v48 = vpop.permute.xlu0 %469 }
 0x184   :  { %v471_v19 = vrot.slane %v470_v48, 6  ;;  %v481_v56 = vrot.slane %v480_v2, 6 }
 0x185   :  { %v444_v27 = vadd.f32 %v442_v17, %v434_v20  ;;  %v506_v17 = vstv %s3878_s3  ;;  %s3911_s3 = sld [smem:[#allocation4 + $0x3c]] }
 0x186   :  { %v472_v30 = vsel %vm300_vm8, %v471_v19, %v470_v48  ;;  %v482_v33 = vsel %vm311_vm9, %v481_v56, %v480_v2 }
 0x187   :  { %v454_v22 = vadd.f32 %v452_v15, %v444_v27  ;;  %v500_v34 = vpop.permute.xlu1 %499  ;;  %v490_v46 = vpop.permute.xlu0 %489 }
 0x188   :  { %v491_v44 = vrot.slane %v490_v46, 6  ;;  %v501_v61 = vrot.slane %v500_v34, 6 }
 0x189   :  { %v464_v52 = vadd.f32 %v462_v49, %v454_v22  ;;  %v507_v22 = vmul.f32 %v506_v17, %v4771_v54 }
 0x18a   :  { %v492_v5 = vsel %vm322_vm10, %v491_v44, %v490_v46  ;;  %v502_v48 = vsel %vm333_vm11, %v501_v61, %v500_v34 }
 0x18b   :  { %v474_v0 = vadd.f32 %v472_v30, %v464_v52  ;;  %v524_v10 = vpop.permute.xlu1 %523  ;;  %v514_v37 = vpop.permute.xlu0 %513 }
 0x18c   :  { %v515_v15 = vrot.slane %v514_v37, 2  ;;  %v525_v49 = vrot.slane %v524_v10, 2 }
 0x18d   :  { %v484_v20 = vadd.f32 %v482_v33, %v474_v0 }
 0x18e   :  { %v516_v56 = vsel %vm190_vm2, %v514_v37, %v515_v15  ;;  %v526_v46 = vsel %vm268_vm6, %v524_v10, %v525_v49 }
 0x18f   :  { %v494_v60 = vadd.f32 %v492_v5, %v484_v20  ;;  %v544_v11 = vpop.permute.xlu1 %543  ;;  %v534_v27 = vpop.permute.xlu0 %533 }
 0x190   :  { %v535_v52 = vrot.slane %v534_v27, 2  ;;  %v545_v44 = vrot.slane %v544_v11, 6 }
 0x191   :  { %v504_v19 = vadd.f32 %v502_v48, %v494_v60 }
 0x192   :  { %v536_v5 = vsel %vm279_vm7, %v534_v27, %v535_v52  ;;  %v546_v60 = vsel %vm159_vm5, %v545_v44, %v544_v11  ;;  %v691_v44 = vstv %s3898_s25  ;;  %s3916_s25 = sld [smem:[#allocation4 + $0x41]] }
 0x193   :  { %v508_v2 = vadd.f32 %v507_v22, %v504_v19  ;;  %v564_v0 = vpop.permute.xlu1 %563  ;;  %v554_v33 = vpop.permute.xlu0 %553 }
 0x194   :  { %v555_v42 = vrot.slane %v554_v33, 6  ;;  %v565_v17 = vrot.slane %v564_v0, 6 }
 0x195   :  { %v518_v30 = vadd.f32 %v516_v56, %v508_v2 }
 0x196   :  { %v556_v37 = vsel %vm300_vm8, %v555_v42, %v554_v33  ;;  %v566_v2 = vsel %vm311_vm9, %v565_v17, %v564_v0 }
 0x197   :  { %v528_v20 = vadd.f32 %v526_v46, %v518_v30  ;;  %v574_v61 = vpop.permute.xlu0 %573  ;;  %v584_v19 = vpop.permute.xlu1 %583  ;;  %v590_v30 = vstv %s589_s24  ;;  %s3913_s24 = sld [smem:[#allocation4 + $0x3e]] }
 0x198   :  { %v575_v15 = vrot.slane %v574_v61, 6  ;;  %v585_v10 = vrot.slane %v584_v19, 6 }
 0x199   :  { %v538_v34 = vadd.f32 %v536_v5, %v528_v20  ;;  %v597_v20 = vstv %s3888_s26  ;;  %s3918_s26 = sld [smem:[#allocation4 + $0x43]] }
 0x19a   :  { %v576_v56 = vsel %vm322_vm10, %v575_v15, %v574_v61  ;;  %v586_v52 = vsel %vm333_vm11, %v585_v10, %v584_v19  ;;  %v598_v61 = vmul.f32 %v597_v20, %v4487_v18  ;;  %v627_v19 = vstv %s3891_s8  ;;  %s3903_s8 = sld [smem:[#allocation4 + $0x34]] }
 0x19b   :  { %v548_v48 = vadd.f32 %v546_v60, %v538_v34  ;;  %v692_v34 = vmul.f32 %v691_v44, %v4579_v59  ;;  %v607_v60 = vstv %s3889_s27  ;;  %v628_v18 = vmul.f32 %v627_v19, %v4512_v32  ;;  %s3920_s27 = sld [smem:[#allocation4 + $0x45]] }
 0x19c   :  { %v608_v17 = vmul.f32 %v607_v60, %v4505_v28  ;;  %v637_v15 = vstv %s3892_s28  ;;  %v657_v10 = vstv %s3894_s4  ;;  %v681_v32 = vstv %s3897_s30  ;;  %s3887_s28 = sld [smem:[#allocation4 + $0x24]] }
 0x19d   :  { %v558_v22 = vadd.f32 %v556_v37, %v548_v48  ;;  %v617_v48 = vstv %s3890_s5  ;;  %v731_v20 = vstv %s3902_s16  ;;  %s3922_s5 = sld [smem:[#allocation4 + $0x47]] }
 0x19e   :  { %v618_v37 = vmul.f32 %v617_v48, %v4535_v41  ;;  %v815_v48 = vstv %s3911_s3  ;;  %s3908_s4 = sld [smem:[#allocation4 + $0x39]] }
 0x19f   :  { %v568_v49 = vadd.f32 %v566_v2, %v558_v22  ;;  %v638_v22 = vmul.f32 %v637_v15, %v4547_v47  ;;  %v647_v2 = vstv %s3893_s29  ;;  %v816_v19 = vmul.f32 %v815_v48, %v4662_v40  ;;  %s3906_s29 = sld [smem:[#allocation4 + $0x37]] }
 0x1a0   :  { %v859_v15 = vstv %s3916_s25  ;;  %s3912_s30 = sld [smem:[#allocation4 + $0x3d]] }
 0x1a1   :  { %v578_v27 = vadd.f32 %v576_v56, %v568_v49  ;;  %v648_v49 = vmul.f32 %v647_v2, %v4539_v43  ;;  %v658_v56 = vmul.f32 %v657_v10, %v4529_v39  ;;  %v860_v2 = vmul.f32 %v859_v15, %v4683_v58  ;;  %s3919_s16 = sld [smem:[#allocation4 + $0x44]] }
 0x1a2   :  { %v899_v10 = vstv %s3920_s27  ;;  %s3923_s3 = sld [smem:[#allocation6 + $0x1]] }
 0x1a3   :  { %v588_v11 = vadd.f32 %v586_v52, %v578_v27  ;;  %v667_v27 = vstv %s3895_s6  ;;  %s3910_s6 = sld [smem:[#allocation4 + $0x3b]] }
 0x1a4   :  { %v668_v52 = vmul.f32 %v667_v27, %v4560_v51  ;;  %s3926_s25 = sld [smem:[#allocation4 + $0x4a]] }
 0x1a5   :  { %v4784_v46 = vadd.f32 %v590_v30, %v588_v11  ;;  %v682_v30 = vmul.f32 %v4570_v55, %v681_v32  ;;  %v701_v11 = vstv %s3899_s14  ;;  %v732_v55 = vmul.f32 %v731_v20, %v4611_v7  ;;  %s3896_s14 = sld [smem:[#allocation4 + $0x2d]] }
 0x1a6   :  { %s3929_s27 = sld [smem:[#allocation4 + $0x4d]] }
 0x1a7   :  { %v1617_v42 = vrot.slane %v4784_v46, %v4479_v9  ;;  %v1610_v33 = vcombine.high %v4784_v46, %v4784_v46 }
 0x1a9   :  { %1626 = vrot.lane.b32.xlu0 %v1617_v42, %s4375_s22  ;;  %v1625_v0 = vcombine.high %v1617_v42, %v1617_v42  ;;  %v1624_v5 = vrot.slane %v1610_v33, %v4479_v9  ;;  %v711_v42 = vstv %s3900_s15  ;;  %v702_v33 = vmul.f32 %v701_v11, %v4594_v1  ;;  %s3915_s15 = sld [smem:[#allocation4 + $0x40]] }
 0x1aa   :  { %v712_v39 = vmul.f32 %v4588_v62, %v711_v42  ;;  %v795_v62 = vstv %s3909_s2  ;;  %s3914_s2 = sld [smem:[#allocation4 + $0x3f]] }
 0x1ab   :  { %1628 = vrot.lane.b32.xlu1 %v1625_v0, %s4375_s22  ;;  %v721_v0 = vstv %s3901_s11  ;;  %s3917_s11 = sld [smem:[#allocation4 + $0x42]] }
 0x1ac   :  { %v722_v44 = vmul.f32 %v721_v0, %v4607_v6 }
 0x1ad   :  { %1630 = vrot.lane.b32.xlu0 %v1624_v5, %s4375_s22  ;;  %v751_v5 = vstv %s3904_s17  ;;  %s3921_s17 = sld [smem:[#allocation4 + $0x46]] }
 0x1af   :  { %694 = vrot.lane.b32.xlu1 %v692_v34, %s4377_s13  ;;  %v752_v34 = vmul.f32 %v751_v5, %v4619_v14  ;;  %v741_v5 = vstv %s3903_s8  ;;  %s3934_s8 = sld [smem:[#allocation4 + $0x52]] }
 0x1b1   :  { %600 = vrot.lane.b32.xlu0 %v598_v61, %s4373_s1  ;;  %v775_v61 = vstv %s3907_s18  ;;  %s3905_s18 = sld [smem:[#allocation4 + $0x36]] }
 0x1b2   :  { %v776_v60 = vmul.f32 %v775_v61, %v4632_v21  ;;  %v593_v61 = vstv %s3887_s28  ;;  %s3936_s28 = sld [smem:[#allocation4 + $0x54]] }
 0x1b5   :  { %610 = vrot.lane.b32.xlu0 %v608_v17, %s4377_s13  ;;  %v796_v17 = vmul.f32 %v4640_v25, %v795_v62 }
 0x1b9   :  { %620 = vrot.lane.b32.xlu0 %v618_v37, %s4378_s10  ;;  %v835_v37 = vstv %s3913_s24 }
 0x1bd   :  { %630 = vrot.lane.b32.xlu0 %v628_v18, %s4376_s23  ;;  %v836_v18 = vmul.f32 %v835_v37, %v4670_v50  ;;  %v594_v37 = vmul.f32 %v593_v61, %v4734_v45 }
 0x1c1   :  { %640 = vrot.lane.b32.xlu0 %v638_v22, %s4380_s9  ;;  %v879_v22 = vstv %s3918_s26  ;;  %s3927_s26 = sld [smem:[#allocation4 + $0x4b]] }
 0x1c2   :  { %v880_v25 = vmul.f32 %v4691_v63, %v879_v22 }
 0x1c5   :  { %650 = vrot.lane.b32.xlu0 %v648_v49, %s4379_s19  ;;  %v900_v49 = vmul.f32 %v899_v10, %v4713_v13 }
 0x1c9   :  { %660 = vrot.lane.b32.xlu0 %v658_v56, %s4381_s20  ;;  %v919_v56 = vstv %s3922_s5  ;;  %s3931_s5 = sld [smem:[#allocation4 + $0x4f]] }
 0x1ca   :  { %v920_v27 = vmul.f32 %v919_v56, %v4721_v23 }
 0x1cd   :  { %670 = vrot.lane.b32.xlu0 %v668_v52, %s4382_s21 }
 0x1d1   :  { %684 = vrot.lane.b32.xlu0 %v682_v30, %s4373_s1 }
 0x1d5   :  { %704 = vrot.lane.b32.xlu0 %v702_v33, %s4378_s10 }
 0x1d9   :  { %714 = vrot.lane.b32.xlu0 %v712_v39, %s4376_s23 }
 0x1dd   :  { %724 = vrot.lane.b32.xlu0 %v722_v44, %s4380_s9 }
 0x1e1   :  { %734 = vrot.lane.b32.xlu0 %v732_v55, %s4379_s19 }
 0x1e5   :  { %754 = vrot.lane.b32.xlu0 %v752_v34, %s4382_s21 }
 0x1e9   :  { %778 = vrot.lane.b32.xlu0 %v776_v60, %s4377_s13  ;;  %v742_v60 = vmul.f32 %v4599_v3, %v741_v5 }
 0x1ed   :  { %798 = vrot.lane.b32.xlu0 %v796_v17, %s4376_s23 }
 0x1f1   :  { %818 = vrot.lane.b32.xlu0 %v816_v19, %s4379_s19  ;;  %v765_v19 = vstv %s3906_s29  ;;  %s3952_s29 = sld [smem:[#allocation4 + $0x64]] }
 0x1f5   :  { %838 = vrot.lane.b32.xlu0 %v836_v18, %s4382_s21 }
 0x1f9   :  { %862 = vrot.lane.b32.xlu0 %v860_v2, %s4377_s13 }
 0x1fd   :  { %882 = vrot.lane.b32.xlu0 %v880_v25, %s4376_s23  ;;  %v766_v25 = vmul.f32 %v4624_v16, %v765_v19 }
 0x201   :  { %902 = vrot.lane.b32.xlu0 %v900_v49, %s4379_s19 }
 0x205   :  { %922 = vrot.lane.b32.xlu0 %v920_v27, %s4382_s21 }
 0x21b   :  { %v1627_v32 = vpop.permute.xlu0 %1626 }
 0x21d   :  { %v1629_v52 = vpop.permute.xlu1 %1628 }
 0x21e   :  { %v1632_v30 = vsel %vm213_vm4, %v1627_v32, %v1629_v52 }
 0x21f   :  { %v1631_v11 = vpop.permute.xlu0 %1630  ;;  %v1637_v42 = vsel %vm1636_vm12, %v1632_v30, 0.0 }
 0x220   :  { %v1633_v63 = vsel %vm213_vm4, %v1629_v52, %v1631_v11  ;;  %v785_v52 = vstv %s3908_s4  ;;  %s3932_s4 = sld [smem:[#allocation4 + $0x50]] }
 0x221   :  { %v1638_v33 = vsel %vm1636_vm12, %v1633_v63, 0.0  ;;  %v786_v16 = vmul.f32 %v785_v52, %v4645_v29 }
 0x222   :  { %v1639_v39 = vadd.f32 %v1638_v33, %v1637_v42 }
 0x223   :  { %v601_v0 = vpop.permute.xlu0 %600 }
 0x224   :  { %1640 = vadd.xlane.f32.xlu1 %v1639_v39  ;;  %v602_v55 = vrot.slane %v601_v0, 2 }
 0x226   :  { %v603_v17 = vsel %vm190_vm2, %v601_v0, %v602_v55  ;;  %v805_v0 = vstv %s3910_s6  ;;  %v825_v55 = vstv %s3912_s30  ;;  %s3938_s6 = sld [smem:[#allocation4 + $0x56]] }
 0x227   :  { %v611_v44 = vpop.permute.xlu0 %610  ;;  %v605_v2 = vadd.f32 %v603_v17, %v594_v37  ;;  %v806_v61 = vmul.f32 %v805_v0, %v4658_v38  ;;  %v849_v37 = vstv %s3915_s15  ;;  %s3940_s15 = sld [smem:[#allocation4 + $0x58]] }
 0x228   :  { %v612_v62 = vrot.slane %v611_v44, 2  ;;  %s3950_s30 = sld [smem:[#allocation4 + $0x62]] }
 0x22a   :  { %v613_v15 = vsel %vm268_vm6, %v611_v44, %v612_v62 }
 0x22b   :  { %v621_v20 = vpop.permute.xlu0 %620  ;;  %v615_v3 = vadd.f32 %v613_v15, %v605_v2  ;;  %v850_v2 = vmul.f32 %v4675_v53, %v849_v37 }
 0x22c   :  { %v622_v48 = vrot.slane %v621_v20, 2 }
 0x22e   :  { %v623_v10 = vsel %vm279_vm7, %v621_v20, %v622_v48  ;;  %v826_v48 = vmul.f32 %v4650_v31, %v825_v55  ;;  %v909_v31 = vstv %s3921_s17  ;;  %s3945_s17 = sld [smem:[#allocation4 + $0x5d]] }
 0x22f   :  { %v631_v34 = vpop.permute.xlu0 %630  ;;  %v625_v30 = vadd.f32 %v623_v10, %v615_v3 }
 0x230   :  { %v632_v22 = vrot.slane %v631_v34, 6 }
 0x232   :  { %v633_v27 = vsel %vm159_vm5, %v632_v22, %v631_v34 }
 0x233   :  { %v641_v18 = vpop.permute.xlu0 %640  ;;  %v635_v63 = vadd.f32 %v633_v27, %v625_v30 }
 0x234   :  { %v642_v49 = vrot.slane %v641_v18, 6 }
 0x235   :  { %744 = vrot.lane.b32.xlu1 %v742_v60, %s4381_s20  ;;  %v677_v60 = vstv %s3896_s14  ;;  %s3954_s14 = sld [smem:[#allocation4 + $0x66]] }
 0x236   :  { %v643_v11 = vsel %vm300_vm8, %v642_v49, %v641_v18  ;;  %v678_v15 = vmul.f32 %v677_v60, %v4745_v57  ;;  %v889_v49 = vstv %s3919_s16  ;;  %s3925_s16 = sld [smem:[#allocation4 + $0x49]] }
 0x237   :  { %v651_v56 = vpop.permute.xlu0 %650  ;;  %v645_v44 = vadd.f32 %v643_v11, %v635_v63  ;;  %v890_v3 = vmul.f32 %v889_v49, %v4709_v12  ;;  %v695_v63 = vpop.permute.xlu1 %694 }
 0x238   :  { %v652_v32 = vrot.slane %v651_v56, 6 }
 0x239   :  { %768 = vrot.lane.b32.xlu1 %v766_v25, %s4373_s1  ;;  %v869_v25 = vstv %s3917_s11  ;;  %s3943_s11 = sld [smem:[#allocation4 + $0x5b]] }
 0x23a   :  { %v653_v33 = vsel %vm311_vm9, %v652_v32, %v651_v56  ;;  %v870_v10 = vmul.f32 %v869_v25, %v4696_v4  ;;  %v910_v56 = vmul.f32 %v4701_v8, %v909_v31 }
 0x23b   :  { %v661_v42 = vpop.permute.xlu0 %660  ;;  %v655_v5 = vadd.f32 %v653_v33, %v645_v44  ;;  %v696_v33 = vrot.slane %v695_v63, 2 }
 0x23c   :  { %v662_v39 = vrot.slane %v661_v42, 6 }
 0x23d   :  { %788 = vrot.lane.b32.xlu1 %v786_v16, %s4378_s10  ;;  %v697_v44 = vsel %vm268_vm6, %v695_v63, %v696_v33 }
 0x23e   :  { %v663_v20 = vsel %vm322_vm10, %v662_v39, %v661_v42 }
 0x23f   :  { %v671_v34 = vpop.permute.xlu0 %670  ;;  %v665_v17 = vadd.f32 %v663_v20, %v655_v5 }
 0x240   :  { %v672_v62 = vrot.slane %v671_v34, 6 }
 0x241   :  { %808 = vrot.lane.b32.xlu1 %v806_v61, %s4380_s9 }
 0x242   :  { %v673_v19 = vsel %vm333_vm11, %v672_v62, %v671_v34 }
 0x243   :  { %v675_v18 = vadd.f32 %v673_v19, %v665_v17  ;;  %v685_v27 = vpop.permute.xlu0 %684 }
 0x244   :  { %v686_v11 = vrot.slane %v685_v27, 2 }
 0x245   :  { %v679_v22 = vadd.f32 %v678_v15, %v675_v18  ;;  %828 = vrot.lane.b32.xlu1 %v826_v48, %s4381_s20 }
 0x246   :  { %v687_v42 = vsel %vm190_vm2, %v685_v27, %v686_v11  ;;  %v761_v27 = vstv %s3905_s18  ;;  %s3956_s18 = sld [smem:[#allocation4 + $0x68]] }
 0x247   :  { %v705_v53 = vpop.permute.xlu0 %704  ;;  %v689_v39 = vadd.f32 %v687_v42, %v679_v22 }
 0x248   :  { %v706_v0 = vrot.slane %v705_v53, 2 }
 0x249   :  { %852 = vrot.lane.b32.xlu1 %v850_v2, %s4373_s1  ;;  %v699_v55 = vadd.f32 %v697_v44, %v689_v39 }
 0x24a   :  { %v707_v5 = vsel %vm279_vm7, %v705_v53, %v706_v0 }
 0x24b   :  { %v715_v32 = vpop.permute.xlu0 %714  ;;  %v709_v60 = vadd.f32 %v707_v5, %v699_v55 }
 0x24c   :  { %v716_v20 = vrot.slane %v715_v32, 6 }
 0x24d   :  { %872 = vrot.lane.b32.xlu1 %v870_v10, %s4378_s10 }
 0x24e   :  { %v717_v61 = vsel %vm159_vm5, %v716_v20, %v715_v32 }
 0x24f   :  { %v725_v52 = vpop.permute.xlu0 %724  ;;  %v719_v37 = vadd.f32 %v717_v61, %v709_v60 }
 0x250   :  { %v726_v34 = vrot.slane %v725_v52, 6 }
 0x251   :  { %892 = vrot.lane.b32.xlu1 %v890_v3, %s4380_s9 }
 0x252   :  { %v727_v48 = vsel %vm300_vm8, %v726_v34, %v725_v52 }
 0x253   :  { %v735_v30 = vpop.permute.xlu0 %734  ;;  %v729_v2 = vadd.f32 %v727_v48, %v719_v37 }
 0x254   :  { %v736_v62 = vrot.slane %v735_v30, 6 }
 0x255   :  { %912 = vrot.lane.b32.xlu1 %v910_v56, %s4381_s20 }
 0x256   :  { %v737_v15 = vsel %vm311_vm9, %v736_v62, %v735_v30  ;;  %v762_v30 = vmul.f32 %v761_v27, %v4758_v26 }
 0x257   :  { %v755_v16 = vpop.permute.xlu0 %754  ;;  %v739_v3 = vadd.f32 %v737_v15, %v729_v2 }
 0x258   :  { %v756_v10 = vrot.slane %v755_v16, 6 }
 0x25a   :  { %v757_v52 = vsel %vm333_vm11, %v756_v10, %v755_v16 }
 0x25b   :  { %v779_v8 = vpop.permute.xlu0 %778 }
 0x25c   :  { %v780_v0 = vrot.slane %v779_v8, 2 }
 0x25f   :  { %v799_v18 = vpop.permute.xlu0 %798 }
 0x260   :  { %v800_v34 = vrot.slane %v799_v18, 6 }
 0x263   :  { %v819_v32 = vpop.permute.xlu0 %818 }
 0x264   :  { %v820_v2 = vrot.slane %v819_v32, 6 }
 0x266   :  { %v821_v27 = vsel %vm311_vm9, %v820_v2, %v819_v32 }
 0x267   :  { %v839_v62 = vpop.permute.xlu0 %838 }
 0x2ad   :  { %v1641_v17 = vpop.xlane.xlu1 %1640 }
 0x2ae   :  { %v1642_v19 = vrot.slane %v1641_v17, 4 }
 0x2b0   :  { %v1643_v22 = vadd.f32 %v1642_v19, %v1641_v17  ;;  %v781_v17 = vsel %vm268_vm6, %v779_v8, %v780_v0  ;;  %v801_v19 = vsel %vm159_vm5, %v800_v34, %v799_v18  ;;  %v840_v8 = vrot.slane %v839_v62, 6 }
 0x2b1   :  { %v745_v25 = vpop.permute.xlu1 %744 }
 0x2b2   :  { %v746_v49 = vrot.slane %v745_v25, 6  ;;  %v1644_v31 = vrot.slane %v1643_v22, 2 }
 0x2b4   :  { %v747_v56 = vsel %vm322_vm10, %v746_v49, %v745_v25  ;;  %v1645_v53 = vadd.f32 %v1644_v31, %v1643_v22  ;;  %v863_v25 = vpop.permute.xlu0 %862 }
 0x2b5   :  { %v749_v11 = vadd.f32 %v747_v56, %v739_v3  ;;  %v769_v63 = vpop.permute.xlu1 %768 }
 0x2b6   :  { %v770_v42 = vrot.slane %v769_v63, 2  ;;  %v1646_v33 = vrot.slane %v1645_v53, 1 }
 0x2b7   :  { %v759_v39 = vadd.f32 %v757_v52, %v749_v11 }
 0x2b8   :  { %v771_v44 = vsel %vm190_vm2, %v769_v63, %v770_v42  ;;  %v1647_v20 = vadd.f32 %v1646_v33, %v1645_v53  ;;  %v845_v63 = vstv %s3914_s2  ;;  %v883_v42 = vpop.permute.xlu0 %882  ;;  %s3982_s2 = sld [smem:[#allocation4 + $0x81]] }
 0x2b9   :  { %v763_v55 = vadd.f32 %v762_v30, %v759_v39  ;;  %v789_v5 = vpop.permute.xlu1 %788  ;;  %v841_v39 = vsel %vm333_vm11, %v840_v8, %v839_v62  ;;  %v846_v0 = vmul.f32 %v845_v63, %v4771_v54  ;;  %v884_v32 = vrot.slane %v883_v42, 6 }
 0x2ba   :  { %v790_v61 = vrot.slane %v789_v5, 2  ;;  %4162 = vpush %v1647_v20  ;;  %v864_v20 = vrot.slane %v863_v25, 2  ;;  %v929_v63 = vstv %s3923_s3  ;;  %s3928_s3 = sld [smem:[#allocation4 + $0x4c]] }
 0x2bb   :  { %v773_v60 = vadd.f32 %v771_v44, %v763_v55 }
 0x2bc   :  { %v791_v37 = vsel %vm279_vm7, %v789_v5, %v790_v61  ;;  %v903_v61 = vpop.permute.xlu0 %902 }
 0x2bd   :  { %v783_v48 = vadd.f32 %v781_v17, %v773_v60  ;;  %v809_v16 = vpop.permute.xlu1 %808  ;;  %v904_v2 = vrot.slane %v903_v61, 6 }
 0x2be   :  { %v810_v15 = vrot.slane %v809_v16, 6 }
 0x2bf   :  { %v793_v22 = vadd.f32 %v791_v37, %v783_v48  ;;  %v865_v48 = vsel %vm268_vm6, %v863_v25, %v864_v20 }
 0x2c0   :  { %v811_v31 = vsel %vm300_vm8, %v810_v15, %v809_v16 }
 0x2c1   :  { %v803_v10 = vadd.f32 %v801_v19, %v793_v22  ;;  %v829_v49 = vpop.permute.xlu1 %828  ;;  %v885_v19 = vsel %vm159_vm5, %v884_v32, %v883_v42 }
 0x2c2   :  { %v830_v3 = vrot.slane %v829_v49, 6 }
 0x2c3   :  { %v813_v56 = vadd.f32 %v811_v31, %v803_v10 }
 0x2c4   :  { %v831_v53 = vsel %vm322_vm10, %v830_v3, %v829_v49  ;;  %v923_v49 = vpop.permute.xlu0 %922 }
 0x2c5   :  { %v823_v11 = vadd.f32 %v821_v27, %v813_v56  ;;  %v853_v18 = vpop.permute.xlu1 %852  ;;  %v905_v27 = vsel %vm311_vm9, %v904_v2, %v903_v61  ;;  %v924_v8 = vrot.slane %v923_v49, 6  ;;  %v1020_v2 = vstv %s3934_s8  ;;  %s3944_s8 = sld [smem:[#allocation4 + $0x5c]] }
 0x2c6   :  { %v854_v52 = vrot.slane %v853_v18, 2 }
 0x2c7   :  { %v833_v33 = vadd.f32 %v831_v53, %v823_v11 }
 0x2c8   :  { %v855_v55 = vsel %vm190_vm2, %v853_v18, %v854_v52  ;;  %v925_v18 = vsel %vm333_vm11, %v924_v8, %v923_v49 }
 0x2c9   :  { %v843_v30 = vadd.f32 %v841_v39, %v833_v33  ;;  %v873_v44 = vpop.permute.xlu1 %872 }
 0x2ca   :  { %v874_v34 = vrot.slane %v873_v44, 2 }
 0x2cb   :  { %v847_v5 = vadd.f32 %v846_v0, %v843_v30 }
 0x2cc   :  { %v875_v62 = vsel %vm279_vm7, %v873_v44, %v874_v34 }
 0x2cd   :  { %v857_v60 = vadd.f32 %v855_v55, %v847_v5  ;;  %v893_v17 = vpop.permute.xlu1 %892 }
 0x2ce   :  { %v894_v37 = vrot.slane %v893_v17, 6 }
 0x2cf   :  { %v867_v16 = vadd.f32 %v865_v48, %v857_v60  ;;  %v946_v60 = vstv %s3926_s25  ;;  %v956_v48 = vstv %s3927_s26  ;;  %s3939_s25 = sld [smem:[#allocation4 + $0x57]] }
 0x2d0   :  { %v895_v3 = vsel %vm300_vm8, %v894_v37, %v893_v17  ;;  %v947_v17 = vmul.f32 %v946_v60, %v4505_v28  ;;  %s3941_s26 = sld [smem:[#allocation4 + $0x59]] }
 0x2d1   :  { %v877_v15 = vadd.f32 %v875_v62, %v867_v16  ;;  %v913_v22 = vpop.permute.xlu1 %912  ;;  %v957_v16 = vmul.f32 %v956_v48, %v4535_v41  ;;  %v996_v62 = vstv %s3931_s5  ;;  %v4960_v48 = vld [vmem:[%s6025_s0 + $0x10] sm:$0x3f]  ;;  %s3930_s5 = sld [smem:[#allocation4 + $0x4e]] }
 0x2d2   :  { %v914_v10 = vrot.slane %v913_v22, 6 }
 0x2d3   :  { %v887_v31 = vadd.f32 %v885_v19, %v877_v15  ;;  %v976_v19 = vstv %s3929_s27  ;;  %v4927_v15 = vld [vmem:[%s6025_s0 + $0x2] sm:$0x3f]  ;;  %s3949_s27 = sld [smem:[#allocation4 + $0x61]] }
 0x2d4   :  { %v915_v25 = vsel %vm322_vm10, %v914_v10, %v913_v22  ;;  %v977_v37 = vmul.f32 %v976_v19, %v4547_v47  ;;  %v997_v22 = vmul.f32 %v4927_v15, %v996_v62  ;;  %v4934_v10 = vld [vmem:[%s6025_s0 + $0x8] sm:$0x3f]  ;;  %v936_v19 = vstv %s3925_s16  ;;  %s3935_s16 = sld [smem:[#allocation4 + $0x53]] }
 0x2d5   :  { %v897_v56 = vadd.f32 %v895_v3, %v887_v31  ;;  %v1021_v49 = vmul.f32 %v4934_v10, %v1020_v2  ;;  %v1040_v31 = vstv %s3936_s28  ;;  %v1124_v62 = vstv %s3945_s17  ;;  %s3937_s17 = sld [smem:[#allocation4 + $0x55]] }
 0x2d6   :  { %v1041_v3 = vmul.f32 %v1040_v31, %v4594_v1  ;;  %v1125_v2 = vmul.f32 %v1124_v62, %v4645_v29  ;;  %v5015_v62 = vld [vmem:[%s6025_s0 + $0x1a] sm:$0x3f]  ;;  %s3960_s28 = sld [smem:[#allocation6 + $0x2]] }
 0x2d7   :  { %v907_v53 = vadd.f32 %v905_v27, %v897_v56  ;;  %v1060_v56 = vstv %s3938_s6  ;;  %s3948_s6 = sld [smem:[#allocation4 + $0x60]] }
 0x2d8   :  { %v1061_v27 = vmul.f32 %v1060_v56, %v4607_v6 }
 0x2d9   :  { %v917_v11 = vadd.f32 %v915_v25, %v907_v53 }
 0x2db   :  { %v927_v52 = vadd.f32 %v925_v18, %v917_v11 }
 0x2dd   :  { %v4898_v42 = vadd.f32 %v929_v63, %v927_v52 }
 0x2df   :  { %v1711_v33 = vrot.slane %v4898_v42, %v4479_v9  ;;  %v1704_v32 = vcombine.high %v4898_v42, %v4898_v42 }
 0x2e1   :  { %1720 = vrot.lane.b32.xlu0 %v1711_v33, %s4375_s22  ;;  %v1719_v61 = vcombine.high %v1711_v33, %v1711_v33 }
 0x2eb   :  { %s4163_s24 = spop %4162 }
 0x2ec   :  { %v1649_v39 = vstv %s4163_s24  ;;  %s3947_s24 = sld [smem:[#allocation4 + $0x5f]] }
 0x2ed   :  { %v1650_v30 = vmul.f32 0.001953125, %v1649_v39 }
 0x2ef   :  { %v4904_v0 = vsub.f32 %v4784_v46, %v1650_v30  ;;  %v1718_v46 = vrot.slane %v1704_v32, %v4479_v9 }
 0x2f1   :  { %6072 = vst [vmem:[#allocation32_spill] sm:$0xff] %v4904_v0  ;;  %v1652_v44 = vmul.f32 %v4904_v0, %v4904_v0 }
 0x2f2   :  { %v1144_v31 = vstv %s3947_s24  ;;  %s3958_s24 = sld [smem:[#allocation4 + $0x6a]] }
 0x2f3   :  { %v1661_v20 = vrot.slane %v1652_v44, %v4479_v9  ;;  %v1654_v55 = vcombine.high %v1652_v44, %v1652_v44 }
 0x2f5   :  { %1670 = vrot.lane.b32.xlu1 %v1661_v20, %s4375_s22  ;;  %v1669_v5 = vcombine.high %v1661_v20, %v1661_v20  ;;  %v1668_v34 = vrot.slane %v1654_v55, %v4479_v9 }
 0x2f7   :  { %1672 = vrot.lane.b32.xlu0 %v1669_v5, %s4375_s22 }
 0x2f9   :  { %1674 = vrot.lane.b32.xlu1 %v1668_v34, %s4375_s22 }
 0x2fb   :  { %1724 = vrot.lane.b32.xlu0 %v1718_v46, %s4375_s22  ;;  %v1080_v46 = vstv %s3940_s15  ;;  %s3973_s15 = sld [smem:[#allocation4 + $0x78]] }
 0x2fd   :  { %1722 = vrot.lane.b32.xlu1 %v1719_v61, %s4375_s22  ;;  %v4953_v61 = vld [vmem:[%s6025_s0 + $0xa] sm:$0x3f] }
 0x2fe   :  { %v1081_v60 = vmul.f32 %v4953_v61, %v1080_v46  ;;  %v5007_v46 = vld [vmem:[%s6025_s0 + $0xa] sm:$0xf] }
 0x301   :  { %949 = vrot.lane.b32.xlu1 %v947_v17, %s4377_s13  ;;  %v1104_v17 = vstv %s3943_s11  ;;  %s3953_s11 = sld [smem:[#allocation4 + $0x65]] }
 0x305   :  { %959 = vrot.lane.b32.xlu1 %v957_v16, %s4378_s10  ;;  %v1105_v16 = vmul.f32 %v4960_v48, %v1104_v17  ;;  %v1248_v17 = vstv %s3958_s24  ;;  %s3924_s24 = sld [smem:[#allocation4 + $0x48]] }
 0x309   :  { %979 = vrot.lane.b32.xlu1 %v977_v37, %s4380_s9  ;;  %v4967_v37 = vld [vmem:[%s6025_s0] sm:$0x3f] }
 0x30d   :  { %999 = vrot.lane.b32.xlu1 %v997_v22, %s4381_s20  ;;  %v937_v22 = vmul.f32 %v4967_v37, %v936_v19  ;;  %v1070_v19 = vstv %s3939_s25  ;;  %s3933_s25 = sld [smem:[#allocation4 + $0x51]] }
 0x311   :  { %1023 = vrot.lane.b32.xlu1 %v1021_v49, %s4373_s1  ;;  %v966_v49 = vstv %s3928_s3  ;;  %s3965_s3 = sld [smem:[#allocation4 + $0x70]] }
 0x315   :  { %1043 = vrot.lane.b32.xlu1 %v1041_v3, %s4378_s10  ;;  %v4976_v3 = vld [vmem:[%s6025_s0 + $0x2] sm:$0xf] }
 0x316   :  { %v967_v56 = vmul.f32 %v4976_v3, %v966_v49  ;;  %v1090_v49 = vstv %s3941_s26  ;;  %s3942_s26 = sld [smem:[#allocation4 + $0x5a]] }
 0x319   :  { %1063 = vrot.lane.b32.xlu1 %v1061_v27, %s4380_s9  ;;  %v1164_v27 = vstv %s3949_s27  ;;  %s3951_s27 = sld [smem:[#allocation4 + $0x63]] }
 0x353   :  { %v1721_v8 = vpop.permute.xlu0 %1720 }
 0x367   :  { %v1671_v25 = vpop.permute.xlu1 %1670 }
 0x369   :  { %v1673_v53 = vpop.permute.xlu0 %1672 }
 0x36a   :  { %v1676_v11 = vsel %vm213_vm4, %v1671_v25, %v1673_v53  ;;  %v4984_v25 = vld [vmem:[%s6025_s0 + $0x12] sm:$0x3f] }
 0x36b   :  { %v1675_v18 = vpop.permute.xlu1 %1674  ;;  %v1680_v52 = vsel %vm1636_vm12, %v1676_v11, 0.0  ;;  %v986_v11 = vstv %s3930_s5 }
 0x36c   :  { %v1677_v63 = vsel %vm213_vm4, %v1673_v53, %v1675_v18  ;;  %v1165_v53 = vmul.f32 %v4984_v25, %v1164_v27  ;;  %v1188_v18 = vstv %s3952_s29  ;;  %s3963_s29 = sld [smem:[#allocation4 + $0x6e]] }
 0x36d   :  { %v1681_v33 = vsel %vm1636_vm12, %v1677_v63, 0.0  ;;  %v1725_v30 = vpop.permute.xlu0 %1724  ;;  %v987_v63 = vmul.f32 %v986_v11, %v4539_v43 }
 0x36e   :  { %v1682_v39 = vadd.f32 %v1681_v33, %v1680_v52  ;;  %v4993_v52 = vld [vmem:[%s6025_s0 + $0x18] sm:$0x3f] }
 0x36f   :  { %v1723_v44 = vpop.permute.xlu1 %1722  ;;  %v1189_v33 = vmul.f32 %v4993_v52, %v1188_v18  ;;  %v1154_v18 = vstv %s3948_s6  ;;  %s3966_s6 = sld [smem:[#allocation4 + $0x71]] }
 0x370   :  { %1683 = vadd.xlane.f32.xlu1 %v1682_v39  ;;  %v1726_v20 = vsel %vm213_vm4, %v1721_v8, %v1723_v44  ;;  %v1727_v55 = vsel %vm213_vm4, %v1723_v44, %v1725_v30  ;;  %v1145_v8 = vmul.f32 %v1144_v31, %v4658_v38  ;;  %v1006_v39 = vstv %s3932_s4  ;;  %s3946_s4 = sld [smem:[#allocation4 + $0x5e]] }
 0x371   :  { %v1730_v5 = vsel %vm1636_vm12, %v1726_v20, 0.0  ;;  %v1731_v32 = vsel %vm1636_vm12, %v1727_v55, 0.0  ;;  %v1007_v30 = vmul.f32 %v1006_v39, %v4560_v51  ;;  %v1208_v44 = vstv %s3954_s14  ;;  %s3971_s14 = sld [smem:[#allocation4 + $0x76]] }
 0x372   :  { %v1732_v34 = vadd.f32 %v1731_v32, %v1730_v5  ;;  %v1030_v20 = vstv %s3935_s16  ;;  %v1209_v55 = vmul.f32 %v1208_v44, %v4696_v4  ;;  %v1050_v5 = vstv %s3937_s17  ;;  %s3955_s16 = sld [smem:[#allocation4 + $0x67]] }
 0x373   :  { %v1031_v32 = vmul.f32 %v1030_v20, %v4579_v59  ;;  %v1091_v31 = vmul.f32 %v1090_v49, %v4619_v14  ;;  %s3957_s17 = sld [smem:[#allocation4 + $0x69]] }
 0x374   :  { %1733 = vadd.xlane.f32.xlu0 %v1732_v34  ;;  %v1228_v34 = vstv %s3956_s18  ;;  %s3959_s18 = sld [smem:[#allocation4 + $0x6b]] }
 0x376   :  { %v1134_v27 = vstv %s3946_s4  ;;  %s3964_s4 = sld [smem:[#allocation4 + $0x6f]] }
 0x378   :  { %v1218_v44 = vstv %s3955_s16  ;;  %s3977_s16 = sld [smem:[#allocation4 + $0x7c]] }
 0x381   :  { %1083 = vrot.lane.b32.xlu1 %v1081_v60, %s4381_s20  ;;  %v1051_v60 = vmul.f32 %v5007_v46, %v1050_v5 }
 0x385   :  { %1107 = vrot.lane.b32.xlu1 %v1105_v16, %s4373_s1  ;;  %v1229_v16 = vmul.f32 %v1228_v34, %v4709_v12 }
 0x389   :  { %1127 = vrot.lane.b32.xlu1 %v1125_v2, %s4378_s10  ;;  %v1071_v2 = vmul.f32 %v1070_v19, %v4611_v7 }
 0x38a   :  { %939 = vrot.lane.b32.xlu0 %v937_v22, %s4373_s1  ;;  %v1249_v22 = vmul.f32 %v5015_v62, %v1248_v17 }
 0x38d   :  { %1147 = vrot.lane.b32.xlu1 %v1145_v8, %s4380_s9 }
 0x38e   :  { %969 = vrot.lane.b32.xlu0 %v967_v56, %s4376_s23  ;;  %v1114_v56 = vstv %s3944_s8 }
 0x38f   :  { %v1115_v8 = vmul.f32 %v1114_v56, %v4632_v21 }
 0x391   :  { %1167 = vrot.lane.b32.xlu1 %v1165_v53, %s4381_s20  ;;  %v5029_v53 = vld [vmem:[%s6025_s0 + $0x12] sm:$0xf] }
 0x392   :  { %989 = vrot.lane.b32.xlu0 %v987_v63, %s4379_s19  ;;  %v1135_v11 = vmul.f32 %v5029_v53, %v1134_v27  ;;  %v1155_v63 = vmul.f32 %v1154_v18, %v4662_v40 }
 0x395   :  { %1191 = vrot.lane.b32.xlu1 %v1189_v33, %s4373_s1  ;;  %v1174_v33 = vstv %s3950_s30  ;;  %s3968_s30 = sld [smem:[#allocation4 + $0x73]] }
 0x396   :  { %1009 = vrot.lane.b32.xlu0 %v1007_v30, %s4382_s21  ;;  %v1175_v39 = vmul.f32 %v1174_v33, %v4670_v50  ;;  %v1198_v30 = vstv %s3953_s11  ;;  %s3975_s11 = sld [smem:[#allocation4 + $0x7a]] }
 0x397   :  { %v1199_v20 = vmul.f32 %v1198_v30, %v4683_v58  ;;  %v932_v30 = vstv %s3924_s24  ;;  %s3984_s24 = sld [smem:[#allocation4 + $0x83]] }
 0x399   :  { %1211 = vrot.lane.b32.xlu1 %v1209_v55, %s4378_s10  ;;  %v5042_v55 = vld [vmem:[%s6025_s0 + $0x1a] sm:$0xf] }
 0x39a   :  { %1033 = vrot.lane.b32.xlu0 %v1031_v32, %s4377_s13  ;;  %6073 = vst [vmem:[#allocation33_spill] sm:$0xff] %v5042_v55  ;;  %v1219_v5 = vmul.f32 %v5042_v55, %v1218_v44  ;;  %v1238_v32 = vstv %s3957_s17  ;;  %s3980_s17 = sld [smem:[#allocation4 + $0x7f]] }
 0x39b   :  { %v1239_v34 = vmul.f32 %v1238_v32, %v4713_v13 }
 0x39d   :  { %1231 = vrot.lane.b32.xlu1 %v1229_v16, %s4380_s9  ;;  %v950_v16 = vpop.permute.xlu1 %949 }
 0x39e   :  { %1053 = vrot.lane.b32.xlu0 %v1051_v60, %s4376_s23  ;;  %v1258_v60 = vstv %s3959_s18  ;;  %s3962_s18 = sld [smem:[#allocation4 + $0x6d]] }
 0x39f   :  { %v1259_v17 = vmul.f32 %v1258_v60, %v4721_v23 }
 0x3a1   :  { %1251 = vrot.lane.b32.xlu1 %v1249_v22, %s4381_s20  ;;  %v960_v19 = vpop.permute.xlu1 %959 }
 0x3a2   :  { %1073 = vrot.lane.b32.xlu0 %v1071_v2, %s4379_s19  ;;  %v961_v24 = vrot.slane %v960_v19, 2 }
 0x3a5   :  { %v980_v22 = vpop.permute.xlu1 %979 }
 0x3a6   :  { %1093 = vrot.lane.b32.xlu0 %v1091_v31, %s4382_s21 }
 0x3a9   :  { %v1000_v2 = vpop.permute.xlu1 %999 }
 0x3aa   :  { %1117 = vrot.lane.b32.xlu0 %v1115_v8, %s4377_s13 }
 0x3ad   :  { %v1024_v49 = vpop.permute.xlu1 %1023 }
 0x3ae   :  { %1137 = vrot.lane.b32.xlu0 %v1135_v11, %s4376_s23 }
 0x3b1   :  { %v5050_v31 = vpop.permute.xlu1 %1043 }
 0x3b2   :  { %1157 = vrot.lane.b32.xlu0 %v1155_v63, %s4379_s19 }
 0x3b5   :  { %v5052_v56 = vpop.permute.xlu1 %1063 }
 0x3b6   :  { %1177 = vrot.lane.b32.xlu0 %v1175_v39, %s4382_s21 }
 0x3ba   :  { %1201 = vrot.lane.b32.xlu0 %v1199_v20, %s4377_s13 }
 0x3be   :  { %1221 = vrot.lane.b32.xlu0 %v1219_v5, %s4376_s23  ;;  %v951_v5 = vrot.slane %v950_v16, 2 }
 0x3c2   :  { %1241 = vrot.lane.b32.xlu0 %v1239_v34, %s4379_s19 }
 0x3c6   :  { %1261 = vrot.lane.b32.xlu0 %v1259_v17, %s4382_s21  ;;  %v933_v17 = vmul.f32 %v932_v30, %v4734_v45 }
 0x3f9   :  { %v1684_v27 = vpop.xlane.xlu1 %1683 }
 0x3fa   :  { %v1685_v8 = vrot.slane %v1684_v27, 4 }
 0x3fc   :  { %v1686_v11 = vadd.f32 %v1685_v8, %v1684_v27  ;;  %v952_v8 = vsel %vm268_vm6, %v950_v16, %v951_v5 }
 0x3fd   :  { %v1734_v18 = vpop.xlane.xlu0 %1733 }
 0x3fe   :  { %v1735_v63 = vrot.slane %v1734_v18, 4  ;;  %v1687_v33 = vrot.slane %v1686_v11, 2 }
 0x400   :  { %v1736_v39 = vadd.f32 %v1735_v63, %v1734_v18  ;;  %v1688_v44 = vadd.f32 %v1687_v33, %v1686_v11  ;;  %v962_v63 = vsel %vm279_vm7, %v960_v19, %v961_v24  ;;  %v981_v33 = vrot.slane %v980_v22, 6  ;;  %v1084_v19 = vpop.permute.xlu1 %1083 }
 0x401   :  { %v940_v20 = vpop.permute.xlu0 %939 }
 0x402   :  { %v941_v32 = vrot.slane %v940_v20, 2  ;;  %v1689_v34 = vrot.slane %v1688_v44, 1  ;;  %v1737_v60 = vrot.slane %v1736_v39, 2 }
 0x404   :  { %v942_v36 = vsel %vm190_vm2, %v940_v20, %v941_v32  ;;  %v1690_v35 = vadd.f32 %v1689_v34, %v1688_v44  ;;  %v1738_v0 = vadd.f32 %v1737_v60, %v1736_v39  ;;  %v1001_v44 = vrot.slane %v1000_v2, 6 }
 0x405   :  { %v944_v23 = vadd.f32 %v942_v36, %v933_v17  ;;  %v970_v27 = vpop.permute.xlu0 %969  ;;  %v982_v36 = vsel %vm300_vm8, %v981_v33, %v980_v22  ;;  %v1025_v17 = vrot.slane %v1024_v49, 2 }
 0x406   :  { %v971_v13 = vrot.slane %v970_v27, 6  ;;  %4164 = vpush %v1690_v35  ;;  %v1739_v18 = vrot.slane %v1738_v0, 1  ;;  %v1002_v24 = vsel %vm322_vm10, %v1001_v44, %v1000_v2 }
 0x407   :  { %v954_v11 = vadd.f32 %v952_v8, %v944_v23  ;;  %v1026_v8 = vsel %vm190_vm2, %v1024_v49, %v1025_v17 }
 0x408   :  { %v1740_v55 = vadd.f32 %v1739_v18, %v1738_v0  ;;  %v972_v45 = vsel %vm159_vm5, %v971_v13, %v970_v27  ;;  %v1016_v0 = vstv %s3933_s25  ;;  %v1045_v18 = vrot.slane %v5050_v31, 2  ;;  %s3986_s25 = sld [smem:[#allocation4 + $0x85]] }
 0x409   :  { %v964_v58 = vadd.f32 %v962_v63, %v954_v11  ;;  %v990_v30 = vpop.permute.xlu0 %989  ;;  %v1108_v11 = vpop.permute.xlu1 %1107 }
 0x40a   :  { %v991_v20 = vrot.slane %v990_v30, 6  ;;  %4166 = vpush %v1740_v55 }
 0x40b   :  { %v974_v39 = vadd.f32 %v972_v45, %v964_v58  ;;  %v1017_v58 = vmul.f32 %v1016_v0, %v4745_v57 }
 0x40c   :  { %v992_v35 = vsel %vm311_vm9, %v991_v20, %v990_v30 }
 0x40d   :  { %v984_v16 = vadd.f32 %v982_v36, %v974_v39  ;;  %v1010_v5 = vpop.permute.xlu0 %1009  ;;  %v1046_v39 = vsel %vm279_vm7, %v5050_v31, %v1045_v18  ;;  %v1065_v36 = vrot.slane %v5052_v56, 6  ;;  %v1128_v49 = vpop.permute.xlu1 %1127 }
 0x40e   :  { %v1011_v23 = vrot.slane %v1010_v5, 6 }
 0x40f   :  { %v994_v32 = vadd.f32 %v992_v35, %v984_v16 }
 0x410   :  { %v1012_v13 = vsel %vm333_vm11, %v1011_v23, %v1010_v5 }
 0x411   :  { %v1004_v34 = vadd.f32 %v1002_v24, %v994_v32  ;;  %v1034_v60 = vpop.permute.xlu0 %1033  ;;  %v1066_v32 = vsel %vm300_vm8, %v1065_v36, %v5052_v56  ;;  %v1085_v24 = vrot.slane %v1084_v19, 6 }
 0x412   :  { %v1035_v55 = vrot.slane %v1034_v60, 2 }
 0x413   :  { %v1014_v45 = vadd.f32 %v1012_v13, %v1004_v34  ;;  %v1086_v13 = vsel %vm322_vm10, %v1085_v24, %v1084_v19 }
 0x414   :  { %v1036_v2 = vsel %vm268_vm6, %v1034_v60, %v1035_v55 }
 0x415   :  { %v1018_v22 = vadd.f32 %v1017_v58, %v1014_v45  ;;  %v1054_v27 = vpop.permute.xlu0 %1053  ;;  %v1100_v58 = vstv %s3942_s26  ;;  %v1148_v45 = vpop.permute.xlu1 %1147  ;;  %s3967_s26 = sld [smem:[#allocation4 + $0x72]] }
 0x416   :  { %v1055_v33 = vrot.slane %v1054_v27, 6 }
 0x417   :  { %v1028_v63 = vadd.f32 %v1026_v8, %v1018_v22  ;;  %v1109_v22 = vrot.slane %v1108_v11, 2  ;;  %v1101_v8 = vmul.f32 %v1100_v58, %v4758_v26 }
 0x418   :  { %v1056_v16 = vsel %vm159_vm5, %v1055_v33, %v1054_v27 }
 0x419   :  { %v1038_v30 = vadd.f32 %v1036_v2, %v1028_v63  ;;  %v1074_v20 = vpop.permute.xlu0 %1073  ;;  %v1110_v33 = vsel %vm190_vm2, %v1108_v11, %v1109_v22 }
 0x41a   :  { %v1075_v5 = vrot.slane %v1074_v20, 6 }
 0x41b   :  { %v1048_v44 = vadd.f32 %v1046_v39, %v1038_v30  ;;  %v1129_v30 = vrot.slane %v1128_v49, 2 }
 0x41c   :  { %v1076_v34 = vsel %vm311_vm9, %v1075_v5, %v1074_v20  ;;  %v1168_v20 = vpop.permute.xlu1 %1167 }
 0x41d   :  { %v1058_v35 = vadd.f32 %v1056_v16, %v1048_v44  ;;  %v1094_v23 = vpop.permute.xlu0 %1093  ;;  %v1130_v5 = vsel %vm279_vm7, %v1128_v49, %v1129_v30 }
 0x41e   :  { %v1095_v60 = vrot.slane %v1094_v23, 6 }
 0x41f   :  { %v1068_v0 = vadd.f32 %v1066_v32, %v1058_v35  ;;  %v1149_v35 = vrot.slane %v1148_v45, 6 }
 0x420   :  { %v1096_v27 = vsel %vm333_vm11, %v1095_v60, %v1094_v23 }
 0x421   :  { %v1078_v17 = vadd.f32 %v1076_v34, %v1068_v0  ;;  %v1118_v31 = vpop.permute.xlu0 %1117  ;;  %v1192_v34 = vpop.permute.xlu1 %1191  ;;  %v1150_v11 = vsel %vm300_vm8, %v1149_v35, %v1148_v45 }
 0x422   :  { %v1119_v56 = vrot.slane %v1118_v31, 2 }
 0x423   :  { %v1088_v55 = vadd.f32 %v1086_v13, %v1078_v17  ;;  %v1169_v17 = vrot.slane %v1168_v20, 6 }
 0x424   :  { %v1120_v19 = vsel %vm268_vm6, %v1118_v31, %v1119_v56 }
 0x425   :  { %v1098_v18 = vadd.f32 %v1096_v27, %v1088_v55  ;;  %v1138_v63 = vpop.permute.xlu0 %1137  ;;  %v1170_v49 = vsel %vm322_vm10, %v1169_v17, %v1168_v20  ;;  %v1184_v27 = vstv %s3951_s27  ;;  %s3989_s27 = sld [smem:[#allocation4 + $0x88]] }
 0x426   :  { %v1139_v44 = vrot.slane %v1138_v63, 6 }
 0x427   :  { %v1102_v2 = vadd.f32 %v1101_v8, %v1098_v18  ;;  %v1212_v8 = vpop.permute.xlu1 %1211 }
 0x428   :  { %v1140_v24 = vsel %vm159_vm5, %v1139_v44, %v1138_v63  ;;  %v1213_v44 = vrot.slane %v1212_v8, 2 }
 0x429   :  { %v1112_v39 = vadd.f32 %v1110_v33, %v1102_v2  ;;  %v1158_v36 = vpop.permute.xlu0 %1157  ;;  %v1193_v2 = vrot.slane %v1192_v34, 2  ;;  %v1185_v33 = vmul.f32 %v1184_v27, %v4771_v54 }
 0x42a   :  { %v1159_v0 = vrot.slane %v1158_v36, 6 }
 0x42b   :  { %v1122_v16 = vadd.f32 %v1120_v19, %v1112_v39  ;;  %v1194_v19 = vsel %vm190_vm2, %v1192_v34, %v1193_v2 }
 0x42c   :  { %v1160_v31 = vsel %vm311_vm9, %v1159_v0, %v1158_v36  ;;  %v1232_v36 = vpop.permute.xlu1 %1231  ;;  %v1214_v0 = vsel %vm279_vm7, %v1212_v8, %v1213_v44 }
 0x42d   :  { %v1132_v23 = vadd.f32 %v1130_v5, %v1122_v16  ;;  %v1178_v32 = vpop.permute.xlu0 %1177 }
 0x42e   :  { %v1179_v55 = vrot.slane %v1178_v32, 6 }
 0x42f   :  { %v1142_v60 = vadd.f32 %v1140_v24, %v1132_v23 }
 0x430   :  { %v1180_v63 = vsel %vm333_vm11, %v1179_v55, %v1178_v32  ;;  %v1252_v34 = vpop.permute.xlu1 %1251 }
 0x431   :  { %v1152_v13 = vadd.f32 %v1150_v11, %v1142_v60  ;;  %v1202_v58 = vpop.permute.xlu0 %1201  ;;  %v1233_v60 = vrot.slane %v1232_v36, 6  ;;  %v1253_v27 = vrot.slane %v1252_v34, 6 }
 0x432   :  { %v1203_v45 = vrot.slane %v1202_v58, 2 }
 0x433   :  { %v1162_v22 = vadd.f32 %v1160_v31, %v1152_v13 }
 0x434   :  { %v1204_v5 = vsel %vm268_vm6, %v1202_v58, %v1203_v45 }
 0x435   :  { %v1172_v18 = vadd.f32 %v1170_v49, %v1162_v22  ;;  %v1222_v56 = vpop.permute.xlu0 %1221  ;;  %v1234_v49 = vsel %vm300_vm8, %v1233_v60, %v1232_v36 }
 0x436   :  { %v1223_v35 = vrot.slane %v1222_v56, 6 }
 0x437   :  { %v1182_v30 = vadd.f32 %v1180_v63, %v1172_v18  ;;  %s5087_s5 = spop %4164 }
 0x438   :  { %v1224_v13 = vsel %vm159_vm5, %v1223_v35, %v1222_v56  ;;  %v1254_v56 = vsel %vm322_vm10, %v1253_v27, %v1252_v34  ;;  %v1335_v34 = vstv %s3968_s30  ;;  %s3995_s30 = sld [smem:[#allocation4 + $0x8e]] }
 0x439   :  { %v1186_v39 = vadd.f32 %v1185_v33, %v1182_v30  ;;  %v1242_v20 = vpop.permute.xlu0 %1241 }
 0x43a   :  { %v1243_v31 = vrot.slane %v1242_v20, 6 }
 0x43b   :  { %v1196_v16 = vadd.f32 %v1194_v19, %v1186_v39  ;;  %s4167_s8 = spop %4166  ;;  %v1268_v19 = vstv %s3960_s28  ;;  %s3991_s28 = sld [smem:[#allocation4 + $0x8a]] }
 0x43c   :  { %v1742_v23 = vstv %s4167_s8  ;;  %s3969_s8 = sld [smem:[#allocation4 + $0x74]] }
 0x43d   :  { %v1206_v24 = vadd.f32 %v1204_v5, %v1196_v16  ;;  %v1743_v32 = vmul.f32 0.001953125, %v1742_v23  ;;  %v1262_v22 = vpop.permute.xlu0 %1261  ;;  %v1285_v5 = vstv %s3963_s29  ;;  %s3972_s29 = sld [smem:[#allocation4 + $0x77]] }
 0x43e   :  { %v1263_v63 = vrot.slane %v1262_v22, 6 }
 0x43f   :  { %v1216_v11 = vadd.f32 %v1214_v0, %v1206_v24  ;;  %v5092_v17 = vsub.f32 %v4898_v42, %v1743_v32  ;;  %v1244_v42 = vsel %vm311_vm9, %v1243_v31, %v1242_v20  ;;  %v1286_v24 = vmul.f32 %v1285_v5, %v4505_v28 }
 0x440   :  { %v1264_v39 = vsel %vm333_vm11, %v1263_v63, %v1262_v22  ;;  %v1295_v32 = vstv %s3964_s4  ;;  %v1336_v28 = vmul.f32 %v4927_v15, %v1335_v34  ;;  %v1359_v31 = vstv %s3971_s14  ;;  %s3974_s4 = sld [smem:[#allocation4 + $0x79]] }
 0x441   :  { %v1226_v55 = vadd.f32 %v1224_v13, %v1216_v11  ;;  %v1745_v58 = vmul.f32 %v5092_v17, %v5092_v17  ;;  %v1296_v60 = vmul.f32 %v1295_v32, %v4535_v41  ;;  %v1315_v11 = vstv %s3966_s6  ;;  %s3993_s6 = sld [smem:[#allocation4 + $0x8c]] }
 0x442   :  { %v1316_v13 = vmul.f32 %v1315_v11, %v4547_v47  ;;  %v1399_v22 = vstv %s3975_s11  ;;  %v1275_v5 = vstv %s3962_s18  ;;  %v1305_v32 = vstv %s3965_s3  ;;  %s3976_s14 = sld [smem:[#allocation4 + $0x7b]] }
 0x443   :  { %v1236_v18 = vadd.f32 %v1234_v49, %v1226_v55  ;;  %v1747_v8 = vcombine.high %v1745_v58, %v1745_v58  ;;  %v1754_v2 = vrot.slane %v1745_v58, %v4479_v9  ;;  %v1360_v55 = vmul.f32 %v4934_v10, %v1359_v31  ;;  %s3981_s11 = sld [smem:[#allocation4 + $0x80]] }
 0x444   :  { %v1379_v58 = vstv %s3973_s15  ;;  %v1400_v47 = vmul.f32 %v1399_v22, %v4607_v6  ;;  %v1325_v11 = vstv %s3967_s26  ;;  %s3978_s15 = sld [smem:[#allocation4 + $0x7d]] }
 0x445   :  { %v1246_v33 = vadd.f32 %v1244_v42, %v1236_v18  ;;  %1763 = vrot.lane.b32.xlu1 %v1754_v2, %s4375_s22  ;;  %v1761_v45 = vrot.slane %v1747_v8, %v4479_v9  ;;  %v1762_v35 = vcombine.high %v1754_v2, %v1754_v2  ;;  %v1380_v41 = vmul.f32 %v1379_v58, %v4594_v1  ;;  %s3987_s18 = sld [smem:[#allocation4 + $0x86]] }
 0x446   :  { %v1326_v34 = vmul.f32 %v1325_v11, %v4539_v43  ;;  %v1389_v31 = vstv %s3974_s4  ;;  %s3992_s3 = sld [smem:[#allocation4 + $0x8b]] }
 0x447   :  { %v1256_v30 = vadd.f32 %v1254_v56, %v1246_v33  ;;  %v1567_v58 = vstv %s3993_s6  ;;  %s3961_s26 = sld [smem:[#allocation4 + $0x6c]] }
 0x448   :  { %v1409_v22 = vstv %s3976_s14  ;;  %s3997_s6 = sld [smem:[#allocation6 + $0x3]] }
 0x449   :  { %v1266_v44 = vadd.f32 %v1264_v39, %v1256_v30  ;;  %1767 = vrot.lane.b32.xlu1 %v1761_v45, %s4375_s22  ;;  %s1697_s14 = sld [smem:[#allocation8]] }
 0x44b   :  { %v5105_v36 = vadd.f32 %v1268_v19, %v1266_v44  ;;  %v1419_v19 = vstv %s3977_s16  ;;  %s3983_s16 = sld [smem:[#allocation4 + $0x82]] }
 0x44c   :  { %v1420_v44 = vmul.f32 %v4953_v61, %v1419_v19  ;;  %v1483_v61 = vstv %s3984_s24  ;;  %s3994_s24 = sld [smem:[#allocation4 + $0x8d]] }
 0x44d   :  { %v1804_v16 = vrot.slane %v5105_v36, %v4479_v9  ;;  %v1797_v23 = vcombine.high %v5105_v36, %v5105_v36 }
 0x44f   :  { %1813 = vrot.lane.b32.xlu0 %v1804_v16, %s4375_s22  ;;  %v1812_v20 = vcombine.high %v1804_v16, %v1804_v16  ;;  %v1811_v0 = vrot.slane %v1797_v23, %v4479_v9  ;;  %v1443_v16 = vstv %s3980_s17  ;;  %v1276_v23 = vmul.f32 %v4967_v37, %v1275_v5  ;;  %s3985_s17 = sld [smem:[#allocation4 + $0x84]] }
 0x451   :  { %1815 = vrot.lane.b32.xlu1 %v1812_v20, %s4375_s22  ;;  %v1444_v20 = vmul.f32 %v4960_v48, %v1443_v16  ;;  %v1306_v48 = vmul.f32 %v4976_v3, %v1305_v32 }
 0x453   :  { %1765 = vrot.lane.b32.xlu0 %v1762_v35, %s4375_s22  ;;  %v1463_v35 = vstv %s3982_s2  ;;  %s3990_s2 = sld [smem:[#allocation4 + $0x89]] }
 0x455   :  { %1288 = vrot.lane.b32.xlu1 %v1286_v24, %s4377_s13  ;;  %v1464_v24 = vmul.f32 %v1463_v35, %v4645_v29  ;;  %v1527_v29 = vstv %s3989_s27  ;;  %s3970_s27 = sld [smem:[#allocation4 + $0x75]] }
 0x456   :  { %v1528_v3 = vmul.f32 %v4993_v52, %v1527_v29  ;;  %v1587_v52 = vstv %s3995_s30 }
 0x457   :  { %1817 = vrot.lane.b32.xlu0 %v1811_v0, %s4375_s22  ;;  %v1503_v0 = vstv %s3986_s25  ;;  %s3996_s25 = sld [smem:[#allocation4 + $0x8f]] }
 0x458   :  { %v1504_v37 = vmul.f32 %v4984_v25, %v1503_v0  ;;  %v1547_v25 = vstv %s3991_s28  ;;  %s3988_s28 = sld [smem:[#allocation4 + $0x87]] }
 0x459   :  { %1298 = vrot.lane.b32.xlu1 %v1296_v60, %s4378_s10  ;;  %v1484_v60 = vmul.f32 %v1483_v61, %v4658_v38  ;;  %v1548_v43 = vmul.f32 %v1547_v25, %v4696_v4  ;;  %v1588_v4 = vmul.f32 %v5015_v62, %v1587_v52 }
 0x45d   :  { %1318 = vrot.lane.b32.xlu1 %v1316_v13, %s4380_s9  ;;  %v1345_v13 = vstv %s3969_s8  ;;  %s3979_s8 = sld [smem:[#allocation4 + $0x7e]] }
 0x45e   :  { %v1346_v38 = vmul.f32 %v1345_v13, %v4560_v51  ;;  %v1390_v51 = vmul.f32 %v5007_v46, %v1389_v31 }
 0x461   :  { %1338 = vrot.lane.b32.xlu1 %v1336_v28, %s4381_s20  ;;  %v1369_v28 = vstv %s3972_s29 }
 0x465   :  { %1362 = vrot.lane.b32.xlu1 %v1360_v55, %s4373_s1  ;;  %v1370_v55 = vmul.f32 %v1369_v28, %v4579_v59  ;;  %v1410_v59 = vmul.f32 %v1409_v22, %v4611_v7  ;;  %v1493_v7 = vstv %s3985_s17  ;;  %s4000_s17 = sld [smem:[#allocation8 + $0x2]] }
 0x469   :  { %1382 = vrot.lane.b32.xlu1 %v1380_v41, %s4378_s10  ;;  %v1568_v41 = vmul.f32 %v1567_v58, %v4709_v12  ;;  %v1473_v12 = vstv %s3983_s16  ;;  %s3998_s16 = sld [smem:[#allocation8 + $0x1]] }
 0x46a   :  { %v1474_v62 = vmul.f32 %v5029_v53, %v1473_v12  ;;  %v6075_v53 = vld [vmem:[#allocation33_spill] sm:$0xff] }
 0x46d   :  { %1402 = vrot.lane.b32.xlu1 %v1400_v47, %s4380_s9  ;;  %v1429_v47 = vstv %s3978_s15  ;;  %s1700_s15 = sld [smem:[#allocation9]] }
 0x46e   :  { %v1430_v46 = vmul.f32 %v1429_v47, %v4619_v14  ;;  %v1513_v14 = vstv %s3987_s18  ;;  %s4001_s18 = sld [smem:[#allocation9 + $0x2]] }
 0x4b7   :  { %v1764_v49 = vpop.permute.xlu1 %1763 }
 0x4bb   :  { %v1768_v15 = vpop.permute.xlu1 %1767 }
 0x4c1   :  { %v1814_v27 = vpop.permute.xlu0 %1813 }
 0x4c3   :  { %v1816_v18 = vpop.permute.xlu1 %1815 }
 0x4c4   :  { %v1819_v63 = vsel %vm213_vm4, %v1814_v27, %v1816_v18  ;;  %v1494_v27 = vmul.f32 %v1493_v7, %v4662_v40  ;;  %v6076_v40 = vld [vmem:[#allocation28_spill] sm:$0xff] }
 0x4c5   :  { %v1766_v8 = vpop.permute.xlu0 %1765  ;;  %v1823_v30 = vsel %vm1636_vm12, %v1819_v63, 0.0 }
 0x4c6   :  { %v1769_v2 = vsel %vm213_vm4, %v1764_v49, %v1766_v8  ;;  %v1770_v10 = vsel %vm213_vm4, %v1766_v8, %v1768_v15  ;;  %v1453_v49 = vstv %s3981_s11  ;;  %v1537_v8 = vstv %s3990_s2  ;;  %s4013_s2 = sld [smem:[#allocation11 + $0xa]] }
 0x4c7   :  { %v1773_v42 = vsel %vm1636_vm12, %v1769_v2, 0.0  ;;  %v1774_v1 = vsel %vm1636_vm12, %v1770_v10, 0.0  ;;  %v1454_v15 = vmul.f32 %v1453_v49, %v4632_v21  ;;  %v1557_v21 = vstv %s3992_s3  ;;  %v6074_v2 = vld [vmem:[#allocation27_spill] sm:$0xff]  ;;  %s4014_s3 = sld [smem:[#allocation11 + $0xb]] }
 0x4c8   :  { %v1775_v33 = vadd.f32 %v1774_v1, %v1773_v42  ;;  %v1538_v10 = vmul.f32 %v1537_v8, %v6074_v2  ;;  %v1558_v42 = vmul.f32 %v6075_v53, %v1557_v21  ;;  %v1577_v1 = vstv %s3994_s24  ;;  %s4015_s24 = sld [smem:[#allocation11 + $0xc]] }
 0x4c9   :  { %v1818_v56 = vpop.permute.xlu0 %1817  ;;  %v1578_v63 = vmul.f32 %v1577_v1, %v6076_v40 }
 0x4ca   :  { %v1820_v6 = vsel %vm213_vm4, %v1816_v18, %v1818_v56  ;;  %1776 = vadd.xlane.f32.xlu1 %v1775_v33  ;;  %v1514_v18 = vmul.f32 %v1513_v14, %v4670_v50  ;;  %v1597_v33 = vstv %s3996_s25  ;;  %v6077_v50 = vld [vmem:[#allocation29_spill] sm:$0xff]  ;;  %s4017_s25 = sld [smem:[#allocation11 + $0xe]] }
 0x4cb   :  { %v1824_v45 = vsel %vm1636_vm12, %v1820_v6, 0.0  ;;  %v1598_v56 = vmul.f32 %v1597_v33, %v6077_v50  ;;  %v1289_v6 = vpop.permute.xlu1 %1288 }
 0x4cc   :  { %v1825_v39 = vadd.f32 %v1824_v45, %v1823_v30 }
 0x4ce   :  { %1826 = vadd.xlane.f32.xlu0 %v1825_v39 }
 0x4cf   :  { %v1299_v30 = vpop.permute.xlu1 %1298 }
 0x4d3   :  { %v1319_v45 = vpop.permute.xlu1 %1318 }
 0x4d7   :  { %v1339_v39 = vpop.permute.xlu1 %1338 }
 0x4d8   :  { %v1340_v7 = vrot.slane %v1339_v39, 6 }
 0x4da   :  { %v1341_v2 = vsel %vm322_vm10, %v1340_v7, %v1339_v39 }
 0x4db   :  { %1422 = vrot.lane.b32.xlu1 %v1420_v44, %s4381_s20  ;;  %v1363_v19 = vpop.permute.xlu1 %1362 }
 0x4dc   :  { %v1364_v40 = vrot.slane %v1363_v19, 2 }
 0x4df   :  { %1446 = vrot.lane.b32.xlu1 %v1444_v20, %s4373_s1  ;;  %v5188_v44 = vpop.permute.xlu1 %1382 }
 0x4e3   :  { %1466 = vrot.lane.b32.xlu1 %v1464_v24, %s4378_s10  ;;  %v5190_v16 = vpop.permute.xlu1 %1402 }
 0x4e4   :  { %1278 = vrot.lane.b32.xlu0 %v1276_v23, %s4373_s1 }
 0x4e7   :  { %1486 = vrot.lane.b32.xlu1 %v1484_v60, %s4380_s9 }
 0x4e8   :  { %1308 = vrot.lane.b32.xlu0 %v1306_v48, %s4376_s23  ;;  %v1271_v48 = vstv %s3961_s26  ;;  %s4019_s26 = sld [smem:[#allocation11 + $0x10]] }
 0x4eb   :  { %1506 = vrot.lane.b32.xlu1 %v1504_v37, %s4381_s20  ;;  %v1290_v37 = vrot.slane %v1289_v6, 2 }
 0x4ec   :  { %1328 = vrot.lane.b32.xlu0 %v1326_v34, %s4379_s19 }
 0x4ed   :  { %v1291_v58 = vsel %vm268_vm6, %v1289_v6, %v1290_v37 }
 0x4ef   :  { %1530 = vrot.lane.b32.xlu1 %v1528_v3, %s4373_s1  ;;  %v6078_v3 = vld [vmem:[#allocation31_spill] sm:$0xff] }
 0x4f0   :  { %1348 = vrot.lane.b32.xlu0 %v1346_v38, %s4382_s21  ;;  %v1272_v13 = vmul.f32 %v1271_v48, %v6078_v3  ;;  %v1300_v38 = vrot.slane %v1299_v30, 2 }
 0x4f2   :  { %v1301_v22 = vsel %vm279_vm7, %v1299_v30, %v1300_v38 }
 0x4f3   :  { %1550 = vrot.lane.b32.xlu1 %v1548_v43, %s4378_s10 }
 0x4f4   :  { %1372 = vrot.lane.b32.xlu0 %v1370_v55, %s4377_s13 }
 0x4f7   :  { %1570 = vrot.lane.b32.xlu1 %v1568_v41, %s4380_s9 }
 0x4f8   :  { %1392 = vrot.lane.b32.xlu0 %v1390_v51, %s4376_s23 }
 0x4fb   :  { %1590 = vrot.lane.b32.xlu1 %v1588_v4, %s4381_s20  ;;  %v1320_v4 = vrot.slane %v1319_v45, 6 }
 0x4fc   :  { %1412 = vrot.lane.b32.xlu0 %v1410_v59, %s4379_s19 }
 0x500   :  { %1432 = vrot.lane.b32.xlu0 %v1430_v46, %s4382_s21 }
 0x504   :  { %1456 = vrot.lane.b32.xlu0 %v1454_v15, %s4377_s13 }
 0x508   :  { %1476 = vrot.lane.b32.xlu0 %v1474_v62, %s4376_s23  ;;  %v1321_v62 = vsel %vm300_vm8, %v1320_v4, %v1319_v45  ;;  %v1365_v45 = vsel %vm190_vm2, %v1363_v19, %v1364_v40 }
 0x50c   :  { %1496 = vrot.lane.b32.xlu0 %v1494_v27, %s4379_s19 }
 0x510   :  { %1516 = vrot.lane.b32.xlu0 %v1514_v18, %s4382_s21 }
 0x514   :  { %1540 = vrot.lane.b32.xlu0 %v1538_v10, %s4377_s13  ;;  %v1355_v10 = vstv %s3970_s27  ;;  %s4022_s27 = sld [smem:[#allocation11 + $0x13]] }
 0x515   :  { %v1356_v33 = vmul.f32 %v1355_v10, %v4745_v57  ;;  %v1404_v57 = vrot.slane %v5190_v16, 6 }
 0x518   :  { %1560 = vrot.lane.b32.xlu0 %v1558_v42, %s4376_s23 }
 0x51c   :  { %1580 = vrot.lane.b32.xlu0 %v1578_v63, %s4379_s19 }
 0x520   :  { %1600 = vrot.lane.b32.xlu0 %v1598_v56, %s4382_s21 }
 0x553   :  { %v1777_v20 = vpop.xlane.xlu1 %1776 }
 0x554   :  { %v1778_v5 = vrot.slane %v1777_v20, 4 }
 0x556   :  { %v1779_v35 = vadd.f32 %v1778_v5, %v1777_v20  ;;  %v1384_v20 = vrot.slane %v5188_v44, 2 }
 0x557   :  { %v1827_v23 = vpop.xlane.xlu0 %1826  ;;  %v1423_v53 = vpop.permute.xlu1 %1422 }
 0x558   :  { %v1828_v24 = vrot.slane %v1827_v23, 4  ;;  %v1780_v32 = vrot.slane %v1779_v35, 2 }
 0x55a   :  { %v1829_v61 = vadd.f32 %v1828_v24, %v1827_v23  ;;  %v1781_v0 = vadd.f32 %v1780_v32, %v1779_v35 }
 0x55b   :  { %v1279_v60 = vpop.permute.xlu0 %1278  ;;  %v1447_v5 = vpop.permute.xlu1 %1446 }
 0x55c   :  { %v1280_v11 = vrot.slane %v1279_v60, 2  ;;  %v1782_v29 = vrot.slane %v1781_v0, 1  ;;  %v1830_v34 = vrot.slane %v1829_v61, 2 }
 0x55e   :  { %v1281_v25 = vsel %vm190_vm2, %v1279_v60, %v1280_v11  ;;  %v1783_v28 = vadd.f32 %v1782_v29, %v1781_v0  ;;  %v1831_v43 = vadd.f32 %v1830_v34, %v1829_v61  ;;  %v1385_v61 = vsel %vm279_vm7, %v5188_v44, %v1384_v20 }
 0x55f   :  { %v1283_v31 = vadd.f32 %v1281_v25, %v1272_v13  ;;  %v1309_v55 = vpop.permute.xlu0 %1308  ;;  %v1467_v19 = vpop.permute.xlu1 %1466  ;;  %v1405_v29 = vsel %vm300_vm8, %v1404_v57, %v5190_v16  ;;  %v1424_v34 = vrot.slane %v1423_v53, 6 }
 0x560   :  { %v1310_v51 = vrot.slane %v1309_v55, 6  ;;  %4168 = vpush %v1783_v28  ;;  %v1832_v52 = vrot.slane %v1831_v43, 1 }
 0x561   :  { %v1293_v41 = vadd.f32 %v1291_v58, %v1283_v31  ;;  %v1425_v28 = vsel %vm322_vm10, %v1424_v34, %v1423_v53  ;;  %v1448_v58 = vrot.slane %v1447_v5, 2 }
 0x562   :  { %v1833_v59 = vadd.f32 %v1832_v52, %v1831_v43  ;;  %v1311_v49 = vsel %vm159_vm5, %v1310_v51, %v1309_v55  ;;  %v1439_v43 = vstv %s3979_s8  ;;  %s4024_s8 = sld [smem:[#allocation11 + $0x15]] }
 0x563   :  { %v1303_v47 = vadd.f32 %v1301_v22, %v1293_v41  ;;  %v1329_v46 = vpop.permute.xlu0 %1328  ;;  %v1487_v31 = vpop.permute.xlu1 %1486  ;;  %v1440_v52 = vmul.f32 %v1439_v43, %v4758_v26 }
 0x564   :  { %v1330_v12 = vrot.slane %v1329_v46, 6  ;;  %4170 = vpush %v1833_v59  ;;  %v1449_v59 = vsel %vm190_vm2, %v1447_v5, %v1448_v58 }
 0x565   :  { %v1313_v15 = vadd.f32 %v1311_v49, %v1303_v47  ;;  %v1468_v47 = vrot.slane %v1467_v19, 2 }
 0x566   :  { %v1331_v18 = vsel %vm311_vm9, %v1330_v12, %v1329_v46 }
 0x567   :  { %v1323_v27 = vadd.f32 %v1321_v62, %v1313_v15  ;;  %v1349_v14 = vpop.permute.xlu0 %1348  ;;  %v1507_v46 = vpop.permute.xlu1 %1506 }
 0x568   :  { %v1350_v8 = vrot.slane %v1349_v14, 6 }
 0x569   :  { %v1333_v21 = vadd.f32 %v1331_v18, %v1323_v27  ;;  %v1469_v27 = vsel %vm279_vm7, %v1467_v19, %v1468_v47 }
 0x56a   :  { %v1351_v63 = vsel %vm333_vm11, %v1350_v8, %v1349_v14  ;;  %v1488_v14 = vrot.slane %v1487_v31, 6 }
 0x56b   :  { %v1343_v42 = vadd.f32 %v1341_v2, %v1333_v21  ;;  %v1373_v1 = vpop.permute.xlu0 %1372  ;;  %v1531_v2 = vpop.permute.xlu1 %1530 }
 0x56c   :  { %v1374_v56 = vrot.slane %v1373_v1, 2  ;;  %v1489_v53 = vsel %vm300_vm8, %v1488_v14, %v1487_v31  ;;  %v1532_v5 = vrot.slane %v1531_v2, 2 }
 0x56d   :  { %v1353_v50 = vadd.f32 %v1351_v63, %v1343_v42  ;;  %v1508_v42 = vrot.slane %v1507_v46, 6 }
 0x56e   :  { %v1375_v39 = vsel %vm268_vm6, %v1373_v1, %v1374_v56 }
 0x56f   :  { %v1357_v6 = vadd.f32 %v1356_v33, %v1353_v50  ;;  %v1393_v30 = vpop.permute.xlu0 %1392  ;;  %v1509_v56 = vsel %vm322_vm10, %v1508_v42, %v1507_v46 }
 0x570   :  { %v1394_v23 = vrot.slane %v1393_v30, 6 }
 0x571   :  { %v1367_v35 = vadd.f32 %v1365_v45, %v1357_v6  ;;  %v1523_v6 = vstv %s3988_s28  ;;  %s4026_s28 = sld [smem:[#allocation11 + $0x17]] }
 0x572   :  { %v1395_v0 = vsel %vm159_vm5, %v1394_v23, %v1393_v30  ;;  %v1551_v30 = vpop.permute.xlu1 %1550 }
 0x573   :  { %v1377_v24 = vadd.f32 %v1375_v39, %v1367_v35  ;;  %v1413_v32 = vpop.permute.xlu0 %1412  ;;  %v1524_v39 = vmul.f32 %v1523_v6, %v4771_v54  ;;  %v1552_v57 = vrot.slane %v1551_v30, 2 }
 0x574   :  { %v1414_v60 = vrot.slane %v1413_v32, 6 }
 0x575   :  { %v1387_v48 = vadd.f32 %v1385_v61, %v1377_v24  ;;  %v1533_v61 = vsel %vm190_vm2, %v1531_v2, %v1532_v5  ;;  %v1553_v54 = vsel %vm279_vm7, %v1551_v30, %v1552_v57 }
 0x576   :  { %v1415_v13 = vsel %vm311_vm9, %v1414_v60, %v1413_v32 }
 0x577   :  { %v1397_v37 = vadd.f32 %v1395_v0, %v1387_v48  ;;  %v1433_v11 = vpop.permute.xlu0 %1432  ;;  %v1571_v48 = vpop.permute.xlu1 %1570 }
 0x578   :  { %v1434_v38 = vrot.slane %v1433_v11, 6 }
 0x579   :  { %v1407_v3 = vadd.f32 %v1405_v29, %v1397_v37 }
 0x57a   :  { %v1435_v51 = vsel %vm333_vm11, %v1434_v38, %v1433_v11 }
 0x57b   :  { %v1417_v25 = vadd.f32 %v1415_v13, %v1407_v3  ;;  %v1457_v44 = vpop.permute.xlu0 %1456  ;;  %v1572_v3 = vrot.slane %v1571_v48, 6 }
 0x57c   :  { %v1458_v16 = vrot.slane %v1457_v44, 2 }
 0x57d   :  { %v1427_v55 = vadd.f32 %v1425_v28, %v1417_v25  ;;  %v1591_v25 = vpop.permute.xlu1 %1590  ;;  %v1573_v58 = vsel %vm300_vm8, %v1572_v3, %v1571_v48 }
 0x57e   :  { %v1459_v15 = vsel %vm268_vm6, %v1457_v44, %v1458_v16 }
 0x57f   :  { %v1437_v41 = vadd.f32 %v1435_v51, %v1427_v55  ;;  %v1477_v22 = vpop.permute.xlu0 %1476  ;;  %v1592_v51 = vrot.slane %v1591_v25, 6 }
 0x580   :  { %v1478_v62 = vrot.slane %v1477_v22, 6 }
 0x581   :  { %v1441_v4 = vadd.f32 %v1440_v52, %v1437_v41 }
 0x582   :  { %v1479_v8 = vsel %vm159_vm5, %v1478_v62, %v1477_v22 }
 0x583   :  { %v1451_v49 = vadd.f32 %v1449_v59, %v1441_v4  ;;  %v1497_v12 = vpop.permute.xlu0 %1496  ;;  %v1593_v59 = vsel %vm322_vm10, %v1592_v51, %v1591_v25  ;;  %v6079_v51 = vld [vmem:[#allocation32_spill] sm:$0xff] }
 0x584   :  { %v1498_v21 = vrot.slane %v1497_v12, 6 }
 0x585   :  { %v1461_v7 = vadd.f32 %v1459_v15, %v1451_v49 }
 0x586   :  { %v1499_v63 = vsel %vm311_vm9, %v1498_v21, %v1497_v12  ;;  %v1607_v12 = vstv %s3997_s6  ;;  %s4002_s6 = sld [smem:[#allocation8 + $0x3]] }
 0x587   :  { %v1471_v18 = vadd.f32 %v1469_v27, %v1461_v7  ;;  %v1517_v26 = vpop.permute.xlu0 %1516 }
 0x588   :  { %v1518_v33 = vrot.slane %v1517_v26, 6 }
 0x589   :  { %v1481_v10 = vadd.f32 %v1479_v8, %v1471_v18 }
 0x58a   :  { %v1519_v35 = vsel %vm333_vm11, %v1518_v33, %v1517_v26 }
 0x58b   :  { %v1491_v1 = vadd.f32 %v1489_v53, %v1481_v10  ;;  %v1541_v40 = vpop.permute.xlu0 %1540 }
 0x58c   :  { %v1542_v24 = vrot.slane %v1541_v40, 2 }
 0x58d   :  { %v1501_v50 = vadd.f32 %v1499_v63, %v1491_v1 }
 0x58e   :  { %v1543_v19 = vsel %vm268_vm6, %v1541_v40, %v1542_v24 }
 0x58f   :  { %v1511_v45 = vadd.f32 %v1509_v56, %v1501_v50  ;;  %v1561_v20 = vpop.permute.xlu0 %1560 }
 0x590   :  { %v1562_v37 = vrot.slane %v1561_v20, 6 }
 0x591   :  { %v1521_v23 = vadd.f32 %v1519_v35, %v1511_v45  ;;  %s5225_s29 = spop %4168 }
 0x592   :  { %v1563_v44 = vsel %vm159_vm5, %v1562_v37, %v1561_v20 }
 0x593   :  { %v1525_v32 = vadd.f32 %v1524_v39, %v1521_v23  ;;  %v1581_v60 = vpop.permute.xlu0 %1580 }
 0x594   :  { %v1582_v28 = vrot.slane %v1581_v60, 6 }
 0x595   :  { %v1535_v0 = vadd.f32 %v1533_v61, %v1525_v32  ;;  %s4171_s4 = spop %4170 }
 0x596   :  { %v1835_v11 = vstv %s4171_s4 }
 0x597   :  { %v1545_v29 = vadd.f32 %v1543_v19, %v1535_v0  ;;  %v1836_v34 = vmul.f32 0.001953125, %v1835_v11  ;;  %v1601_v55 = vpop.permute.xlu0 %1600 }
 0x598   :  { %v1602_v16 = vrot.slane %v1601_v55, 6 }
 0x599   :  { %v1555_v13 = vadd.f32 %v1553_v54, %v1545_v29  ;;  %v5230_v38 = vsub.f32 %v5105_v36, %v1836_v34  ;;  %v1583_v36 = vsel %vm311_vm9, %v1582_v28, %v1581_v60  ;;  %v1692_v29 = vstv %s5087_s5  ;;  %s3999_s5 = sld [smem:[#allocation9 + $0x1]] }
 0x59a   :  { %v1603_v49 = vsel %vm333_vm11, %v1602_v16, %v1601_v55  ;;  %v1693_v34 = vmul.f32 0.001953125, %v1692_v29  ;;  %v1785_v54 = vstv %s5225_s29  ;;  %s4028_s29 = sld [smem:[#allocation11 + $0x19]] }
 0x59b   :  { %v1565_v43 = vadd.f32 %v1563_v44, %v1555_v13  ;;  %v1838_v31 = vmul.f32 %v5230_v38, %v5230_v38  ;;  %v1786_v13 = vmul.f32 0.001953125, %v1785_v54 }
 0x59c   :  { %v1694_v3 = vadd.f32 1e-05, %v1693_v34 }
 0x59d   :  { %v1575_v52 = vadd.f32 %v1573_v58, %v1565_v43  ;;  %v1840_v41 = vcombine.high %v1838_v31, %v1838_v31  ;;  %v1847_v22 = vrot.slane %v1838_v31, %v4479_v9  ;;  %v1787_v25 = vadd.f32 1e-05, %v1786_v13  ;;  %v6081_v13 = vld [vmem:[#allocation24_spill] sm:$0xff] }
 0x59e   :  { %4216 = vrsqrt.f32 %v1694_v3 }
 0x59f   :  { %v1585_v4 = vadd.f32 %v1583_v36, %v1575_v52  ;;  %1856 = vrot.lane.b32.xlu1 %v1847_v22, %s4375_s22  ;;  %v1854_v46 = vrot.slane %v1840_v41, %v4479_v9  ;;  %v1855_v14 = vcombine.high %v1847_v22, %v1847_v22  ;;  %4218 = vrsqrt.f32 %v1787_v25 }
 0x5a0   :  { %v1698_v36 = vstv %s1697_s14  ;;  %s4004_s14 = sld [smem:[#allocation11 + $0x1]] }
 0x5a1   :  { %v1595_v47 = vadd.f32 %v1593_v59, %v1585_v4  ;;  %v4383_v4 = vmov 0.0  }
 0x5a2   :  { %1996 = vst [vmem:[#allocation2] sm:$0xff] %v4383_v4  ;;  %1997 = vst [vmem:[#allocation2 + $0x8] sm:$0xff] %v4383_v4 }
 0x5a3   :  { %v1605_v15 = vadd.f32 %v1603_v49, %v1595_v47  ;;  %1860 = vrot.lane.b32.xlu1 %v1854_v46, %s4375_s22  ;;  %1998 = vst [vmem:[#allocation2 + $0x10] sm:$0xff] %v4383_v4  ;;  %1999 = vst [vmem:[#allocation2 + $0x18] sm:$0xff] %v4383_v4  ;;  %v1701_v49 = vstv %s1700_s15  ;;  %s4005_s15 = sld [smem:[#allocation11 + $0x2]] }
 0x5a5   :  { %v5243_v62 = vadd.f32 %v1607_v12, %v1605_v15  ;;  %v1791_v12 = vstv %s3998_s16  ;;  %s4007_s16 = sld [smem:[#allocation11 + $0x4]] }
 0x5a7   :  { %v1897_v7 = vrot.slane %v5243_v62, %v4479_v9  ;;  %v1890_v18 = vcombine.high %v5243_v62, %v5243_v62 }
 0x5a9   :  { %1906 = vrot.lane.b32.xlu0 %v1897_v7, %s4375_s22  ;;  %v1905_v27 = vcombine.high %v1897_v7, %v1897_v7  ;;  %v1904_v26 = vrot.slane %v1890_v18, %v4479_v9 }
 0x5ab   :  { %1908 = vrot.lane.b32.xlu1 %v1905_v27, %s4375_s22  ;;  %v4217_v43 = vpop.eup %4216 }
 0x5ac   :  { %v1696_v52 = vmul.f32 %v4217_v43, %v6079_v51  ;;  %v4219_v41 = vpop.eup %4218  ;;  %v2216_v51 = vstv %s4019_s26  ;;  %s4023_s26 = sld [smem:[#allocation11 + $0x14]] }
 0x5ad   :  { %1858 = vrot.lane.b32.xlu0 %v1855_v14, %s4375_s22  ;;  %v1789_v47 = vmul.f32 %v4219_v41, %v5092_v17  ;;  %v5277_v14 = vstv %s6032_s7  ;;  %v1794_v17 = vstv %s3999_s5  ;;  %s4008_s7 = sld [smem:[#allocation11 + $0x5]] }
 0x5ae   :  { %v1699_v59 = vmul.f32 %v1698_v36, %v1696_v52  ;;  %v2240_v36 = vstv %s4022_s27  ;;  %s4009_s5 = sld [smem:[#allocation11 + $0x6]] }
 0x5af   :  { %v1792_v27 = vmul.f32 %v1791_v12, %v1789_v47  ;;  %v2280_v12 = vstv %s4026_s28  ;;  %s4025_s27 = sld [smem:[#allocation11 + $0x16]] }
 0x5b0   :  { %v1702_v7 = vadd.f32 %v1701_v49, %v1699_v59  ;;  %v2260_v59 = vstv %s4024_s8  ;;  %s4027_s8 = sld [smem:[#allocation11 + $0x18]] }
 0x5b1   :  { %1910 = vrot.lane.b32.xlu0 %v1904_v26, %s4375_s22  ;;  %s4029_s28 = sld [smem:[#allocation11 + $0x1a]] }
 0x5b2   :  { %vm1983_vm13 = vcmp.ge.f32.partialorder %v1702_v7, 0.0 }
 0x5b3   :  { %v2112_v34 = vstv %s4008_s7  ;;  %s4016_s7 = sld [smem:[#allocation11 + $0xd]] }
 0x611   :  { %v1857_v8 = vpop.permute.xlu1 %1856 }
 0x615   :  { %v1861_v21 = vpop.permute.xlu1 %1860 }
 0x61b   :  { %v1907_v2 = vpop.permute.xlu0 %1906 }
 0x61d   :  { %v1909_v10 = vpop.permute.xlu1 %1908 }
 0x61e   :  { %v1912_v33 = vsel %vm213_vm4, %v1907_v2, %v1909_v10  ;;  %v1884_v2 = vstv %s4000_s17  ;;  %s4010_s17 = sld [smem:[#allocation11 + $0x7]] }
 0x61f   :  { %v1859_v53 = vpop.permute.xlu0 %1858  ;;  %v1916_v30 = vsel %vm1636_vm12, %v1912_v33, 0.0 }
 0x620   :  { %v1862_v42 = vsel %vm213_vm4, %v1857_v8, %v1859_v53  ;;  %v1863_v1 = vsel %vm213_vm4, %v1859_v53, %v1861_v21  ;;  %v1985_v8 = vmul.f32 %v5277_v14, %v1702_v7  ;;  %v1795_v21 = vadd.f32 %v1794_v17, %v1792_v27 }
 0x621   :  { %v1866_v40 = vsel %vm1636_vm12, %v1862_v42, 0.0  ;;  %v1867_v63 = vsel %vm1636_vm12, %v1863_v1, 0.0  ;;  %v1887_v53 = vstv %s4001_s18  ;;  %s4011_s18 = sld [smem:[#allocation11 + $0x8]] }
 0x622   :  { %v1868_v50 = vadd.f32 %v1867_v63, %v1866_v40  ;;  %v1986_v1 = vsel %vm1983_vm13, %v1702_v7, %v1985_v8  ;;  %v1988_v40 = vmul.f32 %v5277_v14, %v1795_v21  ;;  %vm1987_vm14 = vcmp.ge.f32.partialorder %v1795_v21, 0.0 }
 0x623   :  { %v1911_v56 = vpop.permute.xlu0 %1910 }
 0x624   :  { %v1913_v6 = vsel %vm213_vm4, %v1909_v10, %v1911_v56  ;;  %1869 = vadd.xlane.f32.xlu1 %v1868_v50  ;;  %v1989_v33 = vsel %vm1987_vm14, %v1795_v21, %v1988_v40  ;;  %v1977_v40 = vstv %s4002_s6  ;;  %s4032_s6 = sld [smem:[#allocation11 + $0x1d]] }
 0x625   :  { %v1917_v45 = vsel %vm1636_vm12, %v1913_v6, 0.0 }
 0x626   :  { %v1918_v20 = vadd.f32 %v1917_v45, %v1916_v30 }
 0x628   :  { %1919 = vadd.xlane.f32.xlu0 %v1918_v20 }
 0x6ad   :  { %v1870_v5 = vpop.xlane.xlu1 %1869 }
 0x6ae   :  { %v1871_v35 = vrot.slane %v1870_v5, 4 }
 0x6b0   :  { %v1872_v39 = vadd.f32 %v1871_v35, %v1870_v5 }
 0x6b1   :  { %v1920_v23 = vpop.xlane.xlu0 %1919 }
 0x6b2   :  { %v1921_v24 = vrot.slane %v1920_v23, 4  ;;  %v1873_v32 = vrot.slane %v1872_v39, 2 }
 0x6b4   :  { %v1922_v61 = vadd.f32 %v1921_v24, %v1920_v23  ;;  %v1874_v57 = vadd.f32 %v1873_v32, %v1872_v39 }
 0x6b6   :  { %v1875_v48 = vrot.slane %v1874_v57, 1  ;;  %v1923_v0 = vrot.slane %v1922_v61, 2 }
 0x6b8   :  { %v1876_v60 = vadd.f32 %v1875_v48, %v1874_v57  ;;  %v1924_v19 = vadd.f32 %v1923_v0, %v1922_v61 }
 0x6ba   :  { %4172 = vpush %v1876_v60  ;;  %v1925_v37 = vrot.slane %v1924_v19, 1 }
 0x6bc   :  { %v1926_v11 = vadd.f32 %v1925_v37, %v1924_v19 }
 0x6be   :  { %4174 = vpush %v1926_v11  ;;  %v6080_v11 = vld [vmem:[#allocation23_spill] sm:$0xff] }
 0x6eb   :  { %s4173_s30 = spop %4172 }
 0x6ec   :  { %v1878_v44 = vstv %s4173_s30  ;;  %s4003_s30 = sld [smem:[#allocation9 + $0x3]] }
 0x6ed   :  { %v1879_v28 = vmul.f32 0.001953125, %v1878_v44  ;;  %v2176_v44 = vstv %s4015_s24  ;;  %s4018_s24 = sld [smem:[#allocation11 + $0xf]] }
 0x6ef   :  { %v1880_v31 = vadd.f32 1e-05, %v1879_v28  ;;  %s4175_s11 = spop %4174 }
 0x6f0   :  { %v1928_v55 = vstv %s4175_s11  ;;  %s4006_s11 = sld [smem:[#allocation11 + $0x3]] }
 0x6f1   :  { %4220 = vrsqrt.f32 %v1880_v31  ;;  %v1929_v58 = vmul.f32 0.001953125, %v1928_v55  ;;  %v2196_v55 = vstv %s4017_s25  ;;  %s4020_s25 = sld [smem:[#allocation11 + $0x11]] }
 0x6f3   :  { %v5266_v22 = vsub.f32 %v5243_v62, %v1929_v58 }
 0x6f5   :  { %v1931_v16 = vmul.f32 %v5266_v22, %v5266_v22 }
 0x6f7   :  { %v1940_v46 = vrot.slane %v1931_v16, %v4479_v9  ;;  %v1933_v15 = vcombine.high %v1931_v16, %v1931_v16 }
 0x6f9   :  { %1949 = vrot.lane.b32.xlu0 %v1940_v46, %s4375_s22  ;;  %v1948_v62 = vcombine.high %v1940_v46, %v1940_v46  ;;  %v1947_v18 = vrot.slane %v1933_v15, %v4479_v9 }
 0x6fb   :  { %1951 = vrot.lane.b32.xlu1 %v1948_v62, %s4375_s22  ;;  %v2300_v62 = vstv %s4028_s29  ;;  %s2067_s29 = sld [smem:[#allocation11]] }
 0x6fe   :  { %v4221_v26 = vpop.eup %4220 }
 0x6ff   :  { %1953 = vrot.lane.b32.xlu1 %v1947_v18, %s4375_s22  ;;  %v1882_v10 = vmul.f32 %v4221_v26, %v5230_v38 }
 0x701   :  { %v1885_v42 = vmul.f32 %v1884_v2, %v1882_v10 }
 0x703   :  { %2001 = vrot.lane.b32.xlu1 %v1986_v1, %s4375_s22  ;;  %v1888_v63 = vadd.f32 %v1887_v53, %v1885_v42 }
 0x705   :  { %v1991_v50 = vmul.f32 %v5277_v14, %v1888_v63  ;;  %vm1990_vm15 = vcmp.ge.f32.partialorder %v1888_v63, 0.0 }
 0x707   :  { %2008 = vrot.lane.b32.xlu1 %v1989_v33, %s4375_s22  ;;  %v1992_v56 = vsel %vm1990_vm15, %v1888_v63, %v1991_v50  ;;  %v1980_v33 = vstv %s4003_s30  ;;  %s5425_s30 = sld [smem:[#allocation11 + $0x1e]] }
 0x70b   :  { %2016 = vrot.lane.b32.xlu1 %v1992_v56, %s4375_s22 }
 0x76b   :  { %v1950_v38 = vpop.permute.xlu0 %1949 }
 0x76d   :  { %v1952_v6 = vpop.permute.xlu1 %1951 }
 0x76e   :  { %v1955_v30 = vsel %vm213_vm4, %v1950_v38, %v1952_v6 }
 0x76f   :  { %v1959_v5 = vsel %vm1636_vm12, %v1955_v30, 0.0 }
 0x771   :  { %v1954_v45 = vpop.permute.xlu1 %1953 }
 0x772   :  { %v1956_v20 = vsel %vm213_vm4, %v1952_v6, %v1954_v45  ;;  %v2072_v45 = vstv %s4004_s14  ;;  %s5427_s14 = sld [smem:[#allocation11 + $0x1f]] }
 0x773   :  { %v1960_v35 = vsel %vm1636_vm12, %v1956_v20, 0.0 }
 0x774   :  { %v1961_v39 = vadd.f32 %v1960_v35, %v1959_v5  ;;  %v6082_v5 = vld [vmem:[#allocation22_spill] sm:$0xff]  ;;  %v2082_v35 = vstv %s4005_s15  ;;  %s5433_s15 = sld [smem:[#allocation11 + $0x20]] }
 0x775   :  { %v2002_v23 = vpop.permute.xlu1 %2001 }
 0x776   :  { %v2003_v24 = vrot.slane %v2002_v23, 2  ;;  %1962 = vadd.xlane.f32.xlu0 %v1961_v39 }
 0x778   :  { %v2004_v32 = vsel %vm213_vm4, %v2002_v23, %v2003_v24  ;;  %v2092_v23 = vstv %s4006_s11  ;;  %s5438_s11 = sld [smem:[#allocation11 + $0x21]] }
 0x779   :  { %2006 = vst [vmem:[#allocation2 + $0x2] sm:$0xf] %v2004_v32  ;;  %v2009_v61 = vpop.permute.xlu1 %2008 }
 0x77a   :  { %v2010_v57 = vrot.slane %v2009_v61, 2 }
 0x77c   :  { %v2011_v48 = vsel %vm213_vm4, %v2009_v61, %v2010_v57  ;;  %v2102_v61 = vstv %s4007_s16  ;;  %s5454_s16 = sld [smem:[#allocation11 + $0x22]] }
 0x77d   :  { %2014 = vst [vmem:[#allocation2 + $0xa] sm:$0xf] %v2011_v48  ;;  %v2017_v0 = vpop.permute.xlu1 %2016  ;;  %v6083_v48 = vld [vmem:[#allocation25_spill] sm:$0xff] }
 0x77e   :  { %v2018_v60 = vrot.slane %v2017_v0, 2 }
 0x780   :  { %v2019_v19 = vsel %vm213_vm4, %v2017_v0, %v2018_v60  ;;  %v5295_v37 = vld [vmem:[#allocation2 + $0x2] sm:$0x3f]  ;;  %v2122_v60 = vstv %s4009_s5  ;;  %s5462_s5 = sld [smem:[#allocation11 + $0x23]] }
 0x781   :  { %2022 = vst [vmem:[#allocation2 + $0x12] sm:$0xf] %v2019_v19  ;;  %v5299_v29 = vmul.f32 %v5295_v37, %v6080_v11  ;;  %v5343_v30 = vld [vmem:[#allocation2] sm:$0x3f]  ;;  %v5365_v0 = vmul.f32 %v5295_v37, %v6083_v48 }
 0x782   :  { %v2073_v20 = vmul.f32 %v2072_v45, %v5343_v30  ;;  %v5359_v32 = vld [vmem:[#allocation2 + $0x2] sm:$0xf] }
 0x783   :  { %v2113_v3 = vmul.f32 %v2112_v34, %v5299_v29  ;;  %v2103_v57 = vmul.f32 %v2102_v61, %v5359_v32  ;;  %v2123_v19 = vmul.f32 %v2122_v60, %v5365_v0  ;;  %v2132_v34 = vstv %s4010_s17  ;;  %s4012_s17 = sld [smem:[#allocation11 + $0x9]] }
 0x784   :  { %v5301_v54 = vld [vmem:[#allocation2 + $0x8] sm:$0x3f]  ;;  %v2068_v61 = vstv %s2067_s29  ;;  %s4046_s29 = sld [smem:[#allocation11 + $0x2b]] }
 0x785   :  { %v5306_v25 = vmul.f32 %v5301_v54, %v6081_v13  ;;  %v5308_v28 = vld [vmem:[#allocation2 + $0xa] sm:$0x3f] }
 0x786   :  { %v5314_v31 = vmul.f32 %v5308_v28, %v6080_v11  ;;  %v2217_v52 = vmul.f32 %v2216_v51, %v5308_v28  ;;  %v2156_v51 = vstv %s4013_s2  ;;  %s4030_s2 = sld [smem:[#allocation11 + $0x1b]] }
 0x787   :  { %v2177_v43 = vmul.f32 %v2176_v44, %v5306_v25  ;;  %v6084_v44 = vld [vmem:[#allocation26_spill] sm:$0xff] }
 0x788   :  { %v2197_v58 = vmul.f32 %v2196_v55, %v5314_v31  ;;  %v5320_v41 = vld [vmem:[#allocation2 + $0x10] sm:$0x3f]  ;;  %v2142_v55 = vstv %s4011_s18  ;;  %s4021_s18 = sld [smem:[#allocation11 + $0x12]] }
 0x789   :  { %v2241_v16 = vmul.f32 %v2240_v36, %v5320_v41  ;;  %v5326_v4 = vmul.f32 %v5320_v41, %v6081_v13  ;;  %v5328_v47 = vld [vmem:[#allocation2 + $0x12] sm:$0x3f]  ;;  %v5381_v36 = vmul.f32 %v5301_v54, %v6082_v5 }
 0x78a   :  { %v5334_v49 = vmul.f32 %v5328_v47, %v6080_v11  ;;  %v2301_v7 = vmul.f32 %v2300_v62, %v5328_v47  ;;  %v5391_v62 = vmul.f32 %v5308_v28, %v6083_v48 }
 0x78b   :  { %v2261_v46 = vmul.f32 %v2260_v59, %v5326_v4 }
 0x78c   :  { %2115 = vrot.lane.b32.xlu0 %v2113_v3, %s4380_s9  ;;  %v2281_v15 = vmul.f32 %v2280_v12, %v5334_v49  ;;  %v2133_v3 = vmul.f32 %v2132_v34, %v5295_v37  ;;  %v2186_v12 = vstv %s4016_s7  ;;  %s4050_s7 = sld [smem:[#allocation11 + $0x2f]] }
 0x790   :  { %2179 = vrot.lane.b32.xlu0 %v2177_v43, %s4378_s10  ;;  %v5373_v43 = vmul.f32 %v5295_v37, %v6084_v44 }
 0x794   :  { %2199 = vrot.lane.b32.xlu0 %v2197_v58, %s4380_s9  ;;  %v2143_v58 = vmul.f32 %v2142_v55, %v5373_v43 }
 0x798   :  { %2219 = vrot.lane.b32.xlu0 %v2217_v52, %s4381_s20  ;;  %v2157_v52 = vmul.f32 %v2156_v51, %v5301_v54 }
 0x79c   :  { %2243 = vrot.lane.b32.xlu0 %v2241_v16, %s4373_s1  ;;  %v2166_v16 = vstv %s4014_s3  ;;  %s2403_s3 = sld [smem:[#allocation12]] }
 0x79d   :  { %v2167_v59 = vmul.f32 %v2166_v16, %v5381_v36 }
 0x7a0   :  { %2263 = vrot.lane.b32.xlu0 %v2261_v46, %s4378_s10  ;;  %v5385_v46 = vld [vmem:[#allocation2 + $0xa] sm:$0xf] }
 0x7a4   :  { %2283 = vrot.lane.b32.xlu0 %v2281_v15, %s4380_s9  ;;  %v2187_v15 = vmul.f32 %v2186_v12, %v5385_v46 }
 0x7a8   :  { %2303 = vrot.lane.b32.xlu0 %v2301_v7, %s4381_s20  ;;  %v2206_v7 = vstv %s4018_s24  ;;  %s4040_s24 = sld [smem:[#allocation11 + $0x25]] }
 0x7ff   :  { %v1963_v27 = vpop.xlane.xlu0 %1962 }
 0x800   :  { %v1964_v17 = vrot.slane %v1963_v27, 4 }
 0x802   :  { %v1965_v18 = vadd.f32 %v1964_v17, %v1963_v27  ;;  %v2207_v27 = vmul.f32 %v2206_v7, %v5391_v62  ;;  %v5397_v17 = vmul.f32 %v5308_v28, %v6084_v44 }
 0x804   :  { %v1966_v26 = vrot.slane %v1965_v18, 2 }
 0x806   :  { %v1967_v8 = vadd.f32 %v1966_v26, %v1965_v18  ;;  %v2226_v18 = vstv %s4020_s25  ;;  %s4041_s25 = sld [smem:[#allocation11 + $0x26]] }
 0x807   :  { %v2227_v26 = vmul.f32 %v2226_v18, %v5397_v17 }
 0x808   :  { %v1968_v21 = vrot.slane %v1967_v8, 1 }
 0x80a   :  { %v1969_v2 = vadd.f32 %v1968_v21, %v1967_v8  ;;  %v5403_v8 = vmul.f32 %v5320_v41, %v6082_v5  ;;  %v2250_v21 = vstv %s4023_s26  ;;  %s4042_s26 = sld [smem:[#allocation11 + $0x27]] }
 0x80c   :  { %4176 = vpush %v1969_v2  ;;  %v2251_v2 = vmul.f32 %v2250_v21, %v5403_v8  ;;  %v2116_v21 = vpop.permute.xlu0 %2115 }
 0x83d   :  { %s4177_s4 = spop %4176 }
 0x83e   :  { %v1971_v10 = vstv %s4177_s4  ;;  %s4031_s4 = sld [smem:[#allocation11 + $0x1c]] }
 0x83f   :  { %v1972_v53 = vmul.f32 0.001953125, %v1971_v10  ;;  %v5407_v10 = vld [vmem:[#allocation2 + $0x12] sm:$0xf] }
 0x841   :  { %v1973_v42 = vadd.f32 1e-05, %v1972_v53  ;;  %v2270_v53 = vstv %s4025_s27  ;;  %s4043_s27 = sld [smem:[#allocation11 + $0x28]] }
 0x843   :  { %4222 = vrsqrt.f32 %v1973_v42  ;;  %v2271_v42 = vmul.f32 %v2270_v53, %v5407_v10 }
 0x844   :  { %v2324_v60 = vstv %s4031_s4  ;;  %s4047_s4 = sld [smem:[#allocation11 + $0x2c]] }
 0x850   :  { %v4223_v1 = vpop.eup %4222 }
 0x851   :  { %v1975_v63 = vmul.f32 %v4223_v1, %v5266_v22  ;;  %v5349_v22 = vmul.f32 %v5343_v30, %v6082_v5  ;;  %v5413_v1 = vmul.f32 %v5328_v47, %v6083_v48 }
 0x853   :  { %v1978_v50 = vmul.f32 %v1977_v40, %v1975_v63  ;;  %v2083_v39 = vmul.f32 %v2082_v35, %v5349_v22  ;;  %v2290_v40 = vstv %s4027_s8  ;;  %s4044_s8 = sld [smem:[#allocation11 + $0x29]] }
 0x854   :  { %v2291_v63 = vmul.f32 %v2290_v40, %v5413_v1 }
 0x855   :  { %v1981_v56 = vadd.f32 %v1980_v33, %v1978_v50  ;;  %v5419_v33 = vmul.f32 %v5328_v47, %v6084_v44  ;;  %v2310_v50 = vstv %s4029_s28  ;;  %s4045_s28 = sld [smem:[#allocation11 + $0x2a]] }
 0x857   :  { %vm1993_vm0 = vcmp.ge.f32.partialorder %v1981_v56, 0.0  ;;  %v1994_v6 = vmul.f32 %v5277_v14, %v1981_v56  ;;  %v5355_v14 = vmul.f32 %v5343_v30, %v6081_v13 }
 0x859   :  { %v1995_v38 = vsel %vm1993_vm0, %v1981_v56, %v1994_v6  ;;  %v2093_v24 = vmul.f32 %v2092_v23, %v5355_v14  ;;  %v2311_v56 = vmul.f32 %v2310_v50, %v5419_v33  ;;  %v2364_v50 = vstv %s5433_s15  ;;  %s4053_s15 = sld [smem:[#allocation11 + $0x32]] }
 0x85a   :  { %2024 = vrot.lane.b32.xlu1 %v1995_v38, %s4375_s22 }
 0x85e   :  { %2075 = vrot.lane.b32.xlu1 %v2073_v20, %s4373_s1 }
 0x862   :  { %2085 = vrot.lane.b32.xlu1 %v2083_v39, %s4377_s13  ;;  %v6085_v39 = vld [vmem:[#allocation30_spill] sm:$0xff] }
 0x863   :  { %v5431_v23 = vmul.f32 %v5343_v30, %v6085_v39 }
 0x865   :  { %6086 = vst [vmem:[#allocation27_spill] sm:$0xff] %v5431_v23  ;;  %v2069_v55 = vmul.f32 %v2068_v61, %v5431_v23 }
 0x866   :  { %2095 = vrot.lane.b32.xlu1 %v2093_v24, %s4378_s10 }
 0x86a   :  { %2105 = vrot.lane.b32.xlu1 %v2103_v57, %s4376_s23 }
 0x86e   :  { %2125 = vrot.lane.b32.xlu1 %v2123_v19, %s4379_s19 }
 0x872   :  { %2135 = vrot.lane.b32.xlu1 %v2133_v3, %s4381_s20  ;;  %v2334_v3 = vstv %s4032_s6  ;;  %s4049_s6 = sld [smem:[#allocation11 + $0x2e]] }
 0x876   :  { %2145 = vrot.lane.b32.xlu1 %v2143_v58, %s4382_s21 }
 0x87a   :  { %2159 = vrot.lane.b32.xlu1 %v2157_v52, %s4373_s1 }
 0x87e   :  { %2169 = vrot.lane.b32.xlu1 %v2167_v59, %s4377_s13 }
 0x882   :  { %2189 = vrot.lane.b32.xlu1 %v2187_v15, %s4376_s23  ;;  %v2344_v15 = vstv %s5425_s30  ;;  %s4051_s30 = sld [smem:[#allocation11 + $0x30]] }
 0x886   :  { %2209 = vrot.lane.b32.xlu1 %v2207_v27, %s4379_s19 }
 0x88a   :  { %2229 = vrot.lane.b32.xlu1 %v2227_v26, %s4382_s21 }
 0x88e   :  { %2253 = vrot.lane.b32.xlu1 %v2251_v2, %s4377_s13 }
 0x892   :  { %2273 = vrot.lane.b32.xlu1 %v2271_v42, %s4376_s23 }
 0x896   :  { %2293 = vrot.lane.b32.xlu1 %v2291_v63, %s4379_s19 }
 0x89a   :  { %2313 = vrot.lane.b32.xlu1 %v2311_v56, %s4382_s21 }
 0x8cc   :  { %v2025_v6 = vpop.permute.xlu1 %2024 }
 0x8cd   :  { %v2026_v38 = vrot.slane %v2025_v6, 2 }
 0x8cf   :  { %v2027_v45 = vsel %vm213_vm4, %v2025_v6, %v2026_v38 }
 0x8d0   :  { %2030 = vst [vmem:[#allocation2 + $0x1a] sm:$0xf] %v2027_v45  ;;  %v2076_v20 = vpop.permute.xlu1 %2075  ;;  %v2117_v45 = vrot.slane %v2116_v21, 6 }
 0x8d1   :  { %v2077_v35 = vrot.slane %v2076_v20, 2 }
 0x8d3   :  { %v2078_v19 = vsel %vm190_vm2, %v2076_v20, %v2077_v35  ;;  %v2374_v35 = vstv %s5438_s11  ;;  %s4054_s11 = sld [smem:[#allocation11 + $0x33]] }
 0x8d4   :  { %v2086_v24 = vpop.permute.xlu1 %2085  ;;  %v2080_v27 = vadd.f32 %v2078_v19, %v2069_v55  ;;  %v2394_v55 = vstv %s5462_s5  ;;  %s4059_s5 = sld [smem:[#allocation11 + $0x38]] }
 0x8d5   :  { %v2087_v57 = vrot.slane %v2086_v24, 2 }
 0x8d7   :  { %v5436_v34 = vld [vmem:[#allocation2 + $0x18] sm:$0x3f]  ;;  %v2088_v59 = vsel %vm268_vm6, %v2086_v24, %v2087_v57 }
 0x8d8   :  { %v2096_v58 = vpop.permute.xlu1 %2095  ;;  %v2325_v51 = vmul.f32 %v2324_v60, %v5436_v34  ;;  %v5444_v52 = vmul.f32 %v5436_v34, %v6082_v5  ;;  %v5448_v16 = vmul.f32 %v5436_v34, %v6081_v13  ;;  %v5452_v7 = vld [vmem:[#allocation2 + $0x1a] sm:$0x3f]  ;;  %v2354_v13 = vstv %s5427_s14  ;;  %s4052_s14 = sld [smem:[#allocation11 + $0x31]] }
 0x8d9   :  { %v2097_v12 = vrot.slane %v2096_v58, 2  ;;  %v5459_v26 = vld [vmem:[#allocation2 + $0x1a] sm:$0xf]  ;;  %v2090_v2 = vadd.f32 %v2088_v59, %v2080_v27  ;;  %v5468_v40 = vmul.f32 %v5452_v7, %v6080_v11  ;;  %v5475_v38 = vmul.f32 %v5452_v7, %v6083_v48 }
 0x8da   :  { %6087 = vst [vmem:[#allocation33_spill] sm:$0xff] %v5444_v52  ;;  %2327 = vrot.lane.b32.xlu0 %v2325_v51, %s4373_s1  ;;  %v2335_v18 = vmul.f32 %v2334_v3, %v5444_v52  ;;  %v2345_v42 = vmul.f32 %v2344_v15, %v5448_v16  ;;  %v2355_v6 = vmul.f32 %v2354_v13, %v5459_v26  ;;  %v2384_v60 = vstv %s5454_s16  ;;  %s4056_s16 = sld [smem:[#allocation11 + $0x35]] }
 0x8db   :  { %v2098_v5 = vsel %vm279_vm7, %v2096_v58, %v2097_v12  ;;  %6088 = vst [vmem:[#allocation28_spill] sm:$0xff] %v5475_v38  ;;  %v2365_v61 = vmul.f32 %v2364_v50, %v5468_v40  ;;  %v2375_v19 = vmul.f32 %v2374_v35, %v5475_v38  ;;  %v5486_v48 = vmul.f32 %v5452_v7, %v6084_v44  ;;  %v2180_v58 = vpop.permute.xlu0 %2179 }
 0x8dc   :  { %2337 = vrot.lane.b32.xlu1 %v2335_v18, %s4377_s13  ;;  %v2106_v53 = vpop.permute.xlu1 %2105  ;;  %v2100_v56 = vadd.f32 %v2098_v5, %v2090_v2  ;;  %v2118_v3 = vsel %vm300_vm8, %v2117_v45, %v2116_v21  ;;  %v2385_v12 = vmul.f32 %v2384_v60, %v5452_v7  ;;  %v5499_v21 = vmul.f32 %v5301_v54, %v6085_v39 }
 0x8dd   :  { %v2107_v63 = vrot.slane %v2106_v53, 6  ;;  %6089 = vst [vmem:[#allocation29_spill] sm:$0xff] %v5486_v48  ;;  %v2395_v18 = vmul.f32 %v2394_v55, %v5486_v48 }
 0x8de   :  { %2347 = vrot.lane.b32.xlu0 %v2345_v42, %s4378_s10 }
 0x8df   :  { %v2108_v20 = vsel %vm159_vm5, %v2107_v63, %v2106_v53  ;;  %v2152_v53 = vstv %s4012_s17  ;;  %v2200_v42 = vpop.permute.xlu0 %2199  ;;  %s4061_s17 = sld [smem:[#allocation11 + $0x3a]] }
 0x8e0   :  { %v2110_v24 = vadd.f32 %v2108_v20, %v2100_v56  ;;  %2357 = vrot.lane.b32.xlu1 %v2355_v6, %s4376_s23  ;;  %v2126_v11 = vpop.permute.xlu1 %2125  ;;  %v2153_v6 = vmul.f32 %v2152_v53, %v5499_v21 }
 0x8e1   :  { %v2127_v57 = vrot.slane %v2126_v11, 6 }
 0x8e2   :  { %2367 = vrot.lane.b32.xlu0 %v2365_v61, %s4380_s9  ;;  %v2120_v51 = vadd.f32 %v2118_v3, %v2110_v24 }
 0x8e3   :  { %v2128_v15 = vsel %vm311_vm9, %v2127_v57, %v2126_v11  ;;  %v2220_v11 = vpop.permute.xlu0 %2219  ;;  %v2181_v57 = vrot.slane %v2180_v58, 2 }
 0x8e4   :  { %2377 = vrot.lane.b32.xlu1 %v2375_v19, %s4379_s19  ;;  %v2136_v59 = vpop.permute.xlu1 %2135  ;;  %v2130_v5 = vadd.f32 %v2128_v15, %v2120_v51  ;;  %v2221_v53 = vrot.slane %v2220_v11, 6 }
 0x8e5   :  { %v2137_v27 = vrot.slane %v2136_v59, 6 }
 0x8e6   :  { %2387 = vrot.lane.b32.xlu0 %v2385_v12, %s4381_s20  ;;  %v2201_v12 = vrot.slane %v2200_v42, 6 }
 0x8e7   :  { %v2138_v44 = vsel %vm322_vm10, %v2137_v27, %v2136_v59  ;;  %v2182_v59 = vsel %vm279_vm7, %v2180_v58, %v2181_v57  ;;  %v2244_v27 = vpop.permute.xlu0 %2243  ;;  %v5511_v58 = vmul.f32 %v5320_v41, %v6085_v39 }
 0x8e8   :  { %2397 = vrot.lane.b32.xlu1 %v2395_v18, %s4382_s21  ;;  %v2146_v13 = vpop.permute.xlu1 %2145  ;;  %v2140_v63 = vadd.f32 %v2138_v44, %v2130_v5 }
 0x8e9   :  { %v2147_v2 = vrot.slane %v2146_v13, 6 }
 0x8eb   :  { %v2148_v50 = vsel %vm333_vm11, %v2147_v2, %v2146_v13  ;;  %v2202_v2 = vsel %vm300_vm8, %v2201_v12, %v2200_v42 }
 0x8ec   :  { %v2150_v56 = vadd.f32 %v2148_v50, %v2140_v63  ;;  %v2160_v45 = vpop.permute.xlu1 %2159 }
 0x8ed   :  { %v2161_v20 = vrot.slane %v2160_v45, 2 }
 0x8ee   :  { %v2154_v35 = vadd.f32 %v2153_v6, %v2150_v56  ;;  %v2264_v6 = vpop.permute.xlu0 %2263 }
 0x8ef   :  { %v2162_v24 = vsel %vm190_vm2, %v2160_v45, %v2161_v20 }
 0x8f0   :  { %v2170_v61 = vpop.permute.xlu1 %2169  ;;  %v2164_v19 = vadd.f32 %v2162_v24, %v2154_v35  ;;  %v2222_v35 = vsel %vm322_vm10, %v2221_v53, %v2220_v11  ;;  %v2236_v24 = vstv %s4021_s18  ;;  %s4063_s18 = sld [smem:[#allocation11 + $0x3c]] }
 0x8f1   :  { %v2171_v60 = vrot.slane %v2170_v61, 2 }
 0x8f3   :  { %v2172_v3 = vsel %vm268_vm6, %v2170_v61, %v2171_v60  ;;  %v2245_v60 = vrot.slane %v2244_v27, 2 }
 0x8f4   :  { %v2174_v55 = vadd.f32 %v2172_v3, %v2164_v19  ;;  %v2190_v51 = vpop.permute.xlu1 %2189  ;;  %v2237_v19 = vmul.f32 %v2236_v24, %v5511_v58 }
 0x8f5   :  { %v2191_v15 = vrot.slane %v2190_v51, 6 }
 0x8f6   :  { %v2184_v18 = vadd.f32 %v2182_v59, %v2174_v55  ;;  %v2284_v59 = vpop.permute.xlu0 %2283 }
 0x8f7   :  { %v2192_v44 = vsel %vm159_vm5, %v2191_v15, %v2190_v51  ;;  %v2246_v15 = vsel %vm190_vm2, %v2244_v27, %v2245_v60 }
 0x8f8   :  { %v2194_v5 = vadd.f32 %v2192_v44, %v2184_v18  ;;  %v2210_v13 = vpop.permute.xlu1 %2209  ;;  %v2265_v18 = vrot.slane %v2264_v6, 2 }
 0x8f9   :  { %v2211_v63 = vrot.slane %v2210_v13, 6 }
 0x8fa   :  { %v2204_v50 = vadd.f32 %v2202_v2, %v2194_v5  ;;  %v2266_v53 = vsel %vm279_vm7, %v2264_v6, %v2265_v18  ;;  %v5524_v6 = vmul.f32 %v5436_v34, %v6085_v39 }
 0x8fb   :  { %v2212_v56 = vsel %vm311_vm9, %v2211_v63, %v2210_v13  ;;  %v2285_v63 = vrot.slane %v2284_v59, 6 }
 0x8fc   :  { %v2214_v45 = vadd.f32 %v2212_v56, %v2204_v50  ;;  %v2230_v20 = vpop.permute.xlu1 %2229  ;;  %v2304_v50 = vpop.permute.xlu0 %2303 }
 0x8fd   :  { %v2231_v61 = vrot.slane %v2230_v20, 6  ;;  %v2286_v27 = vsel %vm300_vm8, %v2285_v63, %v2284_v59 }
 0x8fe   :  { %v2224_v57 = vadd.f32 %v2222_v35, %v2214_v45 }
 0x8ff   :  { %v2232_v42 = vsel %vm333_vm11, %v2231_v61, %v2230_v20  ;;  %v2305_v61 = vrot.slane %v2304_v50, 6 }
 0x900   :  { %v2234_v3 = vadd.f32 %v2232_v42, %v2224_v57  ;;  %v2254_v55 = vpop.permute.xlu1 %2253 }
 0x901   :  { %v2255_v51 = vrot.slane %v2254_v55, 2 }
 0x902   :  { %v2238_v12 = vadd.f32 %v2237_v19, %v2234_v3 }
 0x903   :  { %v2256_v11 = vsel %vm268_vm6, %v2254_v55, %v2255_v51  ;;  %v2306_v55 = vsel %vm322_vm10, %v2305_v61, %v2304_v50  ;;  %v2320_v51 = vstv %s4030_s2  ;;  %s4065_s2 = sld [smem:[#allocation11 + $0x3e]] }
 0x904   :  { %v2248_v44 = vadd.f32 %v2246_v15, %v2238_v12  ;;  %v2274_v5 = vpop.permute.xlu1 %2273  ;;  %v2321_v59 = vmul.f32 %v2320_v51, %v5524_v6 }
 0x905   :  { %v2275_v13 = vrot.slane %v2274_v5, 6 }
 0x906   :  { %v2258_v2 = vadd.f32 %v2256_v11, %v2248_v44 }
 0x907   :  { %v2276_v20 = vsel %vm159_vm5, %v2275_v13, %v2274_v5 }
 0x908   :  { %v2268_v56 = vadd.f32 %v2266_v53, %v2258_v2  ;;  %v2294_v45 = vpop.permute.xlu1 %2293 }
 0x909   :  { %v2295_v35 = vrot.slane %v2294_v45, 6 }
 0x90a   :  { %v2278_v24 = vadd.f32 %v2276_v20, %v2268_v56 }
 0x90b   :  { %v2296_v42 = vsel %vm311_vm9, %v2295_v35, %v2294_v45 }
 0x90c   :  { %v2288_v57 = vadd.f32 %v2286_v27, %v2278_v24  ;;  %v2314_v60 = vpop.permute.xlu1 %2313 }
 0x90d   :  { %v2315_v19 = vrot.slane %v2314_v60, 6 }
 0x90e   :  { %v2298_v3 = vadd.f32 %v2296_v42, %v2288_v57 }
 0x90f   :  { %v2316_v15 = vsel %vm333_vm11, %v2315_v19, %v2314_v60 }
 0x910   :  { %v2308_v12 = vadd.f32 %v2306_v55, %v2298_v3 }
 0x912   :  { %v2318_v18 = vadd.f32 %v2316_v15, %v2308_v12 }
 0x914   :  { %v2322_v44 = vadd.f32 %v2321_v59, %v2318_v18 }
 0x94c   :  { %v2328_v5 = vpop.permute.xlu0 %2327 }
 0x94d   :  { %v2329_v11 = vrot.slane %v2328_v5, 2 }
 0x94e   :  { %v2338_v13 = vpop.permute.xlu1 %2337 }
 0x94f   :  { %v2330_v2 = vsel %vm190_vm2, %v2328_v5, %v2329_v11  ;;  %v2339_v53 = vrot.slane %v2338_v13, 2 }
 0x950   :  { %v2332_v63 = vadd.f32 %v2330_v2, %v2322_v44  ;;  %v2348_v56 = vpop.permute.xlu0 %2347  ;;  %v2404_v2 = vstv %s2403_s3  ;;  %s4068_s3 = sld [smem:[#allocation11 + $0x41]] }
 0x951   :  { %v2340_v39 = vsel %vm268_vm6, %v2338_v13, %v2339_v53  ;;  %v2349_v45 = vrot.slane %v2348_v56, 2 }
 0x952   :  { %v2342_v50 = vadd.f32 %v2340_v39, %v2332_v63  ;;  %v2358_v20 = vpop.permute.xlu1 %2357 }
 0x953   :  { %v2350_v35 = vsel %vm279_vm7, %v2348_v56, %v2349_v45  ;;  %v2359_v24 = vrot.slane %v2358_v20, 6 }
 0x954   :  { %v2352_v27 = vadd.f32 %v2350_v35, %v2342_v50  ;;  %v2368_v61 = vpop.permute.xlu0 %2367 }
 0x955   :  { %v2360_v57 = vsel %vm159_vm5, %v2359_v24, %v2358_v20  ;;  %v2369_v60 = vrot.slane %v2368_v61, 6  ;;  %v2505_v20 = vstv %s4050_s7  ;;  %v2411_v24 = vstv %s4040_s24  ;;  %s4070_s7 = sld [smem:[#allocation11 + $0x43]] }
 0x956   :  { %v2362_v42 = vadd.f32 %v2360_v57, %v2352_v27  ;;  %v2378_v19 = vpop.permute.xlu1 %2377  ;;  %v2506_v27 = vmul.f32 %v2505_v20, %v5381_v36  ;;  %v2421_v57 = vstv %s4041_s25  ;;  %s4072_s24 = sld [smem:[#allocation11 + $0x45]] }
 0x957   :  { %v2370_v3 = vsel %vm300_vm8, %v2369_v60, %v2368_v61  ;;  %v2379_v55 = vrot.slane %v2378_v19, 6  ;;  %v2412_v61 = vmul.f32 %v2411_v24, %v5343_v30  ;;  %v2422_v60 = vmul.f32 %v2421_v57, %v5349_v22  ;;  %s4074_s25 = sld [smem:[#allocation11 + $0x47]] }
 0x958   :  { %v2372_v51 = vadd.f32 %v2370_v3, %v2362_v42  ;;  %v2388_v12 = vpop.permute.xlu0 %2387  ;;  %v2431_v42 = vstv %s4042_s26  ;;  %v2441_v3 = vstv %s4043_s27  ;;  %v2609_v24 = vstv %s4061_s17  ;;  %s4039_s26 = sld [smem:[#allocation11 + $0x24]] }
 0x959   :  { %v2380_v15 = vsel %vm311_vm9, %v2379_v55, %v2378_v19  ;;  %v2389_v18 = vrot.slane %v2388_v12, 6  ;;  %v2432_v19 = vmul.f32 %v2431_v42, %v5355_v14  ;;  %v2442_v55 = vmul.f32 %v2441_v3, %v5359_v32  ;;  %s4055_s27 = sld [smem:[#allocation11 + $0x34]] }
 0x95a   :  { %v2382_v59 = vadd.f32 %v2380_v15, %v2372_v51  ;;  %v2398_v44 = vpop.permute.xlu1 %2397  ;;  %v2451_v51 = vstv %s4044_s8  ;;  %s4058_s8 = sld [smem:[#allocation11 + $0x37]] }
 0x95b   :  { %v2390_v5 = vsel %vm322_vm10, %v2389_v18, %v2388_v12  ;;  %v2399_v11 = vrot.slane %v2398_v44, 6  ;;  %v2452_v30 = vmul.f32 %v2451_v51, %v5299_v29  ;;  %v2461_v12 = vstv %s4045_s28  ;;  %s4060_s28 = sld [smem:[#allocation11 + $0x39]] }
 0x95c   :  { %v2392_v13 = vadd.f32 %v2390_v5, %v2382_v59  ;;  %v2462_v15 = vmul.f32 %v2461_v12, %v5365_v0  ;;  %v2471_v18 = vstv %s4046_s29  ;;  %v2495_v5 = vstv %s4049_s6  ;;  %s4062_s29 = sld [smem:[#allocation11 + $0x3b]] }
 0x95d   :  { %v2400_v53 = vsel %vm333_vm11, %v2399_v11, %v2398_v44  ;;  %v2472_v59 = vmul.f32 %v2471_v18, %v5295_v37  ;;  %v2481_v44 = vstv %s4047_s4  ;;  %v2496_v11 = vmul.f32 %v2495_v5, %v5301_v54  ;;  %s4048_s4 = sld [smem:[#allocation11 + $0x2d]] }
 0x95e   :  { %v2402_v63 = vadd.f32 %v2400_v53, %v2392_v13  ;;  %v2482_v32 = vmul.f32 %v2481_v44, %v5373_v43  ;;  %v2515_v13 = vstv %s4051_s30  ;;  %v2525_v53 = vstv %s4052_s14  ;;  %s4064_s6 = sld [smem:[#allocation11 + $0x3d]] }
 0x95f   :  { %v2526_v37 = vmul.f32 %v2525_v53, %v5385_v46  ;;  %v2713_v51 = vstv %s4072_s24  ;;  %v2733_v12 = vstv %s4074_s25  ;;  %s4067_s30 = sld [smem:[#allocation11 + $0x40]] }
 0x960   :  { %v5537_v56 = vadd.f32 %v2404_v2, %v2402_v63  ;;  %v2516_v2 = vmul.f32 %v2515_v13, %v5306_v25  ;;  %v2535_v63 = vstv %s4053_s15  ;;  %s4069_s14 = sld [smem:[#allocation11 + $0x42]] }
 0x961   :  { %s4071_s15 = sld [smem:[#allocation11 + $0x44]] }
 0x962   :  { %v3431_v39 = vrot.slane %v5537_v56, %v4479_v9  ;;  %v3424_v45 = vcombine.high %v5537_v56, %v5537_v56  ;;  %s4075_s17 = sld [smem:[#allocation12 + $0x1]] }
 0x963   :  { %s4083_s24 = sld [smem:[#allocation11 + $0x4f]] }
 0x964   :  { %3440 = vrot.lane.b32.xlu0 %v3431_v39, %s4375_s22  ;;  %v3439_v50 = vcombine.high %v3431_v39, %v3431_v39  ;;  %v3438_v35 = vrot.slane %v3424_v45, %v4479_v9  ;;  %v2536_v39 = vmul.f32 %v2535_v63, %v5314_v31  ;;  %v2545_v45 = vstv %s4054_s11  ;;  %s4073_s11 = sld [smem:[#allocation11 + $0x46]] }
 0x965   :  { %v2546_v54 = vmul.f32 %v2545_v45, %v5391_v62  ;;  %v2407_v45 = vstv %s4039_s26  ;;  %s4086_s25 = sld [smem:[#allocation11 + $0x52]] }
 0x966   :  { %3442 = vrot.lane.b32.xlu1 %v3439_v50, %s4375_s22  ;;  %v2565_v50 = vstv %s4056_s16  ;;  %s4057_s16 = sld [smem:[#allocation11 + $0x36]] }
 0x967   :  { %v2566_v20 = vmul.f32 %v2565_v50, %v5397_v17  ;;  %v2555_v50 = vstv %s4055_s27  ;;  %s4088_s26 = sld [smem:[#allocation11 + $0x54]] }
 0x968   :  { %3444 = vrot.lane.b32.xlu0 %v3438_v35, %s4375_s22  ;;  %v2589_v35 = vstv %s4059_s5  ;;  %s4066_s5 = sld [smem:[#allocation11 + $0x3f]] }
 0x969   :  { %v2590_v46 = vmul.f32 %v2589_v35, %v5403_v8  ;;  %s4090_s27 = sld [smem:[#allocation11 + $0x56]] }
 0x96a   :  { %2508 = vrot.lane.b32.xlu1 %v2506_v27, %s4377_s13  ;;  %v2610_v27 = vmul.f32 %v2609_v24, %v5407_v10 }
 0x96c   :  { %2414 = vrot.lane.b32.xlu0 %v2412_v61, %s4373_s1  ;;  %v2629_v61 = vstv %s4063_s18 }
 0x96d   :  { %v2630_v57 = vmul.f32 %v2629_v61, %v5413_v1 }
 0x970   :  { %2424 = vrot.lane.b32.xlu0 %v2422_v60, %s4377_s13  ;;  %v2649_v60 = vstv %s4065_s2  ;;  %s4078_s2 = sld [smem:[#allocation11 + $0x4a]] }
 0x971   :  { %v2650_v42 = vmul.f32 %v2649_v60, %v5419_v33  ;;  %v2579_v60 = vstv %s4058_s8  ;;  %s4092_s8 = sld [smem:[#allocation11 + $0x58]] }
 0x974   :  { %2434 = vrot.lane.b32.xlu0 %v2432_v19, %s4378_s10  ;;  %v2673_v19 = vstv %s4068_s3  ;;  %s4079_s3 = sld [smem:[#allocation11 + $0x4b]] }
 0x975   :  { %v2674_v3 = vmul.f32 %v2673_v19, %v5444_v52 }
 0x978   :  { %2444 = vrot.lane.b32.xlu0 %v2442_v55, %s4376_s23  ;;  %v2693_v55 = vstv %s4070_s7  ;;  %s4081_s7 = sld [smem:[#allocation11 + $0x4d]] }
 0x979   :  { %v2694_v10 = vmul.f32 %v2693_v55, %v5459_v26 }
 0x97c   :  { %2454 = vrot.lane.b32.xlu0 %v2452_v30, %s4380_s9  ;;  %v2714_v30 = vmul.f32 %v2713_v51, %v5475_v38  ;;  %v2580_v51 = vmul.f32 %v2579_v60, %v5320_v41 }
 0x980   :  { %2464 = vrot.lane.b32.xlu0 %v2462_v15, %s4379_s19  ;;  %v2734_v15 = vmul.f32 %v2733_v12, %v5486_v48 }
 0x984   :  { %2474 = vrot.lane.b32.xlu0 %v2472_v59, %s4381_s20 }
 0x988   :  { %2484 = vrot.lane.b32.xlu0 %v2482_v32, %s4382_s21 }
 0x98c   :  { %2498 = vrot.lane.b32.xlu0 %v2496_v11, %s4373_s1 }
 0x990   :  { %2518 = vrot.lane.b32.xlu0 %v2516_v2, %s4378_s10 }
 0x994   :  { %2528 = vrot.lane.b32.xlu0 %v2526_v37, %s4376_s23 }
 0x998   :  { %2538 = vrot.lane.b32.xlu0 %v2536_v39, %s4380_s9 }
 0x99c   :  { %2548 = vrot.lane.b32.xlu0 %v2546_v54, %s4379_s19 }
 0x9a0   :  { %2568 = vrot.lane.b32.xlu0 %v2566_v20, %s4382_s21 }
 0x9a4   :  { %2592 = vrot.lane.b32.xlu0 %v2590_v46, %s4377_s13  ;;  %v2408_v46 = vmul.f32 %v2407_v45, %v5431_v23  ;;  %v2639_v45 = vstv %s4064_s6  ;;  %s4099_s6 = sld [smem:[#allocation11 + $0x5f]] }
 0x9a8   :  { %2612 = vrot.lane.b32.xlu0 %v2610_v27, %s4376_s23  ;;  %v2556_v27 = vmul.f32 %v2555_v50, %v5308_v28  ;;  %v2599_v28 = vstv %s4060_s28  ;;  %s4095_s28 = sld [smem:[#allocation11 + $0x5b]] }
 0x9ac   :  { %2632 = vrot.lane.b32.xlu0 %v2630_v57, %s4379_s19 }
 0x9b0   :  { %2652 = vrot.lane.b32.xlu0 %v2650_v42, %s4382_s21 }
 0x9b4   :  { %2676 = vrot.lane.b32.xlu0 %v2674_v3, %s4377_s13 }
 0x9b8   :  { %2696 = vrot.lane.b32.xlu0 %v2694_v10, %s4376_s23 }
 0x9bc   :  { %2716 = vrot.lane.b32.xlu0 %v2714_v30, %s4379_s19 }
 0x9c0   :  { %2736 = vrot.lane.b32.xlu0 %v2734_v15, %s4382_s21 }
 0x9d6   :  { %v3441_v18 = vpop.permute.xlu0 %3440 }
 0x9d8   :  { %v3443_v59 = vpop.permute.xlu1 %3442 }
 0x9d9   :  { %v3446_v44 = vsel %vm213_vm4, %v3441_v18, %v3443_v59 }
 0x9da   :  { %v3445_v32 = vpop.permute.xlu0 %3444  ;;  %v3450_v26 = vsel %vm1636_vm12, %v3446_v44, 0.0 }
 0x9db   :  { %v3447_v5 = vsel %vm213_vm4, %v3443_v59, %v3445_v32  ;;  %v2600_v32 = vmul.f32 %v2599_v28, %v5326_v4 }
 0x9dc   :  { %v3451_v11 = vsel %vm1636_vm12, %v3447_v5, 0.0  ;;  %v2509_v28 = vpop.permute.xlu1 %2508 }
 0x9dd   :  { %v3452_v13 = vadd.f32 %v3451_v11, %v3450_v26  ;;  %v2619_v11 = vstv %s4062_s29  ;;  %s4097_s29 = sld [smem:[#allocation11 + $0x5d]] }
 0x9de   :  { %v2415_v2 = vpop.permute.xlu0 %2414 }
 0x9df   :  { %3453 = vadd.xlane.f32.xlu1 %v3452_v13  ;;  %v2416_v63 = vrot.slane %v2415_v2, 2 }
 0x9e1   :  { %v2417_v20 = vsel %vm190_vm2, %v2415_v2, %v2416_v63 }
 0x9e2   :  { %v2425_v53 = vpop.permute.xlu0 %2424  ;;  %v2419_v42 = vadd.f32 %v2417_v20, %v2408_v46  ;;  %v2640_v46 = vmul.f32 %v2639_v45, %v5328_v47 }
 0x9e3   :  { %v2426_v54 = vrot.slane %v2425_v53, 2 }
 0x9e5   :  { %v2427_v61 = vsel %vm268_vm6, %v2425_v53, %v2426_v54 }
 0x9e6   :  { %v2435_v37 = vpop.permute.xlu0 %2434  ;;  %v2429_v55 = vadd.f32 %v2427_v61, %v2419_v42  ;;  %v2703_v42 = vstv %s4071_s15  ;;  %s4082_s15 = sld [smem:[#allocation11 + $0x4e]] }
 0x9e7   :  { %v2436_v35 = vrot.slane %v2435_v37, 2 }
 0x9e9   :  { %v2437_v19 = vsel %vm279_vm7, %v2435_v37, %v2436_v35  ;;  %v2620_v37 = vmul.f32 %v2619_v11, %v5334_v49 }
 0x9ea   :  { %v2445_v39 = vpop.permute.xlu0 %2444  ;;  %v2439_v15 = vadd.f32 %v2437_v19, %v2429_v55  ;;  %v2704_v19 = vmul.f32 %v2703_v42, %v5468_v40 }
 0x9eb   :  { %v2446_v57 = vrot.slane %v2445_v39, 6 }
 0x9ed   :  { %v2447_v30 = vsel %vm159_vm5, %v2446_v57, %v2445_v39  ;;  %v2491_v39 = vstv %s4048_s4  ;;  %v2683_v57 = vstv %s4069_s14  ;;  %s4077_s4 = sld [smem:[#allocation11 + $0x49]] }
 0x9ee   :  { %v2455_v24 = vpop.permute.xlu0 %2454  ;;  %v2449_v59 = vadd.f32 %v2447_v30, %v2439_v15  ;;  %v2492_v35 = vmul.f32 %v2491_v39, %v5499_v21  ;;  %v2684_v60 = vmul.f32 %v2683_v57, %v5448_v16  ;;  %s4101_s14 = sld [smem:[#allocation11 + $0x61]] }
 0x9ef   :  { %v2456_v3 = vrot.slane %v2455_v24, 6 }
 0x9f0   :  { %2558 = vrot.lane.b32.xlu1 %v2556_v27, %s4381_s20 }
 0x9f1   :  { %v2457_v18 = vsel %vm300_vm8, %v2456_v3, %v2455_v24  ;;  %v2663_v24 = vstv %s4067_s30  ;;  %v2723_v3 = vstv %s4073_s11  ;;  %s4080_s30 = sld [smem:[#allocation11 + $0x4c]] }
 0x9f2   :  { %v2465_v10 = vpop.permute.xlu0 %2464  ;;  %v2459_v41 = vadd.f32 %v2457_v18, %v2449_v59  ;;  %v2664_v61 = vmul.f32 %v2663_v24, %v5436_v34  ;;  %v2724_v47 = vmul.f32 %v2723_v3, %v5452_v7  ;;  %v2510_v59 = vrot.slane %v2509_v28, 2  ;;  %s4104_s11 = sld [smem:[#allocation11 + $0x64]] }
 0x9f3   :  { %v2466_v12 = vrot.slane %v2465_v10, 6 }
 0x9f4   :  { %2582 = vrot.lane.b32.xlu1 %v2580_v51, %s4373_s1 }
 0x9f5   :  { %v2467_v5 = vsel %vm311_vm9, %v2466_v12, %v2465_v10 }
 0x9f6   :  { %v2475_v44 = vpop.permute.xlu0 %2474  ;;  %v2469_v2 = vadd.f32 %v2467_v5, %v2459_v41  ;;  %v2511_v5 = vsel %vm268_vm6, %v2509_v28, %v2510_v59 }
 0x9f7   :  { %v2476_v26 = vrot.slane %v2475_v44, 6 }
 0x9f8   :  { %2602 = vrot.lane.b32.xlu1 %v2600_v32, %s4378_s10 }
 0x9f9   :  { %v2477_v13 = vsel %vm322_vm10, %v2476_v26, %v2475_v44 }
 0x9fa   :  { %v2485_v53 = vpop.permute.xlu0 %2484  ;;  %v2479_v54 = vadd.f32 %v2477_v13, %v2469_v2 }
 0x9fb   :  { %v2486_v63 = vrot.slane %v2485_v53, 6 }
 0x9fc   :  { %2622 = vrot.lane.b32.xlu1 %v2620_v37, %s4380_s9 }
 0x9fd   :  { %v2487_v50 = vsel %vm333_vm11, %v2486_v63, %v2485_v53 }
 0x9fe   :  { %v2489_v20 = vadd.f32 %v2487_v50, %v2479_v54  ;;  %v2499_v55 = vpop.permute.xlu0 %2498 }
 0x9ff   :  { %v2500_v12 = vrot.slane %v2499_v55, 2 }
 0xa00   :  { %v2493_v27 = vadd.f32 %v2492_v35, %v2489_v20  ;;  %2642 = vrot.lane.b32.xlu1 %v2640_v46, %s4381_s20 }
 0xa01   :  { %v2501_v15 = vsel %vm190_vm2, %v2499_v55, %v2500_v12 }
 0xa02   :  { %v2519_v34 = vpop.permute.xlu0 %2518  ;;  %v2503_v44 = vadd.f32 %v2501_v15, %v2493_v27 }
 0xa03   :  { %v2520_v32 = vrot.slane %v2519_v34, 2 }
 0xa04   :  { %2666 = vrot.lane.b32.xlu1 %v2664_v61, %s4373_s1  ;;  %v2513_v11 = vadd.f32 %v2511_v5, %v2503_v44 }
 0xa05   :  { %v2521_v41 = vsel %vm279_vm7, %v2519_v34, %v2520_v32 }
 0xa06   :  { %v2529_v10 = vpop.permute.xlu0 %2528  ;;  %v2523_v37 = vadd.f32 %v2521_v41, %v2513_v11 }
 0xa07   :  { %v2530_v26 = vrot.slane %v2529_v10, 6 }
 0xa08   :  { %2686 = vrot.lane.b32.xlu1 %v2684_v60, %s4378_s10 }
 0xa09   :  { %v2531_v2 = vsel %vm159_vm5, %v2530_v26, %v2529_v10 }
 0xa0a   :  { %v2539_v51 = vpop.permute.xlu0 %2538  ;;  %v2533_v54 = vadd.f32 %v2531_v2, %v2523_v37 }
 0xa0b   :  { %v2540_v13 = vrot.slane %v2539_v51, 6 }
 0xa0c   :  { %2706 = vrot.lane.b32.xlu1 %v2704_v19, %s4380_s9  ;;  %v2575_v19 = vstv %s4057_s16  ;;  %s4084_s16 = sld [smem:[#allocation11 + $0x50]] }
 0xa0d   :  { %v2541_v39 = vsel %vm300_vm8, %v2540_v13, %v2539_v51 }
 0xa0e   :  { %v2549_v30 = vpop.permute.xlu0 %2548  ;;  %v2543_v46 = vadd.f32 %v2541_v39, %v2533_v54 }
 0xa0f   :  { %v2550_v53 = vrot.slane %v2549_v30, 6 }
 0xa10   :  { %2726 = vrot.lane.b32.xlu1 %v2724_v47, %s4381_s20 }
 0xa11   :  { %v2551_v20 = vsel %vm311_vm9, %v2550_v53, %v2549_v30  ;;  %v2576_v30 = vmul.f32 %v2575_v19, %v5511_v58 }
 0xa12   :  { %v2569_v18 = vpop.permute.xlu0 %2568  ;;  %v2553_v60 = vadd.f32 %v2551_v20, %v2543_v46 }
 0xa13   :  { %v2570_v27 = vrot.slane %v2569_v18, 6 }
 0xa15   :  { %v2571_v10 = vsel %vm333_vm11, %v2570_v27, %v2569_v18 }
 0xa16   :  { %v2593_v7 = vpop.permute.xlu0 %2592 }
 0xa17   :  { %v2594_v15 = vrot.slane %v2593_v7, 2 }
 0xa19   :  { %v2595_v13 = vsel %vm268_vm6, %v2593_v7, %v2594_v15 }
 0xa1a   :  { %v2613_v50 = vpop.permute.xlu0 %2612 }
 0xa1b   :  { %v2614_v2 = vrot.slane %v2613_v50, 6 }
 0xa1e   :  { %v2633_v47 = vpop.permute.xlu0 %2632 }
 0xa1f   :  { %v2634_v54 = vrot.slane %v2633_v47, 6 }
 0xa21   :  { %v2635_v7 = vsel %vm311_vm9, %v2634_v54, %v2633_v47 }
 0xa22   :  { %v2653_v11 = vpop.permute.xlu0 %2652 }
 0xa26   :  { %v2677_v20 = vpop.permute.xlu0 %2676 }
 0xa68   :  { %v3454_v63 = vpop.xlane.xlu1 %3453 }
 0xa69   :  { %v3455_v45 = vrot.slane %v3454_v63, 4 }
 0xa6b   :  { %v3456_v35 = vadd.f32 %v3455_v45, %v3454_v63  ;;  %v2615_v45 = vsel %vm159_vm5, %v2614_v2, %v2613_v50 }
 0xa6c   :  { %v2559_v24 = vpop.permute.xlu1 %2558 }
 0xa6d   :  { %v2560_v61 = vrot.slane %v2559_v24, 6  ;;  %v3457_v57 = vrot.slane %v3456_v35, 2 }
 0xa6f   :  { %v2561_v42 = vsel %vm322_vm10, %v2560_v61, %v2559_v24  ;;  %v3458_v3 = vadd.f32 %v3457_v57, %v3456_v35  ;;  %v2654_v57 = vrot.slane %v2653_v11, 6 }
 0xa70   :  { %v2563_v55 = vadd.f32 %v2561_v42, %v2553_v60  ;;  %v2583_v34 = vpop.permute.xlu1 %2582 }
 0xa71   :  { %v2584_v51 = vrot.slane %v2583_v34, 2  ;;  %v3459_v12 = vrot.slane %v3458_v3, 1  ;;  %v2655_v50 = vsel %vm333_vm11, %v2654_v57, %v2653_v11 }
 0xa72   :  { %v2573_v28 = vadd.f32 %v2571_v10, %v2563_v55  ;;  %v2697_v55 = vpop.permute.xlu0 %2696 }
 0xa73   :  { %v3460_v59 = vadd.f32 %v3459_v12, %v3458_v3  ;;  %v2585_v5 = vsel %vm190_vm2, %v2583_v34, %v2584_v51  ;;  %v2659_v3 = vstv %s4066_s5  ;;  %s4106_s5 = sld [smem:[#allocation11 + $0x66]] }
 0xa74   :  { %v2577_v44 = vadd.f32 %v2576_v30, %v2573_v28  ;;  %v2603_v32 = vpop.permute.xlu1 %2602  ;;  %v2660_v12 = vmul.f32 %v2659_v3, %v5524_v6  ;;  %v2678_v30 = vrot.slane %v2677_v20, 2 }
 0xa75   :  { %v2604_v26 = vrot.slane %v2603_v32, 2  ;;  %4178 = vpush %v3460_v59 }
 0xa76   :  { %v2587_v41 = vadd.f32 %v2585_v5, %v2577_v44  ;;  %v2717_v44 = vpop.permute.xlu0 %2716 }
 0xa77   :  { %v2605_v37 = vsel %vm279_vm7, %v2603_v32, %v2604_v26  ;;  %v2679_v26 = vsel %vm268_vm6, %v2677_v20, %v2678_v30 }
 0xa78   :  { %v2597_v53 = vadd.f32 %v2595_v13, %v2587_v41  ;;  %v2623_v18 = vpop.permute.xlu1 %2622  ;;  %v2698_v41 = vrot.slane %v2697_v55, 6 }
 0xa79   :  { %v2624_v63 = vrot.slane %v2623_v18, 6 }
 0xa7a   :  { %v2607_v39 = vadd.f32 %v2605_v37, %v2597_v53  ;;  %v2699_v37 = vsel %vm159_vm5, %v2698_v41, %v2697_v55 }
 0xa7b   :  { %v2625_v24 = vsel %vm300_vm8, %v2624_v63, %v2623_v18  ;;  %v2718_v63 = vrot.slane %v2717_v44, 6 }
 0xa7c   :  { %v2617_v35 = vadd.f32 %v2615_v45, %v2607_v39  ;;  %v2643_v46 = vpop.permute.xlu1 %2642  ;;  %v2737_v39 = vpop.permute.xlu0 %2736 }
 0xa7d   :  { %v2644_v27 = vrot.slane %v2643_v46, 6  ;;  %v2738_v20 = vrot.slane %v2737_v39, 6 }
 0xa7e   :  { %v2627_v61 = vadd.f32 %v2625_v24, %v2617_v35  ;;  %v2719_v24 = vsel %vm311_vm9, %v2718_v63, %v2717_v44  ;;  %v2854_v63 = vstv %s4088_s26  ;;  %s4098_s26 = sld [smem:[#allocation11 + $0x5e]] }
 0xa7f   :  { %v2645_v19 = vsel %vm322_vm10, %v2644_v27, %v2643_v46  ;;  %v2739_v57 = vsel %vm333_vm11, %v2738_v20, %v2737_v39  ;;  %v2855_v39 = vmul.f32 %v2854_v63, %v5306_v25 }
 0xa80   :  { %v2637_v60 = vadd.f32 %v2635_v7, %v2627_v61  ;;  %v2667_v42 = vpop.permute.xlu1 %2666 }
 0xa81   :  { %v2668_v10 = vrot.slane %v2667_v42, 2 }
 0xa82   :  { %v2647_v34 = vadd.f32 %v2645_v19, %v2637_v60  ;;  %v2743_v60 = vstv %s4075_s17  ;;  %s4087_s17 = sld [smem:[#allocation11 + $0x53]] }
 0xa83   :  { %v2669_v59 = vsel %vm190_vm2, %v2667_v42, %v2668_v10 }
 0xa84   :  { %v2657_v51 = vadd.f32 %v2655_v50, %v2647_v34  ;;  %v2687_v28 = vpop.permute.xlu1 %2686 }
 0xa85   :  { %v2688_v47 = vrot.slane %v2687_v28, 2 }
 0xa86   :  { %v2661_v15 = vadd.f32 %v2660_v12, %v2657_v51 }
 0xa87   :  { %v2689_v2 = vsel %vm279_vm7, %v2687_v28, %v2688_v47  ;;  %v2760_v47 = vstv %s4078_s2  ;;  %s4089_s2 = sld [smem:[#allocation11 + $0x55]] }
 0xa88   :  { %v2671_v32 = vadd.f32 %v2669_v59, %v2661_v15  ;;  %v2707_v5 = vpop.permute.xlu1 %2706  ;;  %v2761_v44 = vmul.f32 %v2760_v47, %v5349_v22 }
 0xa89   :  { %v2708_v11 = vrot.slane %v2707_v5, 6 }
 0xa8a   :  { %v2681_v13 = vadd.f32 %v2679_v26, %v2671_v32  ;;  %v2770_v32 = vstv %s4079_s3  ;;  %v2790_v26 = vstv %s4081_s7  ;;  %s4110_s3 = sld [smem:[#allocation11 + $0x6a]] }
 0xa8b   :  { %v2709_v54 = vsel %vm300_vm8, %v2708_v11, %v2707_v5  ;;  %v2771_v5 = vmul.f32 %v2770_v32, %v5355_v14  ;;  %v2791_v41 = vmul.f32 %v2790_v26, %v5299_v29  ;;  %v2750_v32 = vstv %s4077_s4  ;;  %v5706_v26 = vld [vmem:[#allocation2] sm:$0x3f]  ;;  %s4091_s7 = sld [smem:[#allocation11 + $0x57]] }
 0xa8c   :  { %v2691_v53 = vadd.f32 %v2689_v2, %v2681_v13  ;;  %v2727_v18 = vpop.permute.xlu1 %2726  ;;  %v2810_v13 = vstv %s4083_s24  ;;  %v5677_v2 = vld [vmem:[#allocation2 + $0x2] sm:$0x3f]  ;;  %s4093_s24 = sld [smem:[#allocation11 + $0x59]] }
 0xa8d   :  { %v2728_v35 = vrot.slane %v2727_v18, 6  ;;  %v2811_v11 = vmul.f32 %v5677_v2, %v2810_v13  ;;  %v2958_v13 = vstv %s4099_s6  ;;  %s4109_s4 = sld [smem:[#allocation11 + $0x69]] }
 0xa8e   :  { %v2701_v45 = vadd.f32 %v2699_v37, %v2691_v53  ;;  %v2834_v53 = vstv %s4086_s25  ;;  %s4096_s25 = sld [smem:[#allocation11 + $0x5c]] }
 0xa8f   :  { %v2729_v61 = vsel %vm322_vm10, %v2728_v35, %v2727_v18  ;;  %v5681_v18 = vld [vmem:[#allocation2 + $0x8] sm:$0x3f]  ;;  %s4111_s6 = sld [smem:[#allocation11 + $0x6b]] }
 0xa90   :  { %v2711_v46 = vadd.f32 %v2709_v54, %v2701_v45  ;;  %v2835_v37 = vmul.f32 %v5681_v18, %v2834_v53  ;;  %v2874_v45 = vstv %s4090_s27  ;;  %v2959_v53 = vmul.f32 %v2958_v13, %v5334_v49  ;;  %s4100_s27 = sld [smem:[#allocation11 + $0x60]] }
 0xa91   :  { %v2875_v54 = vmul.f32 %v2874_v45, %v5314_v31  ;;  %v2800_v45 = vstv %s4082_s15  ;;  %s4094_s15 = sld [smem:[#allocation11 + $0x5a]] }
 0xa92   :  { %v2721_v27 = vadd.f32 %v2719_v24, %v2711_v46 }
 0xa94   :  { %v2731_v7 = vadd.f32 %v2729_v61, %v2721_v27 }
 0xa96   :  { %v2741_v42 = vadd.f32 %v2739_v57, %v2731_v7 }
 0xa98   :  { %v5651_v19 = vadd.f32 %v2743_v60, %v2741_v42 }
 0xa9a   :  { %v3524_v3 = vrot.slane %v5651_v19, %v4479_v9  ;;  %v3517_v30 = vcombine.high %v5651_v19, %v5651_v19 }
 0xa9c   :  { %3533 = vrot.lane.b32.xlu0 %v3524_v3, %s4375_s22  ;;  %v3532_v59 = vcombine.high %v3524_v3, %v3524_v3 }
 0xaa6   :  { %s4179_s18 = spop %4178 }
 0xaa7   :  { %v3462_v55 = vstv %s4179_s18  ;;  %s4108_s18 = sld [smem:[#allocation11 + $0x68]] }
 0xaa8   :  { %v3463_v34 = vmul.f32 0.001953125, %v3462_v55 }
 0xaaa   :  { %v5657_v50 = vsub.f32 %v5537_v56, %v3463_v34  ;;  %v3531_v56 = vrot.slane %v3517_v30, %v4479_v9  ;;  %v5697_v30 = vld [vmem:[#allocation2 + $0xa] sm:$0x3f] }
 0xaac   :  { %6090 = vst [vmem:[#allocation31_spill] sm:$0xff] %v5657_v50  ;;  %v3465_v10 = vmul.f32 %v5657_v50, %v5657_v50 }
 0xaae   :  { %v3467_v51 = vcombine.high %v3465_v10, %v3465_v10  ;;  %v3474_v12 = vrot.slane %v3465_v10, %v4479_v9 }
 0xab0   :  { %3483 = vrot.lane.b32.xlu1 %v3474_v12, %s4375_s22  ;;  %v3482_v28 = vcombine.high %v3474_v12, %v3474_v12  ;;  %v3481_v15 = vrot.slane %v3467_v51, %v4479_v9 }
 0xab2   :  { %3485 = vrot.lane.b32.xlu0 %v3482_v28, %s4375_s22  ;;  %v2894_v28 = vstv %s4092_s8  ;;  %s4102_s8 = sld [smem:[#allocation11 + $0x62]] }
 0xab4   :  { %3487 = vrot.lane.b32.xlu1 %v3481_v15, %s4375_s22  ;;  %v2895_v15 = vmul.f32 %v5697_v30, %v2894_v28  ;;  %v3062_v28 = vstv %s4110_s3  ;;  %s4118_s3 = sld [smem:[#allocation11 + $0x71]] }
 0xab6   :  { %3537 = vrot.lane.b32.xlu0 %v3531_v56, %s4375_s22  ;;  %v2918_v56 = vstv %s4095_s28  ;;  %s4105_s28 = sld [smem:[#allocation11 + $0x65]] }
 0xab8   :  { %3535 = vrot.lane.b32.xlu1 %v3532_v59, %s4375_s22  ;;  %v5701_v59 = vld [vmem:[#allocation2 + $0x10] sm:$0x3f] }
 0xab9   :  { %v2919_v47 = vmul.f32 %v5701_v59, %v2918_v56  ;;  %v5739_v56 = vld [vmem:[#allocation2 + $0x1a] sm:$0x3f] }
 0xabc   :  { %2763 = vrot.lane.b32.xlu1 %v2761_v44, %s4377_s13  ;;  %v2938_v44 = vstv %s4097_s29  ;;  %s4107_s29 = sld [smem:[#allocation11 + $0x67]] }
 0xac0   :  { %2773 = vrot.lane.b32.xlu1 %v2771_v5, %s4378_s10  ;;  %v2939_v5 = vmul.f32 %v2938_v44, %v5326_v4 }
 0xac4   :  { %2793 = vrot.lane.b32.xlu1 %v2791_v41, %s4380_s9  ;;  %v2751_v41 = vmul.f32 %v5706_v26, %v2750_v32  ;;  %v2904_v32 = vstv %s4093_s24  ;;  %s4123_s24 = sld [smem:[#allocation11 + $0x76]] }
 0xac8   :  { %2813 = vrot.lane.b32.xlu1 %v2811_v11, %s4381_s20  ;;  %v2780_v11 = vstv %s4080_s30  ;;  %s4076_s30 = sld [smem:[#allocation11 + $0x48]] }
 0xacc   :  { %2837 = vrot.lane.b32.xlu1 %v2835_v37, %s4373_s1  ;;  %v5712_v37 = vld [vmem:[#allocation2 + $0x2] sm:$0xf] }
 0xacd   :  { %v2781_v63 = vmul.f32 %v5712_v37, %v2780_v11  ;;  %v2948_v11 = vstv %s4098_s26  ;;  %s4127_s26 = sld [smem:[#allocation11 + $0x7a]] }
 0xad0   :  { %2857 = vrot.lane.b32.xlu1 %v2855_v39, %s4378_s10  ;;  %v2978_v39 = vstv %s4101_s14  ;;  %s4085_s14 = sld [smem:[#allocation11 + $0x51]] }
 0xad4   :  { %2877 = vrot.lane.b32.xlu1 %v2875_v54, %s4380_s9  ;;  %v5717_v54 = vld [vmem:[#allocation2 + $0x12] sm:$0x3f] }
 0xb0e   :  { %v3534_v35 = vpop.permute.xlu0 %3533 }
 0xb22   :  { %v3484_v46 = vpop.permute.xlu1 %3483 }
 0xb24   :  { %v3486_v24 = vpop.permute.xlu0 %3485 }
 0xb25   :  { %v3489_v20 = vsel %vm213_vm4, %v3484_v46, %v3486_v24  ;;  %v2801_v46 = vmul.f32 %v2800_v45, %v5365_v0 }
 0xb26   :  { %v3488_v27 = vpop.permute.xlu1 %3487  ;;  %v3493_v7 = vsel %vm1636_vm12, %v3489_v20, 0.0  ;;  %v2820_v20 = vstv %s4084_s16 }
 0xb27   :  { %v3490_v61 = vsel %vm213_vm4, %v3486_v24, %v3488_v27  ;;  %v3002_v24 = vstv %s4104_s11  ;;  %v5723_v27 = vld [vmem:[#allocation2 + $0x18] sm:$0x3f]  ;;  %s4103_s11 = sld [smem:[#allocation11 + $0x63]] }
 0xb28   :  { %v3494_v57 = vsel %vm1636_vm12, %v3490_v61, 0.0  ;;  %v3538_v42 = vpop.permute.xlu0 %3537  ;;  %v3003_v61 = vmul.f32 %v5723_v27, %v3002_v24  ;;  %v3012_v24 = vstv %s4105_s28  ;;  %s4134_s28 = sld [smem:[#allocation11 + $0x81]] }
 0xb29   :  { %v3495_v60 = vadd.f32 %v3494_v57, %v3493_v7  ;;  %v2821_v7 = vmul.f32 %v2820_v20, %v5373_v43  ;;  %v3022_v57 = vstv %s4106_s5  ;;  %v3013_v20 = vmul.f32 %v3012_v24, %v5444_v52 }
 0xb2a   :  { %v3536_v3 = vpop.permute.xlu1 %3535 }
 0xb2b   :  { %v3539_v55 = vsel %vm213_vm4, %v3534_v35, %v3536_v3  ;;  %v3540_v34 = vsel %vm213_vm4, %v3536_v3, %v3538_v42  ;;  %3496 = vadd.xlane.f32.xlu1 %v3495_v60  ;;  %v2979_v35 = vmul.f32 %v5717_v54, %v2978_v39  ;;  %v2844_v60 = vstv %s4087_s17  ;;  %s4112_s17 = sld [smem:[#allocation12 + $0x2]] }
 0xb2c   :  { %v3543_v10 = vsel %vm1636_vm12, %v3539_v55, 0.0  ;;  %v3544_v51 = vsel %vm1636_vm12, %v3540_v34, 0.0  ;;  %v3023_v42 = vmul.f32 %v3022_v57, %v5448_v16  ;;  %v2845_v3 = vmul.f32 %v2844_v60, %v5381_v36 }
 0xb2d   :  { %v3545_v12 = vadd.f32 %v3544_v51, %v3543_v10  ;;  %v3042_v55 = vstv %s4108_s18  ;;  %v2864_v34 = vstv %s4089_s2  ;;  %v5734_v51 = vld [vmem:[#allocation2 + $0xa] sm:$0xf]  ;;  %v2968_v39 = vstv %s4100_s27  ;;  %s4115_s18 = sld [smem:[#allocation11 + $0x6e]] }
 0xb2e   :  { %v3043_v10 = vmul.f32 %v3042_v55, %v5468_v40  ;;  %v2969_v45 = vmul.f32 %v2968_v39, %v5413_v1  ;;  %v3052_v60 = vstv %s4109_s4  ;;  %s4116_s2 = sld [smem:[#allocation11 + $0x6f]] }
 0xb2f   :  { %3546 = vadd.xlane.f32.xlu0 %v3545_v12  ;;  %v2865_v12 = vmul.f32 %v5734_v51, %v2864_v34  ;;  %v2764_v34 = vpop.permute.xlu1 %2763  ;;  %s4129_s27 = sld [smem:[#allocation11 + $0x7c]] }
 0xb30   :  { %v2765_v24 = vrot.slane %v2764_v34, 2  ;;  %s4136_s4 = sld [smem:[#allocation11 + $0x83]] }
 0xb3c   :  { %2897 = vrot.lane.b32.xlu1 %v2895_v15, %s4381_s20  ;;  %v2884_v15 = vstv %s4091_s7  ;;  %s4120_s7 = sld [smem:[#allocation11 + $0x73]] }
 0xb3d   :  { %v2885_v44 = vmul.f32 %v2884_v15, %v5391_v62 }
 0xb40   :  { %2921 = vrot.lane.b32.xlu1 %v2919_v47, %s4373_s1  ;;  %v3063_v47 = vmul.f32 %v5739_v56, %v3062_v28 }
 0xb44   :  { %2941 = vrot.lane.b32.xlu1 %v2939_v5, %s4378_s10  ;;  %v2905_v5 = vmul.f32 %v2904_v32, %v5397_v17 }
 0xb45   :  { %2753 = vrot.lane.b32.xlu0 %v2751_v41, %s4373_s1  ;;  %v2928_v41 = vstv %s4096_s25  ;;  %s4125_s25 = sld [smem:[#allocation11 + $0x78]] }
 0xb46   :  { %v2929_v13 = vmul.f32 %v2928_v41, %v5403_v8 }
 0xb48   :  { %2961 = vrot.lane.b32.xlu1 %v2959_v53, %s4380_s9  ;;  %v5749_v53 = vld [vmem:[#allocation2 + $0x12] sm:$0xf] }
 0xb49   :  { %2783 = vrot.lane.b32.xlu0 %v2781_v63, %s4376_s23  ;;  %v2949_v63 = vmul.f32 %v5749_v53, %v2948_v11 }
 0xb4c   :  { %2981 = vrot.lane.b32.xlu1 %v2979_v35, %s4381_s20  ;;  %v2988_v35 = vstv %s4102_s8  ;;  %s4132_s8 = sld [smem:[#allocation11 + $0x7f]] }
 0xb4d   :  { %2803 = vrot.lane.b32.xlu0 %v2801_v46, %s4379_s19  ;;  %v2989_v46 = vmul.f32 %v2988_v35, %v5419_v33 }
 0xb50   :  { %3005 = vrot.lane.b32.xlu1 %v3003_v61, %s4373_s1  ;;  %v3032_v61 = vstv %s4107_s29  ;;  %s4114_s29 = sld [smem:[#allocation11 + $0x6d]] }
 0xb51   :  { %2823 = vrot.lane.b32.xlu0 %v2821_v7, %s4382_s21  ;;  %v5759_v7 = vld [vmem:[#allocation2 + $0x1a] sm:$0xf] }
 0xb52   :  { %6091 = vst [vmem:[#allocation32_spill] sm:$0xff] %v5759_v7  ;;  %v3033_v57 = vmul.f32 %v5759_v7, %v3032_v61 }
 0xb54   :  { %3025 = vrot.lane.b32.xlu1 %v3023_v42, %s4378_s10  ;;  %v3053_v42 = vmul.f32 %v3052_v60, %v5475_v38 }
 0xb55   :  { %2847 = vrot.lane.b32.xlu0 %v2845_v3, %s4377_s13  ;;  %v3072_v3 = vstv %s4111_s6  ;;  %s4117_s6 = sld [smem:[#allocation11 + $0x70]] }
 0xb56   :  { %v3073_v55 = vmul.f32 %v3072_v3, %v5486_v48 }
 0xb58   :  { %3045 = vrot.lane.b32.xlu1 %v3043_v10, %s4380_s9  ;;  %v2774_v10 = vpop.permute.xlu1 %2773 }
 0xb59   :  { %2867 = vrot.lane.b32.xlu0 %v2865_v12, %s4376_s23 }
 0xb5c   :  { %3065 = vrot.lane.b32.xlu1 %v3063_v47, %s4381_s20  ;;  %v2794_v12 = vpop.permute.xlu1 %2793 }
 0xb5d   :  { %2887 = vrot.lane.b32.xlu0 %v2885_v44, %s4379_s19 }
 0xb60   :  { %v2814_v28 = vpop.permute.xlu1 %2813 }
 0xb61   :  { %2907 = vrot.lane.b32.xlu0 %v2905_v5, %s4382_s21 }
 0xb64   :  { %v2838_v15 = vpop.permute.xlu1 %2837 }
 0xb65   :  { %2931 = vrot.lane.b32.xlu0 %v2929_v13, %s4377_s13 }
 0xb68   :  { %v5767_v47 = vpop.permute.xlu1 %2857 }
 0xb69   :  { %2951 = vrot.lane.b32.xlu0 %v2949_v63, %s4376_s23 }
 0xb6c   :  { %v5769_v44 = vpop.permute.xlu1 %2877 }
 0xb6d   :  { %2971 = vrot.lane.b32.xlu0 %v2969_v45, %s4379_s19  ;;  %v2746_v45 = vstv %s4076_s30  ;;  %s4138_s30 = sld [smem:[#allocation11 + $0x85]] }
 0xb6e   :  { %v2747_v60 = vmul.f32 %v2746_v45, %v5431_v23 }
 0xb71   :  { %2991 = vrot.lane.b32.xlu0 %v2989_v46, %s4382_s21 }
 0xb75   :  { %3015 = vrot.lane.b32.xlu0 %v3013_v20, %s4377_s13 }
 0xb79   :  { %3035 = vrot.lane.b32.xlu0 %v3033_v57, %s4376_s23 }
 0xb7d   :  { %3055 = vrot.lane.b32.xlu0 %v3053_v42, %s4379_s19  ;;  %v2775_v42 = vrot.slane %v2774_v10, 2 }
 0xb81   :  { %3075 = vrot.lane.b32.xlu0 %v3073_v55, %s4382_s21 }
 0xbb4   :  { %v3497_v32 = vpop.xlane.xlu1 %3496 }
 0xbb5   :  { %v3498_v5 = vrot.slane %v3497_v32, 4 }
 0xbb7   :  { %v3499_v41 = vadd.f32 %v3498_v5, %v3497_v32  ;;  %v2766_v5 = vsel %vm268_vm6, %v2764_v34, %v2765_v24 }
 0xbb8   :  { %v3547_v13 = vpop.xlane.xlu0 %3546 }
 0xbb9   :  { %v3500_v11 = vrot.slane %v3499_v41, 2  ;;  %v3548_v63 = vrot.slane %v3547_v13, 4 }
 0xbbb   :  { %v3549_v39 = vadd.f32 %v3548_v63, %v3547_v13  ;;  %v3501_v35 = vadd.f32 %v3500_v11, %v3499_v41  ;;  %v2776_v11 = vsel %vm279_vm7, %v2774_v10, %v2775_v42  ;;  %v2795_v63 = vrot.slane %v2794_v12, 6 }
 0xbbc   :  { %v2754_v46 = vpop.permute.xlu0 %2753 }
 0xbbd   :  { %v3550_v20 = vrot.slane %v3549_v39, 2  ;;  %v2755_v61 = vrot.slane %v2754_v46, 2  ;;  %v3502_v57 = vrot.slane %v3501_v35, 1 }
 0xbbf   :  { %v2756_v3 = vsel %vm190_vm2, %v2754_v46, %v2755_v61  ;;  %v3503_v55 = vadd.f32 %v3502_v57, %v3501_v35  ;;  %v3551_v50 = vadd.f32 %v3550_v20, %v3549_v39  ;;  %v2796_v35 = vsel %vm300_vm8, %v2795_v63, %v2794_v12  ;;  %v2898_v57 = vpop.permute.xlu1 %2897 }
 0xbc0   :  { %v2758_v48 = vadd.f32 %v2756_v3, %v2747_v60  ;;  %v2784_v32 = vpop.permute.xlu0 %2783  ;;  %v2815_v20 = vrot.slane %v2814_v28, 6  ;;  %v2830_v60 = vstv %s4085_s14  ;;  %s4119_s14 = sld [smem:[#allocation11 + $0x72]] }
 0xbc1   :  { %v2785_v38 = vrot.slane %v2784_v32, 6  ;;  %4180 = vpush %v3503_v55  ;;  %v3552_v13 = vrot.slane %v3551_v50, 1  ;;  %v2839_v55 = vrot.slane %v2838_v15, 2 }
 0xbc2   :  { %v2768_v41 = vadd.f32 %v2766_v5, %v2758_v48 }
 0xbc3   :  { %v3553_v7 = vadd.f32 %v3552_v13, %v3551_v50  ;;  %v2786_v23 = vsel %vm159_vm5, %v2785_v38, %v2784_v32  ;;  %v2816_v50 = vsel %vm322_vm10, %v2815_v20, %v2814_v28  ;;  %v2922_v12 = vpop.permute.xlu1 %2921  ;;  %v2840_v13 = vsel %vm190_vm2, %v2838_v15, %v2839_v55 }
 0xbc4   :  { %v2778_v52 = vadd.f32 %v2776_v11, %v2768_v41  ;;  %v2804_v45 = vpop.permute.xlu0 %2803  ;;  %v2859_v41 = vrot.slane %v5767_v47, 2 }
 0xbc5   :  { %v2805_v46 = vrot.slane %v2804_v45, 6  ;;  %4182 = vpush %v3553_v7 }
 0xbc6   :  { %v2788_v39 = vadd.f32 %v2786_v23, %v2778_v52  ;;  %v2831_v23 = vmul.f32 %v2830_v60, %v5499_v21 }
 0xbc7   :  { %v2806_v61 = vsel %vm311_vm9, %v2805_v46, %v2804_v45  ;;  %v2942_v20 = vpop.permute.xlu1 %2941 }
 0xbc8   :  { %v2798_v34 = vadd.f32 %v2796_v35, %v2788_v39  ;;  %v2824_v24 = vpop.permute.xlu0 %2823  ;;  %v2860_v39 = vsel %vm279_vm7, %v5767_v47, %v2859_v41  ;;  %v2879_v35 = vrot.slane %v5769_v44, 6 }
 0xbc9   :  { %v2825_v48 = vrot.slane %v2824_v24, 6 }
 0xbca   :  { %v2808_v10 = vadd.f32 %v2806_v61, %v2798_v34 }
 0xbcb   :  { %v2826_v38 = vsel %vm333_vm11, %v2825_v48, %v2824_v24  ;;  %v2962_v55 = vpop.permute.xlu1 %2961 }
 0xbcc   :  { %v2818_v42 = vadd.f32 %v2816_v50, %v2808_v10  ;;  %v2848_v3 = vpop.permute.xlu0 %2847  ;;  %v2880_v10 = vsel %vm300_vm8, %v2879_v35, %v5769_v44  ;;  %v2899_v50 = vrot.slane %v2898_v57, 6 }
 0xbcd   :  { %v2849_v7 = vrot.slane %v2848_v3, 2 }
 0xbce   :  { %v2828_v52 = vadd.f32 %v2826_v38, %v2818_v42 }
 0xbcf   :  { %v2850_v28 = vsel %vm268_vm6, %v2848_v3, %v2849_v7 }
 0xbd0   :  { %v2832_v32 = vadd.f32 %v2831_v23, %v2828_v52  ;;  %v2868_v5 = vpop.permute.xlu0 %2867  ;;  %v2900_v23 = vsel %vm322_vm10, %v2899_v50, %v2898_v57  ;;  %v2914_v52 = vstv %s4094_s15  ;;  %s4141_s15 = sld [smem:[#allocation11 + $0x88]] }
 0xbd1   :  { %v2869_v63 = vrot.slane %v2868_v5, 6 }
 0xbd2   :  { %v2842_v11 = vadd.f32 %v2840_v13, %v2832_v32  ;;  %v2923_v32 = vrot.slane %v2922_v12, 2  ;;  %v2915_v13 = vmul.f32 %v2914_v52, %v5511_v58 }
 0xbd3   :  { %v2870_v24 = vsel %vm159_vm5, %v2869_v63, %v2868_v5 }
 0xbd4   :  { %v2852_v45 = vadd.f32 %v2850_v28, %v2842_v11  ;;  %v2888_v46 = vpop.permute.xlu0 %2887  ;;  %v2982_v28 = vpop.permute.xlu1 %2981 }
 0xbd5   :  { %v2889_v61 = vrot.slane %v2888_v46, 6 }
 0xbd6   :  { %v2862_v34 = vadd.f32 %v2860_v39, %v2852_v45  ;;  %v2924_v45 = vsel %vm190_vm2, %v2922_v12, %v2923_v32 }
 0xbd7   :  { %v2890_v42 = vsel %vm311_vm9, %v2889_v61, %v2888_v46  ;;  %v2943_v46 = vrot.slane %v2942_v20, 2 }
 0xbd8   :  { %v2872_v15 = vadd.f32 %v2870_v24, %v2862_v34  ;;  %v2908_v48 = vpop.permute.xlu0 %2907 }
 0xbd9   :  { %v2909_v3 = vrot.slane %v2908_v48, 6  ;;  %v2944_v61 = vsel %vm279_vm7, %v2942_v20, %v2943_v46 }
 0xbda   :  { %v2882_v60 = vadd.f32 %v2880_v10, %v2872_v15  ;;  %v2963_v15 = vrot.slane %v2962_v55, 6 }
 0xbdb   :  { %v2910_v5 = vsel %vm333_vm11, %v2909_v3, %v2908_v48  ;;  %v3006_v48 = vpop.permute.xlu1 %3005 }
 0xbdc   :  { %v2892_v47 = vadd.f32 %v2890_v42, %v2882_v60  ;;  %v2932_v38 = vpop.permute.xlu0 %2931  ;;  %v2964_v12 = vsel %vm300_vm8, %v2963_v15, %v2962_v55 }
 0xbdd   :  { %v2933_v44 = vrot.slane %v2932_v38, 2 }
 0xbde   :  { %v2902_v7 = vadd.f32 %v2900_v23, %v2892_v47  ;;  %v2983_v47 = vrot.slane %v2982_v28, 6 }
 0xbdf   :  { %v2934_v34 = vsel %vm268_vm6, %v2932_v38, %v2933_v44  ;;  %v3026_v32 = vpop.permute.xlu1 %3025 }
 0xbe0   :  { %v2912_v41 = vadd.f32 %v2910_v5, %v2902_v7  ;;  %v2952_v11 = vpop.permute.xlu0 %2951  ;;  %v2984_v20 = vsel %vm322_vm10, %v2983_v47, %v2982_v28 }
 0xbe1   :  { %v2953_v57 = vrot.slane %v2952_v11, 6 }
 0xbe2   :  { %v2916_v63 = vadd.f32 %v2915_v13, %v2912_v41  ;;  %v2998_v13 = vstv %s4103_s11  ;;  %s4121_s11 = sld [smem:[#allocation11 + $0x74]] }
 0xbe3   :  { %v2954_v60 = vsel %vm159_vm5, %v2953_v57, %v2952_v11 }
 0xbe4   :  { %v2926_v39 = vadd.f32 %v2924_v45, %v2916_v63  ;;  %v2972_v35 = vpop.permute.xlu0 %2971  ;;  %v3007_v63 = vrot.slane %v3006_v48, 2  ;;  %v2999_v45 = vmul.f32 %v2998_v13, %v5524_v6 }
 0xbe5   :  { %v2973_v42 = vrot.slane %v2972_v35, 6 }
 0xbe6   :  { %v2936_v24 = vadd.f32 %v2934_v34, %v2926_v39  ;;  %v3046_v39 = vpop.permute.xlu1 %3045  ;;  %v3008_v57 = vsel %vm190_vm2, %v3006_v48, %v3007_v63 }
 0xbe7   :  { %v2974_v38 = vsel %vm311_vm9, %v2973_v42, %v2972_v35  ;;  %v3027_v35 = vrot.slane %v3026_v32, 2 }
 0xbe8   :  { %v2946_v10 = vadd.f32 %v2944_v61, %v2936_v24  ;;  %v2992_v50 = vpop.permute.xlu0 %2991 }
 0xbe9   :  { %v2993_v7 = vrot.slane %v2992_v50, 6  ;;  %v3028_v42 = vsel %vm279_vm7, %v3026_v32, %v3027_v35 }
 0xbea   :  { %v2956_v3 = vadd.f32 %v2954_v60, %v2946_v10 }
 0xbeb   :  { %v2994_v11 = vsel %vm333_vm11, %v2993_v7, %v2992_v50 }
 0xbec   :  { %v2966_v23 = vadd.f32 %v2964_v12, %v2956_v3  ;;  %v3016_v52 = vpop.permute.xlu0 %3015  ;;  %v3047_v3 = vrot.slane %v3046_v39, 6  ;;  %v3066_v12 = vpop.permute.xlu1 %3065 }
 0xbed   :  { %v3017_v55 = vrot.slane %v3016_v52, 2  ;;  %v3067_v13 = vrot.slane %v3066_v12, 6 }
 0xbee   :  { %v2976_v5 = vadd.f32 %v2974_v38, %v2966_v23 }
 0xbef   :  { %v3018_v28 = vsel %vm268_vm6, %v3016_v52, %v3017_v55 }
 0xbf0   :  { %v2986_v41 = vadd.f32 %v2984_v20, %v2976_v5  ;;  %v3036_v44 = vpop.permute.xlu0 %3035  ;;  %v3048_v20 = vsel %vm300_vm8, %v3047_v3, %v3046_v39 }
 0xbf1   :  { %v3037_v15 = vrot.slane %v3036_v44, 6 }
 0xbf2   :  { %v2996_v46 = vadd.f32 %v2994_v11, %v2986_v41  ;;  %s5804_s16 = spop %4180 }
 0xbf3   :  { %v3038_v48 = vsel %vm159_vm5, %v3037_v15, %v3036_v44  ;;  %v3068_v44 = vsel %vm322_vm10, %v3067_v13, %v3066_v12  ;;  %v3129_v12 = vstv %s4118_s3  ;;  %s4147_s3 = sld [smem:[#allocation11 + $0x8e]] }
 0xbf4   :  { %v3000_v34 = vadd.f32 %v2999_v45, %v2996_v46  ;;  %v3056_v61 = vpop.permute.xlu0 %3055 }
 0xbf5   :  { %v3057_v38 = vrot.slane %v3056_v61, 6 }
 0xbf6   :  { %v3010_v24 = vadd.f32 %v3008_v57, %v3000_v34  ;;  %s4183_s5 = spop %4182  ;;  %v3082_v34 = vstv %s4112_s17  ;;  %s4124_s17 = sld [smem:[#allocation11 + $0x77]] }
 0xbf7   :  { %v3555_v10 = vstv %s4183_s5  ;;  %v3058_v11 = vsel %vm311_vm9, %v3057_v38, %v3056_v61  ;;  %v3173_v38 = vstv %s4123_s24  ;;  %s4143_s5 = sld [smem:[#allocation11 + $0x8a]] }
 0xbf8   :  { %v3020_v60 = vadd.f32 %v3018_v28, %v3010_v24  ;;  %v3556_v50 = vmul.f32 0.001953125, %v3555_v10  ;;  %v3076_v5 = vpop.permute.xlu0 %3075  ;;  %v3099_v28 = vstv %s4115_s18  ;;  %s4145_s18 = sld [smem:[#allocation11 + $0x8c]] }
 0xbf9   :  { %s4130_s24 = sld [smem:[#allocation11 + $0x7d]] }
 0xbfa   :  { %v3030_v47 = vadd.f32 %v3028_v42, %v3020_v60  ;;  %v5809_v23 = vsub.f32 %v5651_v19, %v3556_v50  ;;  %v3077_v19 = vrot.slane %v3076_v5, 6  ;;  %v3100_v60 = vmul.f32 %v3099_v28, %v5349_v22 }
 0xbfb   :  { %v3109_v50 = vstv %s4116_s2  ;;  %v3277_v28 = vstv %s4134_s28  ;;  %s4126_s2 = sld [smem:[#allocation11 + $0x79]] }
 0xbfc   :  { %v3040_v7 = vadd.f32 %v3038_v48, %v3030_v47  ;;  %v3558_v52 = vmul.f32 %v5809_v23, %v5809_v23  ;;  %v3078_v57 = vsel %vm333_vm11, %v3077_v19, %v3076_v5  ;;  %v3110_v3 = vmul.f32 %v3109_v50, %v5355_v14 }
 0xbfd   :  { %v3130_v47 = vmul.f32 %v3129_v12, %v5299_v29  ;;  %v3149_v48 = vstv %s4120_s7  ;;  %v3213_v5 = vstv %s4127_s26  ;;  %v3297_v50 = vstv %s4136_s4  ;;  %s4128_s7 = sld [smem:[#allocation11 + $0x7b]] }
 0xbfe   :  { %v3050_v41 = vadd.f32 %v3048_v20, %v3040_v7  ;;  %v3560_v32 = vcombine.high %v3558_v52, %v3558_v52  ;;  %v3567_v63 = vrot.slane %v3558_v52, %v4479_v9  ;;  %v3150_v22 = vmul.f32 %v5677_v2, %v3149_v48  ;;  %s4144_s26 = sld [smem:[#allocation11 + $0x8b]] }
 0xbff   :  { %v3174_v7 = vmul.f32 %v5681_v18, %v3173_v38  ;;  %v3193_v52 = vstv %s4125_s25  ;;  %v3214_v29 = vmul.f32 %v3213_v5, %v5314_v31  ;;  %v3139_v12 = vstv %s4119_s14  ;;  %s4137_s25 = sld [smem:[#allocation11 + $0x84]] }
 0xc00   :  { %v3060_v45 = vadd.f32 %v3058_v11, %v3050_v41  ;;  %3576 = vrot.lane.b32.xlu1 %v3567_v63, %s4375_s22  ;;  %v3574_v55 = vrot.slane %v3560_v32, %v4479_v9  ;;  %v3575_v10 = vcombine.high %v3567_v63, %v3567_v63  ;;  %v3194_v14 = vmul.f32 %v3193_v52, %v5306_v25  ;;  %s4149_s4 = sld [smem:[#allocation12 + $0x3]] }
 0xc01   :  { %v3159_v48 = vstv %s4121_s11  ;;  %v3183_v38 = vstv %s4124_s17  ;;  %v3203_v52 = vstv %s4126_s2  ;;  %s3510_s14 = sld [smem:[#allocation14]] }
 0xc02   :  { %v3070_v46 = vadd.f32 %v3068_v44, %v3060_v45  ;;  %s4151_s11 = sld [smem:[#allocation15 + $0x1]] }
 0xc03   :  { %v3223_v5 = vstv %s4128_s7  ;;  %s4153_s17 = sld [smem:[#allocation15 + $0x2]] }
 0xc04   :  { %v3080_v39 = vadd.f32 %v3078_v57, %v3070_v46  ;;  %3580 = vrot.lane.b32.xlu1 %v3574_v55, %s4375_s22  ;;  %v3233_v57 = vstv %s4129_s27  ;;  %s4146_s27 = sld [smem:[#allocation11 + $0x8d]] }
 0xc06   :  { %v5822_v35 = vadd.f32 %v3082_v34, %v3080_v39  ;;  %v3234_v39 = vmul.f32 %v5697_v30, %v3233_v57  ;;  %v3119_v30 = vstv %s4117_s6 }
 0xc08   :  { %v3617_v24 = vrot.slane %v5822_v35, %v4479_v9  ;;  %v3610_v15 = vcombine.high %v5822_v35, %v5822_v35 }
 0xc0a   :  { %3626 = vrot.lane.b32.xlu0 %v3617_v24, %s4375_s22  ;;  %v3625_v61 = vcombine.high %v3617_v24, %v3617_v24  ;;  %v3624_v42 = vrot.slane %v3610_v15, %v4479_v9  ;;  %v3257_v24 = vstv %s4132_s8  ;;  %v3089_v15 = vstv %s4114_s29  ;;  %s4148_s8 = sld [smem:[#allocation11 + $0x8f]] }
 0xc0c   :  { %3628 = vrot.lane.b32.xlu1 %v3625_v61, %s4375_s22  ;;  %v3258_v61 = vmul.f32 %v5701_v59, %v3257_v24  ;;  %v3298_v59 = vmul.f32 %v3297_v50, %v5334_v49 }
 0xc0e   :  { %3578 = vrot.lane.b32.xlu0 %v3575_v10, %s4375_s22  ;;  %v3278_v10 = vmul.f32 %v3277_v28, %v5326_v4 }
 0xc10   :  { %3102 = vrot.lane.b32.xlu1 %v3100_v60, %s4377_s13  ;;  %v3090_v60 = vmul.f32 %v5706_v26, %v3089_v15  ;;  %v3140_v26 = vmul.f32 %v3139_v12, %v5365_v0 }
 0xc12   :  { %3630 = vrot.lane.b32.xlu0 %v3624_v42, %s4375_s22  ;;  %v3120_v42 = vmul.f32 %v5712_v37, %v3119_v30  ;;  %v3160_v37 = vmul.f32 %v3159_v48, %v5373_v43  ;;  %v6096_v48 = vld [vmem:[#allocation27_spill] sm:$0xff] }
 0xc14   :  { %3112 = vrot.lane.b32.xlu1 %v3110_v3, %s4378_s10  ;;  %v3317_v3 = vstv %s4138_s30 }
 0xc15   :  { %v3318_v4 = vmul.f32 %v5717_v54, %v3317_v3  ;;  %v3184_v54 = vmul.f32 %v3183_v38, %v5381_v36 }
 0xc18   :  { %3132 = vrot.lane.b32.xlu1 %v3130_v47, %s4380_s9  ;;  %v3341_v47 = vstv %s4141_s15  ;;  %s4150_s15 = sld [smem:[#allocation14 + $0x1]] }
 0xc19   :  { %v3342_v49 = vmul.f32 %v5723_v27, %v3341_v47  ;;  %v3204_v27 = vmul.f32 %v5734_v51, %v3203_v52 }
 0xc1c   :  { %3152 = vrot.lane.b32.xlu1 %v3150_v22, %s4381_s20  ;;  %v3361_v22 = vstv %s4143_s5  ;;  %s4152_s5 = sld [smem:[#allocation14 + $0x2]] }
 0xc1d   :  { %v3362_v0 = vmul.f32 %v3361_v22, %v5448_v16  ;;  %v3224_v16 = vmul.f32 %v3223_v5, %v5391_v62 }
 0xc20   :  { %3176 = vrot.lane.b32.xlu1 %v3174_v7, %s4373_s1  ;;  %v3381_v7 = vstv %s4145_s18 }
 0xc21   :  { %v3382_v43 = vmul.f32 %v3381_v7, %v5468_v40 }
 0xc24   :  { %3196 = vrot.lane.b32.xlu1 %v3194_v14, %s4378_s10  ;;  %v3401_v14 = vstv %s4147_s3 }
 0xc25   :  { %v3402_v36 = vmul.f32 %v5739_v56, %v3401_v14  ;;  %v3307_v56 = vstv %s4137_s25 }
 0xc28   :  { %3216 = vrot.lane.b32.xlu1 %v3214_v29, %s4380_s9  ;;  %v3243_v29 = vstv %s4130_s24 }
 0xc29   :  { %v3244_v40 = vmul.f32 %v3243_v29, %v5397_v17 }
 0xc72   :  { %v3577_v20 = vpop.permute.xlu1 %3576 }
 0xc76   :  { %v3581_v2 = vpop.permute.xlu1 %3580 }
 0xc7c   :  { %v3627_v13 = vpop.permute.xlu0 %3626 }
 0xc7e   :  { %v3629_v41 = vpop.permute.xlu1 %3628 }
 0xc7f   :  { %v3632_v19 = vsel %vm213_vm4, %v3627_v13, %v3629_v41  ;;  %v3308_v13 = vmul.f32 %v3307_v56, %v5413_v1  ;;  %v6094_v1 = vld [vmem:[#allocation28_spill] sm:$0xff] }
 0xc80   :  { %v3579_v32 = vpop.permute.xlu0 %3578  ;;  %v3636_v46 = vsel %vm1636_vm12, %v3632_v19, 0.0 }
 0xc81   :  { %v3582_v63 = vsel %vm213_vm4, %v3577_v20, %v3579_v32  ;;  %v3583_v18 = vsel %vm213_vm4, %v3579_v32, %v3581_v2 }
 0xc82   :  { %v3586_v11 = vsel %vm1636_vm12, %v3582_v63, 0.0  ;;  %v3587_v25 = vsel %vm1636_vm12, %v3583_v18, 0.0  ;;  %v3371_v18 = vstv %s4144_s26 }
 0xc83   :  { %v3588_v45 = vadd.f32 %v3587_v25, %v3586_v11  ;;  %v3391_v25 = vstv %s4146_s27 }
 0xc84   :  { %v3631_v44 = vpop.permute.xlu0 %3630  ;;  %v3392_v19 = vmul.f32 %v3391_v25, %v6094_v1 }
 0xc85   :  { %v3633_v31 = vsel %vm213_vm4, %v3629_v41, %v3631_v44  ;;  %3589 = vadd.xlane.f32.xlu1 %v3588_v45  ;;  %v3411_v45 = vstv %s4148_s8 }
 0xc86   :  { %v3637_v55 = vsel %vm1636_vm12, %v3633_v31, 0.0  ;;  %v3103_v31 = vpop.permute.xlu1 %3102 }
 0xc87   :  { %v3638_v34 = vadd.f32 %v3637_v55, %v3636_v46  ;;  %v3104_v12 = vrot.slane %v3103_v31, 2 }
 0xc89   :  { %3639 = vadd.xlane.f32.xlu0 %v3638_v34  ;;  %v3105_v52 = vsel %vm268_vm6, %v3103_v31, %v3104_v12 }
 0xc8a   :  { %v3113_v46 = vpop.permute.xlu1 %3112 }
 0xc8e   :  { %v3133_v55 = vpop.permute.xlu1 %3132 }
 0xc92   :  { %v3153_v34 = vpop.permute.xlu1 %3152 }
 0xc93   :  { %v3154_v56 = vrot.slane %v3153_v34, 6 }
 0xc96   :  { %3236 = vrot.lane.b32.xlu1 %v3234_v39, %s4381_s20  ;;  %v3177_v57 = vpop.permute.xlu1 %3176 }
 0xc97   :  { %v3178_v1 = vrot.slane %v3177_v57, 2 }
 0xc9a   :  { %3260 = vrot.lane.b32.xlu1 %v3258_v61, %s4373_s1  ;;  %v5905_v39 = vpop.permute.xlu1 %3196 }
 0xc9e   :  { %3280 = vrot.lane.b32.xlu1 %v3278_v10, %s4378_s10  ;;  %v5907_v24 = vpop.permute.xlu1 %3216 }
 0xc9f   :  { %3092 = vrot.lane.b32.xlu0 %v3090_v60, %s4373_s1 }
 0xca2   :  { %3300 = vrot.lane.b32.xlu1 %v3298_v59, %s4380_s9 }
 0xca3   :  { %3122 = vrot.lane.b32.xlu0 %v3120_v42, %s4376_s23 }
 0xca6   :  { %3320 = vrot.lane.b32.xlu1 %v3318_v4, %s4381_s20 }
 0xca7   :  { %3142 = vrot.lane.b32.xlu0 %v3140_v26, %s4379_s19 }
 0xcaa   :  { %3344 = vrot.lane.b32.xlu1 %v3342_v49, %s4373_s1  ;;  %s4133_s1 = sld [smem:[#allocation11 + $0x80]] }
 0xcab   :  { %3162 = vrot.lane.b32.xlu0 %v3160_v37, %s4382_s21  ;;  %v3114_v37 = vrot.slane %v3113_v46, 2 }
 0xcad   :  { %v3115_v5 = vsel %vm279_vm7, %v3113_v46, %v3114_v37 }
 0xcae   :  { %3364 = vrot.lane.b32.xlu1 %v3362_v0, %s4378_s10  ;;  %s4135_s10 = sld [smem:[#allocation11 + $0x82]] }
 0xcaf   :  { %3186 = vrot.lane.b32.xlu0 %v3184_v54, %s4377_s13 }
 0xcb0   :  { %v3267_v51 = vstv %s4133_s1 }
 0xcb1   :  { %v3268_v20 = vmul.f32 %v3267_v51, %v5403_v8  ;;  %v6092_v8 = vld [vmem:[#allocation33_spill] sm:$0xff] }
 0xcb2   :  { %3384 = vrot.lane.b32.xlu1 %v3382_v43, %s4380_s9  ;;  %s4139_s9 = sld [smem:[#allocation11 + $0x86]] }
 0xcb3   :  { %3206 = vrot.lane.b32.xlu0 %v3204_v27, %s4376_s23 }
 0xcb4   :  { %v3287_v2 = vstv %s4135_s10 }
 0xcb5   :  { %v3288_v62 = vmul.f32 %v5749_v53, %v3287_v2  ;;  %v6093_v53 = vld [vmem:[#allocation32_spill] sm:$0xff] }
 0xcb6   :  { %3404 = vrot.lane.b32.xlu1 %v3402_v36, %s4381_s20  ;;  %s4142_s20 = sld [smem:[#allocation11 + $0x89]]  ;;  %v3372_v11 = vmul.f32 %v6093_v53, %v3371_v18  ;;  %v3134_v36 = vrot.slane %v3133_v55, 6  ;;  %v3155_v18 = vsel %vm322_vm10, %v3154_v56, %v3153_v34 }
 0xcb7   :  { %3226 = vrot.lane.b32.xlu0 %v3224_v16, %s4379_s19 }
 0xcb8   :  { %v3327_v41 = vstv %s4139_s9 }
 0xcb9   :  { %v3328_v17 = vmul.f32 %v3327_v41, %v5419_v33  ;;  %v6095_v33 = vld [vmem:[#allocation29_spill] sm:$0xff] }
 0xcba   :  { %v3412_v44 = vmul.f32 %v3411_v45, %v6095_v33 }
 0xcbb   :  { %3246 = vrot.lane.b32.xlu0 %v3244_v40, %s4382_s21 }
 0xcbc   :  { %v3351_v32 = vstv %s4142_s20 }
 0xcbd   :  { %v3352_v63 = vmul.f32 %v3351_v32, %v6092_v8 }
 0xcbf   :  { %3270 = vrot.lane.b32.xlu0 %v3268_v20, %s4377_s13 }
 0xcc3   :  { %3290 = vrot.lane.b32.xlu0 %v3288_v62, %s4376_s23  ;;  %v3135_v62 = vsel %vm300_vm8, %v3134_v36, %v3133_v55 }
 0xcc7   :  { %3310 = vrot.lane.b32.xlu0 %v3308_v13, %s4379_s19 }
 0xccb   :  { %3330 = vrot.lane.b32.xlu0 %v3328_v17, %s4382_s21 }
 0xccf   :  { %3354 = vrot.lane.b32.xlu0 %v3352_v63, %s4377_s13  ;;  %s4113_s13 = sld [smem:[#allocation11 + $0x6c]] }
 0xcd3   :  { %3374 = vrot.lane.b32.xlu0 %v3372_v11, %s4376_s23  ;;  %s4122_s23 = sld [smem:[#allocation11 + $0x75]] }
 0xcd5   :  { %v3085_v59 = vstv %s4113_s13  ;;  %s4154_s13 = sld [smem:[#allocation14 + $0x3]] }
 0xcd6   :  { %v3086_v49 = vmul.f32 %v3085_v59, %v6096_v48 }
 0xcd7   :  { %3394 = vrot.lane.b32.xlu0 %v3392_v19, %s4379_s19  ;;  %s4131_s19 = sld [smem:[#allocation11 + $0x7e]] }
 0xcd9   :  { %v3169_v53 = vstv %s4122_s23  ;;  %s4155_s23 = sld [smem:[#allocation15 + $0x3]] }
 0xcda   :  { %v3170_v45 = vmul.f32 %v3169_v53, %v5499_v21  ;;  %v3218_v21 = vrot.slane %v5907_v24, 6 }
 0xcdb   :  { %3414 = vrot.lane.b32.xlu0 %v3412_v44, %s4382_s21  ;;  %s4140_s21 = sld [smem:[#allocation11 + $0x87]] }
 0xd0e   :  { %v3590_v61 = vpop.xlane.xlu1 %3589 }
 0xd0f   :  { %v3591_v28 = vrot.slane %v3590_v61, 4 }
 0xd11   :  { %v3592_v15 = vadd.f32 %v3591_v28, %v3590_v61  ;;  %v3179_v61 = vsel %vm190_vm2, %v3177_v57, %v3178_v1  ;;  %v3198_v28 = vrot.slane %v5905_v39, 2 }
 0xd12   :  { %v3640_v10 = vpop.xlane.xlu0 %3639  ;;  %v3237_v8 = vpop.permute.xlu1 %3236 }
 0xd13   :  { %v3593_v60 = vrot.slane %v3592_v15, 2  ;;  %v3641_v50 = vrot.slane %v3640_v10, 4 }
 0xd15   :  { %v3642_v30 = vadd.f32 %v3641_v50, %v3640_v10  ;;  %v3594_v42 = vadd.f32 %v3593_v60, %v3592_v15 }
 0xd16   :  { %v3093_v3 = vpop.permute.xlu0 %3092  ;;  %v3261_v31 = vpop.permute.xlu1 %3260 }
 0xd17   :  { %v3643_v4 = vrot.slane %v3642_v30, 2  ;;  %v3094_v26 = vrot.slane %v3093_v3, 2  ;;  %v3595_v47 = vrot.slane %v3594_v42, 1 }
 0xd19   :  { %v3095_v22 = vsel %vm190_vm2, %v3093_v3, %v3094_v26  ;;  %v3596_v38 = vadd.f32 %v3595_v47, %v3594_v42  ;;  %v3644_v0 = vadd.f32 %v3643_v4, %v3642_v30  ;;  %v3199_v30 = vsel %vm279_vm7, %v5905_v39, %v3198_v28 }
 0xd1a   :  { %v3097_v54 = vadd.f32 %v3095_v22, %v3086_v49  ;;  %v3123_v7 = vpop.permute.xlu0 %3122  ;;  %v3281_v59 = vpop.permute.xlu1 %3280  ;;  %v3219_v26 = vsel %vm300_vm8, %v3218_v21, %v5907_v24  ;;  %v3238_v47 = vrot.slane %v3237_v8, 6 }
 0xd1b   :  { %v3124_v43 = vrot.slane %v3123_v7, 6  ;;  %4184 = vpush %v3596_v38  ;;  %v3645_v27 = vrot.slane %v3644_v0, 1 }
 0xd1c   :  { %v3107_v14 = vadd.f32 %v3105_v52, %v3097_v54  ;;  %v3253_v54 = vstv %s4131_s19  ;;  %v3262_v52 = vrot.slane %v3261_v31, 2 }
 0xd1d   :  { %v3646_v16 = vadd.f32 %v3645_v27, %v3644_v0  ;;  %v3125_v51 = vsel %vm159_vm5, %v3124_v43, %v3123_v7  ;;  %v3239_v0 = vsel %vm322_vm10, %v3238_v47, %v3237_v8  ;;  %v3254_v27 = vmul.f32 %v3253_v54, %v5511_v58 }
 0xd1e   :  { %v3117_v29 = vadd.f32 %v3115_v5, %v3107_v14  ;;  %v3143_v40 = vpop.permute.xlu0 %3142  ;;  %v3301_v22 = vpop.permute.xlu1 %3300 }
 0xd1f   :  { %v3144_v20 = vrot.slane %v3143_v40, 6  ;;  %4186 = vpush %v3646_v16 }
 0xd20   :  { %v3127_v2 = vadd.f32 %v3125_v51, %v3117_v29  ;;  %v3263_v29 = vsel %vm190_vm2, %v3261_v31, %v3262_v52 }
 0xd21   :  { %v3145_v17 = vsel %vm311_vm9, %v3144_v20, %v3143_v40  ;;  %v3282_v40 = vrot.slane %v3281_v59, 2 }
 0xd22   :  { %v3137_v13 = vadd.f32 %v3135_v62, %v3127_v2  ;;  %v3163_v41 = vpop.permute.xlu0 %3162  ;;  %v3321_v36 = vpop.permute.xlu1 %3320 }
 0xd23   :  { %v3164_v32 = vrot.slane %v3163_v41, 6 }
 0xd24   :  { %v3147_v63 = vadd.f32 %v3145_v17, %v3137_v13  ;;  %v3283_v13 = vsel %vm279_vm7, %v3281_v59, %v3282_v40 }
 0xd25   :  { %v3165_v19 = vsel %vm333_vm11, %v3164_v32, %v3163_v41  ;;  %v3302_v41 = vrot.slane %v3301_v22, 6 }
 0xd26   :  { %v3157_v11 = vadd.f32 %v3155_v18, %v3147_v63  ;;  %v3187_v25 = vpop.permute.xlu0 %3186  ;;  %v3345_v17 = vpop.permute.xlu1 %3344 }
 0xd27   :  { %v3188_v44 = vrot.slane %v3187_v25, 2  ;;  %v3303_v53 = vsel %vm300_vm8, %v3302_v41, %v3301_v22  ;;  %v3346_v28 = vrot.slane %v3345_v17, 2 }
 0xd28   :  { %v3167_v33 = vadd.f32 %v3165_v19, %v3157_v11  ;;  %v3322_v11 = vrot.slane %v3321_v36, 6 }
 0xd29   :  { %v3189_v34 = vsel %vm268_vm6, %v3187_v25, %v3188_v44  ;;  %v3347_v21 = vsel %vm190_vm2, %v3345_v17, %v3346_v28 }
 0xd2a   :  { %v3171_v46 = vadd.f32 %v3170_v45, %v3167_v33  ;;  %v3207_v55 = vpop.permute.xlu0 %3206  ;;  %v3365_v33 = vpop.permute.xlu1 %3364  ;;  %v3323_v31 = vsel %vm322_vm10, %v3322_v11, %v3321_v36 }
 0xd2b   :  { %v3208_v10 = vrot.slane %v3207_v55, 6  ;;  %v3366_v59 = vrot.slane %v3365_v33, 2 }
 0xd2c   :  { %v3181_v15 = vadd.f32 %v3179_v61, %v3171_v46  ;;  %v3337_v46 = vstv %s4140_s21 }
 0xd2d   :  { %v3209_v3 = vsel %vm159_vm5, %v3208_v10, %v3207_v55 }
 0xd2e   :  { %v3191_v60 = vadd.f32 %v3189_v34, %v3181_v15  ;;  %v3227_v50 = vpop.permute.xlu0 %3226  ;;  %v3338_v34 = vmul.f32 %v3337_v46, %v5524_v6  ;;  %v3367_v6 = vsel %vm279_vm7, %v3365_v33, %v3366_v59 }
 0xd2f   :  { %v3228_v12 = vrot.slane %v3227_v50, 6 }
 0xd30   :  { %v3201_v42 = vadd.f32 %v3199_v30, %v3191_v60 }
 0xd31   :  { %v3229_v49 = vsel %vm311_vm9, %v3228_v12, %v3227_v50  ;;  %v3385_v50 = vpop.permute.xlu1 %3384 }
 0xd32   :  { %v3211_v57 = vadd.f32 %v3209_v3, %v3201_v42  ;;  %v3247_v4 = vpop.permute.xlu0 %3246 }
 0xd33   :  { %v3248_v37 = vrot.slane %v3247_v4, 6 }
 0xd34   :  { %v3221_v48 = vadd.f32 %v3219_v26, %v3211_v57 }
 0xd35   :  { %v3249_v43 = vsel %vm333_vm11, %v3248_v37, %v3247_v4 }
 0xd36   :  { %v3231_v39 = vadd.f32 %v3229_v49, %v3221_v48  ;;  %v3271_v38 = vpop.permute.xlu0 %3270  ;;  %v3386_v48 = vrot.slane %v3385_v50, 6  ;;  %v3405_v49 = vpop.permute.xlu1 %3404 }
 0xd37   :  { %v3272_v24 = vrot.slane %v3271_v38, 2 }
 0xd38   :  { %v3241_v7 = vadd.f32 %v3239_v0, %v3231_v39  ;;  %v3387_v52 = vsel %vm300_vm8, %v3386_v48, %v3385_v50 }
 0xd39   :  { %v3273_v2 = vsel %vm268_vm6, %v3271_v38, %v3272_v24 }
 0xd3a   :  { %v3251_v14 = vadd.f32 %v3249_v43, %v3241_v7  ;;  %v3291_v5 = vpop.permute.xlu0 %3290  ;;  %v3406_v43 = vrot.slane %v3405_v49, 6 }
 0xd3b   :  { %v3292_v62 = vrot.slane %v3291_v5, 6 }
 0xd3c   :  { %v3255_v16 = vadd.f32 %v3254_v27, %v3251_v14 }
 0xd3d   :  { %v3293_v8 = vsel %vm159_vm5, %v3292_v62, %v3291_v5 }
 0xd3e   :  { %v3265_v51 = vadd.f32 %v3263_v29, %v3255_v16  ;;  %v3311_v20 = vpop.permute.xlu0 %3310  ;;  %v3407_v16 = vsel %vm322_vm10, %v3406_v43, %v3405_v49 }
 0xd3f   :  { %v3312_v63 = vrot.slane %v3311_v20, 6 }
 0xd40   :  { %v3275_v56 = vadd.f32 %v3273_v2, %v3265_v51  ;;  %v3421_v51 = vstv %s4149_s4 }
 0xd41   :  { %v3313_v19 = vsel %vm311_vm9, %v3312_v63, %v3311_v20 }
 0xd42   :  { %v3285_v58 = vadd.f32 %v3283_v13, %v3275_v56  ;;  %v3331_v32 = vpop.permute.xlu0 %3330 }
 0xd43   :  { %v3332_v45 = vrot.slane %v3331_v32, 6 }
 0xd44   :  { %v3295_v18 = vadd.f32 %v3293_v8, %v3285_v58 }
 0xd45   :  { %v3333_v15 = vsel %vm333_vm11, %v3332_v45, %v3331_v32 }
 0xd46   :  { %v3305_v25 = vadd.f32 %v3303_v53, %v3295_v18  ;;  %v3355_v1 = vpop.permute.xlu0 %3354 }
 0xd47   :  { %v3356_v60 = vrot.slane %v3355_v1, 2 }
 0xd48   :  { %v3315_v44 = vadd.f32 %v3313_v19, %v3305_v25 }
 0xd49   :  { %v3357_v12 = vsel %vm268_vm6, %v3355_v1, %v3356_v60 }
 0xd4a   :  { %v3325_v55 = vadd.f32 %v3323_v31, %v3315_v44  ;;  %v3375_v61 = vpop.permute.xlu0 %3374 }
 0xd4b   :  { %v3376_v57 = vrot.slane %v3375_v61, 6 }
 0xd4c   :  { %v3335_v10 = vadd.f32 %v3333_v15, %v3325_v55  ;;  %s5942_s28 = spop %4184 }
 0xd4d   :  { %v3377_v39 = vsel %vm159_vm5, %v3376_v57, %v3375_v61 }
 0xd4e   :  { %v3339_v30 = vadd.f32 %v3338_v34, %v3335_v10  ;;  %v3395_v3 = vpop.permute.xlu0 %3394 }
 0xd4f   :  { %v3396_v38 = vrot.slane %v3395_v3, 6 }
 0xd50   :  { %v3349_v42 = vadd.f32 %v3347_v21, %v3339_v30  ;;  %s4187_s29 = spop %4186 }
 0xd51   :  { %v3648_v4 = vstv %s4187_s29  ;;  %v3397_v24 = vsel %vm311_vm9, %v3396_v38, %v3395_v3 }
 0xd52   :  { %v3359_v26 = vadd.f32 %v3357_v12, %v3349_v42  ;;  %v3649_v47 = vmul.f32 0.001953125, %v3648_v4  ;;  %v3415_v7 = vpop.permute.xlu0 %3414 }
 0xd54   :  { %v3369_v37 = vadd.f32 %v3367_v6, %v3359_v26  ;;  %v5947_v22 = vsub.f32 %v5822_v35, %v3649_v47  ;;  %v3416_v35 = vrot.slane %v3415_v7, 6  ;;  %v3505_v26 = vstv %s5804_s16  ;;  %s3513_s16 = sld [smem:[#allocation15]] }
 0xd55   :  { %v3506_v47 = vmul.f32 0.001953125, %v3505_v26  ;;  %v3598_v6 = vstv %s5942_s28 }
 0xd56   :  { %v3379_v0 = vadd.f32 %v3377_v39, %v3369_v37  ;;  %v3651_v54 = vmul.f32 %v5947_v22, %v5947_v22  ;;  %v3417_v20 = vsel %vm333_vm11, %v3416_v35, %v3415_v7  ;;  %v3599_v49 = vmul.f32 0.001953125, %v3598_v6  ;;  %v6097_v35 = vld [vmem:[#allocation31_spill] sm:$0xff] }
 0xd57   :  { %v3507_v48 = vadd.f32 1e-05, %v3506_v47 }
 0xd58   :  { %v3389_v27 = vadd.f32 %v3387_v52, %v3379_v0  ;;  %v3653_v14 = vcombine.high %v3651_v54, %v3651_v54  ;;  %v3660_v5 = vrot.slane %v3651_v54, %v4479_v9  ;;  %v3600_v37 = vadd.f32 1e-05, %v3599_v49 }
 0xd59   :  { %4224 = vrsqrt.f32 %v3507_v48 }
 0xd5a   :  { %v3399_v36 = vadd.f32 %v3397_v24, %v3389_v27  ;;  %3669 = vrot.lane.b32.xlu1 %v3660_v5, %s4375_s22  ;;  %v3667_v40 = vrot.slane %v3653_v14, %v4479_v9  ;;  %v3668_v17 = vcombine.high %v3660_v5, %v3660_v5  ;;  %4226 = vrsqrt.f32 %v3600_v37 }
 0xd5c   :  { %v3409_v29 = vadd.f32 %v3407_v16, %v3399_v36 }
 0xd5e   :  { %v3419_v2 = vadd.f32 %v3417_v20, %v3409_v29  ;;  %3673 = vrot.lane.b32.xlu1 %v3667_v40, %s4375_s22  ;;  %v3511_v29 = vstv %s3510_s14 }
 0xd60   :  { %v3422_v62 = vadd.f32 %v3421_v51, %v3419_v2 }
 0xd62   :  { %v3710_v56 = vrot.slane %v3422_v62, %v4479_v9  ;;  %v3703_v41 = vcombine.high %v3422_v62, %v3422_v62 }
 0xd64   :  { %3719 = vrot.lane.b32.xlu0 %v3710_v56, %s4375_s22  ;;  %v3718_v13 = vcombine.high %v3710_v56, %v3710_v56  ;;  %v3717_v58 = vrot.slane %v3703_v41, %v4479_v9  ;;  %v3604_v56 = vstv %s4150_s15 }
 0xd66   :  { %3721 = vrot.lane.b32.xlu1 %v3718_v13, %s4375_s22  ;;  %v4225_v27 = vpop.eup %4224 }
 0xd67   :  { %v3509_v36 = vmul.f32 %v4225_v27, %v6097_v35  ;;  %v4227_v16 = vpop.eup %4226  ;;  %v4160_v27 = vld [vmem:[%s6025_s0 + $0x1a] sm:$0xf] }
 0xd68   :  { %3671 = vrot.lane.b32.xlu0 %v3668_v17, %s4375_s22  ;;  %v3602_v20 = vmul.f32 %v4227_v16, %v5809_v23 }
 0xd69   :  { %v3512_v51 = vmul.f32 %v3511_v29, %v3509_v36 }
 0xd6a   :  { %v3605_v41 = vmul.f32 %v3604_v56, %v3602_v20 }
 0xd6c   :  { %3723 = vrot.lane.b32.xlu0 %v3717_v58, %s4375_s22  ;;  %v3607_v58 = vstv %s4151_s11 }
 0xdcc   :  { %v3670_v32 = vpop.permute.xlu1 %3669 }
 0xdd0   :  { %v3674_v8 = vpop.permute.xlu1 %3673 }
 0xdd6   :  { %v3720_v63 = vpop.permute.xlu0 %3719 }
 0xdd8   :  { %v3722_v18 = vpop.permute.xlu1 %3721 }
 0xdd9   :  { %v3725_v45 = vsel %vm213_vm4, %v3720_v63, %v3722_v18 }
 0xdda   :  { %v3672_v53 = vpop.permute.xlu0 %3671  ;;  %v3729_v46 = vsel %vm1636_vm12, %v3725_v45, 0.0 }
 0xddb   :  { %v3675_v11 = vsel %vm213_vm4, %v3670_v32, %v3672_v53  ;;  %v3676_v25 = vsel %vm213_vm4, %v3672_v53, %v3674_v8  ;;  %v3697_v32 = vstv %s4152_s5  ;;  %v3608_v8 = vadd.f32 %v3607_v58, %v3605_v41 }
 0xddc   :  { %v3679_v1 = vsel %vm1636_vm12, %v3675_v11, 0.0  ;;  %v3680_v19 = vsel %vm1636_vm12, %v3676_v25, 0.0 }
 0xddd   :  { %v3681_v33 = vadd.f32 %v3680_v19, %v3679_v1 }
 0xdde   :  { %v3724_v44 = vpop.permute.xlu0 %3723 }
 0xddf   :  { %v3726_v31 = vsel %vm213_vm4, %v3722_v18, %v3724_v44  ;;  %3682 = vadd.xlane.f32.xlu1 %v3681_v33  ;;  %v3795_v44 = vld [vmem:[%s6025_s0 + $0x2] sm:$0xf] }
 0xde0   :  { %v3730_v55 = vsel %vm1636_vm12, %v3726_v31, 0.0 }
 0xde1   :  { %v3731_v61 = vadd.f32 %v3730_v55, %v3729_v46 }
 0xde3   :  { %3732 = vadd.xlane.f32.xlu0 %v3731_v61 }
 0xe68   :  { %v3683_v28 = vpop.xlane.xlu1 %3682 }
 0xe69   :  { %v3684_v15 = vrot.slane %v3683_v28, 4 }
 0xe6b   :  { %v3685_v34 = vadd.f32 %v3684_v15, %v3683_v28  ;;  %v4156_v28 = vld [vmem:[%s6025_s0 + $0xa] sm:$0xf] }
 0xe6c   :  { %v3733_v10 = vpop.xlane.xlu0 %3732 }
 0xe6d   :  { %v3686_v60 = vrot.slane %v3685_v34, 2  ;;  %v3734_v50 = vrot.slane %v3733_v10, 4 }
 0xe6f   :  { %v3735_v30 = vadd.f32 %v3734_v50, %v3733_v10  ;;  %v3687_v21 = vadd.f32 %v3686_v60, %v3685_v34  ;;  %v4158_v50 = vld [vmem:[%s6025_s0 + $0x12] sm:$0xf] }
 0xe71   :  { %v3736_v59 = vrot.slane %v3735_v30, 2  ;;  %v3688_v42 = vrot.slane %v3687_v21, 1 }
 0xe73   :  { %v3689_v3 = vadd.f32 %v3688_v42, %v3687_v21  ;;  %v3737_v12 = vadd.f32 %v3736_v59, %v3735_v30 }
 0xe75   :  { %4188 = vpush %v3689_v3  ;;  %v3738_v57 = vrot.slane %v3737_v12, 1 }
 0xe77   :  { %v3739_v4 = vadd.f32 %v3738_v57, %v3737_v12 }
 0xe79   :  { %4190 = vpush %v3739_v4 }
 0xea6   :  { %s4189_s6 = spop %4188 }
 0xea7   :  { %v3691_v39 = vstv %s4189_s6 }
 0xea8   :  { %v3692_v38 = vmul.f32 0.001953125, %v3691_v39  ;;  %v3790_v39 = vstv %s4154_s13 }
 0xeaa   :  { %v3693_v0 = vadd.f32 1e-05, %v3692_v38  ;;  %s4191_s30 = spop %4190 }
 0xeab   :  { %v3741_v54 = vstv %s4191_s30 }
 0xeac   :  { %4228 = vrsqrt.f32 %v3693_v0  ;;  %v3742_v7 = vmul.f32 0.001953125, %v3741_v54  ;;  %v3793_v0 = vstv %s4155_s23 }
 0xeae   :  { %v5976_v52 = vsub.f32 %v3422_v62, %v3742_v7  ;;  %v3514_v62 = vstv %s3513_s16 }
 0xeaf   :  { %v3515_v13 = vadd.f32 %v3514_v62, %v3512_v51 }
 0xeb0   :  { %v3744_v43 = vmul.f32 %v5976_v52, %v5976_v52 }
 0xeb2   :  { %v3753_v14 = vrot.slane %v3744_v43, %v4479_v9  ;;  %v3746_v5 = vcombine.high %v3744_v43, %v3744_v43 }
 0xeb4   :  { %3762 = vrot.lane.b32.xlu0 %v3753_v14, %s4375_s22  ;;  %v3761_v24 = vcombine.high %v3753_v14, %v3753_v14  ;;  %v3760_v40 = vrot.slane %v3746_v5, %v4479_v9  ;;  %v3700_v9 = vstv %s4153_s17 }
 0xeb6   :  { %3764 = vrot.lane.b32.xlu1 %v3761_v24, %s4375_s22 }
 0xeb9   :  { %v4229_v2 = vpop.eup %4228 }
 0xeba   :  { %3766 = vrot.lane.b32.xlu1 %v3760_v40, %s4375_s22  ;;  %v3695_v17 = vmul.f32 %v4229_v2, %v5947_v22 }
 0xebc   :  { %v3698_v63 = vmul.f32 %v3697_v32, %v3695_v17 }
 0xebe   :  { %3797 = vrot.lane.b32.xlu1 %v3515_v13, %s4375_s22  ;;  %v3701_v23 = vadd.f32 %v3700_v9, %v3698_v63 }
 0xec2   :  { %3806 = vrot.lane.b32.xlu1 %v3608_v8, %s4375_s22 }
 0xec6   :  { %3816 = vrot.lane.b32.xlu1 %v3701_v23, %s4375_s22 }
 0xf26   :  { %v3763_v53 = vpop.permute.xlu0 %3762 }
 0xf28   :  { %v3765_v18 = vpop.permute.xlu1 %3764 }
 0xf29   :  { %v3768_v11 = vsel %vm213_vm4, %v3763_v53, %v3765_v18 }
 0xf2a   :  { %v3772_v22 = vsel %vm1636_vm12, %v3768_v11, 0.0 }
 0xf2c   :  { %v3767_v25 = vpop.permute.xlu1 %3766 }
 0xf2d   :  { %v3769_v1 = vsel %vm213_vm4, %v3765_v18, %v3767_v25 }
 0xf2e   :  { %v3773_v19 = vsel %vm1636_vm12, %v3769_v1, 0.0 }
 0xf2f   :  { %v3774_v45 = vadd.f32 %v3773_v19, %v3772_v22 }
 0xf30   :  { %v3798_v33 = vpop.permute.xlu1 %3797 }
 0xf31   :  { %v3799_v31 = vrot.slane %v3798_v33, 2  ;;  %3775 = vadd.xlane.f32.xlu0 %v3774_v45 }
 0xf33   :  { %v3800_v46 = vsel %vm213_vm4, %v3798_v33, %v3799_v31 }
 0xf34   :  { %v3802_v55 = vadd.f32 %v3800_v46, %v3795_v44  ;;  %v3807_v61 = vpop.permute.xlu1 %3806 }
 0xf35   :  { %v3808_v15 = vrot.slane %v3807_v61, 2 }
 0xf36   :  { %3803 = vst [vmem:[%s6037_s12] sm:$0xf] %v3802_v55 }
 0xf37   :  { %v3809_v34 = vsel %vm213_vm4, %v3807_v61, %v3808_v15 }
 0xf38   :  { %v3811_v10 = vadd.f32 %v4156_v28, %v3809_v34  ;;  %v3817_v60 = vpop.permute.xlu1 %3816 }
 0xf39   :  { %v3818_v30 = vrot.slane %v3817_v60, 2 }
 0xf3a   :  { %4157 = vst [vmem:[%s6037_s12 + $0x4] sm:$0xf] %v3811_v10 }
 0xf3b   :  { %v3819_v21 = vsel %vm213_vm4, %v3817_v60, %v3818_v30 }
 0xf3c   :  { %v3821_v59 = vadd.f32 %v4158_v50, %v3819_v21 }
 0xf3e   :  { %4159 = vst [vmem:[%s6037_s12 + $0x8] sm:$0xf] %v3821_v59 }
 0xfba   :  { %v3776_v42 = vpop.xlane.xlu0 %3775 }
 0xfbb   :  { %v3777_v3 = vrot.slane %v3776_v42, 4 }
 0xfbd   :  { %v3778_v12 = vadd.f32 %v3777_v3, %v3776_v42 }
 0xfbf   :  { %v3779_v57 = vrot.slane %v3778_v12, 2 }
 0xfc1   :  { %v3780_v4 = vadd.f32 %v3779_v57, %v3778_v12 }
 0xfc3   :  { %v3781_v26 = vrot.slane %v3780_v4, 1 }
 0xfc5   :  { %v3782_v47 = vadd.f32 %v3781_v26, %v3780_v4 }
 0xfc7   :  { %4192 = vpush %v3782_v47 }
 0xff8   :  { %s4193_s8 = spop %4192 }
 0xff9   :  { %v3784_v6 = vstv %s4193_s8 }
 0xffa   :  { %v3785_v48 = vmul.f32 0.001953125, %v3784_v6 }
 0xffc   :  { %v3786_v49 = vadd.f32 1e-05, %v3785_v48 }
 0xffe   :  { %4230 = vrsqrt.f32 %v3786_v49 }
0x100b   :  { %v4231_v37 = vpop.eup %4230 }
0x100c   :  { %v3788_v38 = vmul.f32 %v4231_v37, %v5976_v52 }
0x100e   :  { %v3791_v54 = vmul.f32 %v3790_v39, %v3788_v38 }
0x1010   :  { %v3794_v7 = vadd.f32 %v3793_v0, %v3791_v54 }
0x1012   :  { %3826 = vrot.lane.b32.xlu1 %v3794_v7, %s4375_s22 }
0x1084   :  { %v3827_v43 = vpop.permute.xlu1 %3826 }
0x1085   :  { %v3828_v14 = vrot.slane %v3827_v43, 2 }
0x1087   :  { %v3829_v5 = vsel %vm213_vm4, %v3827_v43, %v3828_v14 }
0x1088   :  { %v3831_v24 = vadd.f32 %v4160_v27, %v3829_v5 }
0x108a   :  { %4161 = vst [vmem:[%s6037_s12 + $0xc] sm:$0xf] %v3831_v24 }
0x108b   :  { %3838 = vsyncpa [#allocation5], 1 }
0x108c   :  { %3839 = vsyncpa [#allocation7], 1 }
0x108d   :  { %3840 = vsyncpa [#allocation10], 1 }
0x108e   :  { %3841 = vsyncpa [#allocation13], 1 }
0x108f   :  { %3842 = vsyncpa [#allocation16], 1 }

</bundles_post_ra>
